<compile_context>
chip_gen: v5e
topology: v5e:2x2
jax: 0.10.0
libtpu: 0.0.40
codegen_flags: <defaults>
</compile_context>

<pallas_src>
import functools

import jax
import jax.numpy as jnp
from jax.experimental import pallas as pl
from jax.experimental.pallas import tpu as pltpu


# ----------------------------- shared math helpers -----------------------------
def _leaky_relu(x):
    return jnp.where(x >= 0, x, 0.01 * x)


def _elu(x):
    # alpha = 1.0 ; clamp exp argument so the unselected branch never overflows
    return jnp.where(x > 0, x, jnp.exp(jnp.minimum(x, 0.0)) - 1.0)


def _gru_gates(g, hidden, F):
    """g: (*, 4F) fused pre-activations [r | z | gi_n | gh_n]."""
    r = jax.nn.sigmoid(g[:, :F])
    z = jax.nn.sigmoid(g[:, F:2 * F])
    n = jnp.tanh(g[:, 2 * F:3 * F] + r * g[:, 3 * F:4 * F])
    return (1.0 - z) * n + z * hidden


# --------------------------------- fused kernel ---------------------------------
def _fused_kernel(atom_ref, nbr_in_ref, amask_n_ref, smask_n_ref, gth_ref, amask_ref,
                  seg_ref, segT_ref,
                  afc_w_ref, afc_b_ref, nfc_w_ref, nfc_b_ref,
                  waa_ref, wan_ref, ba_ref, wt_ref, bt_ref, wgru_ref, bgru_ref,
                  mwaa_ref, mwan_ref, mba_ref, mwt_ref, mbt_ref,
                  mwgru_ref, mbgru_ref, outw_ref, outb_ref,
                  pred_ref, *, radius, T):
    f32 = jnp.float32
    N = nbr_in_ref.shape[0]          # max neighbor slots
    F = afc_w_ref.shape[1]           # fingerprint dim

    # ---------------- atom_fc ----------------
    hidden = _leaky_relu(
        jnp.dot(atom_ref[...], afc_w_ref[...], preferred_element_type=f32)
        + afc_b_ref[...])                                            # (M, F)

    # ---------------- neighbor_fc (round-0 neighbor features) ----------------
    nfc_w = nfc_w_ref[...]
    nfc_b = nfc_b_ref[...]
    nbr0 = [_leaky_relu(jnp.dot(nbr_in_ref[n], nfc_w, preferred_element_type=f32) + nfc_b)
            for n in range(N)]                                       # N x (M, F)

    amask_n = amask_n_ref[...]                                       # (M, N)
    smask_n = smask_n_ref[...]                                       # (M, N)

    # ---------------- radius rounds of neighbor attention + GRU ----------------
    for r in range(radius):
        if r == 0:
            align_src = hidden
            nbrs = nbr0
        else:
            act = jnp.maximum(hidden, 0.0)
            align_src = act
            # in-kernel gather of activated features via one-hot matmuls (MXU)
            nbrs = [jnp.dot(gth_ref[n], act, preferred_element_type=f32)
                    for n in range(N)]                               # N x (M, F)

        waa = waa_ref[r]            # (F, 1)
        wan = wan_ref[r]            # (F, 1)
        ba = ba_ref[r]              # (1, 1)
        wt = wt_ref[r]              # (F, F)
        bt = bt_ref[r]              # (1, F)
        wg = wgru_ref[r]            # (2F, 4F) fused GRU weight
        bg = bgru_ref[r]            # (1, 4F)

        s_atom = jnp.dot(align_src, waa, preferred_element_type=f32)            # (M, 1)
        cols = [jnp.dot(nbrs[n], wan, preferred_element_type=f32) for n in range(N)]
        score = _leaky_relu(s_atom + jnp.concatenate(cols, axis=1) + ba) + smask_n   # (M, N)

        mx = jnp.max(score, axis=-1, keepdims=True)
        e = jnp.exp(score - mx)
        attn = e * pl.reciprocal(jnp.sum(e, axis=-1, keepdims=True), approx=True)
        attn = attn * amask_n                                                    # (M, N)

        weighted = attn[:, 0:1] * nbrs[0]
        for n in range(1, N):
            weighted = weighted + attn[:, n:n + 1] * nbrs[n]                     # (M, F)
        attn_sum = jnp.sum(attn, axis=-1, keepdims=True)                         # (M, 1)

        # attend linear distributed over the weighted sum (linearity)
        ctx = _elu(jnp.dot(weighted, wt, preferred_element_type=f32) + attn_sum * bt)

        # fused GRU: one (M, 2F) @ (2F, 4F) matmul, lane-dense 4F = 128 output
        g = jnp.dot(jnp.concatenate([ctx, hidden], axis=1), wg,
                    preferred_element_type=f32) + bg
        hidden = _gru_gates(g, hidden, F)

    # ---------------- molecule readout (batched over the Bt molecules) ----------------
    activated = jnp.maximum(hidden, 0.0)                             # (M, F)
    amask = amask_ref[...]                                           # (M, 1)
    mol_smask = jnp.where(amask == 0.0, -9e8, 0.0)                   # (M, 1)
    seg = seg_ref[...]                                               # (M, Bt) membership
    segT = segT_ref[...]                                             # (Bt, M)

    mol = jnp.dot(segT, activated * amask, preferred_element_type=f32)   # (Bt, F)
    act_mol = jnp.maximum(mol, 0.0)

    mwaa = mwaa_ref[...]
    mwan = mwan_ref[...]
    mba = mba_ref[...]
    mwt = mwt_ref[...]
    mbt = mbt_ref[...]
    mwg = mwgru_ref[...]
    mbg = mbgru_ref[...]
    F_ = F

    s_atoms = jnp.dot(activated, mwan, preferred_element_type=f32)       # (M, 1) (loop-invariant)

    for _ in range(T):
        s_mol = jnp.dot(act_mol, mwaa, preferred_element_type=f32)       # (Bt, 1)
        s_mol_atoms = jnp.dot(seg, s_mol, preferred_element_type=f32)    # (M, 1)
        sc = _leaky_relu(s_atoms + s_mol_atoms + mba) + mol_smask        # (M, 1)

        # block-global max shift (softmax is shift invariant); per-molecule
        # denominators via segment matmuls; clamp protects all-padded molecules.
        gmax = jnp.max(sc, axis=0, keepdims=True)                        # (1, 1)
        e = jnp.exp(sc - gmax)                                           # (M, 1)
        den = jnp.maximum(jnp.dot(segT, e, preferred_element_type=f32), 1e-20)   # (Bt, 1)
        den_atoms = jnp.dot(seg, den, preferred_element_type=f32)        # (M, 1)
        attn = e * pl.reciprocal(den_atoms, approx=True) * amask         # (M, 1)

        weighted = jnp.dot(segT, attn * activated, preferred_element_type=f32)   # (Bt, F)
        attn_sum = jnp.dot(segT, attn, preferred_element_type=f32)               # (Bt, 1)
        ctx = _elu(jnp.dot(weighted, mwt, preferred_element_type=f32) + attn_sum * mbt)

        g = jnp.dot(jnp.concatenate([ctx, mol], axis=1), mwg,
                    preferred_element_type=f32) + mbg                    # (Bt, 4F)
        mol = _gru_gates(g, mol, F_)
        act_mol = jnp.maximum(mol, 0.0)

    pred_ref[...] = jnp.dot(mol, outw_ref[...], preferred_element_type=f32) + outb_ref[...]


# --------------------------- parameter pre-fusion helpers ------------------------
def _fuse_gru(wih, whh, bih, bhh):
    """Fuse GRUCell's two matmuls into one (2F, 4F) weight: cols [r | z | gi_n | gh_n]."""
    F = whh.shape[1]
    wihT = wih.T                      # (F, 3F)
    whhT = whh.T
    zero = jnp.zeros((F, F), jnp.float32)
    top = jnp.concatenate([wihT[:, :2 * F], wihT[:, 2 * F:], zero], axis=1)   # (F, 4F)
    bot = jnp.concatenate([whhT[:, :2 * F], zero, whhT[:, 2 * F:]], axis=1)   # (F, 4F)
    w = jnp.concatenate([top, bot], axis=0)                                   # (2F, 4F)
    b = jnp.concatenate([bih[:2 * F] + bhh[:2 * F], bih[2 * F:], bhh[2 * F:]])
    return w, b.reshape(1, 4 * F)


# ------------------------------ full forward pass -------------------------------
def pallas_forward(p, atom_list, bond_list, atom_degree_list, bond_degree_list,
                   atom_mask, radius, T, block_mols=8):
    B, L, Da = atom_list.shape
    N = atom_degree_list.shape[2]
    Db = bond_list.shape[2]
    Dc = Da + Db
    F = p['atom_fc_w'].shape[0]
    O = p['output'][0].shape[0]

    Bt = block_mols
    G = -(-B // Bt)                   # cdiv
    Bpad = G * Bt
    pad = Bpad - B
    if pad:
        atom_list = jnp.pad(atom_list, ((0, pad), (0, 0), (0, 0)))
        bond_list = jnp.pad(bond_list, ((0, pad), (0, 0), (0, 0)))
        atom_degree_list = jnp.pad(atom_degree_list, ((0, pad), (0, 0), (0, 0)),
                                   constant_values=L - 1)
        bond_degree_list = jnp.pad(bond_degree_list, ((0, pad), (0, 0), (0, 0)),
                                   constant_values=0)
        atom_mask = jnp.pad(atom_mask, ((0, pad), (0, 0)))

    M = Bt * L

    # ---- round-0 neighbor inputs (index gathers are JAX glue) ----
    atom_nb = jax.vmap(lambda t, i: t[i])(atom_list, atom_degree_list)   # (Bpad, L, N, Da)
    bond_nb = jax.vmap(lambda t, i: t[i])(bond_list, bond_degree_list)   # (Bpad, L, N, Db)
    nbr_in = jnp.concatenate([atom_nb, bond_nb], axis=-1)                # (Bpad, L, N, Dc)
    nbr_in = nbr_in.reshape(G, Bt, L, N, Dc).transpose(0, 3, 1, 2, 4).reshape(G, N, M, Dc)

    # ---- masks ----
    attend = (atom_degree_list != (L - 1)).astype(jnp.float32).reshape(Bpad * L, N)
    smask = jnp.where(atom_degree_list == (L - 1), -9e8, 0.0).astype(jnp.float32)
    smask = smask.reshape(Bpad * L, N)
    amask = atom_mask.reshape(Bpad * L, 1).astype(jnp.float32)

    # ---- one-hot gather matrices for rounds r >= 1 (per block of molecules) ----
    deg = atom_degree_list.reshape(G, Bt, L, N)
    src = deg + (jnp.arange(Bt, dtype=deg.dtype)[None, :, None, None] * L)   # (G, Bt, L, N)
    src = src.transpose(0, 3, 1, 2).reshape(G, N, M)
    gth = jax.nn.one_hot(src, M, dtype=jnp.float32)                          # (G, N, M, M)

    # ---- segment membership matrices (same for every block) ----
    seg = jax.nn.one_hot(jnp.arange(M) // L, Bt, dtype=jnp.float32)          # (M, Bt)
    segT = seg.T                                                             # (Bt, M)

    # ---- pre-fused / pre-transposed weights ----
    afc_w = p['atom_fc_w'].T                          # (Da, F)
    afc_b = p['atom_fc_b'].reshape(1, F)
    nfc_w = p['neighbor_fc_w'].T                      # (Dc, F)
    nfc_b = p['neighbor_fc_b'].reshape(1, F)

    waa_s = jnp.stack([p['align'][r][0][:, :F].T for r in range(radius)])    # (R, F, 1)
    wan_s = jnp.stack([p['align'][r][0][:, F:].T for r in range(radius)])    # (R, F, 1)
    ba_s = jnp.stack([p['align'][r][1].reshape(1, 1) for r in range(radius)])
    wt_s = jnp.stack([p['attend'][r][0].T for r in range(radius)])           # (R, F, F)
    bt_s = jnp.stack([p['attend'][r][1].reshape(1, F) for r in range(radius)])
    fused = [_fuse_gru(*p['gru'][r]) for r in range(radius)]
    wgru_s = jnp.stack([f[0] for f in fused])                                # (R, 2F, 4F)
    bgru_s = jnp.stack([f[1] for f in fused])                                # (R, 1, 4F)

    maw, mab = p['mol_align']
    m_waa = maw[:, :F].T                              # (F, 1)
    m_wan = maw[:, F:].T                              # (F, 1)
    m_ba = mab.reshape(1, 1)
    mtw, mtb = p['mol_attend']
    m_wt = mtw.T
    m_bt = mtb.reshape(1, F)
    m_wgru, m_bgru = _fuse_gru(*p['mol_gru'])
    ow, ob = p['output']
    out_w = ow.T                                      # (F, O)
    out_b = ob.reshape(1, O)

    atom_flat = atom_list.reshape(Bpad * L, Da)

    def wspec(arr):
        nd = arr.ndim
        return pl.BlockSpec(arr.shape, lambda g, _nd=nd: (0,) * _nd)

    in_specs = [
        pl.BlockSpec((M, Da), lambda g: (g, 0)),                             # atom_flat
        pl.BlockSpec((pl.Squeezed(), N, M, Dc), lambda g: (g, 0, 0, 0)),     # nbr_in
        pl.BlockSpec((M, N), lambda g: (g, 0)),                              # attend mask
        pl.BlockSpec((M, N), lambda g: (g, 0)),                              # softmax mask
        pl.BlockSpec((pl.Squeezed(), N, M, M), lambda g: (g, 0, 0, 0)),      # gather one-hots
        pl.BlockSpec((M, 1), lambda g: (g, 0)),                              # atom mask
        wspec(seg), wspec(segT),
        wspec(afc_w), wspec(afc_b), wspec(nfc_w), wspec(nfc_b),
        wspec(waa_s), wspec(wan_s), wspec(ba_s), wspec(wt_s), wspec(bt_s),
        wspec(wgru_s), wspec(bgru_s),
        wspec(m_waa), wspec(m_wan), wspec(m_ba), wspec(m_wt), wspec(m_bt),
        wspec(m_wgru), wspec(m_bgru), wspec(out_w), wspec(out_b),
    ]

    kernel = functools.partial(_fused_kernel, radius=radius, T=T)
    pred = pl.pallas_call(
        kernel,
        out_shape=jax.ShapeDtypeStruct((Bpad, O), jnp.float32),
        grid=(G,),
        in_specs=in_specs,
        out_specs=pl.BlockSpec((Bt, O), lambda g: (g, 0)),
        compiler_params=pltpu.CompilerParams(dimension_semantics=("parallel",)),
    )(atom_flat, nbr_in, attend, smask, gth, amask, seg, segT,
      afc_w, afc_b, nfc_w, nfc_b,
      waa_s, wan_s, ba_s, wt_s, bt_s, wgru_s, bgru_s,
      m_waa, m_wan, m_ba, m_wt, m_bt, m_wgru, m_bgru, out_w, out_b)

    return pred[:B]


# ------------------------------ pure-JAX reference -------------------------------
def _gru_ref(x, h, w_ih, w_hh, b_ih, b_hh):
    F = h.shape[-1]
    gi = x @ w_ih.T + b_ih
    gh = h @ w_hh.T + b_hh
    r = jax.nn.sigmoid(gi[:, :F] + gh[:, :F])
    z = jax.nn.sigmoid(gi[:, F:2 * F] + gh[:, F:2 * F])
    n = jnp.tanh(gi[:, 2 * F:] + r * gh[:, 2 * F:])
    return (1.0 - z) * n + z * h


def reference_forward(p, atom_list, bond_list, atom_degree_list, bond_degree_list,
                      atom_mask, radius, T):
    B, L, _ = atom_list.shape
    N = atom_degree_list.shape[2]
    F = p['atom_fc_w'].shape[0]
    amask3 = atom_mask[:, :, None]
    atom_feature = _leaky_relu(atom_list @ p['atom_fc_w'].T + p['atom_fc_b'])
    bond_neighbor = jax.vmap(lambda t, i: t[i])(bond_list, bond_degree_list)
    atom_neighbor = jax.vmap(lambda t, i: t[i])(atom_list, atom_degree_list)
    neighbor_feature = jnp.concatenate([atom_neighbor, bond_neighbor], axis=-1)
    neighbor_feature = _leaky_relu(neighbor_feature @ p['neighbor_fc_w'].T + p['neighbor_fc_b'])
    attend_mask = jnp.where(atom_degree_list != L - 1, 1.0, 0.0)[..., None]
    softmax_mask = jnp.where(atom_degree_list == L - 1, -9e8, 0.0)[..., None]

    def att(act_for_align, nbr, h, r):
        aw, ab = p['align'][r]
        tw, tb = p['attend'][r]
        wih, whh, bih, bhh = p['gru'][r]
        expand = jnp.broadcast_to(act_for_align[:, :, None, :], (B, L, N, F))
        fa = jnp.concatenate([expand, nbr], axis=-1)
        score = _leaky_relu(fa @ aw.T + ab) + softmax_mask
        attw = jax.nn.softmax(score, axis=-2) * attend_mask
        nbr_t = nbr @ tw.T + tb
        ctx = _elu(jnp.sum(attw * nbr_t, axis=-2))
        return _gru_ref(ctx.reshape(B * L, F), h.reshape(B * L, F),
                        wih, whh, bih, bhh).reshape(B, L, F)

    atom_feature = att(atom_feature, neighbor_feature, atom_feature, 0)
    activated = jax.nn.relu(atom_feature)
    for d in range(radius - 1):
        nbr = jax.vmap(lambda t, i: t[i])(activated, atom_degree_list)
        atom_feature = att(activated, nbr, atom_feature, d + 1)
        activated = jax.nn.relu(atom_feature)

    mol_feature = jnp.sum(activated * amask3, axis=-2)
    act_mol = jax.nn.relu(mol_feature)
    mol_smask = jnp.where(atom_mask == 0, -9e8, 0.0)[:, :, None]
    maw, mab = p['mol_align']
    mtw, mtb = p['mol_attend']
    gwih, gwhh, gbih, gbhh = p['mol_gru']
    for _ in range(T):
        expand = jnp.broadcast_to(act_mol[:, None, :], (B, L, F))
        ma = jnp.concatenate([expand, activated], axis=-1)
        sc = _leaky_relu(ma @ maw.T + mab) + mol_smask
        attw = jax.nn.softmax(sc, axis=-2) * amask3
        act_t = activated @ mtw.T + mtb
        ctx = _elu(jnp.sum(attw * act_t, axis=-2))
        mol_feature = _gru_ref(ctx, mol_feature, gwih, gwhh, gbih, gbhh)
        act_mol = jax.nn.relu(mol_feature)
    ow, ob = p['output']
    return mol_feature @ ow.T + ob


# ------------------------------ parameter init ----------------------------------
def init_params(key, radius, Da, Db, F, O):
    keys = iter(jax.random.split(key, 64))

    def lin(in_f, out_f):
        bound = float(in_f) ** -0.5
        w = jax.random.uniform(next(keys), (out_f, in_f), jnp.float32, -bound, bound)
        b = jax.random.uniform(next(keys), (out_f,), jnp.float32, -bound, bound)
        return w, b

    def gru(Fh):
        bound = float(Fh) ** -0.5
        return tuple(jax.random.uniform(next(keys), s, jnp.float32, -bound, bound)
                     for s in [(3 * Fh, Fh), (3 * Fh, Fh), (3 * Fh,), (3 * Fh,)])

    p = {}
    p['atom_fc_w'], p['atom_fc_b'] = lin(Da, F)
    p['neighbor_fc_w'], p['neighbor_fc_b'] = lin(Da + Db, F)
    p['align'] = [lin(2 * F, 1) for _ in range(radius)]
    p['attend'] = [lin(F, F) for _ in range(radius)]
    p['gru'] = [gru(F) for _ in range(radius)]
    p['mol_align'] = lin(2 * F, 1)
    p['mol_attend'] = lin(F, F)
    p['mol_gru'] = gru(F)
    p['output'] = lin(F, O)
    return p


# ------------------------------------ main ---------------------------------------
if __name__ == "__main__":
    radius, T = 2, 2
    B, L, N = 2, 16, 4          # batch, mol_length, max_neighbor_num
    Da, Db = 8, 6               # input_feature_dim, input_bond_dim
    F, O = 32, 1                # fingerprint_dim, output_units_num
    Eb = 20                     # bonds per molecule table
    # p_dropout is irrelevant at inference (dropout == identity)
    # TODO(synk): arc / output_feature / feature_only branches of forward() not implemented.

    key = jax.random.PRNGKey(0)
    kp, k1, k2, k3, k4 = jax.random.split(key, 5)
    params = init_params(kp, radius, Da, Db, F, O)

    atom_list = jax.random.normal(k1, (B, L, Da), jnp.float32)
    bond_list = jax.random.normal(k2, (B, Eb, Db), jnp.float32)
    atom_degree_list = jax.random.randint(k3, (B, L, N), 0, L)      # index L-1 == padding atom
    bond_degree_list = jax.random.randint(k4, (B, L, N), 0, Eb)
    lengths = jnp.array([14, 10])
    atom_mask = (jnp.arange(L)[None, :] < lengths[:, None]).astype(jnp.float32)

    out = pallas_forward(params, atom_list, bond_list, atom_degree_list,
                         bond_degree_list, atom_mask, radius, T)
    out = jax.block_until_ready(out)

    ref = reference_forward(params, atom_list, bond_list, atom_degree_list,
                            bond_degree_list, atom_mask, radius, T)

    assert out.shape == (B, O)
    assert bool(jnp.all(jnp.isfinite(out)))
    max_diff = float(jnp.max(jnp.abs(out - ref)))
    if max_diff > 5e-2:
        raise AssertionError(f"Pallas output mismatch vs reference, max|diff|={max_diff}")

    print("KERNEL_OK")
</pallas_src>

<mosaic_0001>
module attributes {stable_mosaic.version = 11 : i64} {
  func.func @_fused_kernel(%arg0: i32, %arg1: memref<128x8xf32, #tpu.memory_space<vmem>>, %arg2: memref<1x4x128x14xf32, #tpu.memory_space<vmem>>, %arg3: memref<128x4xf32, #tpu.memory_space<vmem>>, %arg4: memref<128x4xf32, #tpu.memory_space<vmem>>, %arg5: memref<1x4x128x128xf32, #tpu.memory_space<vmem>>, %arg6: memref<128x1xf32, #tpu.memory_space<vmem>>, %arg7: memref<128x8xf32, #tpu.memory_space<vmem>>, %arg8: memref<8x128xf32, #tpu.memory_space<vmem>>, %arg9: memref<8x32xf32, #tpu.memory_space<vmem>>, %arg10: memref<1x32xf32, #tpu.memory_space<vmem>>, %arg11: memref<14x32xf32, #tpu.memory_space<vmem>>, %arg12: memref<1x32xf32, #tpu.memory_space<vmem>>, %arg13: memref<2x32x1xf32, #tpu.memory_space<vmem>>, %arg14: memref<2x32x1xf32, #tpu.memory_space<vmem>>, %arg15: memref<2x1x1xf32, #tpu.memory_space<vmem>>, %arg16: memref<2x32x32xf32, #tpu.memory_space<vmem>>, %arg17: memref<2x1x32xf32, #tpu.memory_space<vmem>>, %arg18: memref<2x64x128xf32, #tpu.memory_space<vmem>>, %arg19: memref<2x1x128xf32, #tpu.memory_space<vmem>>, %arg20: memref<32x1xf32, #tpu.memory_space<vmem>>, %arg21: memref<32x1xf32, #tpu.memory_space<vmem>>, %arg22: memref<1x1xf32, #tpu.memory_space<vmem>>, %arg23: memref<32x32xf32, #tpu.memory_space<vmem>>, %arg24: memref<1x32xf32, #tpu.memory_space<vmem>>, %arg25: memref<64x128xf32, #tpu.memory_space<vmem>>, %arg26: memref<1x128xf32, #tpu.memory_space<vmem>>, %arg27: memref<32x1xf32, #tpu.memory_space<vmem>>, %arg28: memref<1x1xf32, #tpu.memory_space<vmem>>, %arg29: memref<8x1xf32, #tpu.memory_space<vmem>>) attributes {dimension_semantics = [#tpu.dimension_semantics<parallel>], iteration_bounds = array<i64: 1>, scalar_prefetch = 0 : i64, scratch_operands = 0 : i64, tpu.core_type = #tpu.core_type<tc>, window_params = [{transform_indices = @transform_0, window_bounds = array<i64: 128, 8>}, {transform_indices = @transform_1, window_bounds = array<i64: 1, 4, 128, 14>}, {transform_indices = @transform_2, window_bounds = array<i64: 128, 4>}, {transform_indices = @transform_3, window_bounds = array<i64: 128, 4>}, {transform_indices = @transform_4, window_bounds = array<i64: 1, 4, 128, 128>}, {transform_indices = @transform_5, window_bounds = array<i64: 128, 1>}, {pipeline_mode = #tpu.pipeline_mode<synchronous>, transform_indices = @transform_6, window_bounds = array<i64: 128, 8>}, {pipeline_mode = #tpu.pipeline_mode<synchronous>, transform_indices = @transform_7, window_bounds = array<i64: 8, 128>}, {pipeline_mode = #tpu.pipeline_mode<synchronous>, transform_indices = @transform_8, window_bounds = array<i64: 8, 32>}, {pipeline_mode = #tpu.pipeline_mode<synchronous>, transform_indices = @transform_9, window_bounds = array<i64: 1, 32>}, {pipeline_mode = #tpu.pipeline_mode<synchronous>, transform_indices = @transform_10, window_bounds = array<i64: 14, 32>}, {pipeline_mode = #tpu.pipeline_mode<synchronous>, transform_indices = @transform_11, window_bounds = array<i64: 1, 32>}, {pipeline_mode = #tpu.pipeline_mode<synchronous>, transform_indices = @transform_12, window_bounds = array<i64: 2, 32, 1>}, {pipeline_mode = #tpu.pipeline_mode<synchronous>, transform_indices = @transform_13, window_bounds = array<i64: 2, 32, 1>}, {pipeline_mode = #tpu.pipeline_mode<synchronous>, transform_indices = @transform_14, window_bounds = array<i64: 2, 1, 1>}, {pipeline_mode = #tpu.pipeline_mode<synchronous>, transform_indices = @transform_15, window_bounds = array<i64: 2, 32, 32>}, {pipeline_mode = #tpu.pipeline_mode<synchronous>, transform_indices = @transform_16, window_bounds = array<i64: 2, 1, 32>}, {pipeline_mode = #tpu.pipeline_mode<synchronous>, transform_indices = @transform_17, window_bounds = array<i64: 2, 64, 128>}, {pipeline_mode = #tpu.pipeline_mode<synchronous>, transform_indices = @transform_18, window_bounds = array<i64: 2, 1, 128>}, {pipeline_mode = #tpu.pipeline_mode<synchronous>, transform_indices = @transform_19, window_bounds = array<i64: 32, 1>}, {pipeline_mode = #tpu.pipeline_mode<synchronous>, transform_indices = @transform_20, window_bounds = array<i64: 32, 1>}, {pipeline_mode = #tpu.pipeline_mode<synchronous>, transform_indices = @transform_21, window_bounds = array<i64: 1, 1>}, {pipeline_mode = #tpu.pipeline_mode<synchronous>, transform_indices = @transform_22, window_bounds = array<i64: 32, 32>}, {pipeline_mode = #tpu.pipeline_mode<synchronous>, transform_indices = @transform_23, window_bounds = array<i64: 1, 32>}, {pipeline_mode = #tpu.pipeline_mode<synchronous>, transform_indices = @transform_24, window_bounds = array<i64: 64, 128>}, {pipeline_mode = #tpu.pipeline_mode<synchronous>, transform_indices = @transform_25, window_bounds = array<i64: 1, 128>}, {pipeline_mode = #tpu.pipeline_mode<synchronous>, transform_indices = @transform_26, window_bounds = array<i64: 32, 1>}, {pipeline_mode = #tpu.pipeline_mode<synchronous>, transform_indices = @transform_27, window_bounds = array<i64: 1, 1>}, {transform_indices = @transform_28, window_bounds = array<i64: 8, 1>}]} {
    %c0 = arith.constant 0 : index
    %c0_0 = arith.constant 0 : index
    %0 = vector.load %arg1[%c0, %c0_0] : memref<128x8xf32, #tpu.memory_space<vmem>>, vector<128x8xf32>
    %c0_1 = arith.constant 0 : index
    %c0_2 = arith.constant 0 : index
    %1 = vector.load %arg9[%c0_1, %c0_2] : memref<8x32xf32, #tpu.memory_space<vmem>>, vector<8x32xf32>
    %cst = arith.constant dense<0.000000e+00> : vector<128x32xf32>
    %2 = tpu.matmul %0, %1, %cst {dimension_numbers = #tpu.dot_dimension_numbers<[1], [0], [0], [1], [0, 0, 1, 1], [], []>} : vector<128x8xf32>, vector<8x32xf32>, vector<128x32xf32> -> vector<128x32xf32>
    %c0_3 = arith.constant 0 : index
    %c0_4 = arith.constant 0 : index
    %3 = vector.load %arg10[%c0_3, %c0_4] : memref<1x32xf32, #tpu.memory_space<vmem>>, vector<1x32xf32>
    %4 = vector.broadcast %3 : vector<1x32xf32> to vector<128x32xf32>
    %5 = arith.addf %2, %4 : vector<128x32xf32>
    %cst_5 = arith.constant 0.000000e+00 : f32
    %6 = vector.broadcast %cst_5 : f32 to vector<128x32xf32>
    %7 = arith.cmpf oge, %5, %6 : vector<128x32xf32>
    %cst_6 = arith.constant 0.00999999977 : f32
    %8 = vector.broadcast %cst_6 : f32 to vector<128x32xf32>
    %9 = arith.mulf %8, %5 : vector<128x32xf32>
    %10 = arith.select %7, %5, %9 : vector<128x32xi1>, vector<128x32xf32>
    %c0_7 = arith.constant 0 : index
    %c0_8 = arith.constant 0 : index
    %11 = vector.load %arg11[%c0_7, %c0_8] : memref<14x32xf32, #tpu.memory_space<vmem>>, vector<14x32xf32>
    %c0_9 = arith.constant 0 : index
    %c0_10 = arith.constant 0 : index
    %12 = vector.load %arg12[%c0_9, %c0_10] : memref<1x32xf32, #tpu.memory_space<vmem>>, vector<1x32xf32>
    %c0_11 = arith.constant 0 : index
    %c0_12 = arith.constant 0 : index
    %c0_13 = arith.constant 0 : index
    %c0_14 = arith.constant 0 : index
    %13 = vector.load %arg2[%c0_11, %c0_12, %c0_13, %c0_14] : memref<1x4x128x14xf32, #tpu.memory_space<vmem>>, vector<1x1x128x14xf32>
    %14 = vector.shape_cast %13 : vector<1x1x128x14xf32> to vector<128x14xf32>
    %cst_15 = arith.constant dense<0.000000e+00> : vector<128x32xf32>
    %15 = tpu.matmul %14, %11, %cst_15 {dimension_numbers = #tpu.dot_dimension_numbers<[1], [0], [0], [1], [0, 0, 1, 1], [], []>} : vector<128x14xf32>, vector<14x32xf32>, vector<128x32xf32> -> vector<128x32xf32>
    %16 = vector.broadcast %12 : vector<1x32xf32> to vector<128x32xf32>
    %17 = arith.addf %15, %16 : vector<128x32xf32>
    %cst_16 = arith.constant 0.000000e+00 : f32
    %18 = vector.broadcast %cst_16 : f32 to vector<128x32xf32>
    %19 = arith.cmpf oge, %17, %18 : vector<128x32xf32>
    %cst_17 = arith.constant 0.00999999977 : f32
    %20 = vector.broadcast %cst_17 : f32 to vector<128x32xf32>
    %21 = arith.mulf %20, %17 : vector<128x32xf32>
    %22 = arith.select %19, %17, %21 : vector<128x32xi1>, vector<128x32xf32>
    %c0_18 = arith.constant 0 : index
    %c1 = arith.constant 1 : index
    %c0_19 = arith.constant 0 : index
    %c0_20 = arith.constant 0 : index
    %23 = vector.load %arg2[%c0_18, %c1, %c0_19, %c0_20] : memref<1x4x128x14xf32, #tpu.memory_space<vmem>>, vector<1x1x128x14xf32>
    %24 = vector.shape_cast %23 : vector<1x1x128x14xf32> to vector<128x14xf32>
    %cst_21 = arith.constant dense<0.000000e+00> : vector<128x32xf32>
    %25 = tpu.matmul %24, %11, %cst_21 {dimension_numbers = #tpu.dot_dimension_numbers<[1], [0], [0], [1], [0, 0, 1, 1], [], []>} : vector<128x14xf32>, vector<14x32xf32>, vector<128x32xf32> -> vector<128x32xf32>
    %26 = vector.broadcast %12 : vector<1x32xf32> to vector<128x32xf32>
    %27 = arith.addf %25, %26 : vector<128x32xf32>
    %cst_22 = arith.constant 0.000000e+00 : f32
    %28 = vector.broadcast %cst_22 : f32 to vector<128x32xf32>
    %29 = arith.cmpf oge, %27, %28 : vector<128x32xf32>
    %cst_23 = arith.constant 0.00999999977 : f32
    %30 = vector.broadcast %cst_23 : f32 to vector<128x32xf32>
    %31 = arith.mulf %30, %27 : vector<128x32xf32>
    %32 = arith.select %29, %27, %31 : vector<128x32xi1>, vector<128x32xf32>
    %c0_24 = arith.constant 0 : index
    %c2 = arith.constant 2 : index
    %c0_25 = arith.constant 0 : index
    %c0_26 = arith.constant 0 : index
    %33 = vector.load %arg2[%c0_24, %c2, %c0_25, %c0_26] : memref<1x4x128x14xf32, #tpu.memory_space<vmem>>, vector<1x1x128x14xf32>
    %34 = vector.shape_cast %33 : vector<1x1x128x14xf32> to vector<128x14xf32>
    %cst_27 = arith.constant dense<0.000000e+00> : vector<128x32xf32>
    %35 = tpu.matmul %34, %11, %cst_27 {dimension_numbers = #tpu.dot_dimension_numbers<[1], [0], [0], [1], [0, 0, 1, 1], [], []>} : vector<128x14xf32>, vector<14x32xf32>, vector<128x32xf32> -> vector<128x32xf32>
    %36 = vector.broadcast %12 : vector<1x32xf32> to vector<128x32xf32>
    %37 = arith.addf %35, %36 : vector<128x32xf32>
    %cst_28 = arith.constant 0.000000e+00 : f32
    %38 = vector.broadcast %cst_28 : f32 to vector<128x32xf32>
    %39 = arith.cmpf oge, %37, %38 : vector<128x32xf32>
    %cst_29 = arith.constant 0.00999999977 : f32
    %40 = vector.broadcast %cst_29 : f32 to vector<128x32xf32>
    %41 = arith.mulf %40, %37 : vector<128x32xf32>
    %42 = arith.select %39, %37, %41 : vector<128x32xi1>, vector<128x32xf32>
    %c0_30 = arith.constant 0 : index
    %c3 = arith.constant 3 : index
    %c0_31 = arith.constant 0 : index
    %c0_32 = arith.constant 0 : index
    %43 = vector.load %arg2[%c0_30, %c3, %c0_31, %c0_32] : memref<1x4x128x14xf32, #tpu.memory_space<vmem>>, vector<1x1x128x14xf32>
    %44 = vector.shape_cast %43 : vector<1x1x128x14xf32> to vector<128x14xf32>
    %cst_33 = arith.constant dense<0.000000e+00> : vector<128x32xf32>
    %45 = tpu.matmul %44, %11, %cst_33 {dimension_numbers = #tpu.dot_dimension_numbers<[1], [0], [0], [1], [0, 0, 1, 1], [], []>} : vector<128x14xf32>, vector<14x32xf32>, vector<128x32xf32> -> vector<128x32xf32>
    %46 = vector.broadcast %12 : vector<1x32xf32> to vector<128x32xf32>
    %47 = arith.addf %45, %46 : vector<128x32xf32>
    %cst_34 = arith.constant 0.000000e+00 : f32
    %48 = vector.broadcast %cst_34 : f32 to vector<128x32xf32>
    %49 = arith.cmpf oge, %47, %48 : vector<128x32xf32>
    %cst_35 = arith.constant 0.00999999977 : f32
    %50 = vector.broadcast %cst_35 : f32 to vector<128x32xf32>
    %51 = arith.mulf %50, %47 : vector<128x32xf32>
    %52 = arith.select %49, %47, %51 : vector<128x32xi1>, vector<128x32xf32>
    %c0_36 = arith.constant 0 : index
    %c0_37 = arith.constant 0 : index
    %53 = vector.load %arg3[%c0_36, %c0_37] : memref<128x4xf32, #tpu.memory_space<vmem>>, vector<128x4xf32>
    %c0_38 = arith.constant 0 : index
    %c0_39 = arith.constant 0 : index
    %54 = vector.load %arg4[%c0_38, %c0_39] : memref<128x4xf32, #tpu.memory_space<vmem>>, vector<128x4xf32>
    %c0_40 = arith.constant 0 : index
    %c0_41 = arith.constant 0 : index
    %c0_42 = arith.constant 0 : index
    %55 = vector.load %arg13[%c0_40, %c0_41, %c0_42] : memref<2x32x1xf32, #tpu.memory_space<vmem>>, vector<1x32x1xf32>
    %56 = vector.shape_cast %55 : vector<1x32x1xf32> to vector<32x1xf32>
    %c0_43 = arith.constant 0 : index
    %c0_44 = arith.constant 0 : index
    %c0_45 = arith.constant 0 : index
    %57 = vector.load %arg14[%c0_43, %c0_44, %c0_45] : memref<2x32x1xf32, #tpu.memory_space<vmem>>, vector<1x32x1xf32>
    %58 = vector.shape_cast %57 : vector<1x32x1xf32> to vector<32x1xf32>
    %c0_46 = arith.constant 0 : index
    %c0_47 = arith.constant 0 : index
    %c0_48 = arith.constant 0 : index
    %59 = vector.load %arg15[%c0_46, %c0_47, %c0_48] : memref<2x1x1xf32, #tpu.memory_space<vmem>>, vector<1x1x1xf32>
    %60 = vector.shape_cast %59 : vector<1x1x1xf32> to vector<1x1xf32>
    %c0_49 = arith.constant 0 : index
    %c0_50 = arith.constant 0 : index
    %c0_51 = arith.constant 0 : index
    %61 = vector.load %arg16[%c0_49, %c0_50, %c0_51] : memref<2x32x32xf32, #tpu.memory_space<vmem>>, vector<1x32x32xf32>
    %62 = vector.shape_cast %61 : vector<1x32x32xf32> to vector<32x32xf32>
    %c0_52 = arith.constant 0 : index
    %c0_53 = arith.constant 0 : index
    %c0_54 = arith.constant 0 : index
    %63 = vector.load %arg17[%c0_52, %c0_53, %c0_54] : memref<2x1x32xf32, #tpu.memory_space<vmem>>, vector<1x1x32xf32>
    %64 = vector.shape_cast %63 : vector<1x1x32xf32> to vector<1x32xf32>
    %c0_55 = arith.constant 0 : index
    %c0_56 = arith.constant 0 : index
    %c0_57 = arith.constant 0 : index
    %65 = vector.load %arg18[%c0_55, %c0_56, %c0_57] : memref<2x64x128xf32, #tpu.memory_space<vmem>>, vector<1x64x128xf32>
    %66 = vector.shape_cast %65 : vector<1x64x128xf32> to vector<64x128xf32>
    %c0_58 = arith.constant 0 : index
    %c0_59 = arith.constant 0 : index
    %c0_60 = arith.constant 0 : index
    %67 = vector.load %arg19[%c0_58, %c0_59, %c0_60] : memref<2x1x128xf32, #tpu.memory_space<vmem>>, vector<1x1x128xf32>
    %68 = vector.shape_cast %67 : vector<1x1x128xf32> to vector<1x128xf32>
    %cst_61 = arith.constant dense<0.000000e+00> : vector<128x1xf32>
    %69 = tpu.matmul %10, %56, %cst_61 {dimension_numbers = #tpu.dot_dimension_numbers<[1], [0], [0], [1], [0, 0, 1, 1], [], []>} : vector<128x32xf32>, vector<32x1xf32>, vector<128x1xf32> -> vector<128x1xf32>
    %cst_62 = arith.constant dense<0.000000e+00> : vector<128x1xf32>
    %70 = tpu.matmul %22, %58, %cst_62 {dimension_numbers = #tpu.dot_dimension_numbers<[1], [0], [0], [1], [0, 0, 1, 1], [], []>} : vector<128x32xf32>, vector<32x1xf32>, vector<128x1xf32> -> vector<128x1xf32>
    %cst_63 = arith.constant dense<0.000000e+00> : vector<128x1xf32>
    %71 = tpu.matmul %32, %58, %cst_63 {dimension_numbers = #tpu.dot_dimension_numbers<[1], [0], [0], [1], [0, 0, 1, 1], [], []>} : vector<128x32xf32>, vector<32x1xf32>, vector<128x1xf32> -> vector<128x1xf32>
    %cst_64 = arith.constant dense<0.000000e+00> : vector<128x1xf32>
    %72 = tpu.matmul %42, %58, %cst_64 {dimension_numbers = #tpu.dot_dimension_numbers<[1], [0], [0], [1], [0, 0, 1, 1], [], []>} : vector<128x32xf32>, vector<32x1xf32>, vector<128x1xf32> -> vector<128x1xf32>
    %cst_65 = arith.constant dense<0.000000e+00> : vector<128x1xf32>
    %73 = tpu.matmul %52, %58, %cst_65 {dimension_numbers = #tpu.dot_dimension_numbers<[1], [0], [0], [1], [0, 0, 1, 1], [], []>} : vector<128x32xf32>, vector<32x1xf32>, vector<128x1xf32> -> vector<128x1xf32>
    %74 = tpu.concatenate %70, %71, %72, %73 in 1 : vector<128x1xf32>, vector<128x1xf32>, vector<128x1xf32>, vector<128x1xf32> -> vector<128x4xf32>
    %75 = vector.broadcast %69 : vector<128x1xf32> to vector<128x4xf32>
    %76 = arith.addf %75, %74 : vector<128x4xf32>
    %77 = vector.broadcast %60 : vector<1x1xf32> to vector<128x4xf32>
    %78 = arith.addf %76, %77 : vector<128x4xf32>
    %cst_66 = arith.constant 0.000000e+00 : f32
    %79 = vector.broadcast %cst_66 : f32 to vector<128x4xf32>
    %80 = arith.cmpf oge, %78, %79 : vector<128x4xf32>
    %cst_67 = arith.constant 0.00999999977 : f32
    %81 = vector.broadcast %cst_67 : f32 to vector<128x4xf32>
    %82 = arith.mulf %81, %78 : vector<128x4xf32>
    %83 = arith.select %80, %78, %82 : vector<128x4xi1>, vector<128x4xf32>
    %84 = arith.addf %83, %54 : vector<128x4xf32>
    %cst_68 = arith.constant dense<0xFF800000> : vector<128xf32>
    %85 = vector.multi_reduction <maximumf>, %84, %cst_68 [1] : vector<128x4xf32> to vector<128xf32>
    %86 = vector.shape_cast %85 : vector<128xf32> to vector<128x1xf32>
    %87 = vector.broadcast %86 : vector<128x1xf32> to vector<128x4xf32>
    %88 = arith.subf %84, %87 : vector<128x4xf32>
    %89 = math.exp %88 : vector<128x4xf32>
    %cst_69 = arith.constant dense<0.000000e+00> : vector<128xf32>
    %90 = vector.multi_reduction <add>, %89, %cst_69 [1] : vector<128x4xf32> to vector<128xf32>
    %91 = vector.shape_cast %90 : vector<128xf32> to vector<128x1xf32>
    %92 = tpu.reciprocal %91 {approx = true} : vector<128x1xf32> -> vector<128x1xf32>
    %93 = vector.broadcast %92 : vector<128x1xf32> to vector<128x4xf32>
    %94 = arith.mulf %89, %93 : vector<128x4xf32>
    %95 = arith.mulf %94, %53 : vector<128x4xf32>
    %96 = vector.extract_strided_slice %95 {offsets = [0, 0], sizes = [128, 1], strides = [1, 1]} : vector<128x4xf32> to vector<128x1xf32>
    %97 = vector.broadcast %96 : vector<128x1xf32> to vector<128x32xf32>
    %98 = arith.mulf %97, %22 : vector<128x32xf32>
    %99 = vector.extract_strided_slice %95 {offsets = [0, 1], sizes = [128, 1], strides = [1, 1]} : vector<128x4xf32> to vector<128x1xf32>
    %100 = vector.broadcast %99 : vector<128x1xf32> to vector<128x32xf32>
    %101 = arith.mulf %100, %32 : vector<128x32xf32>
    %102 = arith.addf %98, %101 : vector<128x32xf32>
    %103 = vector.extract_strided_slice %95 {offsets = [0, 2], sizes = [128, 1], strides = [1, 1]} : vector<128x4xf32> to vector<128x1xf32>
    %104 = vector.broadcast %103 : vector<128x1xf32> to vector<128x32xf32>
    %105 = arith.mulf %104, %42 : vector<128x32xf32>
    %106 = arith.addf %102, %105 : vector<128x32xf32>
    %107 = vector.extract_strided_slice %95 {offsets = [0, 3], sizes = [128, 1], strides = [1, 1]} : vector<128x4xf32> to vector<128x1xf32>
    %108 = vector.broadcast %107 : vector<128x1xf32> to vector<128x32xf32>
    %109 = arith.mulf %108, %52 : vector<128x32xf32>
    %110 = arith.addf %106, %109 : vector<128x32xf32>
    %cst_70 = arith.constant dense<0.000000e+00> : vector<128xf32>
    %111 = vector.multi_reduction <add>, %95, %cst_70 [1] : vector<128x4xf32> to vector<128xf32>
    %112 = vector.shape_cast %111 : vector<128xf32> to vector<128x1xf32>
    %cst_71 = arith.constant dense<0.000000e+00> : vector<128x32xf32>
    %113 = tpu.matmul %110, %62, %cst_71 {dimension_numbers = #tpu.dot_dimension_numbers<[1], [0], [0], [1], [0, 0, 1, 1], [], []>} : vector<128x32xf32>, vector<32x32xf32>, vector<128x32xf32> -> vector<128x32xf32>
    %114 = vector.broadcast %112 : vector<128x1xf32> to vector<128x32xf32>
    %115 = vector.broadcast %64 : vector<1x32xf32> to vector<128x32xf32>
    %116 = arith.mulf %114, %115 : vector<128x32xf32>
    %117 = arith.addf %113, %116 : vector<128x32xf32>
    %cst_72 = arith.constant 0.000000e+00 : f32
    %118 = vector.broadcast %cst_72 : f32 to vector<128x32xf32>
    %119 = arith.cmpf ogt, %117, %118 : vector<128x32xf32>
    %cst_73 = arith.constant 0.000000e+00 : f32
    %120 = vector.broadcast %cst_73 : f32 to vector<128x32xf32>
    %121 = arith.minimumf %117, %120 : vector<128x32xf32>
    %122 = math.exp %121 : vector<128x32xf32>
    %cst_74 = arith.constant 1.000000e+00 : f32
    %123 = vector.broadcast %cst_74 : f32 to vector<128x32xf32>
    %124 = arith.subf %122, %123 : vector<128x32xf32>
    %125 = arith.select %119, %117, %124 : vector<128x32xi1>, vector<128x32xf32>
    %126 = tpu.concatenate %125, %10 in 1 : vector<128x32xf32>, vector<128x32xf32> -> vector<128x64xf32>
    %cst_75 = arith.constant dense<0.000000e+00> : vector<128x128xf32>
    %127 = tpu.matmul %126, %66, %cst_75 {dimension_numbers = #tpu.dot_dimension_numbers<[1], [0], [0], [1], [0, 0, 1, 1], [], []>} : vector<128x64xf32>, vector<64x128xf32>, vector<128x128xf32> -> vector<128x128xf32>
    %128 = vector.broadcast %68 : vector<1x128xf32> to vector<128x128xf32>
    %129 = arith.addf %127, %128 : vector<128x128xf32>
    %130 = vector.extract_strided_slice %129 {offsets = [0, 0], sizes = [128, 32], strides = [1, 1]} : vector<128x128xf32> to vector<128x32xf32>
    %131 = arith.negf %130 : vector<128x32xf32>
    %132 = math.exp %131 : vector<128x32xf32>
    %cst_76 = arith.constant 1.000000e+00 : f32
    %133 = vector.broadcast %cst_76 : f32 to vector<128x32xf32>
    %134 = arith.addf %133, %132 : vector<128x32xf32>
    %135 = arith.divf %133, %134 : vector<128x32xf32>
    %136 = vector.extract_strided_slice %129 {offsets = [0, 32], sizes = [128, 32], strides = [1, 1]} : vector<128x128xf32> to vector<128x32xf32>
    %137 = arith.negf %136 : vector<128x32xf32>
    %138 = math.exp %137 : vector<128x32xf32>
    %cst_77 = arith.constant 1.000000e+00 : f32
    %139 = vector.broadcast %cst_77 : f32 to vector<128x32xf32>
    %140 = arith.addf %139, %138 : vector<128x32xf32>
    %141 = arith.divf %139, %140 : vector<128x32xf32>
    %142 = vector.extract_strided_slice %129 {offsets = [0, 64], sizes = [128, 32], strides = [1, 1]} : vector<128x128xf32> to vector<128x32xf32>
    %143 = vector.extract_strided_slice %129 {offsets = [0, 96], sizes = [128, 32], strides = [1, 1]} : vector<128x128xf32> to vector<128x32xf32>
    %144 = arith.mulf %135, %143 : vector<128x32xf32>
    %145 = arith.addf %142, %144 : vector<128x32xf32>
    %146 = math.tanh %145 : vector<128x32xf32>
    %cst_78 = arith.constant 1.000000e+00 : f32
    %147 = vector.broadcast %cst_78 : f32 to vector<128x32xf32>
    %148 = arith.subf %147, %141 : vector<128x32xf32>
    %149 = arith.mulf %148, %146 : vector<128x32xf32>
    %150 = arith.mulf %141, %10 : vector<128x32xf32>
    %151 = arith.addf %149, %150 : vector<128x32xf32>
    %cst_79 = arith.constant 0.000000e+00 : f32
    %152 = vector.broadcast %cst_79 : f32 to vector<128x32xf32>
    %153 = arith.maximumf %151, %152 : vector<128x32xf32>
    %c0_80 = arith.constant 0 : index
    %c0_81 = arith.constant 0 : index
    %c0_82 = arith.constant 0 : index
    %c0_83 = arith.constant 0 : index
    %154 = vector.load %arg5[%c0_80, %c0_81, %c0_82, %c0_83] : memref<1x4x128x128xf32, #tpu.memory_space<vmem>>, vector<1x1x128x128xf32>
    %155 = vector.shape_cast %154 : vector<1x1x128x128xf32> to vector<128x128xf32>
    %cst_84 = arith.constant dense<0.000000e+00> : vector<128x32xf32>
    %156 = tpu.matmul %155, %153, %cst_84 {dimension_numbers = #tpu.dot_dimension_numbers<[1], [0], [0], [1], [0, 0, 1, 1], [], []>} : vector<128x128xf32>, vector<128x32xf32>, vector<128x32xf32> -> vector<128x32xf32>
    %c0_85 = arith.constant 0 : index
    %c1_86 = arith.constant 1 : index
    %c0_87 = arith.constant 0 : index
    %c0_88 = arith.constant 0 : index
    %157 = vector.load %arg5[%c0_85, %c1_86, %c0_87, %c0_88] : memref<1x4x128x128xf32, #tpu.memory_space<vmem>>, vector<1x1x128x128xf32>
    %158 = vector.shape_cast %157 : vector<1x1x128x128xf32> to vector<128x128xf32>
    %cst_89 = arith.constant dense<0.000000e+00> : vector<128x32xf32>
    %159 = tpu.matmul %158, %153, %cst_89 {dimension_numbers = #tpu.dot_dimension_numbers<[1], [0], [0], [1], [0, 0, 1, 1], [], []>} : vector<128x128xf32>, vector<128x32xf32>, vector<128x32xf32> -> vector<128x32xf32>
    %c0_90 = arith.constant 0 : index
    %c2_91 = arith.constant 2 : index
    %c0_92 = arith.constant 0 : index
    %c0_93 = arith.constant 0 : index
    %160 = vector.load %arg5[%c0_90, %c2_91, %c0_92, %c0_93] : memref<1x4x128x128xf32, #tpu.memory_space<vmem>>, vector<1x1x128x128xf32>
    %161 = vector.shape_cast %160 : vector<1x1x128x128xf32> to vector<128x128xf32>
    %cst_94 = arith.constant dense<0.000000e+00> : vector<128x32xf32>
    %162 = tpu.matmul %161, %153, %cst_94 {dimension_numbers = #tpu.dot_dimension_numbers<[1], [0], [0], [1], [0, 0, 1, 1], [], []>} : vector<128x128xf32>, vector<128x32xf32>, vector<128x32xf32> -> vector<128x32xf32>
    %c0_95 = arith.constant 0 : index
    %c3_96 = arith.constant 3 : index
    %c0_97 = arith.constant 0 : index
    %c0_98 = arith.constant 0 : index
    %163 = vector.load %arg5[%c0_95, %c3_96, %c0_97, %c0_98] : memref<1x4x128x128xf32, #tpu.memory_space<vmem>>, vector<1x1x128x128xf32>
    %164 = vector.shape_cast %163 : vector<1x1x128x128xf32> to vector<128x128xf32>
    %cst_99 = arith.constant dense<0.000000e+00> : vector<128x32xf32>
    %165 = tpu.matmul %164, %153, %cst_99 {dimension_numbers = #tpu.dot_dimension_numbers<[1], [0], [0], [1], [0, 0, 1, 1], [], []>} : vector<128x128xf32>, vector<128x32xf32>, vector<128x32xf32> -> vector<128x32xf32>
    %c1_100 = arith.constant 1 : index
    %c0_101 = arith.constant 0 : index
    %c0_102 = arith.constant 0 : index
    %166 = vector.load %arg13[%c1_100, %c0_101, %c0_102] : memref<2x32x1xf32, #tpu.memory_space<vmem>>, vector<1x32x1xf32>
    %167 = vector.shape_cast %166 : vector<1x32x1xf32> to vector<32x1xf32>
    %c1_103 = arith.constant 1 : index
    %c0_104 = arith.constant 0 : index
    %c0_105 = arith.constant 0 : index
    %168 = vector.load %arg14[%c1_103, %c0_104, %c0_105] : memref<2x32x1xf32, #tpu.memory_space<vmem>>, vector<1x32x1xf32>
    %169 = vector.shape_cast %168 : vector<1x32x1xf32> to vector<32x1xf32>
    %c1_106 = arith.constant 1 : index
    %c0_107 = arith.constant 0 : index
    %c0_108 = arith.constant 0 : index
    %170 = vector.load %arg15[%c1_106, %c0_107, %c0_108] : memref<2x1x1xf32, #tpu.memory_space<vmem>>, vector<1x1x1xf32>
    %171 = vector.shape_cast %170 : vector<1x1x1xf32> to vector<1x1xf32>
    %c1_109 = arith.constant 1 : index
    %c0_110 = arith.constant 0 : index
    %c0_111 = arith.constant 0 : index
    %172 = vector.load %arg16[%c1_109, %c0_110, %c0_111] : memref<2x32x32xf32, #tpu.memory_space<vmem>>, vector<1x32x32xf32>
    %173 = vector.shape_cast %172 : vector<1x32x32xf32> to vector<32x32xf32>
    %c1_112 = arith.constant 1 : index
    %c0_113 = arith.constant 0 : index
    %c0_114 = arith.constant 0 : index
    %174 = vector.load %arg17[%c1_112, %c0_113, %c0_114] : memref<2x1x32xf32, #tpu.memory_space<vmem>>, vector<1x1x32xf32>
    %175 = vector.shape_cast %174 : vector<1x1x32xf32> to vector<1x32xf32>
    %c1_115 = arith.constant 1 : index
    %c0_116 = arith.constant 0 : index
    %c0_117 = arith.constant 0 : index
    %176 = vector.load %arg18[%c1_115, %c0_116, %c0_117] : memref<2x64x128xf32, #tpu.memory_space<vmem>>, vector<1x64x128xf32>
    %177 = vector.shape_cast %176 : vector<1x64x128xf32> to vector<64x128xf32>
    %c1_118 = arith.constant 1 : index
    %c0_119 = arith.constant 0 : index
    %c0_120 = arith.constant 0 : index
    %178 = vector.load %arg19[%c1_118, %c0_119, %c0_120] : memref<2x1x128xf32, #tpu.memory_space<vmem>>, vector<1x1x128xf32>
    %179 = vector.shape_cast %178 : vector<1x1x128xf32> to vector<1x128xf32>
    %cst_121 = arith.constant dense<0.000000e+00> : vector<128x1xf32>
    %180 = tpu.matmul %153, %167, %cst_121 {dimension_numbers = #tpu.dot_dimension_numbers<[1], [0], [0], [1], [0, 0, 1, 1], [], []>} : vector<128x32xf32>, vector<32x1xf32>, vector<128x1xf32> -> vector<128x1xf32>
    %cst_122 = arith.constant dense<0.000000e+00> : vector<128x1xf32>
    %181 = tpu.matmul %156, %169, %cst_122 {dimension_numbers = #tpu.dot_dimension_numbers<[1], [0], [0], [1], [0, 0, 1, 1], [], []>} : vector<128x32xf32>, vector<32x1xf32>, vector<128x1xf32> -> vector<128x1xf32>
    %cst_123 = arith.constant dense<0.000000e+00> : vector<128x1xf32>
    %182 = tpu.matmul %159, %169, %cst_123 {dimension_numbers = #tpu.dot_dimension_numbers<[1], [0], [0], [1], [0, 0, 1, 1], [], []>} : vector<128x32xf32>, vector<32x1xf32>, vector<128x1xf32> -> vector<128x1xf32>
    %cst_124 = arith.constant dense<0.000000e+00> : vector<128x1xf32>
    %183 = tpu.matmul %162, %169, %cst_124 {dimension_numbers = #tpu.dot_dimension_numbers<[1], [0], [0], [1], [0, 0, 1, 1], [], []>} : vector<128x32xf32>, vector<32x1xf32>, vector<128x1xf32> -> vector<128x1xf32>
    %cst_125 = arith.constant dense<0.000000e+00> : vector<128x1xf32>
    %184 = tpu.matmul %165, %169, %cst_125 {dimension_numbers = #tpu.dot_dimension_numbers<[1], [0], [0], [1], [0, 0, 1, 1], [], []>} : vector<128x32xf32>, vector<32x1xf32>, vector<128x1xf32> -> vector<128x1xf32>
    %185 = tpu.concatenate %181, %182, %183, %184 in 1 : vector<128x1xf32>, vector<128x1xf32>, vector<128x1xf32>, vector<128x1xf32> -> vector<128x4xf32>
    %186 = vector.broadcast %180 : vector<128x1xf32> to vector<128x4xf32>
    %187 = arith.addf %186, %185 : vector<128x4xf32>
    %188 = vector.broadcast %171 : vector<1x1xf32> to vector<128x4xf32>
    %189 = arith.addf %187, %188 : vector<128x4xf32>
    %cst_126 = arith.constant 0.000000e+00 : f32
    %190 = vector.broadcast %cst_126 : f32 to vector<128x4xf32>
    %191 = arith.cmpf oge, %189, %190 : vector<128x4xf32>
    %cst_127 = arith.constant 0.00999999977 : f32
    %192 = vector.broadcast %cst_127 : f32 to vector<128x4xf32>
    %193 = arith.mulf %192, %189 : vector<128x4xf32>
    %194 = arith.select %191, %189, %193 : vector<128x4xi1>, vector<128x4xf32>
    %195 = arith.addf %194, %54 : vector<128x4xf32>
    %cst_128 = arith.constant dense<0xFF800000> : vector<128xf32>
    %196 = vector.multi_reduction <maximumf>, %195, %cst_128 [1] : vector<128x4xf32> to vector<128xf32>
    %197 = vector.shape_cast %196 : vector<128xf32> to vector<128x1xf32>
    %198 = vector.broadcast %197 : vector<128x1xf32> to vector<128x4xf32>
    %199 = arith.subf %195, %198 : vector<128x4xf32>
    %200 = math.exp %199 : vector<128x4xf32>
    %cst_129 = arith.constant dense<0.000000e+00> : vector<128xf32>
    %201 = vector.multi_reduction <add>, %200, %cst_129 [1] : vector<128x4xf32> to vector<128xf32>
    %202 = vector.shape_cast %201 : vector<128xf32> to vector<128x1xf32>
    %203 = tpu.reciprocal %202 {approx = true} : vector<128x1xf32> -> vector<128x1xf32>
    %204 = vector.broadcast %203 : vector<128x1xf32> to vector<128x4xf32>
    %205 = arith.mulf %200, %204 : vector<128x4xf32>
    %206 = arith.mulf %205, %53 : vector<128x4xf32>
    %207 = vector.extract_strided_slice %206 {offsets = [0, 0], sizes = [128, 1], strides = [1, 1]} : vector<128x4xf32> to vector<128x1xf32>
    %208 = vector.broadcast %207 : vector<128x1xf32> to vector<128x32xf32>
    %209 = arith.mulf %208, %156 : vector<128x32xf32>
    %210 = vector.extract_strided_slice %206 {offsets = [0, 1], sizes = [128, 1], strides = [1, 1]} : vector<128x4xf32> to vector<128x1xf32>
    %211 = vector.broadcast %210 : vector<128x1xf32> to vector<128x32xf32>
    %212 = arith.mulf %211, %159 : vector<128x32xf32>
    %213 = arith.addf %209, %212 : vector<128x32xf32>
    %214 = vector.extract_strided_slice %206 {offsets = [0, 2], sizes = [128, 1], strides = [1, 1]} : vector<128x4xf32> to vector<128x1xf32>
    %215 = vector.broadcast %214 : vector<128x1xf32> to vector<128x32xf32>
    %216 = arith.mulf %215, %162 : vector<128x32xf32>
    %217 = arith.addf %213, %216 : vector<128x32xf32>
    %218 = vector.extract_strided_slice %206 {offsets = [0, 3], sizes = [128, 1], strides = [1, 1]} : vector<128x4xf32> to vector<128x1xf32>
    %219 = vector.broadcast %218 : vector<128x1xf32> to vector<128x32xf32>
    %220 = arith.mulf %219, %165 : vector<128x32xf32>
    %221 = arith.addf %217, %220 : vector<128x32xf32>
    %cst_130 = arith.constant dense<0.000000e+00> : vector<128xf32>
    %222 = vector.multi_reduction <add>, %206, %cst_130 [1] : vector<128x4xf32> to vector<128xf32>
    %223 = vector.shape_cast %222 : vector<128xf32> to vector<128x1xf32>
    %cst_131 = arith.constant dense<0.000000e+00> : vector<128x32xf32>
    %224 = tpu.matmul %221, %173, %cst_131 {dimension_numbers = #tpu.dot_dimension_numbers<[1], [0], [0], [1], [0, 0, 1, 1], [], []>} : vector<128x32xf32>, vector<32x32xf32>, vector<128x32xf32> -> vector<128x32xf32>
    %225 = vector.broadcast %223 : vector<128x1xf32> to vector<128x32xf32>
    %226 = vector.broadcast %175 : vector<1x32xf32> to vector<128x32xf32>
    %227 = arith.mulf %225, %226 : vector<128x32xf32>
    %228 = arith.addf %224, %227 : vector<128x32xf32>
    %cst_132 = arith.constant 0.000000e+00 : f32
    %229 = vector.broadcast %cst_132 : f32 to vector<128x32xf32>
    %230 = arith.cmpf ogt, %228, %229 : vector<128x32xf32>
    %cst_133 = arith.constant 0.000000e+00 : f32
    %231 = vector.broadcast %cst_133 : f32 to vector<128x32xf32>
    %232 = arith.minimumf %228, %231 : vector<128x32xf32>
    %233 = math.exp %232 : vector<128x32xf32>
    %cst_134 = arith.constant 1.000000e+00 : f32
    %234 = vector.broadcast %cst_134 : f32 to vector<128x32xf32>
    %235 = arith.subf %233, %234 : vector<128x32xf32>
    %236 = arith.select %230, %228, %235 : vector<128x32xi1>, vector<128x32xf32>
    %237 = tpu.concatenate %236, %151 in 1 : vector<128x32xf32>, vector<128x32xf32> -> vector<128x64xf32>
    %cst_135 = arith.constant dense<0.000000e+00> : vector<128x128xf32>
    %238 = tpu.matmul %237, %177, %cst_135 {dimension_numbers = #tpu.dot_dimension_numbers<[1], [0], [0], [1], [0, 0, 1, 1], [], []>} : vector<128x64xf32>, vector<64x128xf32>, vector<128x128xf32> -> vector<128x128xf32>
    %239 = vector.broadcast %179 : vector<1x128xf32> to vector<128x128xf32>
    %240 = arith.addf %238, %239 : vector<128x128xf32>
    %241 = vector.extract_strided_slice %240 {offsets = [0, 0], sizes = [128, 32], strides = [1, 1]} : vector<128x128xf32> to vector<128x32xf32>
    %242 = arith.negf %241 : vector<128x32xf32>
    %243 = math.exp %242 : vector<128x32xf32>
    %cst_136 = arith.constant 1.000000e+00 : f32
    %244 = vector.broadcast %cst_136 : f32 to vector<128x32xf32>
    %245 = arith.addf %244, %243 : vector<128x32xf32>
    %246 = arith.divf %244, %245 : vector<128x32xf32>
    %247 = vector.extract_strided_slice %240 {offsets = [0, 32], sizes = [128, 32], strides = [1, 1]} : vector<128x128xf32> to vector<128x32xf32>
    %248 = arith.negf %247 : vector<128x32xf32>
    %249 = math.exp %248 : vector<128x32xf32>
    %cst_137 = arith.constant 1.000000e+00 : f32
    %250 = vector.broadcast %cst_137 : f32 to vector<128x32xf32>
    %251 = arith.addf %250, %249 : vector<128x32xf32>
    %252 = arith.divf %250, %251 : vector<128x32xf32>
    %253 = vector.extract_strided_slice %240 {offsets = [0, 64], sizes = [128, 32], strides = [1, 1]} : vector<128x128xf32> to vector<128x32xf32>
    %254 = vector.extract_strided_slice %240 {offsets = [0, 96], sizes = [128, 32], strides = [1, 1]} : vector<128x128xf32> to vector<128x32xf32>
    %255 = arith.mulf %246, %254 : vector<128x32xf32>
    %256 = arith.addf %253, %255 : vector<128x32xf32>
    %257 = math.tanh %256 : vector<128x32xf32>
    %cst_138 = arith.constant 1.000000e+00 : f32
    %258 = vector.broadcast %cst_138 : f32 to vector<128x32xf32>
    %259 = arith.subf %258, %252 : vector<128x32xf32>
    %260 = arith.mulf %259, %257 : vector<128x32xf32>
    %261 = arith.mulf %252, %151 : vector<128x32xf32>
    %262 = arith.addf %260, %261 : vector<128x32xf32>
    %cst_139 = arith.constant 0.000000e+00 : f32
    %263 = vector.broadcast %cst_139 : f32 to vector<128x32xf32>
    %264 = arith.maximumf %262, %263 : vector<128x32xf32>
    %c0_140 = arith.constant 0 : index
    %c0_141 = arith.constant 0 : index
    %265 = vector.load %arg6[%c0_140, %c0_141] : memref<128x1xf32, #tpu.memory_space<vmem>>, vector<128x1xf32>
    %cst_142 = arith.constant 0.000000e+00 : f32
    %266 = vector.broadcast %cst_142 : f32 to vector<128x1xf32>
    %267 = arith.cmpf oeq, %265, %266 : vector<128x1xf32>
    %cst_143 = arith.constant -9.000000e+08 : f32
    %cst_144 = arith.constant 0.000000e+00 : f32
    %268 = vector.broadcast %cst_143 : f32 to vector<128x1xf32>
    %269 = vector.broadcast %cst_144 : f32 to vector<128x1xf32>
    %270 = arith.select %267, %268, %269 : vector<128x1xi1>, vector<128x1xf32>
    %c0_145 = arith.constant 0 : index
    %c0_146 = arith.constant 0 : index
    %271 = vector.load %arg7[%c0_145, %c0_146] : memref<128x8xf32, #tpu.memory_space<vmem>>, vector<128x8xf32>
    %c0_147 = arith.constant 0 : index
    %c0_148 = arith.constant 0 : index
    %272 = vector.load %arg8[%c0_147, %c0_148] : memref<8x128xf32, #tpu.memory_space<vmem>>, vector<8x128xf32>
    %273 = vector.broadcast %265 : vector<128x1xf32> to vector<128x32xf32>
    %274 = arith.mulf %264, %273 : vector<128x32xf32>
    %cst_149 = arith.constant dense<0.000000e+00> : vector<8x32xf32>
    %275 = tpu.matmul %272, %274, %cst_149 {dimension_numbers = #tpu.dot_dimension_numbers<[1], [0], [0], [1], [0, 0, 1, 1], [], []>} : vector<8x128xf32>, vector<128x32xf32>, vector<8x32xf32> -> vector<8x32xf32>
    %cst_150 = arith.constant 0.000000e+00 : f32
    %276 = vector.broadcast %cst_150 : f32 to vector<8x32xf32>
    %277 = arith.maximumf %275, %276 : vector<8x32xf32>
    %c0_151 = arith.constant 0 : index
    %c0_152 = arith.constant 0 : index
    %278 = vector.load %arg20[%c0_151, %c0_152] : memref<32x1xf32, #tpu.memory_space<vmem>>, vector<32x1xf32>
    %c0_153 = arith.constant 0 : index
    %c0_154 = arith.constant 0 : index
    %279 = vector.load %arg21[%c0_153, %c0_154] : memref<32x1xf32, #tpu.memory_space<vmem>>, vector<32x1xf32>
    %c0_155 = arith.constant 0 : index
    %c0_156 = arith.constant 0 : index
    %280 = vector.load %arg22[%c0_155, %c0_156] : memref<1x1xf32, #tpu.memory_space<vmem>>, vector<1x1xf32>
    %c0_157 = arith.constant 0 : index
    %c0_158 = arith.constant 0 : index
    %281 = vector.load %arg23[%c0_157, %c0_158] : memref<32x32xf32, #tpu.memory_space<vmem>>, vector<32x32xf32>
    %c0_159 = arith.constant 0 : index
    %c0_160 = arith.constant 0 : index
    %282 = vector.load %arg24[%c0_159, %c0_160] : memref<1x32xf32, #tpu.memory_space<vmem>>, vector<1x32xf32>
    %c0_161 = arith.constant 0 : index
    %c0_162 = arith.constant 0 : index
    %283 = vector.load %arg25[%c0_161, %c0_162] : memref<64x128xf32, #tpu.memory_space<vmem>>, vector<64x128xf32>
    %c0_163 = arith.constant 0 : index
    %c0_164 = arith.constant 0 : index
    %284 = vector.load %arg26[%c0_163, %c0_164] : memref<1x128xf32, #tpu.memory_space<vmem>>, vector<1x128xf32>
    %cst_165 = arith.constant dense<0.000000e+00> : vector<128x1xf32>
    %285 = tpu.matmul %264, %279, %cst_165 {dimension_numbers = #tpu.dot_dimension_numbers<[1], [0], [0], [1], [0, 0, 1, 1], [], []>} : vector<128x32xf32>, vector<32x1xf32>, vector<128x1xf32> -> vector<128x1xf32>
    %cst_166 = arith.constant dense<0.000000e+00> : vector<8x1xf32>
    %286 = tpu.matmul %277, %278, %cst_166 {dimension_numbers = #tpu.dot_dimension_numbers<[1], [0], [0], [1], [0, 0, 1, 1], [], []>} : vector<8x32xf32>, vector<32x1xf32>, vector<8x1xf32> -> vector<8x1xf32>
    %cst_167 = arith.constant dense<0.000000e+00> : vector<128x1xf32>
    %287 = tpu.matmul %271, %286, %cst_167 {dimension_numbers = #tpu.dot_dimension_numbers<[1], [0], [0], [1], [0, 0, 1, 1], [], []>} : vector<128x8xf32>, vector<8x1xf32>, vector<128x1xf32> -> vector<128x1xf32>
    %288 = arith.addf %285, %287 : vector<128x1xf32>
    %289 = vector.broadcast %280 : vector<1x1xf32> to vector<128x1xf32>
    %290 = arith.addf %288, %289 : vector<128x1xf32>
    %cst_168 = arith.constant 0.000000e+00 : f32
    %291 = vector.broadcast %cst_168 : f32 to vector<128x1xf32>
    %292 = arith.cmpf oge, %290, %291 : vector<128x1xf32>
    %cst_169 = arith.constant 0.00999999977 : f32
    %293 = vector.broadcast %cst_169 : f32 to vector<128x1xf32>
    %294 = arith.mulf %293, %290 : vector<128x1xf32>
    %295 = arith.select %292, %290, %294 : vector<128x1xi1>, vector<128x1xf32>
    %296 = arith.addf %295, %270 : vector<128x1xf32>
    %cst_170 = arith.constant dense<0xFF800000> : vector<1xf32>
    %297 = vector.multi_reduction <maximumf>, %296, %cst_170 [0] : vector<128x1xf32> to vector<1xf32>
    %298 = vector.shape_cast %297 : vector<1xf32> to vector<1x1xf32>
    %299 = vector.broadcast %298 : vector<1x1xf32> to vector<128x1xf32>
    %300 = arith.subf %296, %299 : vector<128x1xf32>
    %301 = math.exp %300 : vector<128x1xf32>
    %cst_171 = arith.constant dense<0.000000e+00> : vector<8x1xf32>
    %302 = tpu.matmul %272, %301, %cst_171 {dimension_numbers = #tpu.dot_dimension_numbers<[1], [0], [0], [1], [0, 0, 1, 1], [], []>} : vector<8x128xf32>, vector<128x1xf32>, vector<8x1xf32> -> vector<8x1xf32>
    %cst_172 = arith.constant 9.99999968E-21 : f32
    %303 = vector.broadcast %cst_172 : f32 to vector<8x1xf32>
    %304 = arith.maximumf %302, %303 : vector<8x1xf32>
    %cst_173 = arith.constant dense<0.000000e+00> : vector<128x1xf32>
    %305 = tpu.matmul %271, %304, %cst_173 {dimension_numbers = #tpu.dot_dimension_numbers<[1], [0], [0], [1], [0, 0, 1, 1], [], []>} : vector<128x8xf32>, vector<8x1xf32>, vector<128x1xf32> -> vector<128x1xf32>
    %306 = tpu.reciprocal %305 {approx = true} : vector<128x1xf32> -> vector<128x1xf32>
    %307 = arith.mulf %301, %306 : vector<128x1xf32>
    %308 = arith.mulf %307, %265 : vector<128x1xf32>
    %309 = vector.broadcast %308 : vector<128x1xf32> to vector<128x32xf32>
    %310 = arith.mulf %309, %264 : vector<128x32xf32>
    %cst_174 = arith.constant dense<0.000000e+00> : vector<8x32xf32>
    %311 = tpu.matmul %272, %310, %cst_174 {dimension_numbers = #tpu.dot_dimension_numbers<[1], [0], [0], [1], [0, 0, 1, 1], [], []>} : vector<8x128xf32>, vector<128x32xf32>, vector<8x32xf32> -> vector<8x32xf32>
    %cst_175 = arith.constant dense<0.000000e+00> : vector<8x1xf32>
    %312 = tpu.matmul %272, %308, %cst_175 {dimension_numbers = #tpu.dot_dimension_numbers<[1], [0], [0], [1], [0, 0, 1, 1], [], []>} : vector<8x128xf32>, vector<128x1xf32>, vector<8x1xf32> -> vector<8x1xf32>
    %cst_176 = arith.constant dense<0.000000e+00> : vector<8x32xf32>
    %313 = tpu.matmul %311, %281, %cst_176 {dimension_numbers = #tpu.dot_dimension_numbers<[1], [0], [0], [1], [0, 0, 1, 1], [], []>} : vector<8x32xf32>, vector<32x32xf32>, vector<8x32xf32> -> vector<8x32xf32>
    %314 = vector.broadcast %312 : vector<8x1xf32> to vector<8x32xf32>
    %315 = vector.broadcast %282 : vector<1x32xf32> to vector<8x32xf32>
    %316 = arith.mulf %314, %315 : vector<8x32xf32>
    %317 = arith.addf %313, %316 : vector<8x32xf32>
    %cst_177 = arith.constant 0.000000e+00 : f32
    %318 = vector.broadcast %cst_177 : f32 to vector<8x32xf32>
    %319 = arith.cmpf ogt, %317, %318 : vector<8x32xf32>
    %cst_178 = arith.constant 0.000000e+00 : f32
    %320 = vector.broadcast %cst_178 : f32 to vector<8x32xf32>
    %321 = arith.minimumf %317, %320 : vector<8x32xf32>
    %322 = math.exp %321 : vector<8x32xf32>
    %cst_179 = arith.constant 1.000000e+00 : f32
    %323 = vector.broadcast %cst_179 : f32 to vector<8x32xf32>
    %324 = arith.subf %322, %323 : vector<8x32xf32>
    %325 = arith.select %319, %317, %324 : vector<8x32xi1>, vector<8x32xf32>
    %326 = tpu.concatenate %325, %275 in 1 : vector<8x32xf32>, vector<8x32xf32> -> vector<8x64xf32>
    %cst_180 = arith.constant dense<0.000000e+00> : vector<8x128xf32>
    %327 = tpu.matmul %326, %283, %cst_180 {dimension_numbers = #tpu.dot_dimension_numbers<[1], [0], [0], [1], [0, 0, 1, 1], [], []>} : vector<8x64xf32>, vector<64x128xf32>, vector<8x128xf32> -> vector<8x128xf32>
    %328 = vector.broadcast %284 : vector<1x128xf32> to vector<8x128xf32>
    %329 = arith.addf %327, %328 : vector<8x128xf32>
    %330 = vector.extract_strided_slice %329 {offsets = [0, 0], sizes = [8, 32], strides = [1, 1]} : vector<8x128xf32> to vector<8x32xf32>
    %331 = arith.negf %330 : vector<8x32xf32>
    %332 = math.exp %331 : vector<8x32xf32>
    %cst_181 = arith.constant 1.000000e+00 : f32
    %333 = vector.broadcast %cst_181 : f32 to vector<8x32xf32>
    %334 = arith.addf %333, %332 : vector<8x32xf32>
    %335 = arith.divf %333, %334 : vector<8x32xf32>
    %336 = vector.extract_strided_slice %329 {offsets = [0, 32], sizes = [8, 32], strides = [1, 1]} : vector<8x128xf32> to vector<8x32xf32>
    %337 = arith.negf %336 : vector<8x32xf32>
    %338 = math.exp %337 : vector<8x32xf32>
    %cst_182 = arith.constant 1.000000e+00 : f32
    %339 = vector.broadcast %cst_182 : f32 to vector<8x32xf32>
    %340 = arith.addf %339, %338 : vector<8x32xf32>
    %341 = arith.divf %339, %340 : vector<8x32xf32>
    %342 = vector.extract_strided_slice %329 {offsets = [0, 64], sizes = [8, 32], strides = [1, 1]} : vector<8x128xf32> to vector<8x32xf32>
    %343 = vector.extract_strided_slice %329 {offsets = [0, 96], sizes = [8, 32], strides = [1, 1]} : vector<8x128xf32> to vector<8x32xf32>
    %344 = arith.mulf %335, %343 : vector<8x32xf32>
    %345 = arith.addf %342, %344 : vector<8x32xf32>
    %346 = math.tanh %345 : vector<8x32xf32>
    %cst_183 = arith.constant 1.000000e+00 : f32
    %347 = vector.broadcast %cst_183 : f32 to vector<8x32xf32>
    %348 = arith.subf %347, %341 : vector<8x32xf32>
    %349 = arith.mulf %348, %346 : vector<8x32xf32>
    %350 = arith.mulf %341, %275 : vector<8x32xf32>
    %351 = arith.addf %349, %350 : vector<8x32xf32>
    %cst_184 = arith.constant 0.000000e+00 : f32
    %352 = vector.broadcast %cst_184 : f32 to vector<8x32xf32>
    %353 = arith.maximumf %351, %352 : vector<8x32xf32>
    %cst_185 = arith.constant dense<0.000000e+00> : vector<8x1xf32>
    %354 = tpu.matmul %353, %278, %cst_185 {dimension_numbers = #tpu.dot_dimension_numbers<[1], [0], [0], [1], [0, 0, 1, 1], [], []>} : vector<8x32xf32>, vector<32x1xf32>, vector<8x1xf32> -> vector<8x1xf32>
    %cst_186 = arith.constant dense<0.000000e+00> : vector<128x1xf32>
    %355 = tpu.matmul %271, %354, %cst_186 {dimension_numbers = #tpu.dot_dimension_numbers<[1], [0], [0], [1], [0, 0, 1, 1], [], []>} : vector<128x8xf32>, vector<8x1xf32>, vector<128x1xf32> -> vector<128x1xf32>
    %356 = arith.addf %285, %355 : vector<128x1xf32>
    %357 = vector.broadcast %280 : vector<1x1xf32> to vector<128x1xf32>
    %358 = arith.addf %356, %357 : vector<128x1xf32>
    %cst_187 = arith.constant 0.000000e+00 : f32
    %359 = vector.broadcast %cst_187 : f32 to vector<128x1xf32>
    %360 = arith.cmpf oge, %358, %359 : vector<128x1xf32>
    %cst_188 = arith.constant 0.00999999977 : f32
    %361 = vector.broadcast %cst_188 : f32 to vector<128x1xf32>
    %362 = arith.mulf %361, %358 : vector<128x1xf32>
    %363 = arith.select %360, %358, %362 : vector<128x1xi1>, vector<128x1xf32>
    %364 = arith.addf %363, %270 : vector<128x1xf32>
    %cst_189 = arith.constant dense<0xFF800000> : vector<1xf32>
    %365 = vector.multi_reduction <maximumf>, %364, %cst_189 [0] : vector<128x1xf32> to vector<1xf32>
    %366 = vector.shape_cast %365 : vector<1xf32> to vector<1x1xf32>
    %367 = vector.broadcast %366 : vector<1x1xf32> to vector<128x1xf32>
    %368 = arith.subf %364, %367 : vector<128x1xf32>
    %369 = math.exp %368 : vector<128x1xf32>
    %cst_190 = arith.constant dense<0.000000e+00> : vector<8x1xf32>
    %370 = tpu.matmul %272, %369, %cst_190 {dimension_numbers = #tpu.dot_dimension_numbers<[1], [0], [0], [1], [0, 0, 1, 1], [], []>} : vector<8x128xf32>, vector<128x1xf32>, vector<8x1xf32> -> vector<8x1xf32>
    %cst_191 = arith.constant 9.99999968E-21 : f32
    %371 = vector.broadcast %cst_191 : f32 to vector<8x1xf32>
    %372 = arith.maximumf %370, %371 : vector<8x1xf32>
    %cst_192 = arith.constant dense<0.000000e+00> : vector<128x1xf32>
    %373 = tpu.matmul %271, %372, %cst_192 {dimension_numbers = #tpu.dot_dimension_numbers<[1], [0], [0], [1], [0, 0, 1, 1], [], []>} : vector<128x8xf32>, vector<8x1xf32>, vector<128x1xf32> -> vector<128x1xf32>
    %374 = tpu.reciprocal %373 {approx = true} : vector<128x1xf32> -> vector<128x1xf32>
    %375 = arith.mulf %369, %374 : vector<128x1xf32>
    %376 = arith.mulf %375, %265 : vector<128x1xf32>
    %377 = vector.broadcast %376 : vector<128x1xf32> to vector<128x32xf32>
    %378 = arith.mulf %377, %264 : vector<128x32xf32>
    %cst_193 = arith.constant dense<0.000000e+00> : vector<8x32xf32>
    %379 = tpu.matmul %272, %378, %cst_193 {dimension_numbers = #tpu.dot_dimension_numbers<[1], [0], [0], [1], [0, 0, 1, 1], [], []>} : vector<8x128xf32>, vector<128x32xf32>, vector<8x32xf32> -> vector<8x32xf32>
    %cst_194 = arith.constant dense<0.000000e+00> : vector<8x1xf32>
    %380 = tpu.matmul %272, %376, %cst_194 {dimension_numbers = #tpu.dot_dimension_numbers<[1], [0], [0], [1], [0, 0, 1, 1], [], []>} : vector<8x128xf32>, vector<128x1xf32>, vector<8x1xf32> -> vector<8x1xf32>
    %cst_195 = arith.constant dense<0.000000e+00> : vector<8x32xf32>
    %381 = tpu.matmul %379, %281, %cst_195 {dimension_numbers = #tpu.dot_dimension_numbers<[1], [0], [0], [1], [0, 0, 1, 1], [], []>} : vector<8x32xf32>, vector<32x32xf32>, vector<8x32xf32> -> vector<8x32xf32>
    %382 = vector.broadcast %380 : vector<8x1xf32> to vector<8x32xf32>
    %383 = vector.broadcast %282 : vector<1x32xf32> to vector<8x32xf32>
    %384 = arith.mulf %382, %383 : vector<8x32xf32>
    %385 = arith.addf %381, %384 : vector<8x32xf32>
    %cst_196 = arith.constant 0.000000e+00 : f32
    %386 = vector.broadcast %cst_196 : f32 to vector<8x32xf32>
    %387 = arith.cmpf ogt, %385, %386 : vector<8x32xf32>
    %cst_197 = arith.constant 0.000000e+00 : f32
    %388 = vector.broadcast %cst_197 : f32 to vector<8x32xf32>
    %389 = arith.minimumf %385, %388 : vector<8x32xf32>
    %390 = math.exp %389 : vector<8x32xf32>
    %cst_198 = arith.constant 1.000000e+00 : f32
    %391 = vector.broadcast %cst_198 : f32 to vector<8x32xf32>
    %392 = arith.subf %390, %391 : vector<8x32xf32>
    %393 = arith.select %387, %385, %392 : vector<8x32xi1>, vector<8x32xf32>
    %394 = tpu.concatenate %393, %351 in 1 : vector<8x32xf32>, vector<8x32xf32> -> vector<8x64xf32>
    %cst_199 = arith.constant dense<0.000000e+00> : vector<8x128xf32>
    %395 = tpu.matmul %394, %283, %cst_199 {dimension_numbers = #tpu.dot_dimension_numbers<[1], [0], [0], [1], [0, 0, 1, 1], [], []>} : vector<8x64xf32>, vector<64x128xf32>, vector<8x128xf32> -> vector<8x128xf32>
    %396 = vector.broadcast %284 : vector<1x128xf32> to vector<8x128xf32>
    %397 = arith.addf %395, %396 : vector<8x128xf32>
    %398 = vector.extract_strided_slice %397 {offsets = [0, 0], sizes = [8, 32], strides = [1, 1]} : vector<8x128xf32> to vector<8x32xf32>
    %399 = arith.negf %398 : vector<8x32xf32>
    %400 = math.exp %399 : vector<8x32xf32>
    %cst_200 = arith.constant 1.000000e+00 : f32
    %401 = vector.broadcast %cst_200 : f32 to vector<8x32xf32>
    %402 = arith.addf %401, %400 : vector<8x32xf32>
    %403 = arith.divf %401, %402 : vector<8x32xf32>
    %404 = vector.extract_strided_slice %397 {offsets = [0, 32], sizes = [8, 32], strides = [1, 1]} : vector<8x128xf32> to vector<8x32xf32>
    %405 = arith.negf %404 : vector<8x32xf32>
    %406 = math.exp %405 : vector<8x32xf32>
    %cst_201 = arith.constant 1.000000e+00 : f32
    %407 = vector.broadcast %cst_201 : f32 to vector<8x32xf32>
    %408 = arith.addf %407, %406 : vector<8x32xf32>
    %409 = arith.divf %407, %408 : vector<8x32xf32>
    %410 = vector.extract_strided_slice %397 {offsets = [0, 64], sizes = [8, 32], strides = [1, 1]} : vector<8x128xf32> to vector<8x32xf32>
    %411 = vector.extract_strided_slice %397 {offsets = [0, 96], sizes = [8, 32], strides = [1, 1]} : vector<8x128xf32> to vector<8x32xf32>
    %412 = arith.mulf %403, %411 : vector<8x32xf32>
    %413 = arith.addf %410, %412 : vector<8x32xf32>
    %414 = math.tanh %413 : vector<8x32xf32>
    %cst_202 = arith.constant 1.000000e+00 : f32
    %415 = vector.broadcast %cst_202 : f32 to vector<8x32xf32>
    %416 = arith.subf %415, %409 : vector<8x32xf32>
    %417 = arith.mulf %416, %414 : vector<8x32xf32>
    %418 = arith.mulf %409, %351 : vector<8x32xf32>
    %419 = arith.addf %417, %418 : vector<8x32xf32>
    %c0_203 = arith.constant 0 : index
    %c0_204 = arith.constant 0 : index
    %420 = vector.load %arg27[%c0_203, %c0_204] : memref<32x1xf32, #tpu.memory_space<vmem>>, vector<32x1xf32>
    %cst_205 = arith.constant dense<0.000000e+00> : vector<8x1xf32>
    %421 = tpu.matmul %419, %420, %cst_205 {dimension_numbers = #tpu.dot_dimension_numbers<[1], [0], [0], [1], [0, 0, 1, 1], [], []>} : vector<8x32xf32>, vector<32x1xf32>, vector<8x1xf32> -> vector<8x1xf32>
    %c0_206 = arith.constant 0 : index
    %c0_207 = arith.constant 0 : index
    %422 = vector.load %arg28[%c0_206, %c0_207] : memref<1x1xf32, #tpu.memory_space<vmem>>, vector<1x1xf32>
    %423 = vector.broadcast %422 : vector<1x1xf32> to vector<8x1xf32>
    %424 = arith.addf %421, %423 : vector<8x1xf32>
    %c0_208 = arith.constant 0 : index
    %c0_209 = arith.constant 0 : index
    %425 = vector.load %arg29[%c0_208, %c0_209] : memref<8x1xf32, #tpu.memory_space<vmem>>, vector<8x1xf32>
    tpu.vector_store %arg29[%c0_208, %c0_209], %424 {strides = array<i32>} : memref<8x1xf32, #tpu.memory_space<vmem>>, vector<8x1xf32>,
    return
  }
  func.func @transform_0(%arg0: i32) -> (i32, i32) {
    %c0_i32 = arith.constant 0 : i32
    %c0_i32_0 = arith.constant 0 : i32
    return %arg0, %c0_i32 : i32, i32
  }
  func.func @transform_1(%arg0: i32) -> (i32, i32, i32, i32) {
    %c0_i32 = arith.constant 0 : i32
    %c0_i32_0 = arith.constant 0 : i32
    %c0_i32_1 = arith.constant 0 : i32
    %c0_i32_2 = arith.constant 0 : i32
    return %arg0, %c0_i32, %c0_i32_0, %c0_i32_1 : i32, i32, i32, i32
  }
  func.func @transform_2(%arg0: i32) -> (i32, i32) {
    %c0_i32 = arith.constant 0 : i32
    %c0_i32_0 = arith.constant 0 : i32
    return %arg0, %c0_i32 : i32, i32
  }
  func.func @transform_3(%arg0: i32) -> (i32, i32) {
    %c0_i32 = arith.constant 0 : i32
    %c0_i32_0 = arith.constant 0 : i32
    return %arg0, %c0_i32 : i32, i32
  }
  func.func @transform_4(%arg0: i32) -> (i32, i32, i32, i32) {
    %c0_i32 = arith.constant 0 : i32
    %c0_i32_0 = arith.constant 0 : i32
    %c0_i32_1 = arith.constant 0 : i32
    %c0_i32_2 = arith.constant 0 : i32
    return %arg0, %c0_i32, %c0_i32_0, %c0_i32_1 : i32, i32, i32, i32
  }
  func.func @transform_5(%arg0: i32) -> (i32, i32) {
    %c0_i32 = arith.constant 0 : i32
    %c0_i32_0 = arith.constant 0 : i32
    return %arg0, %c0_i32 : i32, i32
  }
  func.func @transform_6(%arg0: i32) -> (i32, i32) {
    %c0_i32 = arith.constant 0 : i32
    %c0_i32_0 = arith.constant 0 : i32
    %c0_i32_1 = arith.constant 0 : i32
    return %c0_i32, %c0_i32_0 : i32, i32
  }
  func.func @transform_7(%arg0: i32) -> (i32, i32) {
    %c0_i32 = arith.constant 0 : i32
    %c0_i32_0 = arith.constant 0 : i32
    %c0_i32_1 = arith.constant 0 : i32
    return %c0_i32, %c0_i32_0 : i32, i32
  }
  func.func @transform_8(%arg0: i32) -> (i32, i32) {
    %c0_i32 = arith.constant 0 : i32
    %c0_i32_0 = arith.constant 0 : i32
    %c0_i32_1 = arith.constant 0 : i32
    return %c0_i32, %c0_i32_0 : i32, i32
  }
  func.func @transform_9(%arg0: i32) -> (i32, i32) {
    %c0_i32 = arith.constant 0 : i32
    %c0_i32_0 = arith.constant 0 : i32
    %c0_i32_1 = arith.constant 0 : i32
    return %c0_i32, %c0_i32_0 : i32, i32
  }
  func.func @transform_10(%arg0: i32) -> (i32, i32) {
    %c0_i32 = arith.constant 0 : i32
    %c0_i32_0 = arith.constant 0 : i32
    %c0_i32_1 = arith.constant 0 : i32
    return %c0_i32, %c0_i32_0 : i32, i32
  }
  func.func @transform_11(%arg0: i32) -> (i32, i32) {
    %c0_i32 = arith.constant 0 : i32
    %c0_i32_0 = arith.constant 0 : i32
    %c0_i32_1 = arith.constant 0 : i32
    return %c0_i32, %c0_i32_0 : i32, i32
  }
  func.func @transform_12(%arg0: i32) -> (i32, i32, i32) {
    %c0_i32 = arith.constant 0 : i32
    %c0_i32_0 = arith.constant 0 : i32
    %c0_i32_1 = arith.constant 0 : i32
    %c0_i32_2 = arith.constant 0 : i32
    return %c0_i32, %c0_i32_0, %c0_i32_1 : i32, i32, i32
  }
  func.func @transform_13(%arg0: i32) -> (i32, i32, i32) {
    %c0_i32 = arith.constant 0 : i32
    %c0_i32_0 = arith.constant 0 : i32
    %c0_i32_1 = arith.constant 0 : i32
    %c0_i32_2 = arith.constant 0 : i32
    return %c0_i32, %c0_i32_0, %c0_i32_1 : i32, i32, i32
  }
  func.func @transform_14(%arg0: i32) -> (i32, i32, i32) {
    %c0_i32 = arith.constant 0 : i32
    %c0_i32_0 = arith.constant 0 : i32
    %c0_i32_1 = arith.constant 0 : i32
    %c0_i32_2 = arith.constant 0 : i32
    return %c0_i32, %c0_i32_0, %c0_i32_1 : i32, i32, i32
  }
  func.func @transform_15(%arg0: i32) -> (i32, i32, i32) {
    %c0_i32 = arith.constant 0 : i32
    %c0_i32_0 = arith.constant 0 : i32
    %c0_i32_1 = arith.constant 0 : i32
    %c0_i32_2 = arith.constant 0 : i32
    return %c0_i32, %c0_i32_0, %c0_i32_1 : i32, i32, i32
  }
  func.func @transform_16(%arg0: i32) -> (i32, i32, i32) {
    %c0_i32 = arith.constant 0 : i32
    %c0_i32_0 = arith.constant 0 : i32
    %c0_i32_1 = arith.constant 0 : i32
    %c0_i32_2 = arith.constant 0 : i32
    return %c0_i32, %c0_i32_0, %c0_i32_1 : i32, i32, i32
  }
  func.func @transform_17(%arg0: i32) -> (i32, i32, i32) {
    %c0_i32 = arith.constant 0 : i32
    %c0_i32_0 = arith.constant 0 : i32
    %c0_i32_1 = arith.constant 0 : i32
    %c0_i32_2 = arith.constant 0 : i32
    return %c0_i32, %c0_i32_0, %c0_i32_1 : i32, i32, i32
  }
  func.func @transform_18(%arg0: i32) -> (i32, i32, i32) {
    %c0_i32 = arith.constant 0 : i32
    %c0_i32_0 = arith.constant 0 : i32
    %c0_i32_1 = arith.constant 0 : i32
    %c0_i32_2 = arith.constant 0 : i32
    return %c0_i32, %c0_i32_0, %c0_i32_1 : i32, i32, i32
  }
  func.func @transform_19(%arg0: i32) -> (i32, i32) {
    %c0_i32 = arith.constant 0 : i32
    %c0_i32_0 = arith.constant 0 : i32
    %c0_i32_1 = arith.constant 0 : i32
    return %c0_i32, %c0_i32_0 : i32, i32
  }
  func.func @transform_20(%arg0: i32) -> (i32, i32) {
    %c0_i32 = arith.constant 0 : i32
    %c0_i32_0 = arith.constant 0 : i32
    %c0_i32_1 = arith.constant 0 : i32
    return %c0_i32, %c0_i32_0 : i32, i32
  }
  func.func @transform_21(%arg0: i32) -> (i32, i32) {
    %c0_i32 = arith.constant 0 : i32
    %c0_i32_0 = arith.constant 0 : i32
    %c0_i32_1 = arith.constant 0 : i32
    return %c0_i32, %c0_i32_0 : i32, i32
  }
  func.func @transform_22(%arg0: i32) -> (i32, i32) {
    %c0_i32 = arith.constant 0 : i32
    %c0_i32_0 = arith.constant 0 : i32
    %c0_i32_1 = arith.constant 0 : i32
    return %c0_i32, %c0_i32_0 : i32, i32
  }
  func.func @transform_23(%arg0: i32) -> (i32, i32) {
    %c0_i32 = arith.constant 0 : i32
    %c0_i32_0 = arith.constant 0 : i32
    %c0_i32_1 = arith.constant 0 : i32
    return %c0_i32, %c0_i32_0 : i32, i32
  }
  func.func @transform_24(%arg0: i32) -> (i32, i32) {
    %c0_i32 = arith.constant 0 : i32
    %c0_i32_0 = arith.constant 0 : i32
    %c0_i32_1 = arith.constant 0 : i32
    return %c0_i32, %c0_i32_0 : i32, i32
  }
  func.func @transform_25(%arg0: i32) -> (i32, i32) {
    %c0_i32 = arith.constant 0 : i32
    %c0_i32_0 = arith.constant 0 : i32
    %c0_i32_1 = arith.constant 0 : i32
    return %c0_i32, %c0_i32_0 : i32, i32
  }
  func.func @transform_26(%arg0: i32) -> (i32, i32) {
    %c0_i32 = arith.constant 0 : i32
    %c0_i32_0 = arith.constant 0 : i32
    %c0_i32_1 = arith.constant 0 : i32
    return %c0_i32, %c0_i32_0 : i32, i32
  }
  func.func @transform_27(%arg0: i32) -> (i32, i32) {
    %c0_i32 = arith.constant 0 : i32
    %c0_i32_0 = arith.constant 0 : i32
    %c0_i32_1 = arith.constant 0 : i32
    return %c0_i32, %c0_i32_0 : i32, i32
  }
  func.func @transform_28(%arg0: i32) -> (i32, i32) {
    %c0_i32 = arith.constant 0 : i32
    %c0_i32_0 = arith.constant 0 : i32
    return %arg0, %c0_i32 : i32, i32
  }
}

</mosaic_0001>

<bundles_post_ra>
// kernel: tpu_custom_call.1
= control target key start
LH: loop header
LB: loop body
LE: loop exit
PB: predicated region body
PF: predicated region fallthrough
CT: control target
= control target key end

     0   :  { %vm347_vm0 = vcmask 1045504   ;;  %vm114_vm1 = vcmask 64512   ;;  %vm298_vm2 = vcmask 113664   ;;  %v15921_v27 = vmov 0   ;;  %s15882_s8 = inlined_call_operand.vmem [shape: f32[8,32], index: 8, kind: input, shape index: {}]   ;;  %s15883_s10 = inlined_call_operand.vmem [shape: f32[14,32], index: 10, kind: input, shape index: {}]   ;;  %s15884_s0 = inlined_call_operand.vmem [shape: f32[128,8], index: 0, kind: input, shape index: {}]   ;;  %s15885_s1 = inlined_call_operand.vmem [shape: f32[1,4,128,14], index: 1, kind: input, shape index: {}]   ;;  %s15886_s14 = inlined_call_operand.vmem [shape: f32[2,1,1], index: 14, kind: input, shape index: {}]   ;;  %s15887_s9 = inlined_call_operand.vmem [shape: f32[1,32], index: 9, kind: input, shape index: {}]   ;;  %s15888_s11 = inlined_call_operand.vmem [shape: f32[1,32], index: 11, kind: input, shape index: {}]   ;;  %s15889_s12 = inlined_call_operand.vmem [shape: f32[2,32,1], index: 12, kind: input, shape index: {}]   ;;  %s15890_s13 = inlined_call_operand.vmem [shape: f32[2,32,1], index: 13, kind: input, shape index: {}]   ;;  %s15891_s3 = inlined_call_operand.vmem [shape: f32[128,4], index: 3, kind: input, shape index: {}]   ;;  %s15892_s2 = inlined_call_operand.vmem [shape: f32[128,4], index: 2, kind: input, shape index: {}]   ;;  %s15893_s16 = inlined_call_operand.vmem [shape: f32[2,1,32], index: 16, kind: input, shape index: {}]   ;;  %s15894_s15 = inlined_call_operand.vmem [shape: f32[2,32,32], index: 15, kind: input, shape index: {}]   ;;  %s15895_s17 = inlined_call_operand.vmem [shape: f32[2,64,128], index: 17, kind: input, shape index: {}]   ;;  %s15896_s18 = inlined_call_operand.vmem [shape: f32[2,1,128], index: 18, kind: input, shape index: {}]   ;;  %s15897_s4 = inlined_call_operand.vmem [shape: f32[1,4,128,128], index: 4, kind: input, shape index: {}]   ;;  %s15898_s5 = inlined_call_operand.vmem [shape: f32[128,1], index: 5, kind: input, shape index: {}]   ;;  %s15899_s7 = inlined_call_operand.vmem [shape: f32[8,128], index: 7, kind: input, shape index: {}]   ;;  %s15900_s20 = inlined_call_operand.vmem [shape: f32[32,1], index: 20, kind: input, shape index: {}]   ;;  %s15901_s19 = inlined_call_operand.vmem [shape: f32[32,1], index: 19, kind: input, shape index: {}]   ;;  %s15902_s6 = inlined_call_operand.vmem [shape: f32[128,8], index: 6, kind: input, shape index: {}]   ;;  %s15903_s21 = inlined_call_operand.<no memory space> [shape: f32[1,1], index: 21, kind: input, shape index: {}]   ;;  %s15904_s23 = inlined_call_operand.vmem [shape: f32[1,32], index: 23, kind: input, shape index: {}]   ;;  %s15905_s22 = inlined_call_operand.vmem [shape: f32[32,32], index: 22, kind: input, shape index: {}]   ;;  %s15906_s25 = inlined_call_operand.vmem [shape: f32[1,128], index: 25, kind: input, shape index: {}]   ;;  %s15907_s24 = inlined_call_operand.vmem [shape: f32[64,128], index: 24, kind: input, shape index: {}]   ;;  %s15908_s26 = inlined_call_operand.vmem [shape: f32[32,1], index: 26, kind: input, shape index: {}]   ;;  %s15909_s27 = inlined_call_operand.<no memory space> [shape: f32[1,1], index: 27, kind: input, shape index: {}]   ;;  %s15910_s28 = inlined_call_operand.vmem [shape: f32[8,1], index: 28, kind: output, shape index: {}]  }
   0x1   :  { %16198 = sst [smem:[#allocation84_spill]] %s15882_s8  ;;  %9215 = vset.pattern.permute.xlu2 %v15921_v27  ;;  %9216 = vset.pattern.permute.xlu1 %v15921_v27  ;;  %vm1053_vm6 = vcmask 261120  }
   0x2   :  { %16199 = sst [smem:[#allocation85_spill]] %s15883_s10  ;;  %9217 = vset.pattern.permute.xlu0 %v15921_v27 }
   0x3   :  { %16200 = sst [smem:[#allocation86_spill]] %s15884_s0 }
   0x4   :  { %16201 = sst [smem:[#allocation87_spill]] %s15885_s1  ;;  %s16472_s1 = smov 2  }
   0x5   :  { %16202 = sst [smem:[#allocation88_spill]] %s15886_s14 }
   0x6   :  { %16203 = sst [smem:[#allocation89_spill]] %s15887_s9 }
   0x7   :  { %16204 = sst [smem:[#allocation90_spill]] %s15888_s11 }
   0x8   :  { %16205 = sst [smem:[#allocation91_spill]] %s15889_s12  ;;  %s15989_s12 = smov 2  }
   0x9   :  { %16206 = sst [smem:[#allocation92_spill]] %s15890_s13 }
   0xa   :  { %16207 = sst [smem:[#allocation93_spill]] %s15891_s3  ;;  %s16474_s3 = smov 3  }
   0xb   :  { %16208 = sst [smem:[#allocation94_spill]] %s15892_s2  ;;  %s16014_s2 = smov 96  }
   0xc   :  { %16209 = sst [smem:[#allocation95_spill]] %s15893_s16 }
   0xd   :  { %16210 = sst [smem:[#allocation96_spill]] %s15894_s15  ;;  %s15987_s15 = smov 3  }
   0xe   :  { %16211 = sst [smem:[#allocation97_spill]] %s15910_s28 }
   0xf   :  { %s16212_s9 = sld [smem:[#allocation84_spill]] }
  0x10   :  { %s16213_s10 = sld [smem:[#allocation85_spill]] }
  0x11   :  { %s16214_s16 = sld [smem:[#allocation86_spill]] }
  0x12   :  { %s16215_s13 = sld [smem:[#allocation87_spill]] }
  0x13   :  { %s16216_s11 = sld [smem:[#allocation88_spill]] }
  0x14   :  { %s16218_s29 = sld [smem:[#allocation89_spill]] }
  0x15   :  { %v109_v0 = vld [vmem:[%s16212_s9] sm:$0xff]  ;;  %s16217_s9 = sld [smem:[#allocation91_spill]] }
  0x16   :  { %v277_v1 = vld [vmem:[%s16213_s10 + $0x8] sm:$0x3f]  ;;  %178 = vmatpush.msra.mxu0 %v109_v0  ;;  %v276_v3 = vld [vmem:[%s16213_s10] sm:$0xff]  ;;  %s16228_s10 = sld [smem:[#allocation90_spill]] }
  0x17   :  { %v93_v2 = vld [vmem:[%s16214_s16] sm:$0xff]  ;;  %9200 = vmatpush.msk.msra.mxu1 %vm347_vm0, %v277_v1  ;;  %8700 = vmatpush.msk.msra.mxu3 %vm347_vm0, %v277_v1  ;;  %v94_v5 = vld [vmem:[%s16214_s16 + $0x8] sm:$0xff]  ;;  %v95_v7 = vld [vmem:[%s16214_s16 + $0x10] sm:$0xff]  ;;  %s16285_s14 = sld [smem:[#allocation93_spill]] }
  0x18   :  { %v280_v4 = vld [vmem:[%s16215_s13 + $0x8] sm:$0xff]  ;;  %8618 = vmatmul.msk.f32.vlgmr.msra.gmra.mxu0 %vm114_vm1, %v93_v2  ;;  %9202 = vmatpush.msk.msra.mxu2 %vm347_vm0, %v277_v1  ;;  %v281_v6 = vld [vmem:[%s16215_s13 + $0x10] sm:$0xff]  ;;  %v282_v8 = vld [vmem:[%s16215_s13 + $0x18] sm:$0xff]  ;;  %s16286_s8 = sld [smem:[#allocation94_spill]] }
  0x19   :  { %9201 = vmatpush.msra.mxu1 %v276_v3  ;;  %8634 = vmatpush.msk.msrb.mxu0 %vm347_vm0, %v277_v1  ;;  %v96_v9 = vld [vmem:[%s16214_s16 + $0x18] sm:$0xff]  ;;  %v283_v10 = vld [vmem:[%s16215_s13 + $0x20] sm:$0xff]  ;;  %v284_v12 = vld [vmem:[%s16215_s13 + $0x28] sm:$0xff]  ;;  %s16288_s30 = sld [smem:[#allocation96_spill]] }
  0x1a   :  { %8636 = vmatmul.msk.f32.vlgmr.msra.gmra.mxu1 %vm298_vm2, %v280_v4  ;;  %722 = vmatpush.msra.mxu3 %v276_v3  ;;  %v97_v11 = vld [vmem:[%s16214_s16 + $0x20] sm:$0xff]  ;;  %v98_v13 = vld [vmem:[%s16214_s16 + $0x28] sm:$0xff]  ;;  %v285_v14 = vld [vmem:[%s16215_s13 + $0x30] sm:$0xff]  ;;  %s16290_s0 = sld [smem:[#allocation95_spill]] }
  0x1b   :  { %8667 = vmatpush.msk.msrb.mxu1 %vm347_vm0, %v277_v1  ;;  %366 = vmatpush.msrb.mxu0 %v276_v3  ;;  %v99_v15 = vld [vmem:[%s16214_s16 + $0x30] sm:$0xff]  ;;  %v286_v16 = vld [vmem:[%s16215_s13 + $0x38] sm:$0xff]  ;;  %v287_v18 = vld [vmem:[%s16215_s13 + $0x40] sm:$0xff] }
  0x1c   :  { %9203 = vmatpush.msra.mxu2 %v276_v3  ;;  %v100_v17 = vld [vmem:[%s16214_s16 + $0x38] sm:$0xff]  ;;  %v101_v19 = vld [vmem:[%s16214_s16 + $0x40] sm:$0xff]  ;;  %v288_v20 = vld [vmem:[%s16215_s13 + $0x48] sm:$0xff] }
  0x1d   :  { %8733 = vmatpush.msk.msra.mxu0 %vm347_vm0, %v277_v1  ;;  %544 = vmatpush.msrb.mxu1 %v276_v3  ;;  %v102_v21 = vld [vmem:[%s16214_s16 + $0x48] sm:$0xff]  ;;  %v289_v22 = vld [vmem:[%s16215_s13 + $0x50] sm:$0xff]  ;;  %v290_v24 = vld [vmem:[%s16215_s13 + $0x58] sm:$0xff] }
  0x1e   :  { %v103_v23 = vld [vmem:[%s16214_s16 + $0x50] sm:$0xff]  ;;  %v104_v25 = vld [vmem:[%s16214_s16 + $0x58] sm:$0xff]  ;;  %v291_v26 = vld [vmem:[%s16215_s13 + $0x60] sm:$0xff] }
  0x1f   :  { %900 = vmatpush.msra.mxu0 %v276_v3  ;;  %v9457_v28 = vld [vmem:[%s16216_s11] ss:$0 sm:$0xff]  ;;  %v292_v31 = vld [vmem:[%s16215_s13 + $0x68] sm:$0xff]  ;;  %v293_v34 = vld [vmem:[%s16215_s13 + $0x70] sm:$0xff] }
  0x20   :  { %8619 = vmatmul.msk.f32.gmra.mxu0 %vm114_vm1, %v94_v5  ;;  %1961 = vperm.xlu2 %9215, %v9457_v28   ;;  %v8684_v29 = vld [vmem:[%s16215_s13 + $0x100] sm:$0xff]  ;;  %v8685_v32 = vld [vmem:[%s16215_s13 + $0x108] sm:$0xff]  ;;  %v8686_v35 = vld [vmem:[%s16215_s13 + $0x110] sm:$0xff] }
  0x21   :  { %v105_v30 = vld [vmem:[%s16214_s16 + $0x60] sm:$0xff]  ;;  %8701 = vmatmul.msk.f32.vlgmr.msra.gmra.mxu3 %vm298_vm2, %v8684_v29  ;;  %v106_v33 = vld [vmem:[%s16214_s16 + $0x68] sm:$0xff]  ;;  %v107_v36 = vld [vmem:[%s16214_s16 + $0x70] sm:$0xff] }
  0x22   :  { %8637 = vmatmul.msk.f32.gmra.mxu1 %vm298_vm2, %v281_v6  ;;  %v294_v37 = vld [vmem:[%s16215_s13 + $0x78] sm:$0xff]  ;;  %v1032_v40 = vld [vmem:[%s16217_s9 + $0x10] sm:$0xff]  ;;  %v1031_v42 = vld [vmem:[%s16217_s9 + $0x8] sm:$0xff] }
  0x23   :  { %v1033_v38 = vld [vmem:[%s16217_s9 + $0x18] sm:$0xff]  ;;  %v8651_v43 = vld [vmem:[%s16215_s13 + $0x80] sm:$0xff]  ;;  %v8652_v52 = vld [vmem:[%s16215_s13 + $0x88] sm:$0xff] }
  0x24   :  { %1114 = vmatpush.msra.mxu1 %v1033_v38  ;;  %v8687_v39 = vld [vmem:[%s16215_s13 + $0x118] sm:$0xff]  ;;  %v8655_v44 = vld [vmem:[%s16215_s13 + $0xa0] sm:$0xff]  ;;  %v8656_v54 = vld [vmem:[%s16215_s13 + $0xa8] sm:$0xff] }
  0x25   :  { %v108_v41 = vld [vmem:[%s16214_s16 + $0x78] sm:$0xff]  ;;  %v1030_v45 = vld [vmem:[%s16217_s9] sm:$0xff]  ;;  %8672 = vmatmul.msk.f32.vlgmr.msra.gmra.mxu2 %vm298_vm2, %v8655_v44  ;;  %s16018_s16 = smov 32   ;;  %v8689_v56 = vld [vmem:[%s16215_s13 + $0x128] sm:$0xff] }
  0x26   :  { %1115 = vmatpush.msra.mxu1 %v1032_v40  ;;  %v10422_v46 = vld [vmem:[%s16218_s29] ss:$0 sm:$0xff]  ;;  %v8653_v61 = vld [vmem:[%s16215_s13 + $0x90] sm:$0xff]  ;;  %v8718_v3 = vld [vmem:[%s16215_s13 + $0x188] sm:$0xff]  ;;  %s16223_s29 = sld [smem:[#allocation92_spill]] }
  0x27   :  { %v8688_v47 = vld [vmem:[%s16215_s13 + $0x120] sm:$0xff]  ;;  %v8657_v63 = vld [vmem:[%s16215_s13 + $0xb0] sm:$0xff]  ;;  %v8654_v6 = vld [vmem:[%s16215_s13 + $0x98] sm:$0xff] }
  0x28   :  { %8620 = vmatmul.msk.f32.gmra.mxu0 %vm114_vm1, %v95_v7  ;;  %1116 = vmatpush.msra.mxu1 %v1031_v42  ;;  %v279_v49 = vld [vmem:[%s16215_s13] sm:$0xff]  ;;  %v8690_v1 = vld [vmem:[%s16215_s13 + $0x130] sm:$0xff]  ;;  %v8722_v29 = vld [vmem:[%s16215_s13 + $0x1a8] sm:$0xff] }
  0x29   :  { %8702 = vmatmul.msk.f32.gmra.mxu3 %vm298_vm2, %v8685_v32  ;;  %v8717_v58 = vld [vmem:[%s16215_s13 + $0x180] sm:$0xff]  ;;  %v8662_v32 = vld [vmem:[%s16215_s13 + $0xd8] sm:$0xff] }
  0x2a   :  { %8638 = vmatmul.msk.f32.gmra.mxu1 %vm298_vm2, %v282_v8  ;;  %v8658_v8 = vld [vmem:[%s16215_s13 + $0xb8] sm:$0xff]  ;;  %v8663_v40 = vld [vmem:[%s16215_s13 + $0xe0] sm:$0xff] }
  0x2b   :  { %1117 = vmatpush.msra.mxu1 %v1030_v45 }
  0x2d   :  { %8673 = vmatmul.msk.f32.gmra.mxu2 %vm298_vm2, %v8656_v54 }
  0x30   :  { %8621 = vmatmul.msk.f32.gmra.mxu0 %vm114_vm1, %v96_v9 }
  0x31   :  { %8703 = vmatmul.msk.f32.gmra.mxu3 %vm298_vm2, %v8686_v35  ;;  %v8695_v35 = vld [vmem:[%s16215_s13 + $0x158] sm:$0xff] }
  0x32   :  { %8639 = vmatmul.msk.f32.gmra.mxu1 %vm298_vm2, %v283_v10  ;;  %v8691_v10 = vld [vmem:[%s16215_s13 + $0x138] sm:$0xff] }
  0x35   :  { %8674 = vmatmul.msk.f32.gmra.mxu2 %vm298_vm2, %v8657_v63 }
  0x38   :  { %8622 = vmatmul.msk.f32.gmra.mxu0 %vm114_vm1, %v97_v11 }
  0x39   :  { %8704 = vmatmul.msk.f32.gmra.mxu3 %vm298_vm2, %v8687_v39 }
  0x3a   :  { %8640 = vmatmul.msk.f32.gmra.mxu1 %vm298_vm2, %v284_v12  ;;  %v8719_v12 = vld [vmem:[%s16215_s13 + $0x190] sm:$0xff] }
  0x3d   :  { %8675 = vmatmul.msk.f32.gmra.mxu2 %vm298_vm2, %v8658_v8 }
  0x40   :  { %8623 = vmatmul.msk.f32.gmra.mxu0 %vm114_vm1, %v98_v13 }
  0x41   :  { %8705 = vmatmul.msk.f32.gmra.mxu3 %vm298_vm2, %v8688_v47  ;;  %v8724_v47 = vld [vmem:[%s16215_s13 + $0x1b8] sm:$0xff] }
  0x42   :  { %8641 = vmatmul.msk.f32.gmra.mxu1 %vm298_vm2, %v285_v14  ;;  %v8659_v14 = vld [vmem:[%s16215_s13 + $0xc0] sm:$0xff] }
  0x45   :  { %8676 = vmatmul.msk.f32.gmra.mxu2 %vm298_vm2, %v8659_v14 }
  0x48   :  { %8624 = vmatmul.msk.f32.gmra.mxu0 %vm114_vm1, %v99_v15  ;;  %v8692_v15 = vld [vmem:[%s16215_s13 + $0x140] sm:$0xff] }
  0x49   :  { %8706 = vmatmul.msk.f32.gmra.mxu3 %vm298_vm2, %v8689_v56  ;;  %v8725_v56 = vld [vmem:[%s16215_s13 + $0x1c0] sm:$0xff] }
  0x4a   :  { %8642 = vmatmul.msk.f32.gmra.mxu1 %vm298_vm2, %v286_v16 }
  0x50   :  { %8625 = vmatmul.msk.f32.gmra.mxu0 %vm114_vm1, %v100_v17  ;;  %v8720_v17 = vld [vmem:[%s16215_s13 + $0x198] sm:$0xff] }
  0x51   :  { %8707 = vmatmul.msk.f32.gmra.mxu3 %vm298_vm2, %v8690_v1  ;;  %v8726_v1 = vld [vmem:[%s16215_s13 + $0x1c8] sm:$0xff] }
  0x52   :  { %8643 = vmatmul.msk.f32.gmra.mxu1 %vm298_vm2, %v287_v18 }
  0x58   :  { %8626 = vmatmul.msk.f32.gmra.mxu0 %vm114_vm1, %v101_v19  ;;  %v8660_v19 = vld [vmem:[%s16215_s13 + $0xc8] sm:$0xff] }
  0x59   :  { %8708 = vmatmul.msk.f32.gmra.mxu3 %vm298_vm2, %v8691_v10  ;;  %8677 = vmatmul.msk.f32.gmra.mxu2 %vm298_vm2, %v8660_v19  ;;  %v1037_v10 = vld [vmem:[%s16223_s29 + $0x18] sm:$0xff]  ;;  %v1034_v19 = vld [vmem:[%s16223_s29] sm:$0xff] }
  0x5a   :  { %8644 = vmatmul.msk.f32.gmra.mxu1 %vm298_vm2, %v288_v20  ;;  %v8693_v20 = vld [vmem:[%s16215_s13 + $0x148] sm:$0xff]  ;;  %1340 = vmatpush.msrb.mxu3 %v1037_v10 }
  0x5b   :  { %1227 = vmatpush.msrb.mxu2 %v1037_v10 }
  0x60   :  { %8627 = vmatmul.msk.f32.gmra.mxu0 %vm114_vm1, %v102_v21 }
  0x61   :  { %8709 = vmatmul.msk.f32.gmra.mxu3 %vm298_vm2, %v8692_v15 }
  0x62   :  { %8645 = vmatmul.msk.f32.gmra.mxu1 %vm298_vm2, %v289_v22  ;;  %v8721_v22 = vld [vmem:[%s16215_s13 + $0x1a0] sm:$0xff] }
  0x68   :  { %8628 = vmatmul.msk.f32.gmra.mxu0 %vm114_vm1, %v103_v23 }
  0x69   :  { %8710 = vmatmul.msk.f32.gmra.mxu3 %vm298_vm2, %v8693_v20 }
  0x6a   :  { %8646 = vmatmul.msk.f32.gmra.mxu1 %vm298_vm2, %v290_v24  ;;  %v8661_v24 = vld [vmem:[%s16215_s13 + $0xd0] sm:$0xff] }
  0x6b   :  { %8678 = vmatmul.msk.f32.gmra.mxu2 %vm298_vm2, %v8661_v24 }
  0x70   :  { %8629 = vmatmul.msk.f32.gmra.mxu0 %vm114_vm1, %v104_v25 }
  0x72   :  { %8647 = vmatmul.msk.f32.gmra.mxu1 %vm298_vm2, %v291_v26  ;;  %v8694_v26 = vld [vmem:[%s16215_s13 + $0x150] sm:$0xff] }
  0x73   :  { %8711 = vmatmul.msk.f32.gmra.mxu3 %vm298_vm2, %v8694_v26  ;;  %8679 = vmatmul.msk.f32.gmra.mxu2 %vm298_vm2, %v8662_v32  ;;  %v8729_v32 = vld [vmem:[%s16215_s13 + $0x1e0] sm:$0xff] }
  0x78   :  { %8630 = vmatmul.msk.f32.gmra.mxu0 %vm114_vm1, %v105_v30 }
  0x7a   :  { %8648 = vmatmul.msk.f32.gmra.mxu1 %vm298_vm2, %v292_v31 }
  0x7b   :  { %8712 = vmatmul.msk.f32.gmra.mxu3 %vm298_vm2, %v8695_v35  ;;  %8680 = vmatmul.msk.f32.gmra.mxu2 %vm298_vm2, %v8663_v40 }
  0x80   :  { %8631 = vmatmul.msk.f32.gmra.mxu0 %vm114_vm1, %v106_v33 }
  0x82   :  { %8649 = vmatmul.msk.f32.gmra.mxu1 %vm298_vm2, %v293_v34 }
  0x88   :  { %8632 = vmatmul.msk.f32.gmra.mxu0 %vm114_vm1, %v107_v36 }
  0x8a   :  { %8650 = vmatmul.msk.f32.gmra.mxu1 %vm298_vm2, %v294_v37  ;;  %v8723_v37 = vld [vmem:[%s16215_s13 + $0x1b0] sm:$0xff] }
  0x90   :  { %8633 = vmatmul.msk.f32.gmra.mxu0 %vm114_vm1, %v108_v41 }
  0x92   :  { %8668 = vmatmul.msk.f32.vlgmr.msrb.gmra.mxu1 %vm298_vm2, %v8651_v43  ;;  %v8696_v43 = vld [vmem:[%s16215_s13 + $0x160] sm:$0xff] }
  0x93   :  { %8713 = vmatmul.msk.f32.gmra.mxu3 %vm298_vm2, %v8696_v43  ;;  %1566 = vmatpush.msrb.mxu1 %v1037_v10 }
  0x95   :  { %v180_v48 = vpop.f32.mrf.mxu0 }
  0x96   :  { %v181_v50 = vadd.f32 %v10422_v46, %v180_v48 }
  0x97   :  { %v10432_v51 = vpop.f32.mrf.mxu1 }
  0x98   :  { %8635 = vmatmul.msk.f32.vlgmr.msrb.gmra.mxu0 %vm298_vm2, %v279_v49  ;;  %vm228_vm3 = vcmp.ge.f32.partialorder %v181_v50, 0.0  ;;  %v244_v53 = vmul.f32 0.01, %v181_v50  ;;  %v8664_v49 = vld [vmem:[%s16215_s13 + $0xe8] sm:$0xff] }
  0x99   :  { %8681 = vmatmul.msk.f32.gmra.mxu2 %vm298_vm2, %v8664_v49  ;;  %1453 = vmatpush.msrb.mxu0 %v1037_v10 }
  0x9a   :  { %8669 = vmatmul.msk.f32.gmra.mxu1 %vm298_vm2, %v8652_v52  ;;  %v260_v55 = vsel %vm228_vm3, %v181_v50, %v244_v53  ;;  %v8697_v53 = vld [vmem:[%s16215_s13 + $0x168] sm:$0xff] }
  0x9b   :  { %2897 = vrot.lane.b32.xlu2 %v260_v55, %s16018_s16  ;;  %8714 = vmatmul.msk.f32.gmra.mxu3 %vm298_vm2, %v8697_v53  ;;  %v8731_v53 = vld [vmem:[%s16215_s13 + $0x1f0] sm:$0xff] }
  0x9d   :  { %v183_v57 = vpop.f32.mrf.mxu0 }
  0x9e   :  { %v184_v59 = vadd.f32 %v10422_v46, %v183_v57 }
  0x9f   :  { %v10452_v60 = vpop.f32.mrf.mxu1 }
  0xa0   :  { %8734 = vmatmul.msk.f32.vlgmr.msra.gmra.mxu0 %vm298_vm2, %v8717_v58  ;;  %vm229_vm4 = vcmp.ge.f32.partialorder %v184_v59, 0.0  ;;  %v245_v62 = vmul.f32 0.01, %v184_v59  ;;  %v8665_v58 = vld [vmem:[%s16215_s13 + $0xf0] sm:$0xff] }
  0xa1   :  { %8682 = vmatmul.msk.f32.gmra.mxu2 %vm298_vm2, %v8665_v58 }
  0xa2   :  { %8670 = vmatmul.msk.f32.gmra.mxu1 %vm298_vm2, %v8653_v61  ;;  %v261_v0 = vsel %vm229_vm4, %v184_v59, %v245_v62  ;;  %v8698_v62 = vld [vmem:[%s16215_s13 + $0x170] sm:$0xff] }
  0xa3   :  { %2899 = vrot.lane.b32.xlu1 %v261_v0, %s16018_s16  ;;  %8715 = vmatmul.msk.f32.gmra.mxu3 %vm298_vm2, %v8698_v62 }
  0xa5   :  { %v186_v2 = vpop.f32.mrf.mxu0 }
  0xa6   :  { %v187_v4 = vadd.f32 %v10422_v46, %v186_v2 }
  0xa7   :  { %v10472_v5 = vpop.f32.mrf.mxu1 }
  0xa8   :  { %8735 = vmatmul.msk.f32.gmra.mxu0 %vm298_vm2, %v8718_v3  ;;  %vm230_vm5 = vcmp.ge.f32.partialorder %v187_v4, 0.0  ;;  %v246_v7 = vmul.f32 0.01, %v187_v4 }
  0xaa   :  { %8671 = vmatmul.msk.f32.gmra.mxu1 %vm298_vm2, %v8654_v6  ;;  %v262_v9 = vsel %vm230_vm5, %v187_v4, %v246_v7  ;;  %v8699_v6 = vld [vmem:[%s16215_s13 + $0x178] sm:$0xff] }
  0xab   :  { %2901 = vrot.lane.b32.xlu0 %v262_v9, %s16018_s16  ;;  %8716 = vmatmul.msk.f32.gmra.mxu3 %vm298_vm2, %v8699_v6 }
  0xad   :  { %v189_v11 = vpop.f32.mrf.mxu0 }
  0xae   :  { %v190_v25 = vadd.f32 %v10422_v46, %v189_v11 }
  0xaf   :  { %v10491_v13 = vpop.f32.mrf.mxu1 }
  0xb0   :  { %8736 = vmatmul.msk.f32.gmra.mxu0 %vm298_vm2, %v8719_v12  ;;  %v247_v30 = vmul.f32 0.01, %v190_v25  ;;  %vm231_vm7 = vcmp.ge.f32.partialorder %v190_v25, 0.0  ;;  %v1036_v12 = vld [vmem:[%s16223_s29 + $0x10] sm:$0xff] }
  0xb1   :  { %1341 = vmatpush.msrb.mxu3 %v1036_v12  ;;  %1228 = vmatpush.msrb.mxu2 %v1036_v12 }
  0xb2   :  { %8750 = vmatmul.msk.f32.vlgmr.msra.gmra.mxu1 %vm1053_vm6, %v260_v55  ;;  %v10544_v34 = vsel %vm231_vm7, %v190_v25, %v247_v30  ;;  %1454 = vmatpush.msrb.mxu0 %v1036_v12  ;;  %v724_v25 = vpop.f32.mrf.mxu3 }
  0xb3   :  { %1567 = vmatpush.msrb.mxu1 %v1036_v12 }
  0xb5   :  { %v192_v16 = vpop.f32.mrf.mxu0 }
  0xb6   :  { %v193_v33 = vadd.f32 %v10422_v46, %v192_v16  ;;  %v1035_v16 = vld [vmem:[%s16223_s29 + $0x8] sm:$0xff] }
  0xb7   :  { %v10506_v18 = vpop.f32.mrf.mxu1  ;;  %1342 = vmatpush.msrb.mxu3 %v1035_v16  ;;  %1455 = vmatpush.msrb.mxu0 %v1035_v16 }
  0xb8   :  { %8737 = vmatmul.msk.f32.gmra.mxu0 %vm298_vm2, %v8720_v17  ;;  %v248_v38 = vmul.f32 0.01, %v193_v33  ;;  %vm232_vm8 = vcmp.ge.f32.partialorder %v193_v33, 0.0  ;;  %v8666_v17 = vld [vmem:[%s16215_s13 + $0xf8] sm:$0xff]  ;;  %1229 = vmatpush.msrb.mxu2 %v1035_v16 }
  0xb9   :  { %8683 = vmatmul.msk.f32.gmra.mxu2 %vm298_vm2, %v8666_v17  ;;  %1343 = vmatpush.msrb.mxu3 %v1034_v19 }
  0xba   :  { %8751 = vmatmul.msk.f32.gmra.mxu1 %vm1053_vm6, %v261_v0  ;;  %v10563_v42 = vsel %vm232_vm8, %v193_v33, %v248_v38  ;;  %1456 = vmatpush.msrb.mxu0 %v1034_v19  ;;  %v727_v35 = vpop.f32.mrf.mxu3 }
  0xbb   :  { %16219 = vst [vmem:[#allocation4_spill] sm:$0xff] %v10563_v42  ;;  %1230 = vmatpush.msrb.mxu2 %v1034_v19  ;;  %1568 = vmatpush.msrb.mxu1 %v1035_v16 }
  0xbd   :  { %v195_v21 = vpop.f32.mrf.mxu0  ;;  %1569 = vmatpush.msrb.mxu1 %v1034_v19 }
  0xbe   :  { %v196_v41 = vadd.f32 %v10422_v46, %v195_v21 }
  0xbf   :  { %v10521_v23 = vpop.f32.mrf.mxu1 }
  0xc0   :  { %8738 = vmatmul.msk.f32.gmra.mxu0 %vm298_vm2, %v8721_v22  ;;  %v249_v44 = vmul.f32 0.01, %v196_v41  ;;  %vm233_vm9 = vcmp.ge.f32.partialorder %v196_v41, 0.0  ;;  %v8728_v22 = vld [vmem:[%s16215_s13 + $0x1d8] sm:$0xff] }
  0xc2   :  { %8752 = vmatmul.msk.f32.gmra.mxu1 %vm1053_vm6, %v262_v9  ;;  %v10582_v52 = vsel %vm233_vm9, %v196_v41, %v249_v44  ;;  %v8727_v9 = vld [vmem:[%s16215_s13 + $0x1d0] sm:$0xff]  ;;  %v8730_v41 = vld [vmem:[%s16215_s13 + $0x1e8] sm:$0xff] }
  0xc3   :  { %16220 = vst [vmem:[#allocation5_spill] sm:$0xff] %v10582_v52 }
  0xc5   :  { %v198_v28 = vpop.f32.mrf.mxu0 }
  0xc6   :  { %v199_v50 = vadd.f32 %v10422_v46, %v198_v28 }
  0xc7   :  { %v10537_v31 = vpop.f32.mrf.mxu1 }
  0xc8   :  { %8739 = vmatmul.msk.f32.gmra.mxu0 %vm298_vm2, %v8722_v29  ;;  %v250_v54 = vmul.f32 0.01, %v199_v50  ;;  %vm234_vm10 = vcmp.ge.f32.partialorder %v199_v50, 0.0 }
  0xca   :  { %8753 = vmatmul.msk.f32.gmra.mxu1 %vm1053_vm6, %v10544_v34  ;;  %v10601_v61 = vsel %vm234_vm10, %v199_v50, %v250_v54  ;;  %v10693_v54 = vld [vmem:[%s16228_s10] ss:$0 sm:$0xff] }
  0xcb   :  { %16221 = vst [vmem:[#allocation6_spill] sm:$0xff] %v10601_v61  ;;  %v372_v16 = vadd.f32 %v10693_v54, %v10432_v51 }
  0xcd   :  { %v201_v36 = vpop.f32.mrf.mxu0  ;;  %vm417_vm9 = vcmp.ge.f32.partialorder %v372_v16, 0.0 }
  0xce   :  { %v202_v59 = vadd.f32 %v10422_v46, %v201_v36 }
  0xcf   :  { %v10556_v39 = vpop.f32.mrf.mxu1 }
  0xd0   :  { %8740 = vmatmul.msk.f32.gmra.mxu0 %vm298_vm2, %v8723_v37  ;;  %v251_v63 = vmul.f32 0.01, %v202_v59  ;;  %vm235_vm11 = vcmp.ge.f32.partialorder %v202_v59, 0.0 }
  0xd2   :  { %8754 = vmatmul.msk.f32.gmra.mxu1 %vm1053_vm6, %v10563_v42  ;;  %v10617_v4 = vsel %vm235_vm11, %v202_v59, %v251_v63 }
  0xd3   :  { %16222 = vst [vmem:[#allocation7_spill] sm:$0xff] %v10617_v4 }
  0xd5   :  { %v204_v45 = vpop.f32.mrf.mxu0 }
  0xd6   :  { %v205_v3 = vadd.f32 %v10422_v46, %v204_v45 }
  0xd7   :  { %v10575_v48 = vpop.f32.mrf.mxu1 }
  0xd8   :  { %8741 = vmatmul.msk.f32.gmra.mxu0 %vm298_vm2, %v8724_v47  ;;  %v252_v7 = vmul.f32 0.01, %v205_v3  ;;  %vm236_vm12 = vcmp.ge.f32.partialorder %v205_v3, 0.0  ;;  %v10685_v47 = vpop.f32.mrf.mxu3 }
  0xda   :  { %8755 = vmatmul.msk.f32.gmra.mxu1 %vm1053_vm6, %v10582_v52  ;;  %v10638_v15 = vsel %vm236_vm12, %v205_v3, %v252_v7  ;;  %v725_v7 = vadd.f32 %v10693_v54, %v724_v25 }
  0xdb   :  { %16224 = vst [vmem:[#allocation8_spill] sm:$0xff] %v10638_v15 }
  0xdc   :  { %v788_v19 = vmul.f32 0.01, %v725_v7  ;;  %vm772_vm7 = vcmp.ge.f32.partialorder %v725_v7, 0.0 }
  0xdd   :  { %v207_v55 = vpop.f32.mrf.mxu0 }
  0xde   :  { %v208_v14 = vadd.f32 %v10422_v46, %v207_v55  ;;  %v10730_v51 = vsel %vm772_vm7, %v725_v7, %v788_v19 }
  0xdf   :  { %v10594_v57 = vpop.f32.mrf.mxu1 }
  0xe0   :  { %8742 = vmatmul.msk.f32.gmra.mxu0 %vm298_vm2, %v8725_v56  ;;  %v253_v20 = vmul.f32 0.01, %v208_v14  ;;  %vm237_vm13 = vcmp.ge.f32.partialorder %v208_v14, 0.0 }
  0xe2   :  { %8756 = vmatmul.msk.f32.gmra.mxu1 %vm1053_vm6, %v10601_v61  ;;  %v10659_v28 = vsel %vm237_vm13, %v208_v14, %v253_v20 }
  0xe3   :  { %16225 = vst [vmem:[#allocation9_spill] sm:$0xff] %v10659_v28 }
  0xe5   :  { %v210_v0 = vpop.f32.mrf.mxu0 }
  0xe6   :  { %v211_v26 = vadd.f32 %v10422_v46, %v210_v0  ;;  %v10704_v0 = vpop.f32.mrf.mxu3 }
  0xe7   :  { %v10613_v2 = vpop.f32.mrf.mxu1 }
  0xe8   :  { %8743 = vmatmul.msk.f32.gmra.mxu0 %vm298_vm2, %v8726_v1  ;;  %v254_v29 = vmul.f32 0.01, %v211_v26  ;;  %vm238_vm14 = vcmp.ge.f32.partialorder %v211_v26, 0.0  ;;  %v10706_v1 = vpop.f32.mrf.mxu2 }
  0xe9   :  { %v559_v19 = vadd.f32 %v10693_v54, %v10706_v1 }
  0xea   :  { %8757 = vmatmul.msk.f32.gmra.mxu1 %vm1053_vm6, %v10617_v4  ;;  %v10670_v37 = vsel %vm238_vm14, %v211_v26, %v254_v29 }
  0xeb   :  { %16226 = vst [vmem:[#allocation10_spill] sm:$0xff] %v10670_v37 }
  0xed   :  { %v213_v8 = vpop.f32.mrf.mxu0 }
  0xee   :  { %v214_v36 = vadd.f32 %v10422_v46, %v213_v8  ;;  %v8732_v8 = vld [vmem:[%s16215_s13 + $0x1f8] sm:$0xff]  ;;  %s15991_s13 = smov 1  }
  0xef   :  { %v10631_v11 = vpop.f32.mrf.mxu1 }
  0xf0   :  { %8744 = vmatmul.msk.f32.gmra.mxu0 %vm298_vm2, %v8727_v9  ;;  %v255_v38 = vmul.f32 0.01, %v214_v36  ;;  %vm239_vm15 = vcmp.ge.f32.partialorder %v214_v36, 0.0 }
  0xf2   :  { %8758 = vmatmul.msk.f32.gmra.mxu1 %vm1053_vm6, %v10638_v15  ;;  %v10681_v45 = vsel %vm239_vm15, %v214_v36, %v255_v38  ;;  %v433_v36 = vmul.f32 0.01, %v372_v16  ;;  %v10737_v38 = vpop.f32.mrf.mxu3 }
  0xf3   :  { %16227 = vst [vmem:[#allocation11_spill] sm:$0xff] %v10681_v45 }
  0xf5   :  { %v216_v21 = vpop.f32.mrf.mxu0 }
  0xf6   :  { %v217_v44 = vadd.f32 %v10422_v46, %v216_v21 }
  0xf7   :  { %v10655_v24 = vpop.f32.mrf.mxu1 }
  0xf8   :  { %8745 = vmatmul.msk.f32.gmra.mxu0 %vm298_vm2, %v8728_v22  ;;  %v256_v49 = vmul.f32 0.01, %v217_v44  ;;  %vm240_vm0 = vcmp.ge.f32.partialorder %v217_v44, 0.0 }
  0xfa   :  { %8759 = vmatmul.msk.f32.gmra.mxu1 %vm1053_vm6, %v10659_v28  ;;  %v10698_v59 = vsel %vm240_vm0, %v217_v44, %v256_v49 }
  0xfb   :  { %16229 = vst [vmem:[#allocation12_spill] sm:$0xff] %v10698_v59 }
  0xfd   :  { %v219_v30 = vpop.f32.mrf.mxu0 }
  0xfe   :  { %v220_v58 = vadd.f32 %v10422_v46, %v219_v30  ;;  %v728_v30 = vadd.f32 %v10693_v54, %v727_v35 }
  0xff   :  { %v10666_v33 = vpop.f32.mrf.mxu1 }
 0x100   :  { %8746 = vmatmul.msk.f32.gmra.mxu0 %vm298_vm2, %v8729_v32  ;;  %v257_v3 = vmul.f32 0.01, %v220_v58  ;;  %vm241_vm4 = vcmp.ge.f32.partialorder %v220_v58, 0.0  ;;  %v10735_v32 = vpop.f32.mrf.mxu2  ;;  %vm773_vm11 = vcmp.ge.f32.partialorder %v728_v30, 0.0 }
 0x102   :  { %8760 = vmatmul.msk.f32.gmra.mxu1 %vm1053_vm6, %v10670_v37  ;;  %v10720_v20 = vsel %vm241_vm4, %v220_v58, %v257_v3  ;;  %vm598_vm4 = vcmp.ge.f32.partialorder %v559_v19, 0.0 }
 0x103   :  { %16230 = vst [vmem:[#allocation13_spill] sm:$0xff] %v10720_v20 }
 0x105   :  { %v222_v40 = vpop.f32.mrf.mxu0 }
 0x106   :  { %v223_v17 = vadd.f32 %v10422_v46, %v222_v40 }
 0x107   :  { %v10677_v43 = vpop.f32.mrf.mxu1 }
 0x108   :  { %8747 = vmatmul.msk.f32.gmra.mxu0 %vm298_vm2, %v8730_v41  ;;  %v258_v26 = vmul.f32 0.01, %v223_v17  ;;  %v375_v41 = vadd.f32 %v10693_v54, %v10452_v60  ;;  %v10761_v7 = vpop.f32.mrf.mxu2 }
 0x10a   :  { %8761 = vmatmul.msk.f32.gmra.mxu1 %vm1053_vm6, %v10681_v45  ;;  %v434_v58 = vmul.f32 0.01, %v375_v41  ;;  %vm418_vm12 = vcmp.ge.f32.partialorder %v375_v41, 0.0 }
 0x10d   :  { %v225_v50 = vpop.f32.mrf.mxu0 }
 0x10e   :  { %v226_v49 = vadd.f32 %v10422_v46, %v225_v50  ;;  %v731_v46 = vadd.f32 %v10693_v54, %v10685_v47 }
 0x10f   :  { %v546_v55 = vpop.f32.mrf.mxu1 }
 0x110   :  { %v547_v56 = vadd.f32 %v10693_v54, %v546_v55  ;;  %8748 = vmatmul.msk.f32.gmra.mxu0 %vm298_vm2, %v8731_v53  ;;  %v789_v53 = vmul.f32 0.01, %v728_v30  ;;  %v10749_v55 = vsel %vm417_vm9, %v372_v16, %v433_v36  ;;  %vm243_vm13 = vcmp.ge.f32.partialorder %v226_v49, 0.0 }
 0x111   :  { %vm774_vm15 = vcmp.ge.f32.partialorder %v731_v46, 0.0 }
 0x112   :  { %v610_v62 = vmul.f32 0.01, %v547_v56  ;;  %8762 = vmatmul.msk.f32.gmra.mxu1 %vm1053_vm6, %v10698_v59  ;;  %vm594_vm3 = vcmp.ge.f32.partialorder %v547_v56, 0.0  ;;  %v10759_v50 = vsel %vm773_vm11, %v728_v30, %v789_v53 }
 0x114   :  { %v10702_v63 = vsel %vm594_vm3, %v547_v56, %v610_v62  ;;  %v259_v62 = vmul.f32 0.01, %v226_v49 }
 0x115   :  { %v368_v6 = vpop.f32.mrf.mxu0  ;;  %8782 = vmatmul.msk.f32.vlgmr.msrb.gmra.mxu3 %vm1053_vm6, %v10702_v63 }
 0x116   :  { %v369_v9 = vadd.f32 %v10693_v54, %v368_v6  ;;  %v10773_v16 = vsel %vm243_vm13, %v226_v49, %v259_v62  ;;  %v562_v62 = vadd.f32 %v10693_v54, %v10735_v32  ;;  %v384_v32 = vadd.f32 %v10693_v54, %v10506_v18 }
 0x117   :  { %v549_v10 = vpop.f32.mrf.mxu1  ;;  %16232 = vst [vmem:[#allocation15_spill] sm:$0xff] %v10773_v16 }
 0x118   :  { %v432_v12 = vmul.f32 0.01, %v369_v9  ;;  %v550_v14 = vadd.f32 %v10693_v54, %v549_v10  ;;  %8749 = vmatmul.msk.f32.gmra.mxu0 %vm298_vm2, %v8732_v8  ;;  %vm416_vm5 = vcmp.ge.f32.partialorder %v369_v9, 0.0  ;;  %vm242_vm2 = vcmp.ge.f32.partialorder %v223_v17, 0.0  ;;  %v10768_v10 = vpop.f32.mrf.mxu3 }
 0x119   :  { %v10745_v35 = vsel %vm242_vm2, %v223_v17, %v258_v26  ;;  %vm599_vm2 = vcmp.ge.f32.partialorder %v562_v62, 0.0  ;;  %vm421_vm11 = vcmp.ge.f32.partialorder %v384_v32, 0.0 }
 0x11a   :  { %8763 = vmatmul.msk.f32.gmra.mxu1 %vm1053_vm6, %v10720_v20  ;;  %v10724_v21 = vsel %vm416_vm5, %v369_v9, %v432_v12  ;;  %vm595_vm8 = vcmp.ge.f32.partialorder %v550_v14, 0.0  ;;  %v611_v22 = vmul.f32 0.01, %v550_v14  ;;  %16231 = vst [vmem:[#allocation14_spill] sm:$0xff] %v10745_v35  ;;  %v10766_v9 = vsel %vm418_vm12, %v375_v41, %v434_v58 }
 0x11b   :  { %8766 = vmatmul.msk.f32.vlgmr.msrb.gmra.mxu2 %vm1053_vm6, %v10724_v21  ;;  %v378_v12 = vadd.f32 %v10693_v54, %v10472_v5 }
 0x11c   :  { %v10728_v25 = vsel %vm595_vm8, %v550_v14, %v611_v22  ;;  %v790_v14 = vmul.f32 0.01, %v731_v46 }
 0x11d   :  { %v902_v29 = vpop.f32.mrf.mxu0  ;;  %8783 = vmatmul.msk.f32.gmra.mxu3 %vm1053_vm6, %v10728_v25  ;;  %v435_v36 = vmul.f32 0.01, %v378_v12  ;;  %vm419_vm3 = vcmp.ge.f32.partialorder %v378_v12, 0.0 }
 0x11e   :  { %v903_v47 = vadd.f32 %v10693_v54, %v902_v29  ;;  %v734_v29 = vadd.f32 %v10693_v54, %v10704_v0  ;;  %v10787_v30 = vsel %vm774_vm15, %v731_v46, %v790_v14  ;;  %v567_v0 = vpop.f32.mrf.mxu2 }
 0x11f   :  { %v552_v40 = vpop.f32.mrf.mxu1  ;;  %v10794_v53 = vsel %vm419_vm3, %v378_v12, %v435_v36  ;;  %v565_v36 = vadd.f32 %v10693_v54, %v10761_v7 }
 0x120   :  { %v553_v44 = vadd.f32 %v10693_v54, %v552_v40  ;;  %8798 = vmatmul.msk.f32.vlgmr.msrb.gmra.mxu0 %vm1053_vm6, %v10730_v51  ;;  %v966_v5 = vmul.f32 0.01, %v903_v47  ;;  %vm950_vm0 = vcmp.ge.f32.partialorder %v903_v47, 0.0  ;;  %v614_v40 = vmul.f32 0.01, %v559_v19  ;;  %v742_v46 = vpop.f32.mrf.mxu3 }
 0x121   :  { %v791_v49 = vmul.f32 0.01, %v734_v29  ;;  %vm775_vm5 = vcmp.ge.f32.partialorder %v734_v29, 0.0  ;;  %vm600_vm12 = vcmp.ge.f32.partialorder %v565_v36, 0.0 }
 0x122   :  { %8764 = vmatmul.msk.f32.gmra.mxu1 %vm1053_vm6, %v10745_v35  ;;  %vm596_vm10 = vcmp.ge.f32.partialorder %v553_v44, 0.0  ;;  %v612_v56 = vmul.f32 0.01, %v553_v44  ;;  %v10791_v41 = vsel %vm950_vm0, %v903_v47, %v966_v5  ;;  %v10800_v58 = vsel %vm598_vm4, %v559_v19, %v614_v40 }
 0x123   :  { %8767 = vmatmul.msk.f32.gmra.mxu2 %vm1053_vm6, %v10749_v55  ;;  %16233 = vst [vmem:[#allocation16_spill] sm:$0xff] %v10800_v58  ;;  %v10808_v12 = vsel %vm775_vm5, %v734_v29, %v791_v49  ;;  %v615_v47 = vmul.f32 0.01, %v562_v62 }
 0x124   :  { %v10753_v60 = vsel %vm596_vm10, %v553_v44, %v612_v56  ;;  %v381_v56 = vadd.f32 %v10693_v54, %v10491_v13 }
 0x125   :  { %v905_v3 = vpop.f32.mrf.mxu0  ;;  %8784 = vmatmul.msk.f32.gmra.mxu3 %vm1053_vm6, %v10753_v60  ;;  %v10823_v29 = vsel %vm599_vm2, %v562_v62, %v615_v47  ;;  %v616_v62 = vmul.f32 0.01, %v565_v36 }
 0x126   :  { %v906_v44 = vadd.f32 %v10693_v54, %v905_v3  ;;  %v436_v13 = vmul.f32 0.01, %v381_v56  ;;  %vm420_vm8 = vcmp.ge.f32.partialorder %v381_v56, 0.0  ;;  %16235 = vst [vmem:[#allocation18_spill] sm:$0xff] %v10823_v29  ;;  %v570_v18 = vpop.f32.mrf.mxu2 }
 0x127   :  { %v555_v6 = vpop.f32.mrf.mxu1  ;;  %v571_v20 = vadd.f32 %v10693_v54, %v570_v18 }
 0x128   :  { %v556_v8 = vadd.f32 %v10693_v54, %v555_v6  ;;  %8799 = vmatmul.msk.f32.gmra.mxu0 %vm1053_vm6, %v10759_v50  ;;  %v967_v3 = vmul.f32 0.01, %v906_v44  ;;  %vm951_vm7 = vcmp.ge.f32.partialorder %v906_v44, 0.0  ;;  %v10821_v5 = vsel %vm420_vm8, %v381_v56, %v436_v13  ;;  %v745_v40 = vpop.f32.mrf.mxu3 }
 0x129   :  { %16234 = vst [vmem:[#allocation17_spill] sm:$0xff] %v10821_v5  ;;  %v437_v56 = vmul.f32 0.01, %v384_v32 }
 0x12a   :  { %8765 = vmatmul.msk.f32.gmra.mxu1 %vm1053_vm6, %v10773_v16  ;;  %vm597_vm14 = vcmp.ge.f32.partialorder %v556_v8, 0.0  ;;  %v613_v17 = vmul.f32 0.01, %v556_v8  ;;  %v10817_v19 = vsel %vm951_vm7, %v906_v44, %v967_v3  ;;  %v740_v44 = vadd.f32 %v10693_v54, %v10768_v10 }
 0x12b   :  { %8768 = vmatmul.msk.f32.gmra.mxu2 %vm1053_vm6, %v10766_v9  ;;  %v10840_v10 = vsel %vm421_vm11, %v384_v32, %v437_v56  ;;  %vm602_vm7 = vcmp.ge.f32.partialorder %v571_v20, 0.0 }
 0x12c   :  { %v10781_v22 = vsel %vm597_vm14, %v556_v8, %v613_v17  ;;  %v737_v8 = vadd.f32 %v10693_v54, %v10737_v38  ;;  %v793_v13 = vmul.f32 0.01, %v740_v44  ;;  %16237 = vst [vmem:[#allocation20_spill] sm:$0xff] %v10840_v10  ;;  %vm777_vm13 = vcmp.ge.f32.partialorder %v740_v44, 0.0 }
 0x12d   :  { %v908_v26 = vpop.f32.mrf.mxu0  ;;  %8785 = vmatmul.msk.f32.gmra.mxu3 %vm1053_vm6, %v10781_v22 }
 0x12e   :  { %v909_v38 = vadd.f32 %v10693_v54, %v908_v26  ;;  %v792_v17 = vmul.f32 0.01, %v737_v8  ;;  %vm776_vm9 = vcmp.ge.f32.partialorder %v737_v8, 0.0  ;;  %v10852_v32 = vsel %vm777_vm13, %v740_v44, %v793_v13 }
 0x12f   :  { %v1119_v1 = vpop.f32.mrf.mxu1  ;;  %16239 = vst [vmem:[#allocation22_spill] sm:$0xff] %v10852_v32 }
 0x130   :  { %8800 = vmatmul.msk.f32.gmra.mxu0 %vm1053_vm6, %v10787_v30  ;;  %1864 = vperm.xlu1 %9216, %v1119_v1   ;;  %v968_v26 = vmul.f32 0.01, %v909_v38  ;;  %v10831_v49 = vsel %vm776_vm9, %v737_v8, %v792_v17  ;;  %vm952_vm10 = vcmp.ge.f32.partialorder %v909_v38, 0.0  ;;  %v387_v8 = vadd.f32 %v10693_v54, %v10521_v23  ;;  %v573_v23 = vpop.f32.mrf.mxu2 }
 0x131   :  { %16236 = vst [vmem:[#allocation19_spill] sm:$0xff] %v10831_v49  ;;  %v568_v17 = vadd.f32 %v10693_v54, %v567_v0  ;;  %v390_v0 = vadd.f32 %v10693_v54, %v10537_v31  ;;  %v574_v37 = vadd.f32 %v10693_v54, %v573_v23 }
 0x132   :  { %8814 = vmatmul.msk.f32.vlgmr.msrb.gmra.mxu1 %vm1053_vm6, %v10791_v41  ;;  %v10838_v47 = vsel %vm952_vm10, %v909_v38, %v968_v26  ;;  %v743_v38 = vadd.f32 %v10693_v54, %v742_v46  ;;  %v438_v26 = vmul.f32 0.01, %v387_v8  ;;  %vm422_vm15 = vcmp.ge.f32.partialorder %v387_v8, 0.0 }
 0x133   :  { %8769 = vmatmul.msk.f32.gmra.mxu2 %vm1053_vm6, %v10794_v53  ;;  %v617_v56 = vmul.f32 0.01, %v568_v17  ;;  %vm601_vm0 = vcmp.ge.f32.partialorder %v568_v17, 0.0  ;;  %vm423_vm5 = vcmp.ge.f32.partialorder %v390_v0, 0.0  ;;  %vm603_vm10 = vcmp.ge.f32.partialorder %v574_v37, 0.0 }
 0x134   :  { %v794_v44 = vmul.f32 0.01, %v743_v38  ;;  %v10865_v27 = vsel %vm422_vm15, %v387_v8, %v438_v26  ;;  %vm778_vm3 = vcmp.ge.f32.partialorder %v743_v38, 0.0  ;;  %v618_v8 = vmul.f32 0.01, %v571_v20 }
 0x135   :  { %v911_v6 = vpop.f32.mrf.mxu0  ;;  %8786 = vmatmul.msk.f32.gmra.mxu3 %vm1053_vm6, %v10800_v58  ;;  %16241 = vst [vmem:[#allocation24_spill] sm:$0xff] %v10865_v27  ;;  %v10867_v16 = vsel %vm601_vm0, %v568_v17, %v617_v56 }
 0x136   :  { %v912_v3 = vadd.f32 %v10693_v54, %v911_v6  ;;  %16242 = vst [vmem:[#allocation25_spill] sm:$0xff] %v10867_v16  ;;  %v10873_v45 = vsel %vm778_vm3, %v743_v38, %v794_v44  ;;  %v393_v44 = vadd.f32 %v10693_v54, %v10556_v39  ;;  %v10888_v35 = vsel %vm602_vm7, %v571_v20, %v618_v8 }
 0x137   :  { %v1122_v14 = vpop.f32.mrf.mxu1  ;;  %16243 = vst [vmem:[#allocation26_spill] sm:$0xff] %v10873_v45  ;;  %v396_v20 = vadd.f32 %v10693_v54, %v10575_v48 }
 0x138   :  { %8801 = vmatmul.msk.f32.gmra.mxu0 %vm1053_vm6, %v10808_v12  ;;  %1869 = vperm.xlu2 %9215, %v1122_v14   ;;  %v10846_v14 = vsel %vm600_vm12, %v565_v36, %v616_v62  ;;  %v969_v6 = vmul.f32 0.01, %v912_v3  ;;  %vm953_vm14 = vcmp.ge.f32.partialorder %v912_v3, 0.0  ;;  %v748_v36 = vpop.f32.mrf.mxu3  ;;  %16246 = vst [vmem:[#allocation29_spill] sm:$0xff] %v10888_v35  ;;  %v440_v39 = vmul.f32 0.01, %v393_v44 }
 0x139   :  { %16238 = vst [vmem:[#allocation21_spill] sm:$0xff] %v10846_v14  ;;  %vm424_vm9 = vcmp.ge.f32.partialorder %v393_v44, 0.0  ;;  %vm425_vm13 = vcmp.ge.f32.partialorder %v396_v20, 0.0 }
 0x13a   :  { %8815 = vmatmul.msk.f32.gmra.mxu1 %vm1053_vm6, %v10817_v19  ;;  %v10861_v13 = vsel %vm953_vm14, %v912_v3, %v969_v6  ;;  %v439_v3 = vmul.f32 0.01, %v390_v0  ;;  %v576_v6 = vpop.f32.mrf.mxu2 }
 0x13b   :  { %8770 = vmatmul.msk.f32.gmra.mxu2 %vm1053_vm6, %v10821_v5  ;;  %16240 = vst [vmem:[#allocation23_spill] sm:$0xff] %v10861_v13  ;;  %v577_v28 = vadd.f32 %v10693_v54, %v576_v6 }
 0x13c   :  { %v10882_v56 = vsel %vm423_vm5, %v390_v0, %v439_v3 }
 0x13d   :  { %v914_v1 = vpop.f32.mrf.mxu0  ;;  %8787 = vmatmul.msk.f32.gmra.mxu3 %vm1053_vm6, %v10823_v29  ;;  %16245 = vst [vmem:[#allocation28_spill] sm:$0xff] %v10882_v56  ;;  %vm604_vm14 = vcmp.ge.f32.partialorder %v577_v28, 0.0 }
 0x13e   :  { %v915_v46 = vadd.f32 %v10693_v54, %v914_v1  ;;  %v746_v1 = vadd.f32 %v10693_v54, %v745_v40 }
 0x13f   :  { %v1125_v7 = vpop.f32.mrf.mxu1 }
 0x140   :  { %8802 = vmatmul.msk.f32.gmra.mxu0 %vm1053_vm6, %v10831_v49  ;;  %1874 = vperm.xlu0 %9217, %v1125_v7   ;;  %vm954_vm4 = vcmp.ge.f32.partialorder %v915_v46, 0.0  ;;  %v751_v18 = vpop.f32.mrf.mxu3  ;;  %v795_v40 = vmul.f32 0.01, %v746_v1  ;;  %vm779_vm8 = vcmp.ge.f32.partialorder %v746_v1, 0.0 }
 0x142   :  { %8816 = vmatmul.msk.f32.gmra.mxu1 %vm1053_vm6, %v10838_v47  ;;  %v10894_v0 = vsel %vm779_vm8, %v746_v1, %v795_v40  ;;  %v579_v8 = vpop.f32.mrf.mxu2  ;;  %v10907_v40 = vsel %vm424_vm9, %v393_v44, %v440_v39  ;;  %v441_v44 = vmul.f32 0.01, %v396_v20 }
 0x143   :  { %8771 = vmatmul.msk.f32.gmra.mxu2 %vm1053_vm6, %v10840_v10  ;;  %16247 = vst [vmem:[#allocation30_spill] sm:$0xff] %v10894_v0 }
 0x144   :  { %16249 = vst [vmem:[#allocation32_spill] sm:$0xff] %v10907_v40 }
 0x145   :  { %v917_v7 = vpop.f32.mrf.mxu0  ;;  %8788 = vmatmul.msk.f32.gmra.mxu3 %vm1053_vm6, %v10846_v14 }
 0x146   :  { %v918_v26 = vadd.f32 %v10693_v54, %v917_v7 }
 0x147   :  { %v1128_v62 = vpop.f32.mrf.mxu1 }
 0x148   :  { %8803 = vmatmul.msk.f32.gmra.mxu0 %vm1053_vm6, %v10852_v32  ;;  %1879 = vperm.xlu2 %9215, %v1128_v62   ;;  %v970_v62 = vmul.f32 0.01, %v915_v46  ;;  %v971_v7 = vmul.f32 0.01, %v918_v26  ;;  %vm955_vm2 = vcmp.ge.f32.partialorder %v918_v26, 0.0 }
 0x14a   :  { %8817 = vmatmul.msk.f32.gmra.mxu1 %vm1053_vm6, %v10861_v13  ;;  %v10880_v38 = vsel %vm954_vm4, %v915_v46, %v970_v62  ;;  %v749_v46 = vadd.f32 %v10693_v54, %v748_v36  ;;  %v619_v62 = vmul.f32 0.01, %v574_v37  ;;  %v10903_v1 = vsel %vm955_vm2, %v918_v26, %v971_v7 }
 0x14b   :  { %8772 = vmatmul.msk.f32.gmra.mxu2 %vm1053_vm6, %v10865_v27  ;;  %16244 = vst [vmem:[#allocation27_spill] sm:$0xff] %v10880_v38  ;;  %v752_v26 = vadd.f32 %v10693_v54, %v751_v18  ;;  %v10924_v18 = vsel %vm425_vm13, %v396_v20, %v441_v44 }
 0x14c   :  { %v796_v36 = vmul.f32 0.01, %v749_v46  ;;  %16248 = vst [vmem:[#allocation31_spill] sm:$0xff] %v10903_v1  ;;  %vm780_vm11 = vcmp.ge.f32.partialorder %v749_v46, 0.0  ;;  %v10909_v59 = vsel %vm603_vm10, %v574_v37, %v619_v62  ;;  %v620_v37 = vmul.f32 0.01, %v577_v28 }
 0x14d   :  { %v920_v31 = vpop.f32.mrf.mxu0  ;;  %8789 = vmatmul.msk.f32.gmra.mxu3 %vm1053_vm6, %v10867_v16  ;;  %16250 = vst [vmem:[#allocation33_spill] sm:$0xff] %v10909_v59  ;;  %v797_v62 = vmul.f32 0.01, %v752_v26  ;;  %vm781_vm15 = vcmp.ge.f32.partialorder %v752_v26, 0.0 }
 0x14e   :  { %v921_v23 = vadd.f32 %v10693_v54, %v920_v31  ;;  %v10915_v7 = vsel %vm780_vm11, %v749_v46, %v796_v36  ;;  %16253 = vst [vmem:[#allocation36_spill] sm:$0xff] %v10924_v18  ;;  %v399_v46 = vadd.f32 %v10693_v54, %v10594_v57  ;;  %v10930_v36 = vsel %vm604_vm14, %v577_v28, %v620_v37 }
 0x14f   :  { %v1131_v17 = vpop.f32.mrf.mxu1  ;;  %16251 = vst [vmem:[#allocation34_spill] sm:$0xff] %v10915_v7  ;;  %v10936_v44 = vsel %vm781_vm15, %v752_v26, %v797_v62 }
 0x150   :  { %8804 = vmatmul.msk.f32.gmra.mxu0 %vm1053_vm6, %v10873_v45  ;;  %1884 = vperm.xlu0 %9217, %v1131_v17   ;;  %v972_v48 = vmul.f32 0.01, %v921_v23  ;;  %vm956_vm12 = vcmp.ge.f32.partialorder %v921_v23, 0.0  ;;  %16254 = vst [vmem:[#allocation37_spill] sm:$0xff] %v10930_v36  ;;  %v442_v57 = vmul.f32 0.01, %v399_v46 }
 0x151   :  { %16255 = vst [vmem:[#allocation38_spill] sm:$0xff] %v10936_v44  ;;  %vm426_vm3 = vcmp.ge.f32.partialorder %v399_v46, 0.0 }
 0x152   :  { %8818 = vmatmul.msk.f32.gmra.mxu1 %vm1053_vm6, %v10880_v38 }
 0x153   :  { %8773 = vmatmul.msk.f32.gmra.mxu2 %vm1053_vm6, %v10882_v56 }
 0x155   :  { %v923_v17 = vpop.f32.mrf.mxu0  ;;  %8790 = vmatmul.msk.f32.gmra.mxu3 %vm1053_vm6, %v10888_v35  ;;  %v10922_v35 = vsel %vm956_vm12, %v921_v23, %v972_v48 }
 0x156   :  { %v924_v6 = vadd.f32 %v10693_v54, %v923_v17  ;;  %16252 = vst [vmem:[#allocation35_spill] sm:$0xff] %v10922_v35  ;;  %v582_v17 = vpop.f32.mrf.mxu2 }
 0x157   :  { %v1134_v3 = vpop.f32.mrf.mxu1 }
 0x158   :  { %8805 = vmatmul.msk.f32.gmra.mxu0 %vm1053_vm6, %v10894_v0  ;;  %1889 = vperm.xlu1 %9216, %v1134_v3   ;;  %v754_v3 = vpop.f32.mrf.mxu3  ;;  %v973_v23 = vmul.f32 0.01, %v924_v6  ;;  %vm957_vm0 = vcmp.ge.f32.partialorder %v924_v6, 0.0 }
 0x159   :  { %v755_v20 = vadd.f32 %v10693_v54, %v754_v3 }
 0x15a   :  { %8819 = vmatmul.msk.f32.gmra.mxu1 %vm1053_vm6, %v10903_v1  ;;  %v10945_v62 = vsel %vm957_vm0, %v924_v6, %v973_v23 }
 0x15b   :  { %8774 = vmatmul.msk.f32.gmra.mxu2 %vm1053_vm6, %v10907_v40  ;;  %v798_v26 = vmul.f32 0.01, %v755_v20  ;;  %16256 = vst [vmem:[#allocation39_spill] sm:$0xff] %v10945_v62  ;;  %vm782_vm5 = vcmp.ge.f32.partialorder %v755_v20, 0.0 }
 0x15d   :  { %v926_v31 = vpop.f32.mrf.mxu0  ;;  %8791 = vmatmul.msk.f32.gmra.mxu3 %vm1053_vm6, %v10909_v59  ;;  %v580_v59 = vadd.f32 %v10693_v54, %v579_v8  ;;  %v402_v8 = vadd.f32 %v10693_v54, %v10613_v2  ;;  %v10959_v6 = vsel %vm782_vm5, %v755_v20, %v798_v26  ;;  %v405_v20 = vadd.f32 %v10693_v54, %v10631_v11 }
 0x15e   :  { %v927_v3 = vadd.f32 %v10693_v54, %v926_v31  ;;  %16259 = vst [vmem:[#allocation42_spill] sm:$0xff] %v10959_v6 }
 0x15f   :  { %v1137_v39 = vpop.f32.mrf.mxu1  ;;  %v621_v28 = vmul.f32 0.01, %v580_v59  ;;  %vm605_vm4 = vcmp.ge.f32.partialorder %v580_v59, 0.0  ;;  %v443_v23 = vmul.f32 0.01, %v402_v8  ;;  %vm427_vm8 = vcmp.ge.f32.partialorder %v402_v8, 0.0 }
 0x160   :  { %8806 = vmatmul.msk.f32.gmra.mxu0 %vm1053_vm6, %v10915_v7  ;;  %1894 = vperm.xlu2 %9215, %v1137_v39   ;;  %v757_v39 = vpop.f32.mrf.mxu3  ;;  %v583_v7 = vadd.f32 %v10693_v54, %v582_v17  ;;  %vm958_vm7 = vcmp.ge.f32.partialorder %v927_v3, 0.0  ;;  %v444_v11 = vmul.f32 0.01, %v405_v20  ;;  %vm428_vm11 = vcmp.ge.f32.partialorder %v405_v20, 0.0 }
 0x161   :  { %v758_v31 = vadd.f32 %v10693_v54, %v757_v39 }
 0x162   :  { %8820 = vmatmul.msk.f32.gmra.mxu1 %vm1053_vm6, %v10922_v35  ;;  %vm606_vm2 = vcmp.ge.f32.partialorder %v583_v7, 0.0 }
 0x163   :  { %8775 = vmatmul.msk.f32.gmra.mxu2 %vm1053_vm6, %v10924_v18  ;;  %v10951_v18 = vsel %vm605_vm4, %v580_v59, %v621_v28  ;;  %v622_v59 = vmul.f32 0.01, %v583_v7  ;;  %v799_v39 = vmul.f32 0.01, %v758_v31  ;;  %vm783_vm9 = vcmp.ge.f32.partialorder %v758_v31, 0.0 }
 0x164   :  { %16258 = vst [vmem:[#allocation41_spill] sm:$0xff] %v10951_v18 }
 0x165   :  { %v929_v48 = vpop.f32.mrf.mxu0  ;;  %8792 = vmatmul.msk.f32.gmra.mxu3 %vm1053_vm6, %v10930_v36  ;;  %v10949_v36 = vsel %vm426_vm3, %v399_v46, %v442_v57  ;;  %v585_v46 = vpop.f32.mrf.mxu2  ;;  %v10972_v26 = vsel %vm606_vm2, %v583_v7, %v622_v59  ;;  %v408_v59 = vadd.f32 %v10693_v54, %v10655_v24 }
 0x166   :  { %16257 = vst [vmem:[#allocation40_spill] sm:$0xff] %v10949_v36  ;;  %v930_v17 = vadd.f32 %v10693_v54, %v929_v48 }
 0x167   :  { %v1140_v37 = vpop.f32.mrf.mxu1  ;;  %16262 = vst [vmem:[#allocation45_spill] sm:$0xff] %v10972_v26  ;;  %vm429_vm15 = vcmp.ge.f32.partialorder %v408_v59, 0.0 }
 0x168   :  { %8807 = vmatmul.msk.f32.gmra.mxu0 %vm1053_vm6, %v10936_v44  ;;  %1899 = vperm.xlu2 %9215, %v1140_v37   ;;  %v974_v37 = vmul.f32 0.01, %v927_v3  ;;  %v760_v57 = vpop.f32.mrf.mxu3  ;;  %v975_v48 = vmul.f32 0.01, %v930_v17  ;;  %vm959_vm10 = vcmp.ge.f32.partialorder %v930_v17, 0.0 }
 0x16a   :  { %8821 = vmatmul.msk.f32.gmra.mxu1 %vm1053_vm6, %v10945_v62 }
 0x16b   :  { %8776 = vmatmul.msk.f32.gmra.mxu2 %vm1053_vm6, %v10949_v36  ;;  %v10964_v36 = vsel %vm958_vm7, %v927_v3, %v974_v37  ;;  %v761_v3 = vadd.f32 %v10693_v54, %v760_v57 }
 0x16c   :  { %16260 = vst [vmem:[#allocation43_spill] sm:$0xff] %v10964_v36 }
 0x16d   :  { %v932_v2 = vpop.f32.mrf.mxu0  ;;  %8793 = vmatmul.msk.f32.gmra.mxu3 %vm1053_vm6, %v10951_v18  ;;  %v10966_v18 = vsel %vm427_vm8, %v402_v8, %v443_v23  ;;  %v10980_v8 = vsel %vm783_vm9, %v758_v31, %v799_v39  ;;  %v588_v23 = vpop.f32.mrf.mxu2  ;;  %v10987_v31 = vsel %vm959_vm10, %v930_v17, %v975_v48  ;;  %v10991_v39 = vsel %vm428_vm11, %v405_v20, %v444_v11 }
 0x16e   :  { %16261 = vst [vmem:[#allocation44_spill] sm:$0xff] %v10966_v18  ;;  %v933_v57 = vadd.f32 %v10693_v54, %v932_v2  ;;  %vm784_vm13 = vcmp.ge.f32.partialorder %v761_v3, 0.0 }
 0x16f   :  { %v1143_v28 = vpop.f32.mrf.mxu1  ;;  %16263 = vst [vmem:[#allocation46_spill] sm:$0xff] %v10980_v8 }
 0x170   :  { %1904 = vperm.xlu2 %9215, %v1143_v28   ;;  %8808 = vmatmul.msk.f32.gmra.mxu0 %vm1053_vm6, %v10959_v6  ;;  %v586_v28 = vadd.f32 %v10693_v54, %v585_v46  ;;  %v763_v46 = vpop.f32.mrf.mxu3  ;;  %16264 = vst [vmem:[#allocation47_spill] sm:$0xff] %v10987_v31  ;;  %v976_v24 = vmul.f32 0.01, %v933_v57  ;;  %vm960_vm14 = vcmp.ge.f32.partialorder %v933_v57, 0.0 }
 0x171   :  { %16265 = vst [vmem:[#allocation48_spill] sm:$0xff] %v10991_v39  ;;  %v764_v2 = vadd.f32 %v10693_v54, %v763_v46 }
 0x172   :  { %8822 = vmatmul.msk.f32.gmra.mxu1 %vm1053_vm6, %v10964_v36  ;;  %v623_v37 = vmul.f32 0.01, %v586_v28  ;;  %vm607_vm12 = vcmp.ge.f32.partialorder %v586_v28, 0.0 }
 0x173   :  { %8777 = vmatmul.msk.f32.gmra.mxu2 %vm1053_vm6, %v10966_v18  ;;  %vm785_vm3 = vcmp.ge.f32.partialorder %v764_v2, 0.0 }
 0x174   :  { %v10993_v18 = vsel %vm607_vm12, %v586_v28, %v623_v37  ;;  %v801_v37 = vmul.f32 0.01, %v764_v2 }
 0x175   :  { %v935_v6 = vpop.f32.mrf.mxu0  ;;  %8794 = vmatmul.msk.f32.gmra.mxu3 %vm1053_vm6, %v10972_v26  ;;  %v800_v26 = vmul.f32 0.01, %v761_v3  ;;  %16266 = vst [vmem:[#allocation49_spill] sm:$0xff] %v10993_v18  ;;  %v591_v48 = vpop.f32.mrf.mxu2 }
 0x176   :  { %v936_v11 = vadd.f32 %v10693_v54, %v935_v6 }
 0x177   :  { %v1146_v7 = vpop.f32.mrf.mxu1  ;;  %v11001_v17 = vsel %vm784_vm13, %v761_v3, %v800_v26  ;;  %v411_v26 = vadd.f32 %v10693_v54, %v10666_v33  ;;  %v11022_v33 = vsel %vm785_vm3, %v764_v2, %v801_v37 }
 0x178   :  { %1909 = vperm.xlu1 %9216, %v1146_v7   ;;  %8809 = vmatmul.msk.f32.gmra.mxu0 %vm1053_vm6, %v10980_v8  ;;  %v589_v7 = vadd.f32 %v10693_v54, %v588_v23  ;;  %v445_v8 = vmul.f32 0.01, %v408_v59  ;;  %16267 = vst [vmem:[#allocation50_spill] sm:$0xff] %v11001_v17  ;;  %v11006_v23 = vsel %vm960_vm14, %v933_v57, %v976_v24  ;;  %v766_v3 = vpop.f32.mrf.mxu3  ;;  %v977_v6 = vmul.f32 0.01, %v936_v11 }
 0x179   :  { %16268 = vst [vmem:[#allocation51_spill] sm:$0xff] %v11006_v23  ;;  %vm961_vm4 = vcmp.ge.f32.partialorder %v936_v11, 0.0  ;;  %vm430_vm5 = vcmp.ge.f32.partialorder %v411_v26, 0.0  ;;  %vm1811_vm14 = vcmask 7168  }
 0x17a   :  { %8823 = vmatmul.msk.f32.gmra.mxu1 %vm1053_vm6, %v10987_v31  ;;  %v624_v20 = vmul.f32 0.01, %v589_v7  ;;  %vm608_vm0 = vcmp.ge.f32.partialorder %v589_v7, 0.0  ;;  %v11008_v46 = vsel %vm429_vm15, %v408_v59, %v445_v8  ;;  %v767_v8 = vadd.f32 %v10693_v54, %v766_v3  ;;  %16271 = vst [vmem:[#allocation54_spill] sm:$0xff] %v11022_v33 }
 0x17b   :  { %8778 = vmatmul.msk.f32.gmra.mxu2 %vm1053_vm6, %v10991_v39  ;;  %16269 = vst [vmem:[#allocation52_spill] sm:$0xff] %v11008_v46  ;;  %v446_v59 = vmul.f32 0.01, %v411_v26  ;;  %v414_v3 = vadd.f32 %v10693_v54, %v10677_v43  ;;  %vm1828_vm15 = vcmask 15360  }
 0x17c   :  { %vm786_vm8 = vcmp.ge.f32.partialorder %v767_v8, 0.0 }
 0x17d   :  { %v938_v44 = vpop.f32.mrf.mxu0  ;;  %8795 = vmatmul.msk.f32.gmra.mxu3 %vm1053_vm6, %v10993_v18  ;;  %v11014_v18 = vsel %vm608_vm0, %v589_v7, %v624_v20  ;;  %v11033_v2 = vsel %vm430_vm5, %v411_v26, %v446_v59  ;;  %v447_v43 = vmul.f32 0.01, %v414_v3  ;;  %vm431_vm9 = vcmp.ge.f32.partialorder %v414_v3, 0.0 }
 0x17e   :  { %16270 = vst [vmem:[#allocation53_spill] sm:$0xff] %v11014_v18  ;;  %v939_v20 = vadd.f32 %v10693_v54, %v938_v44  ;;  %vm1845_vm0 = vcmask 23552   ;;  %vm2044_vm5 = vcmask 31744  }
 0x17f   :  { %v1149_v28 = vpop.f32.mrf.mxu1  ;;  %16273 = vst [vmem:[#allocation56_spill] sm:$0xff] %v11033_v2 }
 0x180   :  { %1914 = vperm.xlu0 %9217, %v1149_v28   ;;  %8810 = vmatmul.msk.f32.gmra.mxu0 %vm1053_vm6, %v11001_v17  ;;  %v592_v28 = vadd.f32 %v10693_v54, %v591_v48  ;;  %v802_v48 = vmul.f32 0.01, %v767_v8  ;;  %vm962_vm2 = vcmp.ge.f32.partialorder %v939_v20, 0.0 }
 0x182   :  { %8824 = vmatmul.msk.f32.gmra.mxu1 %vm1053_vm6, %v11006_v23  ;;  %v625_v24 = vmul.f32 0.01, %v592_v28  ;;  %vm609_vm7 = vcmp.ge.f32.partialorder %v592_v28, 0.0 }
 0x183   :  { %8779 = vmatmul.msk.f32.gmra.mxu2 %vm1053_vm6, %v11008_v46  ;;  %v11027_v46 = vsel %vm961_vm4, %v936_v11, %v977_v6  ;;  %v11040_v6 = vsel %vm786_vm8, %v767_v8, %v802_v48  ;;  %v11051_v8 = vsel %vm431_vm9, %v414_v3, %v447_v43 }
 0x184   :  { %16272 = vst [vmem:[#allocation55_spill] sm:$0xff] %v11027_v46  ;;  %v11035_v37 = vsel %vm609_vm7, %v592_v28, %v625_v24 }
 0x185   :  { %v941_v57 = vpop.f32.mrf.mxu0  ;;  %8796 = vmatmul.msk.f32.gmra.mxu3 %vm1053_vm6, %v11014_v18  ;;  %16274 = vst [vmem:[#allocation57_spill] sm:$0xff] %v11035_v37  ;;  %v978_v18 = vmul.f32 0.01, %v939_v20 }
 0x186   :  { %16275 = vst [vmem:[#allocation58_spill] sm:$0xff] %v11040_v6  ;;  %v942_v28 = vadd.f32 %v10693_v54, %v941_v57 }
 0x187   :  { %v1152_v7 = vpop.f32.mrf.mxu1  ;;  %v11047_v24 = vsel %vm962_vm2, %v939_v20, %v978_v18  ;;  %16277 = vst [vmem:[#allocation60_spill] sm:$0xff] %v11051_v8 }
 0x188   :  { %1919 = vperm.xlu0 %9217, %v1152_v7   ;;  %8811 = vmatmul.msk.f32.gmra.mxu0 %vm1053_vm6, %v11022_v33  ;;  %v769_v7 = vpop.f32.mrf.mxu3  ;;  %16276 = vst [vmem:[#allocation59_spill] sm:$0xff] %v11047_v24  ;;  %v979_v48 = vmul.f32 0.01, %v942_v28  ;;  %vm963_vm11 = vcmp.ge.f32.partialorder %v942_v28, 0.0 }
 0x189   :  { %v770_v11 = vadd.f32 %v10693_v54, %v769_v7 }
 0x18a   :  { %8825 = vmatmul.msk.f32.gmra.mxu1 %vm1053_vm6, %v11027_v46  ;;  %v11061_v57 = vsel %vm963_vm11, %v942_v28, %v979_v48 }
 0x18b   :  { %8780 = vmatmul.msk.f32.gmra.mxu2 %vm1053_vm6, %v11033_v2  ;;  %v803_v59 = vmul.f32 0.01, %v770_v11  ;;  %vm787_vm10 = vcmp.ge.f32.partialorder %v770_v11, 0.0  ;;  %16279 = vst [vmem:[#allocation62_spill] sm:$0xff] %v11061_v57 }
 0x18d   :  { %v944_v44 = vpop.f32.mrf.mxu0  ;;  %8797 = vmatmul.msk.f32.gmra.mxu3 %vm1053_vm6, %v11035_v37 }
 0x18e   :  { %v945_v18 = vadd.f32 %v10693_v54, %v944_v44 }
 0x18f   :  { %v1155_v26 = vpop.f32.mrf.mxu1 }
 0x190   :  { %1924 = vperm.xlu2 %9215, %v1155_v26   ;;  %8812 = vmatmul.msk.f32.gmra.mxu0 %vm1053_vm6, %v11040_v6  ;;  %v11055_v26 = vsel %vm787_vm10, %v770_v11, %v803_v59  ;;  %v980_v20 = vmul.f32 0.01, %v945_v18  ;;  %vm964_vm12 = vcmp.ge.f32.partialorder %v945_v18, 0.0 }
 0x191   :  { %16278 = vst [vmem:[#allocation61_spill] sm:$0xff] %v11055_v26 }
 0x192   :  { %8826 = vmatmul.msk.f32.gmra.mxu1 %vm1053_vm6, %v11047_v24  ;;  %v11068_v44 = vsel %vm964_vm12, %v945_v18, %v980_v20 }
 0x193   :  { %8781 = vmatmul.msk.f32.gmra.mxu2 %vm1053_vm6, %v11051_v8  ;;  %16280 = vst [vmem:[#allocation63_spill] sm:$0xff] %v11068_v44 }
 0x195   :  { %v947_v7 = vpop.f32.mrf.mxu0 }
 0x197   :  { %v1158_v37 = vpop.f32.mrf.mxu1 }
 0x198   :  { %v1345_v6 = vpop.f32.mrf.mxu3  ;;  %1929 = vperm.xlu1 %9216, %v1158_v37   ;;  %8813 = vmatmul.msk.f32.gmra.mxu0 %vm1053_vm6, %v11055_v26  ;;  %v948_v37 = vadd.f32 %v10693_v54, %v947_v7 }
 0x199   :  { %1635 = vrot.lane.b32.xlu0 %v1345_v6, %s15991_s13 }
 0x19a   :  { %8827 = vmatmul.msk.f32.gmra.mxu1 %vm1053_vm6, %v11061_v57  ;;  %v981_v6 = vmul.f32 0.01, %v948_v37  ;;  %vm965_vm13 = vcmp.ge.f32.partialorder %v948_v37, 0.0 }
 0x19c   :  { %v11072_v26 = vsel %vm965_vm13, %v948_v37, %v981_v6 }
 0x19d   :  { %v1458_v3 = vpop.f32.mrf.mxu0  ;;  %16281 = vst [vmem:[#allocation64_spill] sm:$0xff] %v11072_v26 }
 0x19f   :  { %v1161_v11 = vpop.f32.mrf.mxu1 }
 0x1a0   :  { %v1348_v43 = vpop.f32.mrf.mxu3 }
 0x1a1   :  { %1699 = vrot.lane.b32.xlu0 %v1458_v3, %s15989_s12  ;;  %1637 = vrot.lane.b32.xlu2 %v1348_v43, %s15991_s13 }
 0x1a2   :  { %8828 = vmatmul.msk.f32.gmra.mxu1 %vm1053_vm6, %v11068_v44 }
 0x1a5   :  { %v1461_v28 = vpop.f32.mrf.mxu0 }
 0x1a7   :  { %v1164_v59 = vpop.f32.mrf.mxu1 }
 0x1a8   :  { %v1351_v48 = vpop.f32.mrf.mxu3  ;;  %1939 = vperm.xlu1 %9216, %v1164_v59  }
 0x1a9   :  { %1934 = vperm.xlu0 %9217, %v1161_v11  }
 0x1aa   :  { %8829 = vmatmul.msk.f32.gmra.mxu1 %vm1053_vm6, %v11072_v26 }
 0x1ad   :  { %v1464_v54 = vpop.f32.mrf.mxu0 }
 0x1af   :  { %v1571_v7 = vpop.f32.mrf.mxu1 }
 0x1b0   :  { %v1354_v3 = vpop.f32.mrf.mxu3  ;;  %1703 = vrot.lane.b32.xlu1 %v1464_v54, %s15989_s12 }
 0x1b1   :  { %1701 = vrot.lane.b32.xlu0 %v1461_v28, %s15989_s12  ;;  %v11084_v28 = vpop.permute.xlu2 %1961 }
 0x1b5   :  { %v1467_v18 = vpop.f32.mrf.mxu0 }
 0x1b6   :  { %1705 = vrot.lane.b32.xlu2 %v1467_v18, %s15989_s12 }
 0x1b7   :  { %v1574_v20 = vpop.f32.mrf.mxu1 }
 0x1b8   :  { %1763 = vrot.lane.b32.xlu1 %v1571_v7, %s15987_s15  ;;  %v1357_v11 = vpop.f32.mrf.mxu3 }
 0x1b9   :  { %1639 = vrot.lane.b32.xlu0 %v1351_v48, %s15991_s13  ;;  %v11088_v48 = vpop.permute.xlu2 %2897 }
 0x1ba   :  { %16282 = vst [vmem:[#allocation65_spill] sm:$0xff] %v11088_v48 }
 0x1bd   :  { %v1470_v43 = vpop.f32.mrf.mxu0 }
 0x1bf   :  { %v1577_v37 = vpop.f32.mrf.mxu1 }
 0x1c0   :  { %1641 = vrot.lane.b32.xlu1 %v1354_v3, %s15991_s13  ;;  %1767 = vrot.lane.b32.xlu2 %v1577_v37, %s15987_s15  ;;  %v1360_v6 = vpop.f32.mrf.mxu3 }
 0x1c1   :  { %1643 = vrot.lane.b32.xlu0 %v1357_v11, %s15991_s13  ;;  %v11093_v26 = vpop.permute.xlu2 %1869 }
 0x1c5   :  { %v1473_v59 = vpop.f32.mrf.mxu0 }
 0x1c7   :  { %v1580_v54 = vpop.f32.mrf.mxu1 }
 0x1c8   :  { %1765 = vrot.lane.b32.xlu1 %v1574_v20, %s15987_s15  ;;  %1709 = vrot.lane.b32.xlu2 %v1473_v59, %s15989_s12  ;;  %v1363_v7 = vpop.f32.mrf.mxu3 }
 0x1c9   :  { %v11098_v44 = vpop.permute.xlu2 %1879 }
 0x1cd   :  { %v1476_v18 = vpop.f32.mrf.mxu0 }
 0x1ce   :  { %1711 = vrot.lane.b32.xlu0 %v1476_v18, %s15989_s12 }
 0x1cf   :  { %v1583_v3 = vpop.f32.mrf.mxu1 }
 0x1d0   :  { %1707 = vrot.lane.b32.xlu1 %v1470_v43, %s15989_s12  ;;  %1647 = vrot.lane.b32.xlu2 %v1363_v7, %s15991_s13  ;;  %v1366_v11 = vpop.f32.mrf.mxu3  ;;  %v11102_v7 = vpop.permute.xlu0 %2901 }
 0x1d1   :  { %16283 = vst [vmem:[#allocation66_spill] sm:$0xff] %v11102_v7  ;;  %v11104_v57 = vpop.permute.xlu2 %1894 }
 0x1d5   :  { %v1479_v37 = vpop.f32.mrf.mxu0 }
 0x1d7   :  { %v1586_v8 = vpop.f32.mrf.mxu1 }
 0x1d8   :  { %1645 = vrot.lane.b32.xlu1 %v1360_v6, %s15991_s13  ;;  %1771 = vrot.lane.b32.xlu2 %v1583_v3, %s15987_s15  ;;  %v1369_v20 = vpop.f32.mrf.mxu3  ;;  %v11109_v3 = vpop.permute.xlu0 %1874 }
 0x1d9   :  { %1773 = vrot.lane.b32.xlu0 %v1586_v8, %s15987_s15 }
 0x1dd   :  { %v1482_v59 = vpop.f32.mrf.mxu0 }
 0x1df   :  { %v1589_v18 = vpop.f32.mrf.mxu1 }
 0x1e0   :  { %1769 = vrot.lane.b32.xlu1 %v1580_v54, %s15987_s15  ;;  %1713 = vrot.lane.b32.xlu2 %v1479_v37, %s15989_s12  ;;  %v1372_v43 = vpop.f32.mrf.mxu3  ;;  %v11112_v37 = vpop.permute.xlu2 %1899 }
 0x1e1   :  { %v11118_v17 = vpop.permute.xlu0 %1884 }
 0x1e5   :  { %v1485_v2 = vpop.f32.mrf.mxu0 }
 0x1e6   :  { %1717 = vrot.lane.b32.xlu0 %v1485_v2, %s15989_s12  ;;  %v11116_v2 = vpop.permute.xlu1 %2899 }
 0x1e7   :  { %v1592_v6 = vpop.f32.mrf.mxu1  ;;  %16284 = vst [vmem:[#allocation67_spill] sm:$0xff] %v11116_v2 }
 0x1e8   :  { %1649 = vrot.lane.b32.xlu1 %v1366_v11, %s15991_s13  ;;  %1651 = vrot.lane.b32.xlu2 %v1369_v20, %s15991_s13  ;;  %v1375_v8 = vpop.f32.mrf.mxu3 }
 0x1ed   :  { %v1488_v33 = vpop.f32.mrf.mxu0 }
 0x1ee   :  { %1655 = vrot.lane.b32.xlu0 %v1375_v8, %s15991_s13  ;;  %v11123_v39 = vpop.permute.xlu1 %1864 }
 0x1ef   :  { %v1595_v54 = vpop.f32.mrf.mxu1 }
 0x1f0   :  { %1715 = vrot.lane.b32.xlu2 %v1482_v59, %s15989_s12  ;;  %1775 = vrot.lane.b32.xlu1 %v1589_v18, %s15987_s15  ;;  %v1378_v24 = vpop.f32.mrf.mxu3  ;;  %v11127_v59 = vpop.permute.xlu2 %1904 }
 0x1f1   :  { %v11129_v18 = vpop.f32.mrf.mxu2 }
 0x1f2   :  { %v11125_v46 = vpop.permute.xlu0 %1914 }
 0x1f5   :  { %v1491_v11 = vpop.f32.mrf.mxu0 }
 0x1f6   :  { %1719 = vrot.lane.b32.xlu0 %v1488_v33, %s15989_s12  ;;  %v11134_v33 = vpop.permute.xlu1 %1889 }
 0x1f7   :  { %v1598_v20 = vpop.f32.mrf.mxu1 }
 0x1f8   :  { %1653 = vrot.lane.b32.xlu2 %v1372_v43, %s15991_s13  ;;  %1777 = vrot.lane.b32.xlu1 %v1592_v6, %s15987_s15  ;;  %v1381_v8 = vpop.f32.mrf.mxu3  ;;  %v11136_v6 = vpop.permute.xlu2 %1924 }
 0x1f9   :  { %v1235_v62 = vpop.f32.mrf.mxu2 }
 0x1fa   :  { %v11138_v36 = vpop.permute.xlu0 %1919 }
 0x1fd   :  { %v1494_v23 = vpop.f32.mrf.mxu0 }
 0x1fe   :  { %1657 = vrot.lane.b32.xlu0 %v1378_v24, %s15991_s13  ;;  %v11143_v24 = vpop.permute.xlu1 %1909 }
 0x1ff   :  { %v1601_v31 = vpop.f32.mrf.mxu1 }
 0x200   :  { %1723 = vrot.lane.b32.xlu1 %v1494_v23, %s15989_s12  ;;  %1779 = vrot.lane.b32.xlu2 %v1595_v54, %s15987_s15  ;;  %v1384_v43 = vpop.f32.mrf.mxu3  ;;  %v1638_v23 = vpop.permute.xlu2 %1637 }
 0x201   :  { %v1238_v16 = vpop.f32.mrf.mxu2  ;;  %v1813_v38 = vsel %vm1811_vm14, %v1235_v62, %v1638_v23 }
 0x205   :  { %v1497_v40 = vpop.f32.mrf.mxu0 }
 0x206   :  { %1721 = vrot.lane.b32.xlu0 %v1491_v11, %s15989_s12 }
 0x207   :  { %v1604_v0 = vpop.f32.mrf.mxu1 }
 0x208   :  { %1781 = vrot.lane.b32.xlu2 %v1598_v20, %s15987_s15  ;;  %1783 = vrot.lane.b32.xlu1 %v1601_v31, %s15987_s15  ;;  %v1387_v15 = vpop.f32.mrf.mxu3 }
 0x20a   :  { %v11148_v11 = vpop.permute.xlu1 %1929 }
 0x20b   :  { %v1636_v54 = vpop.permute.xlu0 %1635 }
 0x20d   :  { %v1500_v31 = vpop.f32.mrf.mxu0 }
 0x20e   :  { %1663 = vrot.lane.b32.xlu0 %v1387_v15, %s15991_s13  ;;  %v11155_v15 = vpop.f32.mrf.mxu2 }
 0x20f   :  { %v1607_v56 = vpop.f32.mrf.mxu1 }
 0x210   :  { %1659 = vrot.lane.b32.xlu2 %v1381_v8, %s15991_s13  ;;  %1661 = vrot.lane.b32.xlu1 %v1384_v43, %s15991_s13  ;;  %v11150_v4 = vpop.permute.xlu2 %1705  ;;  %v1390_v43 = vpop.f32.mrf.mxu3 }
 0x213   :  { %v1700_v20 = vpop.permute.xlu0 %1699 }
 0x215   :  { %v1503_v14 = vpop.f32.mrf.mxu0 }
 0x216   :  { %1727 = vrot.lane.b32.xlu0 %v1500_v31, %s15989_s12 }
 0x217   :  { %v1610_v7 = vpop.f32.mrf.mxu1 }
 0x218   :  { %1725 = vrot.lane.b32.xlu1 %v1497_v40, %s15989_s12  ;;  %1785 = vrot.lane.b32.xlu2 %v1604_v0, %s15987_s15  ;;  %v1244_v40 = vpop.f32.mrf.mxu2 }
 0x21a   :  { %v11157_v35 = vpop.permute.xlu1 %1939  ;;  %v1768_v8 = vpop.permute.xlu2 %1767 }
 0x21b   :  { %v11159_v52 = vpop.permute.xlu0 %1934 }
 0x21e   :  { %1789 = vrot.lane.b32.xlu0 %v1610_v7, %s15987_s15 }
 0x21f   :  { %v1613_v45 = vpop.f32.mrf.mxu1 }
 0x220   :  { %1665 = vrot.lane.b32.xlu1 %v1390_v43, %s15991_s13  ;;  %1787 = vrot.lane.b32.xlu2 %v1607_v56, %s15987_s15  ;;  %v1247_v7 = vpop.f32.mrf.mxu2 }
 0x222   :  { %v1704_v31 = vpop.permute.xlu1 %1703  ;;  %v1710_v27 = vpop.permute.xlu2 %1709 }
 0x223   :  { %v1702_v0 = vpop.permute.xlu0 %1701 }
 0x227   :  { %v1616_v61 = vpop.f32.mrf.mxu1 }
 0x228   :  { %1729 = vrot.lane.b32.xlu1 %v1503_v14, %s15989_s12  ;;  %1791 = vrot.lane.b32.xlu2 %v1613_v45, %s15987_s15  ;;  %v11169_v56 = vpop.f32.mrf.mxu2  ;;  %v1812_v14 = vsel %vm1811_vm14, %v11129_v18, %v1636_v54  ;;  %v1830_v45 = vsel %vm1828_vm15, %v1813_v38, %v1702_v0 }
 0x229   :  { %1793 = vrot.lane.b32.xlu0 %v1616_v61, %s15987_s15  ;;  %v1829_v29 = vsel %vm1828_vm15, %v1812_v14, %v1700_v20  ;;  %s16016_s15 = smov 64  }
 0x22a   :  { %v1764_v42 = vpop.permute.xlu1 %1763  ;;  %v11167_v1 = vpop.permute.xlu2 %1647 }
 0x22b   :  { %v1640_v32 = vpop.permute.xlu0 %1639  ;;  %v1846_v2 = vsel %vm1845_vm0, %v1829_v29, %v1764_v42 }
 0x22c   :  { %v1814_v48 = vsel %vm1811_vm14, %v1238_v16, %v1640_v32  ;;  %v1942_v23 = vadd.f32 %v11123_v39, %v1846_v2 }
 0x22d   :  { %v1831_v38 = vsel %vm1828_vm15, %v1814_v48, %v1704_v31 }
 0x22e   :  { %v1964_v14 = vadd.f32 %v11084_v28, %v1942_v23  ;;  %v1848_v16 = vsel %vm1845_vm0, %v1831_v38, %v1768_v8  ;;  %v1015_v8 = vld [vmem:[%s16285_s14 + $0x8] sm:$0xff] }
 0x230   :  { %v11183_v13 = vpop.f32.mrf.mxu2  ;;  %vm1980_vm4 = vcmp.ge.f32.partialorder %v1964_v14, 0.0 }
 0x232   :  { %v1642_v43 = vpop.permute.xlu1 %1641  ;;  %v1772_v10 = vpop.permute.xlu2 %1771 }
 0x233   :  { %v1644_v5 = vpop.permute.xlu0 %1643 }
 0x234   :  { %v1816_v18 = vsel %vm1811_vm14, %v1244_v40, %v1644_v5  ;;  %v1996_v5 = vmul.f32 0.01, %v1964_v14 }
 0x23a   :  { %v1766_v61 = vpop.permute.xlu1 %1765  ;;  %v11175_v49 = vpop.permute.xlu2 %1713 }
 0x23b   :  { %v1847_v58 = vsel %vm1845_vm0, %v1830_v45, %v1766_v61  ;;  %v1256_v45 = vpop.f32.mrf.mxu2 }
 0x23c   :  { %v1943_v62 = vadd.f32 %v11093_v26, %v1847_v58  ;;  %v1944_v26 = vadd.f32 %v11109_v3, %v1848_v16  ;;  %v2012_v3 = vsel %vm1980_vm4, %v1964_v14, %v1996_v5 }
 0x23e   :  { %v1965_v54 = vadd.f32 %v11084_v28, %v1943_v62  ;;  %v1966_v61 = vadd.f32 %v11084_v28, %v1944_v26 }
 0x240   :  { %v11191_v29 = vpop.permute.xlu0 %1711  ;;  %v1997_v39 = vmul.f32 0.01, %v1965_v54  ;;  %vm1981_vm3 = vcmp.ge.f32.partialorder %v1965_v54, 0.0  ;;  %v1998_v14 = vmul.f32 0.01, %v1966_v61  ;;  %vm1982_vm8 = vcmp.ge.f32.partialorder %v1966_v61, 0.0 }
 0x242   :  { %v1708_v20 = vpop.permute.xlu1 %1707  ;;  %v1652_v0 = vpop.permute.xlu2 %1651  ;;  %v2013_v40 = vsel %vm1981_vm3, %v1965_v54, %v1997_v39  ;;  %v2014_v5 = vsel %vm1982_vm8, %v1966_v61, %v1998_v14 }
 0x243   :  { %v1833_v42 = vsel %vm1828_vm15, %v1816_v18, %v1708_v20  ;;  %v11207_v18 = vadd.f32 %v2013_v40, %v1015_v8  ;;  %v1259_v8 = vpop.f32.mrf.mxu2  ;;  %v1820_v61 = vsel %vm1811_vm14, %v1256_v45, %v1652_v0  ;;  %v1019_v0 = vld [vmem:[%s16285_s14 + $0x28] sm:$0xff] }
 0x244   :  { %v1850_v58 = vsel %vm1845_vm0, %v1833_v42, %v1772_v10 }
 0x245   :  { %v1946_v32 = vadd.f32 %v11118_v17, %v1850_v58  ;;  %v1014_v17 = vld [vmem:[%s16285_s14] sm:$0xff] }
 0x246   :  { %v11209_v20 = vadd.f32 %v2012_v3, %v1014_v17 }
 0x247   :  { %v1968_v48 = vadd.f32 %v11084_v28, %v1946_v32 }
 0x248   :  { %v2045_v39 = vsel %vm2044_vm5, %v11209_v20, -inf }
 0x249   :  { %v2000_v54 = vmul.f32 0.01, %v1968_v48  ;;  %vm1984_vm7 = vcmp.ge.f32.partialorder %v1968_v48, 0.0 }
 0x24a   :  { %v1646_v2 = vpop.permute.xlu1 %1645  ;;  %v1716_v31 = vpop.permute.xlu2 %1715 }
 0x24b   :  { %v1817_v10 = vsel %vm1811_vm14, %v1247_v7, %v1646_v2  ;;  %v1774_v23 = vpop.permute.xlu0 %1773  ;;  %v1815_v7 = vsel %vm1811_vm14, %v11155_v15, %v1642_v43  ;;  %v1018_v15 = vld [vmem:[%s16285_s14 + $0x20] sm:$0xff] }
 0x24c   :  { %v1834_v62 = vsel %vm1828_vm15, %v1817_v10, %v1710_v27  ;;  %v2048_v27 = vsel %vm2044_vm5, %v11207_v18, -inf  ;;  %v1832_v16 = vsel %vm1828_vm15, %v1815_v7, %v11150_v4  ;;  %v1016_v4 = vld [vmem:[%s16285_s14 + $0x10] sm:$0xff] }
 0x24d   :  { %v1851_v38 = vsel %vm1845_vm0, %v1834_v62, %v1774_v23  ;;  %v11232_v17 = vadd.f32 %v2014_v5, %v1016_v4  ;;  %v1017_v62 = vld [vmem:[%s16285_s14 + $0x18] sm:$0xff]  ;;  %v1818_v5 = vsel %vm1811_vm14, %v11169_v56, %v11167_v1 }
 0x24e   :  { %v1947_v42 = vadd.f32 %v11134_v33, %v1851_v38  ;;  %v2016_v33 = vsel %vm1984_vm7, %v1968_v48, %v2000_v54  ;;  %v1837_v38 = vsel %vm1828_vm15, %v1820_v61, %v1716_v31 }
 0x24f   :  { %v11229_v40 = vadd.f32 %v2016_v33, %v1018_v15  ;;  %v1262_v33 = vpop.f32.mrf.mxu2 }
 0x250   :  { %v1969_v43 = vadd.f32 %v11084_v28, %v1947_v42  ;;  %v2051_v42 = vsel %vm2044_vm5, %v11232_v17, -inf }
 0x252   :  { %v1770_v58 = vpop.permute.xlu1 %1769  ;;  %v1654_v32 = vpop.permute.xlu2 %1653  ;;  %2049 = vmax.xlane.f32.xlu1 %v2048_v27  ;;  %v2001_v48 = vmul.f32 0.01, %v1969_v43  ;;  %vm1985_vm9 = vcmp.ge.f32.partialorder %v1969_v43, 0.0 }
 0x253   :  { %v1849_v26 = vsel %vm1845_vm0, %v1832_v16, %v1770_v58  ;;  %2046 = vmax.xlane.f32.xlu0 %v2045_v39  ;;  %v1821_v1 = vsel %vm1811_vm14, %v1259_v8, %v1654_v32 }
 0x254   :  { %v1945_v2 = vadd.f32 %v11098_v44, %v1849_v26  ;;  %v2057_v44 = vsel %vm2044_vm5, %v11229_v40, -inf  ;;  %v2017_v45 = vsel %vm1985_vm9, %v1969_v43, %v2001_v48  ;;  %v1835_v43 = vsel %vm1828_vm15, %v1818_v5, %v11191_v29  ;;  %v1021_v5 = vld [vmem:[%s16285_s14 + $0x38] sm:$0xff] }
 0x255   :  { %v11253_v15 = vadd.f32 %v2017_v45, %v1019_v0 }
 0x256   :  { %v1967_v10 = vadd.f32 %v11084_v28, %v1945_v2 }
 0x258   :  { %v1718_v3 = vpop.permute.xlu0 %1717  ;;  %vm1983_vm2 = vcmp.ge.f32.partialorder %v1967_v10, 0.0  ;;  %v1999_v23 = vmul.f32 0.01, %v1967_v10 }
 0x259   :  { %v1838_v56 = vsel %vm1828_vm15, %v1821_v1, %v1718_v3 }
 0x25a   :  { %v1650_v54 = vpop.permute.xlu1 %1649  ;;  %v1780_v7 = vpop.permute.xlu2 %1779  ;;  %2058 = vmax.xlane.f32.xlu1 %v2057_v44  ;;  %v2015_v14 = vsel %vm1983_vm2, %v1967_v10, %v1999_v23  ;;  %v2060_v10 = vsel %vm2044_vm5, %v11253_v15, -inf }
 0x25b   :  { %v1854_v27 = vsel %vm1845_vm0, %v1837_v38, %v1780_v7  ;;  %2052 = vmax.xlane.f32.xlu0 %v2051_v42  ;;  %v11244_v16 = vadd.f32 %v2015_v14, %v1017_v62  ;;  %v1022_v62 = vld [vmem:[%s16285_s14 + $0x40] sm:$0xff]  ;;  %v1819_v38 = vsel %vm1811_vm14, %v11183_v13, %v1650_v54  ;;  %v1020_v14 = vld [vmem:[%s16285_s14 + $0x30] sm:$0xff] }
 0x25c   :  { %v1950_v58 = vadd.f32 %v11127_v59, %v1854_v27  ;;  %v1265_v27 = vpop.f32.mrf.mxu2  ;;  %v1836_v8 = vsel %vm1828_vm15, %v1819_v38, %v11175_v49 }
 0x25d   :  { %v2054_v31 = vsel %vm2044_vm5, %v11244_v16, -inf }
 0x25e   :  { %v1972_v39 = vadd.f32 %v11084_v28, %v1950_v58  ;;  %2055 = vmax.xlane.f32.xlu2 %v2054_v31 }
 0x260   :  { %v1656_v26 = vpop.permute.xlu0 %1655  ;;  %vm1988_vm10 = vcmp.ge.f32.partialorder %v1972_v39, 0.0  ;;  %v2004_v4 = vmul.f32 0.01, %v1972_v39 }
 0x261   :  { %v1822_v38 = vsel %vm1811_vm14, %v1262_v33, %v1656_v26 }
 0x262   :  { %v1776_v59 = vpop.permute.xlu1 %1775  ;;  %v1782_v2 = vpop.permute.xlu2 %1781  ;;  %v2020_v23 = vsel %vm1988_vm10, %v1972_v39, %v2004_v4 }
 0x263   :  { %v1852_v48 = vsel %vm1845_vm0, %v1835_v43, %v1776_v59  ;;  %2061 = vmax.xlane.f32.xlu0 %v2060_v10  ;;  %v11270_v44 = vadd.f32 %v2020_v23, %v1022_v62  ;;  %v1855_v7 = vsel %vm1845_vm0, %v1838_v56, %v1782_v2 }
 0x264   :  { %v1948_v61 = vadd.f32 %v11104_v57, %v1852_v48  ;;  %v1951_v32 = vadd.f32 %v11143_v24, %v1855_v7 }
 0x265   :  { %v2069_v13 = vsel %vm2044_vm5, %v11270_v44, -inf }
 0x266   :  { %v1970_v29 = vadd.f32 %v11084_v28, %v1948_v61  ;;  %v1973_v24 = vadd.f32 %v11084_v28, %v1951_v32  ;;  %v1023_v61 = vld [vmem:[%s16285_s14 + $0x48] sm:$0xff] }
 0x268   :  { %v1720_v42 = vpop.permute.xlu0 %1719  ;;  %vm1986_vm11 = vcmp.ge.f32.partialorder %v1970_v29, 0.0  ;;  %v2002_v57 = vmul.f32 0.01, %v1970_v29  ;;  %v2005_v48 = vmul.f32 0.01, %v1973_v24  ;;  %vm1989_vm13 = vcmp.ge.f32.partialorder %v1973_v24, 0.0 }
 0x269   :  { %v1839_v32 = vsel %vm1828_vm15, %v1822_v38, %v1720_v42 }
 0x26a   :  { %v1778_v3 = vpop.permute.xlu1 %1777  ;;  %v1660_v0 = vpop.permute.xlu2 %1659  ;;  %v2018_v54 = vsel %vm1986_vm11, %v1970_v29, %v2002_v57  ;;  %v2021_v1 = vsel %vm1989_vm13, %v1973_v24, %v2005_v48  ;;  %vm2964_vm11 = vcmask 523264  }
 0x26b   :  { %v1853_v45 = vsel %vm1845_vm0, %v1836_v8, %v1778_v3  ;;  %2070 = vmax.xlane.f32.xlu0 %v2069_v13  ;;  %v11284_v58 = vadd.f32 %v2018_v54, %v1020_v14  ;;  %v11305_v57 = vadd.f32 %v2021_v1, %v1023_v61  ;;  %v1026_v1 = vld [vmem:[%s16285_s14 + $0x60] sm:$0xff] }
 0x26c   :  { %v1949_v31 = vadd.f32 %v11112_v37, %v1853_v45  ;;  %v1268_v37 = vpop.f32.mrf.mxu2 }
 0x26d   :  { %v2063_v39 = vsel %vm2044_vm5, %v11284_v58, -inf  ;;  %v1824_v7 = vsel %vm1811_vm14, %v1268_v37, %v1660_v0  ;;  %v2072_v42 = vsel %vm2044_vm5, %v11305_v57, -inf }
 0x26e   :  { %v1971_v49 = vadd.f32 %v11084_v28, %v1949_v31  ;;  %2064 = vmax.xlane.f32.xlu2 %v2063_v39 }
 0x270   :  { %v1658_v4 = vpop.permute.xlu0 %1657  ;;  %vm1987_vm12 = vcmp.ge.f32.partialorder %v1971_v49, 0.0  ;;  %v2003_v43 = vmul.f32 0.01, %v1971_v49 }
 0x271   :  { %v1823_v56 = vsel %vm1811_vm14, %v1265_v27, %v1658_v4 }
 0x272   :  { %v1724_v59 = vpop.permute.xlu1 %1723  ;;  %v1786_v2 = vpop.permute.xlu2 %1785  ;;  %v2019_v10 = vsel %vm1987_vm12, %v1971_v49, %v2003_v43 }
 0x273   :  { %v11294_v62 = vadd.f32 %v2019_v10, %v1021_v5  ;;  %v1841_v8 = vsel %vm1828_vm15, %v1824_v7, %v1724_v59 }
 0x274   :  { %v1271_v31 = vpop.f32.mrf.mxu2 }
 0x275   :  { %v2066_v23 = vsel %vm2044_vm5, %v11294_v62, -inf }
 0x276   :  { %2067 = vmax.xlane.f32.xlu1 %v2066_v23 }
 0x278   :  { %v1722_v29 = vpop.permute.xlu0 %1721 }
 0x279   :  { %v1840_v14 = vsel %vm1828_vm15, %v1823_v56, %v1722_v29 }
 0x27a   :  { %v1857_v3 = vsel %vm1845_vm0, %v1840_v14, %v1786_v2  ;;  %v1784_v13 = vpop.permute.xlu1 %1783  ;;  %v1788_v54 = vpop.permute.xlu2 %1787 }
 0x27b   :  { %v1953_v45 = vadd.f32 %v11138_v36, %v1857_v3  ;;  %v1856_v27 = vsel %vm1845_vm0, %v1839_v32, %v1784_v13  ;;  %v1858_v33 = vsel %vm1845_vm0, %v1841_v8, %v1788_v54  ;;  %v1025_v36 = vld [vmem:[%s16285_s14 + $0x58] sm:$0xff] }
 0x27c   :  { %v1952_v26 = vadd.f32 %v11125_v46, %v1856_v27  ;;  %v1954_v0 = vadd.f32 %v11136_v6, %v1858_v33  ;;  %v1024_v6 = vld [vmem:[%s16285_s14 + $0x50] sm:$0xff]  ;;  %v1274_v29 = vpop.f32.mrf.mxu2 }
 0x27d   :  { %v1975_v39 = vadd.f32 %v11084_v28, %v1953_v45 }
 0x27e   :  { %v1974_v24 = vadd.f32 %v11084_v28, %v1952_v26  ;;  %v1976_v49 = vadd.f32 %v11084_v28, %v1954_v0  ;;  %2073 = vmax.xlane.f32.xlu1 %v2072_v42  ;;  %v1028_v26 = vld [vmem:[%s16285_s14 + $0x70] sm:$0xff] }
 0x27f   :  { %vm1991_vm3 = vcmp.ge.f32.partialorder %v1975_v39, 0.0  ;;  %v2007_v4 = vmul.f32 0.01, %v1975_v39 }
 0x280   :  { %v1664_v46 = vpop.permute.xlu0 %1663  ;;  %vm1990_vm4 = vcmp.ge.f32.partialorder %v1974_v24, 0.0  ;;  %v2006_v5 = vmul.f32 0.01, %v1974_v24  ;;  %v2008_v59 = vmul.f32 0.01, %v1976_v49  ;;  %vm1992_vm7 = vcmp.ge.f32.partialorder %v1976_v49, 0.0 }
 0x281   :  { %v2023_v43 = vsel %vm1991_vm3, %v1975_v39, %v2007_v4  ;;  %v1826_v38 = vsel %vm1811_vm14, %v1274_v29, %v1664_v46 }
 0x282   :  { %v1662_v2 = vpop.permute.xlu1 %1661  ;;  %v11326_v10 = vadd.f32 %v2023_v43, %v1025_v36  ;;  %v2022_v48 = vsel %vm1990_vm4, %v1974_v24, %v2006_v5  ;;  %v2024_v56 = vsel %vm1992_vm7, %v1976_v49, %v2008_v59  ;;  %v1792_v32 = vpop.permute.xlu2 %1791 }
 0x283   :  { %v11328_v37 = vadd.f32 %v2022_v48, %v1024_v6  ;;  %v11338_v14 = vadd.f32 %v2024_v56, %v1026_v1  ;;  %v1825_v33 = vsel %vm1811_vm14, %v1271_v31, %v1662_v2  ;;  %v1027_v6 = vld [vmem:[%s16285_s14 + $0x68] sm:$0xff] }
 0x284   :  { %v2078_v23 = vsel %vm2044_vm5, %v11326_v10, -inf  ;;  %v1277_v59 = vpop.f32.mrf.mxu2 }
 0x285   :  { %2079 = vmax.xlane.f32.xlu2 %v2078_v23  ;;  %v2075_v61 = vsel %vm2044_vm5, %v11328_v37, -inf  ;;  %v2081_v45 = vsel %vm2044_vm5, %v11338_v14, -inf }
 0x286   :  { %2076 = vmax.xlane.f32.xlu0 %v2075_v61 }
 0x288   :  { %v1728_v7 = vpop.permute.xlu0 %1727 }
 0x289   :  { %v1843_v8 = vsel %vm1828_vm15, %v1826_v38, %v1728_v7  ;;  %v1029_v7 = vld [vmem:[%s16285_s14 + $0x78] sm:$0xff] }
 0x28a   :  { %v1860_v3 = vsel %vm1845_vm0, %v1843_v8, %v1792_v32  ;;  %v1726_v13 = vpop.permute.xlu1 %1725 }
 0x28b   :  { %v1956_v54 = vadd.f32 %v11159_v52, %v1860_v3  ;;  %v1842_v39 = vsel %vm1828_vm15, %v1825_v33, %v1726_v13 }
 0x28d   :  { %v1978_v27 = vadd.f32 %v11084_v28, %v1956_v54  ;;  %2082 = vmax.xlane.f32.xlu2 %v2081_v45 }
 0x28f   :  { %vm1994_vm8 = vcmp.ge.f32.partialorder %v1978_v27, 0.0  ;;  %v2010_v0 = vmul.f32 0.01, %v1978_v27 }
 0x290   :  { %v1790_v42 = vpop.permute.xlu0 %1789 }
 0x291   :  { %v1859_v24 = vsel %vm1845_vm0, %v1842_v39, %v1790_v42  ;;  %v2026_v52 = vsel %vm1994_vm8, %v1978_v27, %v2010_v0 }
 0x292   :  { %v1955_v49 = vadd.f32 %v11148_v11, %v1859_v24  ;;  %v1666_v36 = vpop.permute.xlu1 %1665  ;;  %v11353_v4 = vadd.f32 %v2026_v52, %v1028_v26 }
 0x293   :  { %v1827_v11 = vsel %vm1811_vm14, %v1277_v59, %v1666_v36 }
 0x294   :  { %v1977_v46 = vadd.f32 %v11084_v28, %v1955_v49  ;;  %v2087_v31 = vsel %vm2044_vm5, %v11353_v4, -inf }
 0x295   :  { %2088 = vmax.xlane.f32.xlu1 %v2087_v31 }
 0x296   :  { %vm1993_vm2 = vcmp.ge.f32.partialorder %v1977_v46, 0.0  ;;  %v2009_v5 = vmul.f32 0.01, %v1977_v46 }
 0x298   :  { %v2025_v43 = vsel %vm1993_vm2, %v1977_v46, %v2009_v5 }
 0x299   :  { %v11361_v2 = vadd.f32 %v2025_v43, %v1027_v6 }
 0x29a   :  { %v1730_v48 = vpop.permute.xlu1 %1729 }
 0x29b   :  { %v1844_v23 = vsel %vm1828_vm15, %v1827_v11, %v1730_v48  ;;  %v1794_v61 = vpop.permute.xlu0 %1793  ;;  %v2084_v1 = vsel %vm2044_vm5, %v11361_v2, -inf }
 0x29c   :  { %v1861_v56 = vsel %vm1845_vm0, %v1844_v23, %v1794_v61  ;;  %2085 = vmax.xlane.f32.xlu0 %v2084_v1 }
 0x29d   :  { %v1957_v29 = vadd.f32 %v11157_v35, %v1861_v56 }
 0x29f   :  { %v1979_v38 = vadd.f32 %v11084_v28, %v1957_v29 }
 0x2a1   :  { %vm1995_vm9 = vcmp.ge.f32.partialorder %v1979_v38, 0.0  ;;  %v2011_v32 = vmul.f32 0.01, %v1979_v38 }
 0x2a3   :  { %v2027_v8 = vsel %vm1995_vm9, %v1979_v38, %v2011_v32 }
 0x2a4   :  { %v11373_v3 = vadd.f32 %v2027_v8, %v1029_v7 }
 0x2a6   :  { %v2090_v13 = vsel %vm2044_vm5, %v11373_v3, -inf }
 0x2a7   :  { %2091 = vmax.xlane.f32.xlu1 %v2090_v13 }
 0x2c5   :  { %v2050_v54 = vpop.xlane.xlu1 %2049 }
 0x2c6   :  { %v2094_v45 = vsub.f32 %v11207_v18, %v2050_v54  ;;  %v2047_v27 = vpop.xlane.xlu0 %2046 }
 0x2c7   :  { %v2093_v35 = vsub.f32 %v11209_v20, %v2047_v27 }
 0x2c8   :  { %v2111_v28 = vmul.f32 1.442695, %v2094_v45 }
 0x2c9   :  { %v2109_v33 = vmul.f32 1.442695, %v2093_v35 }
 0x2ca   :  { %9469 = vpow2.f32 %v2111_v28 }
 0x2cb   :  { %9471 = vpow2.f32 %v2109_v33 }
 0x2cd   :  { %v2059_v46 = vpop.xlane.xlu1 %2058 }
 0x2ce   :  { %v2053_v26 = vpop.xlane.xlu0 %2052  ;;  %v2097_v31 = vsub.f32 %v11229_v40, %v2059_v46 }
 0x2cf   :  { %v2095_v0 = vsub.f32 %v11232_v17, %v2053_v26 }
 0x2d0   :  { %v11380_v39 = vpop.eup %9469  ;;  %v2117_v5 = vmul.f32 1.442695, %v2097_v31 }
 0x2d1   :  { %v11382_v42 = vpop.eup %9471  ;;  %v2113_v24 = vmul.f32 1.442695, %v2095_v0  ;;  %v2056_v52 = vpop.xlane.xlu2 %2055  ;;  %v2144_v49 = vsel %vm2044_vm5, %v11380_v39, 0.0 }
 0x2d2   :  { %v2096_v18 = vsub.f32 %v11244_v16, %v2056_v52  ;;  %2145 = vadd.xlane.f32.xlu2 %v2144_v49  ;;  %v2141_v20 = vsel %vm2044_vm5, %v11382_v42, 0.0 }
 0x2d3   :  { %9473 = vpow2.f32 %v2113_v24  ;;  %2142 = vadd.xlane.f32.xlu0 %v2141_v20 }
 0x2d4   :  { %v2115_v36 = vmul.f32 1.442695, %v2096_v18 }
 0x2d6   :  { %9475 = vpow2.f32 %v2115_v36  ;;  %v2062_v43 = vpop.xlane.xlu0 %2061 }
 0x2d7   :  { %9477 = vpow2.f32 %v2117_v5  ;;  %v2098_v59 = vsub.f32 %v11253_v15, %v2062_v43 }
 0x2d9   :  { %v11389_v17 = vpop.eup %9473  ;;  %v2119_v61 = vmul.f32 1.442695, %v2098_v59 }
 0x2da   :  { %v2147_v6 = vsel %vm2044_vm5, %v11389_v17, 0.0 }
 0x2db   :  { %2148 = vadd.xlane.f32.xlu2 %v2147_v6 }
 0x2dc   :  { %v11394_v16 = vpop.eup %9475 }
 0x2dd   :  { %v2150_v23 = vsel %vm2044_vm5, %v11394_v16, 0.0  ;;  %v11400_v1 = vpop.eup %9477 }
 0x2de   :  { %v2153_v38 = vsel %vm2044_vm5, %v11400_v1, 0.0  ;;  %v2071_v32 = vpop.xlane.xlu0 %2070 }
 0x2df   :  { %v2101_v13 = vsub.f32 %v11270_v44, %v2071_v32 }
 0x2e1   :  { %v2065_v11 = vpop.xlane.xlu2 %2064  ;;  %v2125_v54 = vmul.f32 1.442695, %v2101_v13 }
 0x2e2   :  { %v2099_v48 = vsub.f32 %v11284_v58, %v2065_v11 }
 0x2e3   :  { %2151 = vadd.xlane.f32.xlu2 %v2150_v23 }
 0x2e4   :  { %v2121_v40 = vmul.f32 1.442695, %v2099_v48 }
 0x2e6   :  { %9479 = vpow2.f32 %v2121_v40 }
 0x2e7   :  { %9481 = vpow2.f32 %v2119_v61 }
 0x2e9   :  { %v2068_v56 = vpop.xlane.xlu1 %2067 }
 0x2ea   :  { %v2100_v29 = vsub.f32 %v11294_v62, %v2068_v56 }
 0x2eb   :  { %2154 = vadd.xlane.f32.xlu2 %v2153_v38 }
 0x2ec   :  { %v11405_v15 = vpop.eup %9479  ;;  %v2123_v58 = vmul.f32 1.442695, %v2100_v29 }
 0x2ed   :  { %v2159_v7 = vsel %vm2044_vm5, %v11405_v15, 0.0  ;;  %v11409_v8 = vpop.eup %9481 }
 0x2ee   :  { %2160 = vadd.xlane.f32.xlu1 %v2159_v7  ;;  %9483 = vpow2.f32 %v2123_v58  ;;  %v2156_v62 = vsel %vm2044_vm5, %v11409_v8, 0.0 }
 0x2ef   :  { %9485 = vpow2.f32 %v2125_v54  ;;  %v15995_v54 = vmov 2  }
 0x2f0   :  { %9219 = vset.pattern.permute.xlu0 %v15995_v54 }
 0x2f1   :  { %v2074_v45 = vpop.xlane.xlu1 %2073 }
 0x2f2   :  { %v2102_v28 = vsub.f32 %v11305_v57, %v2074_v45  ;;  %v15997_v45 = vmov 1  }
 0x2f3   :  { %2157 = vadd.xlane.f32.xlu2 %v2156_v62  ;;  %9218 = vset.pattern.permute.xlu1 %v15997_v45 }
 0x2f4   :  { %v11414_v27 = vpop.eup %9483  ;;  %v2127_v49 = vmul.f32 1.442695, %v2102_v28 }
 0x2f5   :  { %v2162_v44 = vsel %vm2044_vm5, %v11414_v27, 0.0  ;;  %v11421_v18 = vpop.eup %9485 }
 0x2f8   :  { %v2080_v35 = vpop.xlane.xlu2 %2079 }
 0x2f9   :  { %v2104_v33 = vsub.f32 %v11326_v10, %v2080_v35  ;;  %v2077_v26 = vpop.xlane.xlu0 %2076  ;;  %v2165_v10 = vsel %vm2044_vm5, %v11421_v18, 0.0 }
 0x2fa   :  { %v2103_v0 = vsub.f32 %v11328_v37, %v2077_v26 }
 0x2fb   :  { %v2131_v24 = vmul.f32 1.442695, %v2104_v33  ;;  %2163 = vadd.xlane.f32.xlu2 %v2162_v44  ;;  %v998_v33 = vld [vmem:[%s16286_s8] sm:$0xff] }
 0x2fc   :  { %v2129_v52 = vmul.f32 1.442695, %v2103_v0 }
 0x2fd   :  { %9487 = vpow2.f32 %v2131_v24 }
 0x2fe   :  { %9489 = vpow2.f32 %v2129_v52  ;;  %v999_v52 = vld [vmem:[%s16286_s8 + $0x8] sm:$0xff] }
 0x2ff   :  { %9491 = vpow2.f32 %v2127_v49 }
 0x300   :  { %v2083_v20 = vpop.xlane.xlu2 %2082 }
 0x301   :  { %v2105_v57 = vsub.f32 %v11338_v14, %v2083_v20  ;;  %v16287_v20 = vmov 0  }
 0x303   :  { %v11426_v36 = vpop.eup %9487  ;;  %2166 = vadd.xlane.f32.xlu2 %v2165_v10  ;;  %v2133_v31 = vmul.f32 1.442695, %v2105_v57  ;;  %v15993_v10 = vmov 3  }
 0x304   :  { %v11428_v37 = vpop.eup %9489  ;;  %v2174_v46 = vsel %vm2044_vm5, %v11426_v36, 0.0 }
 0x305   :  { %2175 = vadd.xlane.f32.xlu0 %v2174_v46  ;;  %v2171_v6 = vsel %vm2044_vm5, %v11428_v37, 0.0  ;;  %v11434_v5 = vpop.eup %9491  ;;  %9493 = vpow2.f32 %v2133_v31  ;;  %v1000_v46 = vld [vmem:[%s16286_s8 + $0x10] sm:$0xff] }
 0x306   :  { %2172 = vadd.xlane.f32.xlu1 %v2171_v6  ;;  %v2168_v59 = vsel %vm2044_vm5, %v11434_v5, 0.0 }
 0x308   :  { %v2089_v14 = vpop.xlane.xlu1 %2088 }
 0x309   :  { %v2107_v43 = vsub.f32 %v11353_v4, %v2089_v14 }
 0x30b   :  { %v2137_v11 = vmul.f32 1.442695, %v2107_v43  ;;  %2169 = vadd.xlane.f32.xlu2 %v2168_v59  ;;  %v11439_v48 = vpop.eup %9493 }
 0x30c   :  { %v2177_v56 = vsel %vm2044_vm5, %v11439_v48, 0.0 }
 0x30d   :  { %9495 = vpow2.f32 %v2137_v11 }
 0x30f   :  { %v2086_v23 = vpop.xlane.xlu0 %2085 }
 0x310   :  { %v2106_v40 = vsub.f32 %v11361_v2, %v2086_v23 }
 0x312   :  { %v2135_v61 = vmul.f32 1.442695, %v2106_v40 }
 0x313   :  { %v11444_v29 = vpop.eup %9495  ;;  %2178 = vadd.xlane.f32.xlu2 %v2177_v56  ;;  %v1002_v56 = vld [vmem:[%s16286_s8 + $0x20] sm:$0xff] }
 0x314   :  { %9497 = vpow2.f32 %v2135_v61  ;;  %v2183_v4 = vsel %vm2044_vm5, %v11444_v29, 0.0 }
 0x315   :  { %2184 = vadd.xlane.f32.xlu0 %v2183_v4 }
 0x31a   :  { %v11448_v38 = vpop.eup %9497  ;;  %v2092_v58 = vpop.xlane.xlu1 %2091 }
 0x31b   :  { %v2108_v7 = vsub.f32 %v11373_v3, %v2092_v58  ;;  %v2180_v2 = vsel %vm2044_vm5, %v11448_v38, 0.0 }
 0x31c   :  { %2181 = vadd.xlane.f32.xlu1 %v2180_v2  ;;  %v1042_v2 = vld [vmem:[%s16288_s30 + $0x18] sm:$0xff] }
 0x31d   :  { %v2139_v32 = vmul.f32 1.442695, %v2108_v7  ;;  %2748 = vmatpush.msra.mxu2 %v1042_v2 }
 0x31f   :  { %9499 = vpow2.f32 %v2139_v32 }
 0x325   :  { %v11453_v13 = vpop.eup %9499 }
 0x326   :  { %v2186_v62 = vsel %vm2044_vm5, %v11453_v13, 0.0 }
 0x327   :  { %2187 = vadd.xlane.f32.xlu1 %v2186_v62 }
 0x345   :  { %v2146_v3 = vpop.xlane.xlu2 %2145 }
 0x346   :  { %v2143_v35 = vpop.xlane.xlu0 %2142 }
 0x347   :  { %9501 = vrcp.f32 %v2143_v35 }
 0x348   :  { %9503 = vrcp.f32 %v2146_v3  ;;  %v1040_v3 = vld [vmem:[%s16288_s30 + $0x8] sm:$0xff] }
 0x34d   :  { %v9502_v28 = vpop.eup %9501 }
 0x34e   :  { %v2205_v26 = vmul.f32 %v9502_v28, %v11382_v42  ;;  %v9504_v44 = vpop.eup %9503  ;;  %v2149_v57 = vpop.xlane.xlu2 %2148  ;;  %v1001_v28 = vld [vmem:[%s16286_s8 + $0x18] sm:$0xff] }
 0x34f   :  { %v2206_v24 = vmul.f32 %v9504_v44, %v11380_v39  ;;  %9505 = vrcp.f32 %v2149_v57 }
 0x350   :  { %v2221_v0 = vmul.f32 %v2205_v26, %v998_v33  ;;  %v1039_v33 = vld [vmem:[%s16288_s30] sm:$0xff] }
 0x351   :  { %v2222_v49 = vmul.f32 %v2206_v24, %v999_v52  ;;  %v1003_v24 = vld [vmem:[%s16286_s8 + $0x28] sm:$0xff] }
 0x352   :  { %2430 = vperm.xlu0 %9219, %v2221_v0   ;;  %2334 = vperm.xlu1 %9218, %v2221_v0   ;;  %v2621_v43 = vsel %vm2044_vm5, %v2221_v0, 0.0 }
 0x353   :  { %2239 = vperm.xlu2 %9215, %v2221_v0  }
 0x355   :  { %v9506_v39 = vpop.eup %9505 }
 0x356   :  { %v2207_v42 = vmul.f32 %v9506_v39, %v11389_v17  ;;  %v2152_v6 = vpop.xlane.xlu2 %2151  ;;  %v2624_v17 = vsel %vm2044_vm5, %v2222_v49, 0.0 }
 0x358   :  { %v2223_v31 = vmul.f32 %v2207_v42, %v1000_v46 }
 0x35a   :  { %2434 = vperm.xlu0 %9219, %v2222_v49   ;;  %9221 = vset.pattern.permute.xlu1 %v16287_v20  ;;  %v2627_v23 = vsel %vm2044_vm5, %v2223_v31, 0.0 }
 0x35b   :  { %9220 = vset.pattern.permute.xlu2 %v15993_v10  ;;  %2244 = vperm.xlu1 %9221, %v2222_v49  }
 0x35c   :  { %2526 = vperm.xlu2 %9220, %v2221_v0  }
 0x35e   :  { %v2155_v14 = vpop.xlane.xlu2 %2154 }
 0x35f   :  { %9507 = vrcp.f32 %v2155_v14 }
 0x360   :  { %9509 = vrcp.f32 %v2152_v6 }
 0x361   :  { %v2161_v7 = vpop.xlane.xlu1 %2160 }
 0x362   :  { %9223 = vset.pattern.permute.xlu0 %v15993_v10 }
 0x363   :  { %2530 = vperm.xlu0 %9223, %v2222_v49   ;;  %9222 = vset.pattern.permute.xlu1 %v15997_v45 }
 0x364   :  { %2338 = vperm.xlu1 %9222, %v2222_v49   ;;  %9225 = vset.pattern.permute.xlu2 %v15997_v45 }
 0x365   :  { %v9508_v40 = vpop.eup %9507 }
 0x366   :  { %v2158_v59 = vpop.xlane.xlu2 %2157  ;;  %v2209_v61 = vmul.f32 %v9508_v40, %v11400_v1  ;;  %v9510_v32 = vpop.eup %9509  ;;  %v1041_v1 = vld [vmem:[%s16288_s30 + $0x10] sm:$0xff] }
 0x367   :  { %9511 = vrcp.f32 %v2158_v59  ;;  %2749 = vmatpush.msra.mxu2 %v1041_v1  ;;  %v2208_v62 = vmul.f32 %v9510_v32, %v11394_v16 }
 0x368   :  { %v11488_v58 = vmul.f32 %v2209_v61, %v1002_v56  ;;  %9513 = vrcp.f32 %v2161_v7 }
 0x369   :  { %2750 = vmatpush.msra.mxu2 %v1040_v3  ;;  %v11513_v0 = vmul.f32 %v2208_v62, %v1001_v28 }
 0x36b   :  { %9224 = vset.pattern.permute.xlu0 %v16287_v20  ;;  %2751 = vmatpush.msra.mxu2 %v1039_v33 }
 0x36c   :  { %9227 = vset.pattern.permute.xlu1 %v15993_v10 }
 0x36d   :  { %2534 = vperm.xlu1 %9227, %v2223_v31   ;;  %v9512_v16 = vpop.eup %9511 }
 0x36e   :  { %v2164_v11 = vpop.xlane.xlu2 %2163  ;;  %v2210_v44 = vmul.f32 %v9512_v16, %v11409_v8 }
 0x36f   :  { %9515 = vrcp.f32 %v2164_v11 }
 0x370   :  { %v11529_v39 = vmul.f32 %v2210_v44, %v1003_v24 }
 0x375   :  { %9229 = vset.pattern.permute.xlu1 %v15997_v45 }
 0x376   :  { %v11486_v4 = vpop.xlane.xlu2 %2166 }
 0x377   :  { %9517 = vrcp.f32 %v11486_v4 }
 0x378   :  { %v11522_v52 = vpop.xlane.xlu0 %2175 }
 0x379   :  { %v11510_v26 = vpop.xlane.xlu1 %2172  ;;  %9519 = vrcp.f32 %v11522_v52  ;;  %v1009_v52 = vld [vmem:[%s16286_s8 + $0x58] sm:$0xff] }
 0x37e   :  { %v11499_v35 = vpop.xlane.xlu2 %2169 }
 0x385   :  { %2622 = vadd.xlane.f32.xlu2 %v2621_v43 }
 0x386   :  { %v11525_v49 = vpop.xlane.xlu2 %2178 }
 0x387   :  { %9521 = vrcp.f32 %v11525_v49 }
 0x388   :  { %v11535_v8 = vpop.xlane.xlu0 %2184  ;;  %9523 = vrcp.f32 %v11499_v35  ;;  %v1007_v35 = vld [vmem:[%s16286_s8 + $0x48] sm:$0xff] }
 0x38d   :  { %2625 = vadd.xlane.f32.xlu0 %v2624_v17 }
 0x38f   :  { %v11527_v57 = vpop.xlane.xlu1 %2181 }
 0x390   :  { %9525 = vrcp.f32 %v11527_v57 }
 0x391   :  { %9527 = vrcp.f32 %v11535_v8  ;;  %v1012_v8 = vld [vmem:[%s16286_s8 + $0x70] sm:$0xff] }
 0x392   :  { %9529 = vrcp.f32 %v11510_v26  ;;  %v1008_v26 = vld [vmem:[%s16286_s8 + $0x50] sm:$0xff] }
 0x397   :  { %2628 = vadd.xlane.f32.xlu1 %v2627_v23  ;;  %v1004_v23 = vld [vmem:[%s16286_s8 + $0x30] sm:$0xff] }
 0x39a   :  { %v11538_v42 = vpop.xlane.xlu1 %2187 }
 0x39b   :  { %9531 = vrcp.f32 %v11538_v42 }
 0x39d   :  { %2342 = vperm.xlu2 %9225, %v2223_v31  }
 0x3a1   :  { %2249 = vperm.xlu0 %9224, %v2223_v31  }
 0x3a5   :  { %2350 = vperm.xlu2 %9225, %v11488_v58  }
 0x3a9   :  { %9226 = vset.pattern.permute.xlu0 %v15995_v54 }
 0x3aa   :  { %2438 = vperm.xlu0 %9226, %v2223_v31   ;;  %v9514_v31 = vpop.eup %9513 }
 0x3ab   :  { %v2211_v43 = vmul.f32 %v9514_v31, %v11405_v15  ;;  %v9516_v11 = vpop.eup %9515 }
 0x3ac   :  { %v9518_v44 = vpop.eup %9517 }
 0x3ad   :  { %9234 = vset.pattern.permute.xlu2 %v15993_v10  ;;  %v2240_v46 = vpop.permute.xlu2 %2239  ;;  %v11554_v7 = vmul.f32 %v2211_v43, %v1004_v23 }
 0x3ae   :  { %2542 = vperm.xlu2 %9234, %v11488_v58   ;;  %v2317_v59 = vmul.f32 %v2240_v46, %v10724_v21  ;;  %v2212_v21 = vmul.f32 %v9516_v11, %v11414_v27 }
 0x3b0   :  { %2346 = vperm.xlu1 %9229, %v11513_v0  }
 0x3b2   :  { %9228 = vset.pattern.permute.xlu0 %v16287_v20 }
 0x3b3   :  { %2254 = vperm.xlu0 %9228, %v11513_v0  }
 0x3b6   :  { %9235 = vset.pattern.permute.xlu2 %v16287_v20  ;;  %v2527_v40 = vpop.permute.xlu2 %2526 }
 0x3b7   :  { %2264 = vperm.xlu2 %9235, %v11529_v39   ;;  %v2589_v2 = vmul.f32 %v2527_v40, %v10791_v41 }
 0x3b8   :  { %9231 = vset.pattern.permute.xlu1 %v15993_v10 }
 0x3b9   :  { %2538 = vperm.xlu1 %9231, %v11513_v0  }
 0x3bb   :  { %9230 = vset.pattern.permute.xlu0 %v15995_v54 }
 0x3bc   :  { %2442 = vperm.xlu0 %9230, %v11513_v0  }
 0x3bf   :  { %9237 = vset.pattern.permute.xlu2 %v15995_v54 }
 0x3c0   :  { %2450 = vperm.xlu2 %9237, %v11529_v39  }
 0x3c1   :  { %9236 = vset.pattern.permute.xlu1 %v15997_v45 }
 0x3c2   :  { %2354 = vperm.xlu1 %9236, %v11529_v39  }
 0x3c4   :  { %v2335_v6 = vpop.permute.xlu1 %2334  ;;  %v2431_v14 = vpop.permute.xlu0 %2430  ;;  %9232 = vset.pattern.permute.xlu0 %v16287_v20 }
 0x3c5   :  { %v2397_v17 = vmul.f32 %v2335_v6, %v10702_v63  ;;  %v2493_v56 = vmul.f32 %v2431_v14, %v10730_v51  ;;  %v1005_v51 = vld [vmem:[%s16286_s8 + $0x38] sm:$0xff] }
 0x3c6   :  { %v11565_v62 = vmul.f32 %v2212_v21, %v1005_v51 }
 0x3c7   :  { %v2413_v61 = vadd.f32 %v2397_v17, %v2317_v59  ;;  %v1011_v17 = vld [vmem:[%s16286_s8 + $0x68] sm:$0xff] }
 0x3c8   :  { %9238 = vset.pattern.permute.xlu2 %v15993_v10 }
 0x3c9   :  { %v2509_v15 = vadd.f32 %v2493_v56, %v2413_v61  ;;  %2546 = vperm.xlu2 %9238, %v11529_v39  }
 0x3ca   :  { %9239 = vset.pattern.permute.xlu1 %v16287_v20 }
 0x3cb   :  { %v2605_v63 = vadd.f32 %v2589_v2, %v2509_v15  ;;  %2269 = vperm.xlu1 %9239, %v11554_v7  }
 0x3cc   :  { %v2435_v1 = vpop.permute.xlu0 %2434 }
 0x3cd   :  { %v2245_v32 = vpop.permute.xlu1 %2244  ;;  %8830 = vmatmul.msk.f32.vlgmr.msra.gmra.mxu2 %vm1053_vm6, %v2605_v63  ;;  %v2494_v33 = vmul.f32 %v2435_v1, %v10759_v50 }
 0x3ce   :  { %v2318_v27 = vmul.f32 %v2245_v32, %v10749_v55  ;;  %v2213_v55 = vmul.f32 %v9518_v44, %v11421_v18  ;;  %v2630_v18 = vsel %vm2044_vm5, %v11513_v0, 0.0  ;;  %v1013_v32 = vld [vmem:[%s16286_s8 + $0x78] sm:$0xff] }
 0x3d1   :  { %9243 = vset.pattern.permute.xlu2 %v15997_v45 }
 0x3d2   :  { %2362 = vperm.xlu2 %9243, %v11565_v62  }
 0x3d3   :  { %9240 = vset.pattern.permute.xlu1 %v15997_v45 }
 0x3d4   :  { %2358 = vperm.xlu1 %9240, %v11554_v7  }
 0x3d5   :  { %v2531_v28 = vpop.permute.xlu0 %2530 }
 0x3d6   :  { %v2339_v41 = vpop.permute.xlu1 %2338  ;;  %v2590_v24 = vmul.f32 %v2531_v28, %v10817_v19  ;;  %v9520_v19 = vpop.eup %9519 }
 0x3d7   :  { %v2398_v3 = vmul.f32 %v2339_v41, %v10728_v25  ;;  %v1006_v25 = vld [vmem:[%s16286_s8 + $0x40] sm:$0xff]  ;;  %v2216_v31 = vmul.f32 %v9520_v19, %v11426_v36  ;;  %v9522_v14 = vpop.eup %9521 }
 0x3d8   :  { %v11586_v50 = vmul.f32 %v2213_v55, %v1006_v25  ;;  %v2217_v0 = vmul.f32 %v9522_v14, %v11439_v48  ;;  %v1010_v36 = vld [vmem:[%s16286_s8 + $0x60] sm:$0xff]  ;;  %v9524_v43 = vpop.eup %9523 }
 0x3d9   :  { %v2414_v16 = vadd.f32 %v2398_v3, %v2318_v27  ;;  %v11599_v6 = vmul.f32 %v2216_v31, %v1009_v52  ;;  %v9526_v59 = vpop.eup %9525  ;;  %v2214_v48 = vmul.f32 %v9524_v43, %v11434_v5  ;;  %v16289_v52 = vld [vmem:[#allocation23_spill] sm:$0xff] }
 0x3da   :  { %9245 = vset.pattern.permute.xlu2 %v15993_v10  ;;  %v11610_v49 = vmul.f32 %v2217_v0, %v1010_v36  ;;  %v2218_v57 = vmul.f32 %v9526_v59, %v11448_v38  ;;  %v9528_v5 = vpop.eup %9527  ;;  %v1051_v36 = vld [vmem:[%s15895_s17 + $0x38] sm:$0xff] }
 0x3db   :  { %v2510_v46 = vadd.f32 %v2494_v33, %v2414_v16  ;;  %2554 = vperm.xlu2 %9245, %v11565_v62   ;;  %v11626_v23 = vmul.f32 %v2214_v48, %v1007_v35  ;;  %v2219_v38 = vmul.f32 %v9528_v5, %v11444_v29  ;;  %v9530_v11 = vpop.eup %9529  ;;  %3021 = vmatpush.msra.mxu3 %v1051_v36  ;;  %v1047_v59 = vld [vmem:[%s15895_s17 + $0x18] sm:$0xff]  ;;  %v1046_v48 = vld [vmem:[%s15895_s17 + $0x10] sm:$0xff]  ;;  %v1045_v35 = vld [vmem:[%s15895_s17 + $0x8] sm:$0xff] }
 0x3dc   :  { %9241 = vset.pattern.permute.xlu1 %v15993_v10  ;;  %v11628_v40 = vmul.f32 %v2218_v57, %v1011_v17  ;;  %v9532_v15 = vpop.eup %9531  ;;  %v2215_v21 = vmul.f32 %v9530_v11, %v11428_v37  ;;  %v1044_v57 = vld [vmem:[%s15895_s17] sm:$0xff]  ;;  %v16295_v36 = vld [vmem:[#allocation18_spill] sm:$0xff] }
 0x3dd   :  { %2550 = vperm.xlu1 %9241, %v11554_v7   ;;  %v2606_v4 = vadd.f32 %v2590_v24, %v2510_v46  ;;  %v11640_v61 = vmul.f32 %v2219_v38, %v1012_v8  ;;  %v2220_v42 = vmul.f32 %v9532_v15, %v11453_v13  ;;  %v11739_v5 = vld [vmem:[%s16290_s0] ss:$0 sm:$0xff]  ;;  %v2639_v38 = vsel %vm2044_vm5, %v11554_v7, 0.0 }
 0x3de   :  { %v11664_v1 = vmul.f32 %v2215_v21, %v1008_v26 }
 0x3df   :  { %8831 = vmatmul.msk.f32.gmra.mxu2 %vm1053_vm6, %v2606_v4  ;;  %v2535_v51 = vpop.permute.xlu1 %2534  ;;  %v11666_v41 = vmul.f32 %v2220_v42, %v1013_v32 }
 0x3e3   :  { %9247 = vset.pattern.permute.xlu2 %v15997_v45 }
 0x3e4   :  { %2366 = vperm.xlu2 %9247, %v11586_v50  }
 0x3e5   :  { %9246 = vset.pattern.permute.xlu1 %v16287_v20 }
 0x3e6   :  { %2631 = vadd.xlane.f32.xlu0 %v2630_v18  ;;  %2279 = vperm.xlu1 %9246, %v11586_v50  }
 0x3ec   :  { %9248 = vset.pattern.permute.xlu2 %v15995_v54 }
 0x3ed   :  { %2462 = vperm.xlu2 %9248, %v11586_v50  }
 0x3ee   :  { %2294 = vperm.xlu1 %9246, %v11599_v6  }
 0x3f5   :  { %9249 = vset.pattern.permute.xlu2 %v15993_v10 }
 0x3f6   :  { %2558 = vperm.xlu2 %9249, %v11586_v50   ;;  %9261 = vset.pattern.permute.xlu1 %v15995_v54 }
 0x3f7   :  { %2478 = vperm.xlu1 %9261, %v11610_v49  }
 0x3f8   :  { %v11642_v56 = vpop.xlane.xlu2 %2622 }
 0x3f9   :  { %v2672_v11 = vmul.f32 %v11739_v5, %v11642_v56 }
 0x3fa   :  { %2259 = vperm.xlu0 %9232, %v11488_v58  }
 0x3fe   :  { %9250 = vset.pattern.permute.xlu2 %v16287_v20 }
 0x3ff   :  { %2284 = vperm.xlu2 %9250, %v11626_v23   ;;  %9263 = vset.pattern.permute.xlu1 %v15997_v45 }
 0x400   :  { %2386 = vperm.xlu1 %9263, %v11628_v40   ;;  %v11649_v29 = vpop.xlane.xlu0 %2625  ;;  %v2343_v2 = vpop.permute.xlu2 %2342 }
 0x401   :  { %v2399_v37 = vmul.f32 %v2343_v2, %v10753_v60  ;;  %v2673_v32 = vmul.f32 %v11739_v5, %v11649_v29 }
 0x402   :  { %9233 = vset.pattern.permute.xlu0 %v15995_v54 }
 0x403   :  { %2446 = vperm.xlu0 %9233, %v11488_v58  }
 0x407   :  { %9251 = vset.pattern.permute.xlu2 %v15997_v45 }
 0x408   :  { %2370 = vperm.xlu2 %9251, %v11626_v23   ;;  %9266 = vset.pattern.permute.xlu1 %v16287_v20  ;;  %v11673_v3 = vpop.permute.xlu2 %2350 }
 0x409   :  { %2309 = vperm.xlu1 %9266, %v11640_v61  }
 0x40a   :  { %v11676_v13 = vpop.xlane.xlu1 %2628 }
 0x410   :  { %9252 = vset.pattern.permute.xlu2 %v15993_v10  ;;  %v11686_v4 = vpop.permute.xlu2 %2542 }
 0x411   :  { %2562 = vperm.xlu2 %9252, %v11626_v23   ;;  %9268 = vset.pattern.permute.xlu1 %v15995_v54 }
 0x412   :  { %2486 = vperm.xlu1 %9268, %v11640_v61  }
 0x413   :  { %v2250_v63 = vpop.permute.xlu0 %2249 }
 0x414   :  { %v2319_v27 = vmul.f32 %v2250_v63, %v10766_v9  ;;  %v2591_v9 = vmul.f32 %v2535_v51, %v10838_v47  ;;  %v2633_v47 = vsel %vm2044_vm5, %v11488_v58, 0.0  ;;  %v1048_v58 = vld [vmem:[%s15895_s17 + $0x20] sm:$0xff] }
 0x416   :  { %v2415_v33 = vadd.f32 %v2399_v37, %v2319_v27  ;;  %v16291_v27 = vld [vmem:[#allocation65_spill] sm:$0xff] }
 0x418   :  { %v11695_v31 = vpop.permute.xlu2 %2264 }
 0x419   :  { %9253 = vset.pattern.permute.xlu2 %v16287_v20 }
 0x41a   :  { %2289 = vperm.xlu2 %9253, %v11664_v1   ;;  %9271 = vset.pattern.permute.xlu1 %v15997_v45 }
 0x41b   :  { %2394 = vperm.xlu1 %9271, %v11666_v41  }
 0x41c   :  { %v2439_v28 = vpop.permute.xlu0 %2438 }
 0x41d   :  { %v2495_v16 = vmul.f32 %v2439_v28, %v10787_v30 }
 0x41f   :  { %v2511_v44 = vadd.f32 %v2495_v16, %v2415_v33 }
 0x420   :  { %v11713_v43 = vpop.permute.xlu2 %2450 }
 0x421   :  { %v2607_v24 = vadd.f32 %v2591_v9, %v2511_v44 }
 0x422   :  { %9254 = vset.pattern.permute.xlu2 %v15997_v45  ;;  %v2347_v60 = vpop.permute.xlu1 %2346 }
 0x423   :  { %2374 = vperm.xlu2 %9254, %v11664_v1   ;;  %2903 = vrot.lane.b32.xlu1 %v10544_v34, %s16018_s16  ;;  %v2400_v55 = vmul.f32 %v2347_v60, %v10781_v22  ;;  %v1050_v22 = vld [vmem:[%s15895_s17 + $0x30] sm:$0xff] }
 0x424   :  { %8832 = vmatmul.msk.f32.gmra.mxu2 %vm1053_vm6, %v2607_v24  ;;  %9273 = vset.pattern.permute.xlu1 %v15993_v10 }
 0x425   :  { %v2255_v46 = vpop.permute.xlu0 %2254  ;;  %3022 = vmatpush.msra.mxu3 %v1050_v22 }
 0x426   :  { %v2320_v30 = vmul.f32 %v2255_v46, %v10794_v53 }
 0x428   :  { %v2416_v19 = vadd.f32 %v2400_v55, %v2320_v30  ;;  %v11730_v17 = vpop.permute.xlu2 %2546 }
 0x42b   :  { %9255 = vset.pattern.permute.xlu2 %v15993_v10  ;;  %v2539_v34 = vpop.permute.xlu1 %2538 }
 0x42c   :  { %2566 = vperm.xlu2 %9255, %v11664_v1   ;;  %v2592_v14 = vmul.f32 %v2539_v34, %v16289_v52  ;;  %v16292_v34 = vld [vmem:[#allocation17_spill] sm:$0xff] }
 0x42d   :  { %2634 = vadd.xlane.f32.xlu0 %v2633_v47 }
 0x42e   :  { %v2443_v25 = vpop.permute.xlu0 %2442 }
 0x42f   :  { %v2496_v18 = vmul.f32 %v2443_v25, %v10808_v12  ;;  %v1049_v12 = vld [vmem:[%s15895_s17 + $0x28] sm:$0xff] }
 0x430   :  { %3023 = vmatpush.msra.mxu3 %v1049_v12  ;;  %v11743_v8 = vpop.permute.xlu2 %2362 }
 0x431   :  { %v2512_v53 = vadd.f32 %v2496_v18, %v2416_v19  ;;  %v16293_v18 = vld [vmem:[#allocation67_spill] sm:$0xff] }
 0x432   :  { %3024 = vmatpush.msra.mxu3 %v1048_v58 }
 0x433   :  { %v2608_v0 = vadd.f32 %v2592_v14, %v2512_v53  ;;  %v16294_v14 = vld [vmem:[#allocation16_spill] sm:$0xff] }
 0x434   :  { %9257 = vset.pattern.permute.xlu2 %v15995_v54  ;;  %3025 = vmatpush.msra.mxu3 %v1047_v59  ;;  %v2355_v56 = vpop.permute.xlu1 %2354  ;;  %v2401_v53 = vmul.f32 %v11673_v3, %v16294_v14  ;;  %v16296_v59 = vld [vmem:[#allocation19_spill] sm:$0xff]  ;;  %v16298_v3 = vld [vmem:[#allocation20_spill] sm:$0xff] }
 0x435   :  { %2474 = vperm.xlu2 %9257, %v11599_v6   ;;  %8833 = vmatmul.msk.f32.gmra.mxu2 %vm1053_vm6, %v2608_v0  ;;  %v2402_v22 = vmul.f32 %v2355_v56, %v16295_v36 }
 0x436   :  { %3026 = vmatpush.msra.mxu3 %v1046_v48 }
 0x438   :  { %3027 = vmatpush.msra.mxu3 %v1045_v35  ;;  %v16297_v35 = vld [vmem:[#allocation27_spill] sm:$0xff] }
 0x43a   :  { %3028 = vmatpush.msra.mxu3 %v1044_v57  ;;  %v2593_v57 = vmul.f32 %v11686_v4, %v16297_v35 }
 0x43d   :  { %9258 = vset.pattern.permute.xlu2 %v15993_v10  ;;  %v11766_v9 = vpop.permute.xlu1 %2269 }
 0x43e   :  { %2570 = vperm.xlu2 %9258, %v11599_v6  }
 0x441   :  { %2454 = vperm.xlu0 %9233, %v11554_v7   ;;  %v11751_v7 = vpop.permute.xlu2 %2554 }
 0x446   :  { %9260 = vset.pattern.permute.xlu2 %v15997_v45  ;;  %v2359_v30 = vpop.permute.xlu1 %2358 }
 0x447   :  { %2382 = vperm.xlu2 %9260, %v11610_v49  }
 0x449   :  { %9242 = vset.pattern.permute.xlu0 %v16287_v20  ;;  %v11761_v28 = vpop.permute.xlu2 %2366 }
 0x44a   :  { %2274 = vperm.xlu0 %9242, %v11565_v62  }
 0x44d   :  { %2640 = vadd.xlane.f32.xlu1 %v2639_v38  ;;  %v2322_v38 = vmul.f32 %v11695_v31, %v16298_v3  ;;  %v16305_v3 = vld [vmem:[#allocation26_spill] sm:$0xff] }
 0x44f   :  { %9262 = vset.pattern.permute.xlu2 %v15993_v10 }
 0x450   :  { %2574 = vperm.xlu2 %9262, %v11610_v49   ;;  %v2753_v2 = vpop.f32.mrf.mxu2 }
 0x451   :  { %v2754_v15 = vadd.f32 %v2753_v2, %v2672_v11  ;;  %v11774_v60 = vpop.permute.xlu2 %2462  ;;  %v2551_v11 = vpop.permute.xlu1 %2550 }
 0x452   :  { %9244 = vset.pattern.permute.xlu0 %v15995_v54 }
 0x453   :  { %v2817_v63 = vmin.f32 %v2754_v15, 0.0  ;;  %2458 = vperm.xlu0 %9244, %v11565_v62   ;;  %vm2801_vm10 = vcmp.gt.f32.partialorder %v2754_v15, 0.0 }
 0x455   :  { %v2833_v21 = vmul.f32 1.442695, %v2817_v63 }
 0x457   :  { %9533 = vpow2.f32 %v2833_v21  ;;  %v16299_v21 = vld [vmem:[#allocation22_spill] sm:$0xff] }
 0x458   :  { %9264 = vset.pattern.permute.xlu2 %v15995_v54 }
 0x459   :  { %2482 = vperm.xlu2 %9264, %v11628_v40   ;;  %v11768_v44 = vpop.xlane.xlu0 %2631  ;;  %v11789_v12 = vpop.permute.xlu2 %2558 }
 0x45a   :  { %v11805_v31 = vpop.permute.xlu1 %2279 }
 0x45b   :  { %2466 = vperm.xlu0 %9244, %v11626_v23  }
 0x45d   :  { %v9534_v51 = vpop.eup %9533 }
 0x45e   :  { %v8846_v26 = vadd.f32 -1.0, %v9534_v51  ;;  %v2498_v51 = vmul.f32 %v11713_v43, %v16299_v21 }
 0x460   :  { %v2881_v42 = vsel %vm2801_vm10, %v2754_v15, %v8846_v26  ;;  %v2418_v15 = vadd.f32 %v2402_v22, %v2322_v38  ;;  %v16300_v26 = vld [vmem:[#allocation31_spill] sm:$0xff]  ;;  %v16304_v22 = vld [vmem:[#allocation24_spill] sm:$0xff] }
 0x461   :  { %9267 = vset.pattern.permute.xlu2 %v15997_v45  ;;  %v2945_v37 = vsel %vm1053_vm6, %v2881_v42, %v16291_v27  ;;  %v2594_v4 = vmul.f32 %v11730_v17, %v16300_v26  ;;  %v11803_v42 = vpop.permute.xlu2 %2284  ;;  %v2645_v17 = vsel %vm2044_vm5, %v11586_v50, 0.0 }
 0x462   :  { %2390 = vperm.xlu2 %9267, %v11640_v61   ;;  %v2756_v33 = vpop.f32.mrf.mxu2  ;;  %8862 = vmatmul.msk.f32.vlgmr.msra.gmra.mxu3 %vm2964_vm11, %v2945_v37  ;;  %v2514_v56 = vadd.f32 %v2498_v51, %v2418_v15  ;;  %v11812_v37 = vpop.permute.xlu1 %2294  ;;  %v16306_v15 = vld [vmem:[#allocation5_spill] sm:$0xff] }
 0x463   :  { %v2757_v16 = vadd.f32 %v2756_v33, %v2673_v32  ;;  %2470 = vperm.xlu0 %9244, %v11664_v1  }
 0x464   :  { %v2610_v32 = vadd.f32 %v2594_v4, %v2514_v56  ;;  %v16308_v4 = vld [vmem:[#allocation66_spill] sm:$0xff] }
 0x465   :  { %v2818_v29 = vmin.f32 %v2757_v16, 0.0  ;;  %vm2802_vm12 = vcmp.gt.f32.partialorder %v2757_v16, 0.0 }
 0x466   :  { %2586 = vperm.xlu1 %9273, %v11666_v41  }
 0x467   :  { %v2835_v24 = vmul.f32 1.442695, %v2818_v29  ;;  %v16301_v29 = vld [vmem:[#allocation4_spill] sm:$0xff] }
 0x469   :  { %9535 = vpow2.f32 %v2835_v24  ;;  %v11810_v43 = vpop.permute.xlu2 %2370  ;;  %v2636_v24 = vsel %vm2044_vm5, %v11529_v39, 0.0 }
 0x46a   :  { %9269 = vset.pattern.permute.xlu2 %v15993_v10 }
 0x46b   :  { %2582 = vperm.xlu2 %9269, %v11640_v61   ;;  %9256 = vset.pattern.permute.xlu0 %v15997_v45 }
 0x46c   :  { %2378 = vperm.xlu0 %9256, %v11599_v6   ;;  %v2260_v46 = vpop.permute.xlu0 %2259 }
 0x46d   :  { %v2321_v25 = vmul.f32 %v2260_v46, %v16292_v34 }
 0x46e   :  { %9275 = vset.pattern.permute.xlu1 %v16287_v20 }
 0x46f   :  { %v9536_v47 = vpop.eup %9535  ;;  %v2417_v58 = vadd.f32 %v2401_v53, %v2321_v25 }
 0x470   :  { %v8847_v55 = vadd.f32 -1.0, %v9536_v47 }
 0x471   :  { %v11818_v33 = vpop.permute.xlu2 %2562 }
 0x472   :  { %v2882_v19 = vsel %vm2802_vm12, %v2757_v16, %v8847_v55  ;;  %v11820_v16 = vpop.permute.xlu1 %2478  ;;  %v2674_v55 = vmul.f32 %v11739_v5, %v11676_v13 }
 0x473   :  { %9272 = vset.pattern.permute.xlu2 %v15995_v54  ;;  %v2946_v52 = vsel %vm1053_vm6, %v2882_v19, %v16293_v18  ;;  %v16302_v19 = vld [vmem:[#allocation6_spill] sm:$0xff] }
 0x474   :  { %2490 = vperm.xlu2 %9272, %v11666_v41   ;;  %9259 = vset.pattern.permute.xlu0 %v16287_v20 }
 0x475   :  { %8863 = vmatmul.msk.f32.gmra.mxu3 %vm2964_vm11, %v2946_v52  ;;  %2299 = vperm.xlu0 %9259, %v11610_v49   ;;  %v2447_v0 = vpop.permute.xlu0 %2446 }
 0x476   :  { %v2497_v48 = vmul.f32 %v2447_v0, %v16296_v59  ;;  %v16303_v0 = vld [vmem:[#allocation21_spill] sm:$0xff] }
 0x477   :  { %v2403_v36 = vmul.f32 %v2359_v30, %v16303_v0 }
 0x478   :  { %v2513_v2 = vadd.f32 %v2497_v48, %v2417_v58  ;;  %v2323_v58 = vmul.f32 %v11766_v9, %v16304_v22  ;;  %v2675_v9 = vmul.f32 %v11739_v5, %v11768_v44  ;;  %v16312_v22 = vld [vmem:[#allocation8_spill] sm:$0xff] }
 0x479   :  { %v11826_v46 = vpop.permute.xlu2 %2289 }
 0x47a   :  { %v2609_v63 = vadd.f32 %v2593_v57, %v2513_v2  ;;  %v11828_v47 = vpop.permute.xlu1 %2386  ;;  %v2419_v35 = vadd.f32 %v2403_v36, %v2323_v58 }
 0x47c   :  { %8834 = vmatmul.msk.f32.gmra.mxu2 %vm1053_vm6, %v2609_v63  ;;  %9274 = vset.pattern.permute.xlu2 %v16287_v20  ;;  %v16307_v63 = vld [vmem:[#allocation35_spill] sm:$0xff] }
 0x47d   :  { %2304 = vperm.xlu0 %9259, %v11628_v40   ;;  %v2595_v21 = vmul.f32 %v2551_v11, %v16307_v63  ;;  %v16315_v63 = vld [vmem:[#allocation39_spill] sm:$0xff] }
 0x481   :  { %v11832_v34 = vpop.permute.xlu2 %2374 }
 0x482   :  { %v11836_v52 = vpop.permute.xlu1 %2309 }
 0x484   :  { %8835 = vmatmul.msk.f32.gmra.mxu2 %vm1053_vm6, %v2610_v32 }
 0x485   :  { %9265 = vset.pattern.permute.xlu0 %v15993_v10 }
 0x486   :  { %2578 = vperm.xlu0 %9265, %v11628_v40  }
 0x489   :  { %v11843_v13 = vpop.permute.xlu2 %2566 }
 0x48a   :  { %v11845_v57 = vpop.permute.xlu1 %2486 }
 0x48e   :  { %9270 = vset.pattern.permute.xlu0 %v16287_v20 }
 0x48f   :  { %2314 = vperm.xlu0 %9270, %v11666_v41  }
 0x490   :  { %2646 = vadd.xlane.f32.xlu1 %v2645_v17 }
 0x492   :  { %v11861_v44 = vpop.permute.xlu1 %2394 }
 0x497   :  { %2905 = vrot.lane.b32.xlu0 %v16301_v29, %s16018_s16 }
 0x49d   :  { %2637 = vadd.xlane.f32.xlu2 %v2636_v24  ;;  %v11857_v24 = vpop.permute.xlu2 %2474 }
 0x4a0   :  { %v11838_v53 = vpop.xlane.xlu0 %2634 }
 0x4a7   :  { %v2759_v50 = vpop.f32.mrf.mxu2 }
 0x4a8   :  { %v2760_v25 = vadd.f32 %v2759_v50, %v2674_v55  ;;  %v16309_v50 = vld [vmem:[#allocation7_spill] sm:$0xff] }
 0x4a9   :  { %2909 = vrot.lane.b32.xlu1 %v16302_v19, %s16018_s16  ;;  %v16310_v19 = vld [vmem:[#allocation28_spill] sm:$0xff] }
 0x4aa   :  { %v2819_v14 = vmin.f32 %v2760_v25, 0.0  ;;  %vm2803_vm13 = vcmp.gt.f32.partialorder %v2760_v25, 0.0 }
 0x4ac   :  { %v2837_v39 = vmul.f32 1.442695, %v2819_v14 }
 0x4ae   :  { %9537 = vpow2.f32 %v2837_v39  ;;  %v16311_v39 = vld [vmem:[#allocation25_spill] sm:$0xff] }
 0x4af   :  { %v2404_v0 = vmul.f32 %v11743_v8, %v16311_v39  ;;  %v2596_v8 = vmul.f32 %v11751_v7, %v16315_v63  ;;  %v16319_v7 = vld [vmem:[#allocation9_spill] sm:$0xff]  ;;  %v16322_v39 = vld [vmem:[#allocation36_spill] sm:$0xff]  ;;  %v16327_v63 = vld [vmem:[#allocation42_spill] sm:$0xff] }
 0x4b3   :  { %v2455_v59 = vpop.permute.xlu0 %2454 }
 0x4b4   :  { %v9538_v48 = vpop.eup %9537  ;;  %v2499_v38 = vmul.f32 %v2455_v59, %v16305_v3  ;;  %v16313_v59 = vld [vmem:[#allocation32_spill] sm:$0xff] }
 0x4b5   :  { %v8848_v2 = vadd.f32 -1.0, %v9538_v48  ;;  %2907 = vrot.lane.b32.xlu2 %v16306_v15, %s16018_s16  ;;  %v2325_v48 = vmul.f32 %v11805_v31, %v16313_v59 }
 0x4b6   :  { %v2515_v30 = vadd.f32 %v2499_v38, %v2419_v35  ;;  %v2571_v35 = vpop.permute.xlu2 %2570 }
 0x4b7   :  { %v2883_v51 = vsel %vm2803_vm13, %v2760_v25, %v8848_v2  ;;  %v2642_v25 = vsel %vm2044_vm5, %v11565_v62, 0.0  ;;  %v16314_v2 = vld [vmem:[#allocation30_spill] sm:$0xff]  ;;  %v2648_v62 = vsel %vm2044_vm5, %v11626_v23, 0.0 }
 0x4b8   :  { %v2611_v56 = vadd.f32 %v2595_v21, %v2515_v30  ;;  %v2762_v26 = vpop.f32.mrf.mxu2  ;;  %v2947_v32 = vsel %vm1053_vm6, %v2883_v51, %v16308_v4  ;;  %v16316_v21 = vld [vmem:[#allocation29_spill] sm:$0xff] }
 0x4b9   :  { %v2763_v17 = vadd.f32 %v2762_v26, %v2675_v9  ;;  %8864 = vmatmul.msk.f32.gmra.mxu3 %vm2964_vm11, %v2947_v32  ;;  %v2405_v30 = vmul.f32 %v11761_v28, %v16316_v21  ;;  %v11879_v9 = vpop.permute.xlu1 %2903 }
 0x4ba   :  { %8836 = vmatmul.msk.f32.gmra.mxu2 %vm1053_vm6, %v2611_v56  ;;  %16317 = vst [vmem:[#allocation23_spill] sm:$0xff] %v11879_v9 }
 0x4bb   :  { %v2820_v29 = vmin.f32 %v2763_v17, 0.0  ;;  %vm2804_vm3 = vcmp.gt.f32.partialorder %v2763_v17, 0.0  ;;  %v2421_v26 = vadd.f32 %v2405_v30, %v2325_v48  ;;  %v16324_v48 = vld [vmem:[#allocation47_spill] sm:$0xff] }
 0x4bc   :  { %v2275_v11 = vpop.permute.xlu0 %2274 }
 0x4bd   :  { %v2839_v55 = vmul.f32 1.442695, %v2820_v29  ;;  %2911 = vrot.lane.b32.xlu2 %v16309_v50, %s16018_s16  ;;  %v2324_v14 = vmul.f32 %v2275_v11, %v16310_v19  ;;  %v16318_v29 = vld [vmem:[#allocation34_spill] sm:$0xff]  ;;  %v16321_v50 = vld [vmem:[#allocation33_spill] sm:$0xff] }
 0x4be   :  { %v2501_v23 = vmul.f32 %v11774_v60, %v16318_v29  ;;  %v2383_v19 = vpop.permute.xlu2 %2382  ;;  %v2326_v60 = vmul.f32 %v11803_v42, %v16322_v39  ;;  %v2654_v42 = vsel %vm2044_vm5, %v11599_v6, 0.0 }
 0x4bf   :  { %9539 = vpow2.f32 %v2839_v55  ;;  %v2420_v38 = vadd.f32 %v2404_v0, %v2324_v14  ;;  %v16320_v55 = vld [vmem:[#allocation43_spill] sm:$0xff]  ;;  %v2651_v14 = vsel %vm2044_vm5, %v11664_v1, 0.0  ;;  %v16323_v0 = vld [vmem:[#allocation38_spill] sm:$0xff]  ;;  %v16325_v1 = vld [vmem:[#allocation37_spill] sm:$0xff] }
 0x4c0   :  { %v2517_v11 = vadd.f32 %v2501_v23, %v2421_v26  ;;  %v16330_v26 = vld [vmem:[#allocation51_spill] sm:$0xff] }
 0x4c1   :  { %2643 = vadd.xlane.f32.xlu0 %v2642_v25  ;;  %v2406_v25 = vmul.f32 %v11810_v43, %v16321_v50  ;;  %v2599_v6 = vmul.f32 %v11843_v13, %v16330_v26  ;;  %v16333_v50 = vld [vmem:[#allocation45_spill] sm:$0xff]  ;;  %v2666_v26 = vsel %vm2044_vm5, %v11666_v41, 0.0 }
 0x4c3   :  { %v2422_v59 = vadd.f32 %v2406_v25, %v2326_v60  ;;  %v2409_v25 = vmul.f32 %v2383_v19, %v16333_v50 }
 0x4c5   :  { %v9540_v36 = vpop.eup %9539  ;;  %2913 = vrot.lane.b32.xlu2 %v16312_v22, %s16018_s16  ;;  %v2459_v58 = vpop.permute.xlu0 %2458  ;;  %v2657_v22 = vsel %vm2044_vm5, %v11610_v49, 0.0 }
 0x4c6   :  { %v8849_v3 = vadd.f32 -1.0, %v9540_v36  ;;  %v2500_v15 = vmul.f32 %v2459_v58, %v16314_v2  ;;  %v16326_v2 = vld [vmem:[#allocation40_spill] sm:$0xff] }
 0x4c7   :  { %v2327_v49 = vmul.f32 %v11826_v46, %v16326_v2  ;;  %v16331_v46 = vld [vmem:[#allocation46_spill] sm:$0xff]  ;;  %v2660_v2 = vsel %vm2044_vm5, %v11628_v40, 0.0  ;;  %v2676_v40 = vmul.f32 %v11739_v5, %v11838_v53 }
 0x4c8   :  { %v2516_v51 = vadd.f32 %v2500_v15, %v2420_v38  ;;  %v2884_v56 = vsel %vm2804_vm3, %v2763_v17, %v8849_v3  ;;  %v2597_v17 = vmul.f32 %v11789_v12, %v16320_v55  ;;  %v2598_v3 = vmul.f32 %v11818_v33, %v16324_v48  ;;  %v2575_v15 = vpop.permute.xlu2 %2574  ;;  %v16328_v33 = vld [vmem:[#allocation41_spill] sm:$0xff]  ;;  %v16332_v55 = vld [vmem:[#allocation55_spill] sm:$0xff] }
 0x4c9   :  { %2649 = vadd.xlane.f32.xlu0 %v2648_v62  ;;  %v2948_v31 = vsel %vm1053_vm6, %v2884_v56, %v11879_v9  ;;  %v2407_v38 = vmul.f32 %v11832_v34, %v16325_v1  ;;  %v2504_v23 = vmul.f32 %v11857_v24, %v16331_v46  ;;  %v16337_v24 = vld [vmem:[#allocation10_spill] sm:$0xff]  ;;  %v16348_v46 = vld [vmem:[#allocation63_spill] sm:$0xff] }
 0x4ca   :  { %v2612_v32 = vadd.f32 %v2596_v8, %v2516_v51  ;;  %8865 = vmatmul.msk.f32.gmra.mxu3 %vm2964_vm11, %v2948_v31  ;;  %v2613_v58 = vadd.f32 %v2597_v17, %v2517_v11  ;;  %v16329_v31 = vld [vmem:[#allocation44_spill] sm:$0xff]  ;;  %v2600_v17 = vmul.f32 %v2571_v35, %v16332_v55  ;;  %v16349_v55 = vld [vmem:[#allocation57_spill] sm:$0xff] }
 0x4cb   :  { %v2423_v21 = vadd.f32 %v2407_v38, %v2327_v49  ;;  %v2328_v34 = vmul.f32 %v11812_v37, %v16329_v31  ;;  %v16343_v49 = vld [vmem:[#allocation54_spill] sm:$0xff] }
 0x4cc   :  { %8837 = vmatmul.msk.f32.gmra.mxu2 %vm1053_vm6, %v2612_v32 }
 0x4cd   :  { %2915 = vrot.lane.b32.xlu2 %v16319_v7, %s16018_s16  ;;  %v2467_v28 = vpop.permute.xlu0 %2466 }
 0x4ce   :  { %v2502_v36 = vmul.f32 %v2467_v28, %v16323_v0  ;;  %v16335_v0 = vld [vmem:[#allocation50_spill] sm:$0xff] }
 0x4cf   :  { %v2505_v13 = vmul.f32 %v11820_v16, %v16335_v0  ;;  %v16341_v16 = vld [vmem:[#allocation14_spill] sm:$0xff] }
 0x4d0   :  { %v2518_v43 = vadd.f32 %v2502_v36, %v2422_v59  ;;  %v2483_v7 = vpop.permute.xlu2 %2482  ;;  %v16336_v36 = vld [vmem:[#allocation12_spill] sm:$0xff]  ;;  %v16338_v59 = vld [vmem:[#allocation59_spill] sm:$0xff] }
 0x4d1   :  { %2652 = vadd.xlane.f32.xlu0 %v2651_v14  ;;  %v16334_v14 = vld [vmem:[#allocation48_spill] sm:$0xff]  ;;  %v2601_v19 = vmul.f32 %v2575_v15, %v16338_v59  ;;  %v2506_v15 = vmul.f32 %v2483_v7, %v16343_v49 }
 0x4d2   :  { %v2614_v62 = vadd.f32 %v2598_v3, %v2518_v43  ;;  %v16340_v3 = vld [vmem:[#allocation49_spill] sm:$0xff] }
 0x4d3   :  { %2658 = vadd.xlane.f32.xlu1 %v2657_v22  ;;  %v2410_v1 = vmul.f32 %v11828_v47, %v16340_v3 }
 0x4d4   :  { %8838 = vmatmul.msk.f32.gmra.mxu2 %vm1053_vm6, %v2613_v58 }
 0x4d5   :  { %v2471_v12 = vpop.permute.xlu0 %2470 }
 0x4d6   :  { %v2503_v8 = vmul.f32 %v2471_v12, %v16327_v63  ;;  %v16339_v12 = vld [vmem:[#allocation52_spill] sm:$0xff] }
 0x4d8   :  { %v2519_v30 = vadd.f32 %v2503_v8, %v2423_v21  ;;  %v2391_v22 = vpop.permute.xlu2 %2390  ;;  %v16344_v8 = vld [vmem:[#allocation53_spill] sm:$0xff] }
 0x4d9   :  { %2655 = vadd.xlane.f32.xlu0 %v2654_v42  ;;  %v16342_v42 = vld [vmem:[#allocation11_spill] sm:$0xff]  ;;  %v2411_v21 = vmul.f32 %v2391_v22, %v16344_v8 }
 0x4da   :  { %v2615_v32 = vadd.f32 %v2599_v6, %v2519_v30  ;;  %v16345_v30 = vld [vmem:[#allocation62_spill] sm:$0xff]  ;;  %v2641_v6 = vpop.xlane.xlu1 %2640  ;;  %v16356_v8 = vld [vmem:[#allocation15_spill] sm:$0xff] }
 0x4dc   :  { %8839 = vmatmul.msk.f32.gmra.mxu2 %vm1053_vm6, %v2614_v62 }
 0x4de   :  { %v2379_v51 = vpop.permute.xlu0 %2378 }
 0x4df   :  { %v2408_v56 = vmul.f32 %v2379_v51, %v16328_v33  ;;  %v16346_v33 = vld [vmem:[#allocation56_spill] sm:$0xff] }
 0x4e0   :  { %v2583_v62 = vpop.permute.xlu2 %2582 }
 0x4e1   :  { %v2424_v29 = vadd.f32 %v2408_v56, %v2328_v34  ;;  %v2331_v56 = vmul.f32 %v11836_v52, %v16346_v33 }
 0x4e3   :  { %v2520_v28 = vadd.f32 %v2504_v23, %v2424_v29  ;;  %v2427_v34 = vadd.f32 %v2411_v21, %v2331_v56  ;;  %v2603_v23 = vmul.f32 %v2583_v62, %v16348_v46  ;;  %v2678_v21 = vmul.f32 %v11739_v5, %v2641_v6 }
 0x4e4   :  { %8840 = vmatmul.msk.f32.gmra.mxu2 %vm1053_vm6, %v2615_v32  ;;  %v16347_v32 = vld [vmem:[#allocation58_spill] sm:$0xff] }
 0x4e5   :  { %v2616_v60 = vadd.f32 %v2600_v17, %v2520_v28  ;;  %v2507_v29 = vmul.f32 %v11845_v57, %v16347_v32  ;;  %v2412_v17 = vmul.f32 %v11861_v44, %v16349_v55  ;;  %v2587_v57 = vpop.permute.xlu1 %2586 }
 0x4e7   :  { %v2300_v11 = vpop.permute.xlu0 %2299  ;;  %v2523_v52 = vadd.f32 %v2507_v29, %v2427_v34 }
 0x4e8   :  { %v2329_v39 = vmul.f32 %v2300_v11, %v16334_v14  ;;  %v2491_v41 = vpop.permute.xlu2 %2490 }
 0x4ea   :  { %v2425_v37 = vadd.f32 %v2409_v25, %v2329_v39  ;;  %v16350_v25 = vld [vmem:[#allocation60_spill] sm:$0xff]  ;;  %v2619_v39 = vadd.f32 %v2603_v23, %v2523_v52 }
 0x4ec   :  { %2921 = vrot.lane.b32.xlu1 %v16336_v36, %s16018_s16  ;;  %8841 = vmatmul.msk.f32.gmra.mxu2 %vm1053_vm6, %v2616_v60  ;;  %v2521_v58 = vadd.f32 %v2505_v13, %v2425_v37  ;;  %v16351_v60 = vld [vmem:[#allocation61_spill] sm:$0xff]  ;;  %v16352_v36 = vld [vmem:[#allocation64_spill] sm:$0xff] }
 0x4ed   :  { %2917 = vrot.lane.b32.xlu0 %v16337_v24, %s16018_s16  ;;  %v2508_v0 = vmul.f32 %v2491_v41, %v16351_v60  ;;  %v2604_v24 = vmul.f32 %v2587_v57, %v16352_v36 }
 0x4ee   :  { %v2617_v48 = vadd.f32 %v2601_v19, %v2521_v58 }
 0x4ef   :  { %v2305_v35 = vpop.permute.xlu0 %2304 }
 0x4f0   :  { %v2330_v43 = vmul.f32 %v2305_v35, %v16339_v12 }
 0x4f2   :  { %v2426_v38 = vadd.f32 %v2410_v1, %v2330_v43 }
 0x4f4   :  { %2925 = vrot.lane.b32.xlu1 %v16341_v16, %s16018_s16  ;;  %8842 = vmatmul.msk.f32.gmra.mxu2 %vm1053_vm6, %v2617_v48  ;;  %v2522_v47 = vadd.f32 %v2506_v15, %v2426_v38  ;;  %v16354_v16 = vld [vmem:[#allocation13_spill] sm:$0xff] }
 0x4f5   :  { %2919 = vrot.lane.b32.xlu0 %v16342_v42, %s16018_s16  ;;  %v2663_v42 = vsel %vm2044_vm5, %v11640_v61, 0.0 }
 0x4f6   :  { %2661 = vadd.xlane.f32.xlu2 %v2660_v2 }
 0x4f8   :  { %v2579_v63 = vpop.permute.xlu0 %2578 }
 0x4f9   :  { %v2602_v51 = vmul.f32 %v2579_v63, %v16345_v30 }
 0x4fb   :  { %v2618_v31 = vadd.f32 %v2602_v51, %v2522_v47 }
 0x4fd   :  { %8843 = vmatmul.msk.f32.gmra.mxu2 %vm1053_vm6, %v2618_v31 }
 0x4fe   :  { %2667 = vadd.xlane.f32.xlu2 %v2666_v26 }
 0x4ff   :  { %v2765_v7 = vpop.f32.mrf.mxu2 }
 0x500   :  { %v2766_v28 = vadd.f32 %v2765_v7, %v2676_v40 }
 0x501   :  { %v2315_v11 = vpop.permute.xlu0 %2314 }
 0x502   :  { %v2821_v50 = vmin.f32 %v2766_v28, 0.0  ;;  %v2332_v14 = vmul.f32 %v2315_v11, %v16350_v25  ;;  %vm2805_vm4 = vcmp.gt.f32.partialorder %v2766_v28, 0.0 }
 0x503   :  { %v2647_v33 = vpop.xlane.xlu1 %2646 }
 0x504   :  { %v2841_v53 = vmul.f32 1.442695, %v2821_v50  ;;  %v2428_v37 = vadd.f32 %v2412_v17, %v2332_v14 }
 0x505   :  { %8844 = vmatmul.msk.f32.gmra.mxu2 %vm1053_vm6, %v2619_v39 }
 0x506   :  { %9541 = vpow2.f32 %v2841_v53  ;;  %v2524_v13 = vadd.f32 %v2508_v0, %v2428_v37 }
 0x507   :  { %v2768_v48 = vpop.f32.mrf.mxu2 }
 0x508   :  { %v2620_v22 = vadd.f32 %v2604_v24, %v2524_v13 }
 0x509   :  { %v11960_v35 = vpop.permute.xlu0 %2905 }
 0x50a   :  { %16353 = vst [vmem:[#allocation17_spill] sm:$0xff] %v11960_v35 }
 0x50c   :  { %v9542_v58 = vpop.eup %9541 }
 0x50d   :  { %8845 = vmatmul.msk.f32.gmra.mxu2 %vm1053_vm6, %v2620_v22  ;;  %v8850_v44 = vadd.f32 -1.0, %v9542_v58 }
 0x50f   :  { %v2885_v19 = vsel %vm2805_vm4, %v2766_v28, %v8850_v44  ;;  %v2680_v28 = vmul.f32 %v11739_v5, %v2647_v33 }
 0x510   :  { %v2638_v59 = vpop.xlane.xlu2 %2637  ;;  %v2949_v43 = vsel %vm1053_vm6, %v2885_v19, %v11960_v35 }
 0x511   :  { %v2677_v12 = vmul.f32 %v11739_v5, %v2638_v59  ;;  %8866 = vmatmul.msk.f32.gmra.mxu3 %vm2964_vm11, %v2949_v43 }
 0x513   :  { %v2769_v3 = vadd.f32 %v2768_v48, %v2677_v12 }
 0x515   :  { %v2822_v1 = vmin.f32 %v2769_v3, 0.0  ;;  %vm2806_vm7 = vcmp.gt.f32.partialorder %v2769_v3, 0.0 }
 0x516   :  { %2923 = vrot.lane.b32.xlu2 %v16354_v16, %s16018_s16 }
 0x517   :  { %v2843_v38 = vmul.f32 1.442695, %v2822_v1 }
 0x518   :  { %v11970_v15 = vpop.permute.xlu2 %2907 }
 0x519   :  { %9543 = vpow2.f32 %v2843_v38  ;;  %16355 = vst [vmem:[#allocation16_spill] sm:$0xff] %v11970_v15 }
 0x51b   :  { %v11978_v26 = vpop.permute.xlu1 %2909 }
 0x51c   :  { %16357 = vst [vmem:[#allocation18_spill] sm:$0xff] %v11978_v26 }
 0x51f   :  { %v9544_v2 = vpop.eup %9543  ;;  %2664 = vadd.xlane.f32.xlu0 %v2663_v42 }
 0x520   :  { %v8851_v49 = vadd.f32 -1.0, %v9544_v2  ;;  %v11985_v41 = vpop.permute.xlu2 %2911 }
 0x521   :  { %16358 = vst [vmem:[#allocation19_spill] sm:$0xff] %v11985_v41 }
 0x522   :  { %v2886_v62 = vsel %vm2806_vm7, %v2769_v3, %v8851_v49 }
 0x523   :  { %v2950_v63 = vsel %vm1053_vm6, %v2886_v62, %v11970_v15 }
 0x524   :  { %8867 = vmatmul.msk.f32.gmra.mxu3 %vm2964_vm11, %v2950_v63 }
 0x528   :  { %v11991_v22 = vpop.permute.xlu2 %2913 }
 0x529   :  { %16359 = vst [vmem:[#allocation27_spill] sm:$0xff] %v11991_v22 }
 0x530   :  { %v11998_v2 = vpop.permute.xlu2 %2915 }
 0x531   :  { %16360 = vst [vmem:[#allocation20_spill] sm:$0xff] %v11998_v2 }
 0x533   :  { %2927 = vrot.lane.b32.xlu0 %v16356_v8, %s16018_s16 }
 0x534   :  { %v2644_v31 = vpop.xlane.xlu0 %2643 }
 0x535   :  { %v2679_v32 = vmul.f32 %v11739_v5, %v2644_v31 }
 0x53c   :  { %v2650_v52 = vpop.xlane.xlu0 %2649 }
 0x53d   :  { %v2771_v47 = vpop.f32.mrf.mxu2  ;;  %v2681_v39 = vmul.f32 %v11739_v5, %v2650_v52 }
 0x53e   :  { %v2772_v30 = vadd.f32 %v2771_v47, %v2678_v21 }
 0x540   :  { %v2823_v61 = vmin.f32 %v2772_v30, 0.0  ;;  %vm2807_vm8 = vcmp.gt.f32.partialorder %v2772_v30, 0.0 }
 0x542   :  { %v2845_v51 = vmul.f32 1.442695, %v2823_v61 }
 0x544   :  { %9545 = vpow2.f32 %v2845_v51  ;;  %v2653_v57 = vpop.xlane.xlu0 %2652 }
 0x545   :  { %v2682_v44 = vmul.f32 %v11739_v5, %v2653_v57 }
 0x546   :  { %v2659_v47 = vpop.xlane.xlu1 %2658 }
 0x54a   :  { %v9546_v56 = vpop.eup %9545 }
 0x54b   :  { %v8852_v34 = vadd.f32 -1.0, %v9546_v56  ;;  %v2684_v56 = vmul.f32 %v11739_v5, %v2659_v47 }
 0x54c   :  { %v2656_v3 = vpop.xlane.xlu0 %2655 }
 0x54d   :  { %v2887_v40 = vsel %vm2807_vm8, %v2772_v30, %v8852_v34  ;;  %v2683_v42 = vmul.f32 %v11739_v5, %v2656_v3 }
 0x54e   :  { %v2951_v29 = vsel %vm1053_vm6, %v2887_v40, %v11978_v26 }
 0x54f   :  { %v2774_v46 = vpop.f32.mrf.mxu2  ;;  %8868 = vmatmul.msk.f32.gmra.mxu3 %vm2964_vm11, %v2951_v29 }
 0x550   :  { %v2775_v6 = vadd.f32 %v2774_v46, %v2679_v32 }
 0x552   :  { %v2824_v23 = vmin.f32 %v2775_v6, 0.0  ;;  %vm2808_vm2 = vcmp.gt.f32.partialorder %v2775_v6, 0.0 }
 0x554   :  { %v2847_v7 = vmul.f32 1.442695, %v2824_v23 }
 0x556   :  { %9547 = vpow2.f32 %v2847_v7 }
 0x557   :  { %v2777_v11 = vpop.f32.mrf.mxu2 }
 0x558   :  { %v2778_v55 = vadd.f32 %v2777_v11, %v2680_v28 }
 0x55a   :  { %v2825_v17 = vmin.f32 %v2778_v55, 0.0  ;;  %vm2809_vm9 = vcmp.gt.f32.partialorder %v2778_v55, 0.0 }
 0x55c   :  { %v9548_v50 = vpop.eup %9547  ;;  %v2849_v25 = vmul.f32 1.442695, %v2825_v17 }
 0x55d   :  { %v8853_v14 = vadd.f32 -1.0, %v9548_v50 }
 0x55e   :  { %9549 = vpow2.f32 %v2849_v25 }
 0x55f   :  { %v2780_v53 = vpop.f32.mrf.mxu2  ;;  %v2888_v37 = vsel %vm2808_vm2, %v2775_v6, %v8853_v14  ;;  %v12003_v51 = vpop.permute.xlu0 %2917 }
 0x560   :  { %v2781_v60 = vadd.f32 %v2780_v53, %v2681_v39  ;;  %v2952_v0 = vsel %vm1053_vm6, %v2888_v37, %v11985_v41 }
 0x561   :  { %8869 = vmatmul.msk.f32.gmra.mxu3 %vm2964_vm11, %v2952_v0 }
 0x562   :  { %v2826_v13 = vmin.f32 %v2781_v60, 0.0  ;;  %vm2810_vm10 = vcmp.gt.f32.partialorder %v2781_v60, 0.0 }
 0x564   :  { %v9550_v36 = vpop.eup %9549  ;;  %v2851_v24 = vmul.f32 1.442695, %v2826_v13 }
 0x565   :  { %v8854_v58 = vadd.f32 -1.0, %v9550_v36 }
 0x566   :  { %9551 = vpow2.f32 %v2851_v24 }
 0x567   :  { %v2783_v59 = vpop.f32.mrf.mxu2  ;;  %v2889_v19 = vsel %vm2809_vm9, %v2778_v55, %v8854_v58  ;;  %v12009_v28 = vpop.permute.xlu0 %2919 }
 0x568   :  { %v2784_v12 = vadd.f32 %v2783_v59, %v2682_v44  ;;  %v2953_v43 = vsel %vm1053_vm6, %v2889_v19, %v11991_v22 }
 0x569   :  { %8870 = vmatmul.msk.f32.gmra.mxu3 %vm2964_vm11, %v2953_v43  ;;  %v2662_v6 = vpop.xlane.xlu2 %2661 }
 0x56a   :  { %v2827_v48 = vmin.f32 %v2784_v12, 0.0  ;;  %vm2811_vm12 = vcmp.gt.f32.partialorder %v2784_v12, 0.0  ;;  %v2685_v52 = vmul.f32 %v11739_v5, %v2662_v6 }
 0x56c   :  { %v9552_v1 = vpop.eup %9551  ;;  %v2853_v16 = vmul.f32 1.442695, %v2827_v48 }
 0x56d   :  { %v8855_v38 = vadd.f32 -1.0, %v9552_v1 }
 0x56e   :  { %9553 = vpow2.f32 %v2853_v16 }
 0x56f   :  { %v2786_v49 = vpop.f32.mrf.mxu2  ;;  %v2890_v62 = vsel %vm2810_vm10, %v2781_v60, %v8855_v38  ;;  %v12015_v60 = vpop.permute.xlu1 %2921 }
 0x570   :  { %v2787_v63 = vadd.f32 %v2786_v49, %v2683_v42  ;;  %v2954_v8 = vsel %vm1053_vm6, %v2890_v62, %v11998_v2 }
 0x571   :  { %8871 = vmatmul.msk.f32.gmra.mxu3 %vm2964_vm11, %v2954_v8  ;;  %v2668_v37 = vpop.xlane.xlu2 %2667 }
 0x572   :  { %v2828_v21 = vmin.f32 %v2787_v63, 0.0  ;;  %vm2812_vm13 = vcmp.gt.f32.partialorder %v2787_v63, 0.0  ;;  %v2687_v19 = vmul.f32 %v11739_v5, %v2668_v37 }
 0x574   :  { %v9554_v30 = vpop.eup %9553  ;;  %v2855_v61 = vmul.f32 1.442695, %v2828_v21 }
 0x575   :  { %v8856_v33 = vadd.f32 -1.0, %v9554_v30 }
 0x576   :  { %9555 = vpow2.f32 %v2855_v61 }
 0x577   :  { %v2789_v31 = vpop.f32.mrf.mxu2  ;;  %v2891_v34 = vsel %vm2811_vm12, %v2784_v12, %v8856_v33  ;;  %v12027_v8 = vpop.permute.xlu1 %2925 }
 0x578   :  { %v2790_v40 = vadd.f32 %v2789_v31, %v2684_v56  ;;  %v2955_v32 = vsel %vm1053_vm6, %v2891_v34, %v12003_v51  ;;  %v3030_v33 = vpop.f32.mrf.mxu3 }
 0x579   :  { %8872 = vmatmul.msk.f32.gmra.mxu3 %vm2964_vm11, %v2955_v32  ;;  %v12020_v58 = vpop.permute.xlu2 %2923 }
 0x57a   :  { %v2829_v29 = vmin.f32 %v2790_v40, 0.0  ;;  %vm2813_vm3 = vcmp.gt.f32.partialorder %v2790_v40, 0.0  ;;  %16361 = vst [vmem:[#allocation22_spill] sm:$0xff] %v12020_v58 }
 0x57c   :  { %v9556_v46 = vpop.eup %9555  ;;  %v2857_v23 = vmul.f32 1.442695, %v2829_v29 }
 0x57d   :  { %v8857_v7 = vadd.f32 -1.0, %v9556_v46 }
 0x57e   :  { %9557 = vpow2.f32 %v2857_v23 }
 0x57f   :  { %v2892_v11 = vsel %vm2812_vm13, %v2787_v63, %v8857_v7 }
 0x580   :  { %v2792_v55 = vpop.f32.mrf.mxu2  ;;  %v2956_v17 = vsel %vm1053_vm6, %v2892_v11, %v12009_v28  ;;  %v3033_v34 = vpop.f32.mrf.mxu3 }
 0x581   :  { %v2793_v50 = vadd.f32 %v2792_v55, %v2685_v52  ;;  %8873 = vmatmul.msk.f32.gmra.mxu3 %vm2964_vm11, %v2956_v17  ;;  %v9462_v52 = vld [vmem:[%s15896_s18] ss:$0 sm:$0xff] }
 0x582   :  { %v12056_v37 = vadd.f32 %v9462_v52, %v3030_v33 }
 0x583   :  { %v2830_v25 = vmin.f32 %v2793_v50, 0.0  ;;  %vm2814_vm4 = vcmp.gt.f32.partialorder %v2793_v50, 0.0 }
 0x584   :  { %v9558_v14 = vpop.eup %9557 }
 0x585   :  { %v8858_v39 = vadd.f32 -1.0, %v9558_v14  ;;  %v2859_v53 = vmul.f32 1.442695, %v2830_v25 }
 0x587   :  { %9559 = vpow2.f32 %v2859_v53  ;;  %v2893_v0 = vsel %vm2813_vm3, %v2790_v40, %v8858_v39 }
 0x588   :  { %v2795_v57 = vpop.f32.mrf.mxu2  ;;  %v2957_v13 = vsel %vm1053_vm6, %v2893_v0, %v12015_v60  ;;  %v3036_v40 = vpop.f32.mrf.mxu3 }
 0x589   :  { %8874 = vmatmul.msk.f32.gmra.mxu3 %vm2964_vm11, %v2957_v13 }
 0x58d   :  { %v9560_v36 = vpop.eup %9559 }
 0x58e   :  { %v8859_v24 = vadd.f32 -1.0, %v9560_v36 }
 0x590   :  { %v2798_v44 = vpop.f32.mrf.mxu2  ;;  %v2894_v59 = vsel %vm2814_vm4, %v2793_v50, %v8859_v24  ;;  %v3039_v32 = vpop.f32.mrf.mxu3 }
 0x591   :  { %v2958_v12 = vsel %vm1053_vm6, %v2894_v59, %v12020_v58  ;;  %v2799_v48 = vadd.f32 %v2798_v44, %v2687_v19  ;;  %v12048_v14 = vadd.f32 %v9462_v52, %v3039_v32 }
 0x592   :  { %8875 = vmatmul.msk.f32.gmra.mxu3 %vm2964_vm11, %v2958_v12  ;;  %v2665_v43 = vpop.xlane.xlu0 %2664 }
 0x593   :  { %v2686_v3 = vmul.f32 %v11739_v5, %v2665_v43  ;;  %v2832_v16 = vmin.f32 %v2799_v48, 0.0  ;;  %vm2816_vm8 = vcmp.gt.f32.partialorder %v2799_v48, 0.0 }
 0x595   :  { %v2796_v1 = vadd.f32 %v2795_v57, %v2686_v3  ;;  %v2863_v49 = vmul.f32 1.442695, %v2832_v16 }
 0x597   :  { %v2831_v38 = vmin.f32 %v2796_v1, 0.0  ;;  %vm2815_vm7 = vcmp.gt.f32.partialorder %v2796_v1, 0.0 }
 0x598   :  { %v3042_v29 = vpop.f32.mrf.mxu3 }
 0x599   :  { %v2861_v42 = vmul.f32 1.442695, %v2831_v38  ;;  %v12089_v3 = vadd.f32 %v9462_v52, %v3042_v29 }
 0x59b   :  { %9561 = vpow2.f32 %v2861_v42  ;;  %v12097_v42 = vadd.f32 %v9462_v52, %v3033_v34 }
 0x59c   :  { %9563 = vpow2.f32 %v2863_v49  ;;  %v12099_v49 = vadd.f32 %v9462_v52, %v3036_v40 }
 0x5a1   :  { %v9562_v62 = vpop.eup %9561 }
 0x5a2   :  { %v8860_v63 = vadd.f32 -1.0, %v9562_v62  ;;  %v9564_v47 = vpop.eup %9563 }
 0x5a3   :  { %v8861_v5 = vadd.f32 -1.0, %v9564_v47 }
 0x5a4   :  { %v2895_v21 = vsel %vm2815_vm7, %v2796_v1, %v8860_v63 }
 0x5a5   :  { %v2959_v30 = vsel %vm1053_vm6, %v2895_v21, %v12027_v8  ;;  %v12032_v61 = vpop.permute.xlu0 %2927  ;;  %v2896_v56 = vsel %vm2816_vm8, %v2799_v48, %v8861_v5 }
 0x5a6   :  { %8876 = vmatmul.msk.f32.gmra.mxu3 %vm2964_vm11, %v2959_v30  ;;  %v2960_v31 = vsel %vm1053_vm6, %v2896_v56, %v12032_v61 }
 0x5a7   :  { %v3045_v46 = vpop.f32.mrf.mxu3 }
 0x5a8   :  { %v12091_v1 = vadd.f32 %v9462_v52, %v3045_v46 }
 0x5ae   :  { %8877 = vmatmul.msk.f32.gmra.mxu3 %vm2964_vm11, %v2960_v31 }
 0x5d2   :  { %v3048_v6 = vpop.f32.mrf.mxu3 }
 0x5d3   :  { %v12044_v50 = vadd.f32 %v9462_v52, %v3048_v6 }
 0x5e4   :  { %v3051_v23 = vpop.f32.mrf.mxu3 }
 0x5e5   :  { %v12080_v12 = vadd.f32 %v9462_v52, %v3051_v23 }
 0x5ec   :  { %v3054_v7 = vpop.f32.mrf.mxu3 }
 0x5ed   :  { %v12082_v43 = vadd.f32 %v9462_v52, %v3054_v7 }
 0x5f4   :  { %v3057_v11 = vpop.f32.mrf.mxu3 }
 0x5f5   :  { %v12040_v55 = vadd.f32 %v9462_v52, %v3057_v11 }
 0x5f7   :  { %3416 = vrot.lane.b32.xlu0 %v12040_v55, %s16018_s16 }
 0x5fc   :  { %v3060_v17 = vpop.f32.mrf.mxu3 }
 0x5fd   :  { %v12072_v59 = vadd.f32 %v9462_v52, %v3060_v17 }
 0x5ff   :  { %3410 = vrot.lane.b32.xlu0 %v12044_v50, %s16018_s16  ;;  %v8888_v31 = vmul.f32 -1.442695, %v12072_v59 }
 0x604   :  { %v3063_v25 = vpop.f32.mrf.mxu3 }
 0x605   :  { %v12050_v39 = vadd.f32 %v9462_v52, %v3063_v25 }
 0x607   :  { %3404 = vrot.lane.b32.xlu0 %v12048_v14, %s16018_s16  ;;  %3420 = vrot.lane.b32.xlu1 %v12050_v39, %s16018_s16  ;;  %v8889_v62 = vmul.f32 -1.442695, %v12050_v39 }
 0x60c   :  { %v3066_v53 = vpop.f32.mrf.mxu3 }
 0x60d   :  { %v12058_v0 = vadd.f32 %v9462_v52, %v3066_v53 }
 0x60f   :  { %3398 = vrot.lane.b32.xlu0 %v12056_v37, %s16018_s16  ;;  %3422 = vrot.lane.b32.xlu2 %v12058_v0, %s16018_s16  ;;  %v8890_v48 = vmul.f32 -1.442695, %v12058_v0 }
 0x611   :  { %9565 = vpow2.f32 %v8890_v48 }
 0x615   :  { %v3069_v57 = vpop.f32.mrf.mxu3 }
 0x616   :  { %v12064_v13 = vadd.f32 %v9462_v52, %v3069_v57 }
 0x617   :  { %v9566_v16 = vpop.eup %9565 }
 0x618   :  { %3424 = vrot.lane.b32.xlu1 %v12064_v13, %s16018_s16  ;;  %v3138_v38 = vadd.f32 1.0, %v9566_v16  ;;  %v8891_v11 = vmul.f32 -1.442695, %v12064_v13 }
 0x61a   :  { %9567 = vrcp.f32 %v3138_v38  ;;  %v3333_v29 = vand.u32 2147483648, %v3138_v38  ;;  %vm3327_vm9 = vweird.f32 %v3138_v38  ;;  %v3331_v46 = vand.u32 2147483647, %v3138_v38 }
 0x61b   :  { %9569 = vpow2.f32 %v8889_v62 }
 0x61c   :  { %vm3332_vm12 = vcmp.eq.f32.partialorder %v3331_v46, 8.507059e+37 }
 0x620   :  { %v9568_v63 = vpop.eup %9567 }
 0x621   :  { %v9570_v21 = vpop.eup %9569  ;;  %v3323_v47 = vmul.f32 %v9568_v63, %v3138_v38  ;;  %vm3328_vm2 = vweird.f32 %v9568_v63  ;;  %v8885_v38 = vmul.f32 -1.442695, %v12080_v12 }
 0x622   :  { %v3137_v30 = vadd.f32 1.0, %v9570_v21  ;;  %vm3329_vm10 = vmor %vm3327_vm9, %vm3328_vm2 }
 0x623   :  { %v3324_v33 = vsub.f32 1.0, %v3323_v47 }
 0x624   :  { %9571 = vrcp.f32 %v3137_v30  ;;  %v3318_v21 = vand.u32 2147483648, %v3137_v30  ;;  %vm3312_vm3 = vweird.f32 %v3137_v30 }
 0x625   :  { %v3325_v56 = vmul.f32 %v9568_v63, %v3324_v33 }
 0x627   :  { %v3326_v40 = vadd.f32 %v9568_v63, %v3325_v56 }
 0x629   :  { %v3072_v36 = vpop.f32.mrf.mxu3  ;;  %v3330_v23 = vsel %vm3329_vm10, %v9568_v63, %v3326_v40 }
 0x62a   :  { %v12068_v24 = vadd.f32 %v9462_v52, %v3072_v36  ;;  %v9572_v34 = vpop.eup %9571 }
 0x62b   :  { %v3308_v7 = vmul.f32 %v9572_v34, %v3137_v30  ;;  %vm3313_vm13 = vweird.f32 %v9572_v34 }
 0x62c   :  { %3426 = vrot.lane.b32.xlu2 %v12068_v24, %s16018_s16  ;;  %v8892_v5 = vmul.f32 -1.442695, %v12068_v24  ;;  %vm3314_vm4 = vmor %vm3312_vm3, %vm3313_vm13 }
 0x62d   :  { %v3309_v57 = vsub.f32 1.0, %v3308_v7 }
 0x62e   :  { %9573 = vpow2.f32 %v8892_v5  ;;  %v3316_v5 = vand.u32 2147483647, %v3137_v30 }
 0x62f   :  { %9575 = vpow2.f32 %v8888_v31  ;;  %v3310_v48 = vmul.f32 %v9572_v34, %v3309_v57  ;;  %v3319_v31 = vor.u32 1.1754944e-38, %v3318_v21 }
 0x630   :  { %vm3317_vm7 = vcmp.eq.f32.partialorder %v3316_v5, 8.507059e+37 }
 0x631   :  { %v3075_v44 = vpop.f32.mrf.mxu3  ;;  %v3311_v62 = vadd.f32 %v9572_v34, %v3310_v48 }
 0x632   :  { %v12074_v19 = vadd.f32 %v9462_v52, %v3075_v44  ;;  %v3334_v52 = vor.u32 1.1754944e-38, %v3333_v29  ;;  %v8882_v29 = vmul.f32 -1.442695, %v12089_v3 }
 0x633   :  { %v3315_v56 = vsel %vm3314_vm4, %v9572_v34, %v3311_v62  ;;  %v8886_v62 = vmul.f32 -1.442695, %v12082_v43 }
 0x634   :  { %3418 = vrot.lane.b32.xlu2 %v12072_v59, %s16018_s16  ;;  %3428 = vrot.lane.b32.xlu1 %v12074_v19, %s16018_s16  ;;  %v9574_v32 = vpop.eup %9573  ;;  %v12111_v25 = vsel %vm3332_vm12, %v3334_v52, %v3330_v23  ;;  %v8893_v46 = vmul.f32 -1.442695, %v12074_v19  ;;  %v12127_v7 = vsel %vm3317_vm7, %v3319_v31, %v3315_v56 }
 0x635   :  { %v12108_v6 = vadd.f32 1.0, %v9574_v32  ;;  %v9576_v36 = vpop.eup %9575 }
 0x636   :  { %v12116_v44 = vadd.f32 1.0, %v9576_v36 }
 0x637   :  { %9577 = vrcp.f32 %v12108_v6  ;;  %vm3357_vm2 = vweird.f32 %v12108_v6 }
 0x638   :  { %9579 = vpow2.f32 %v8891_v11  ;;  %vm3297_vm13 = vweird.f32 %v12116_v44 }
 0x639   :  { %9581 = vrcp.f32 %v12116_v44 }
 0x63a   :  { %9583 = vpow2.f32 %v8885_v38  ;;  %v3363_v38 = vand.u32 2147483648, %v12108_v6 }
 0x63c   :  { %3412 = vrot.lane.b32.xlu2 %v12080_v12, %s16018_s16  ;;  %3414 = vrot.lane.b32.xlu1 %v12082_v43, %s16018_s16 }
 0x63d   :  { %v9578_v16 = vpop.eup %9577 }
 0x63e   :  { %v9580_v63 = vpop.eup %9579  ;;  %v3353_v47 = vmul.f32 %v9578_v16, %v12108_v6  ;;  %vm3358_vm8 = vweird.f32 %v9578_v16 }
 0x63f   :  { %v12121_v33 = vadd.f32 1.0, %v9580_v63  ;;  %v12123_v32 = vpop.eup %9581  ;;  %v3361_v63 = vand.u32 2147483647, %v12108_v6  ;;  %vm3359_vm9 = vmor %vm3357_vm2, %vm3358_vm8 }
 0x640   :  { %v3354_v40 = vsub.f32 1.0, %v3353_v47  ;;  %v9584_v52 = vpop.eup %9583  ;;  %v3293_v34 = vmul.f32 %v12123_v32, %v12116_v44  ;;  %v8887_v47 = vmul.f32 -1.442695, %v12040_v55  ;;  %vm3298_vm12 = vweird.f32 %v12123_v32 }
 0x641   :  { %9585 = vrcp.f32 %v12121_v33  ;;  %vm3362_vm10 = vcmp.eq.f32.partialorder %v3361_v63, 8.507059e+37  ;;  %v8878_v63 = vmul.f32 -1.442695, %v12056_v37  ;;  %vm3299_vm3 = vmor %vm3297_vm13, %vm3298_vm12  ;;  %vm3342_vm8 = vweird.f32 %v12121_v33 }
 0x642   :  { %v3355_v11 = vmul.f32 %v9578_v16, %v3354_v40  ;;  %9587 = vpow2.f32 %v8882_v29  ;;  %v3294_v36 = vsub.f32 1.0, %v3293_v34  ;;  %v3364_v29 = vor.u32 1.1754944e-38, %v3363_v38 }
 0x643   :  { %9589 = vpow2.f32 %v8893_v46  ;;  %v8884_v38 = vmul.f32 -1.442695, %v12044_v50 }
 0x644   :  { %3406 = vrot.lane.b32.xlu2 %v12089_v3, %s16018_s16  ;;  %3408 = vrot.lane.b32.xlu1 %v12091_v1, %s16018_s16  ;;  %v3356_v57 = vadd.f32 %v9578_v16, %v3355_v11  ;;  %v3295_v40 = vmul.f32 %v12123_v32, %v3294_v36 }
 0x646   :  { %v3360_v56 = vsel %vm3359_vm9, %v9578_v16, %v3356_v57  ;;  %v3296_v34 = vadd.f32 %v12123_v32, %v3295_v40  ;;  %v3303_v57 = vand.u32 2147483648, %v12116_v44 }
 0x647   :  { %v12137_v48 = vpop.eup %9585 }
 0x648   :  { %v9588_v21 = vpop.eup %9587  ;;  %v3338_v31 = vmul.f32 %v12137_v48, %v12121_v33  ;;  %vm3343_vm7 = vweird.f32 %v12137_v48 }
 0x649   :  { %v9590_v5 = vpop.eup %9589  ;;  %v12148_v46 = vadd.f32 1.0, %v9588_v21  ;;  %vm12195_vm2 = vmor %vm3342_vm8, %vm3343_vm7 }
 0x64a   :  { %v3339_v11 = vsub.f32 1.0, %v3338_v31 }
 0x64b   :  { %vm3207_vm8 = vweird.f32 %v12148_v46 }
 0x64c   :  { %3400 = vrot.lane.b32.xlu2 %v12097_v42, %s16018_s16  ;;  %3402 = vrot.lane.b32.xlu1 %v12099_v49, %s16018_s16 }
 0x669   :  { %v3423_v17 = vpop.permute.xlu2 %3422 }
 0x66a   :  { %v3458_v53 = vmul.f32 %v3423_v17, %v12111_v25  ;;  %v12134_v17 = vadd.f32 1.0, %v9584_v52  ;;  %v12152_v52 = vsel %vm3362_vm10, %v3364_v29, %v3360_v56  ;;  %v3300_v56 = vsel %vm3299_vm3, %v12123_v32, %v3296_v34 }
 0x66b   :  { %v3304_v29 = vor.u32 1.1754944e-38, %v3303_v57  ;;  %v8881_v57 = vmul.f32 -1.442695, %v12048_v14 }
 0x66c   :  { %3502 = vrot.lane.b32.xlu1 %v3458_v53, %s16016_s15  ;;  %v8879_v53 = vmul.f32 -1.442695, %v12097_v42  ;;  %9591 = vrcp.f32 %v12134_v17  ;;  %vm3252_vm12 = vweird.f32 %v12134_v17 }
 0x66e   :  { %9593 = vpow2.f32 %v8879_v53  ;;  %v8883_v53 = vmul.f32 -1.442695, %v12091_v1 }
 0x66f   :  { %9595 = vpow2.f32 %v8886_v62  ;;  %v3301_v62 = vand.u32 2147483647, %v12116_v44  ;;  %v8880_v44 = vmul.f32 -1.442695, %v12099_v49 }
 0x670   :  { %9597 = vpow2.f32 %v8887_v47 }
 0x671   :  { %9599 = vrcp.f32 %v12148_v46  ;;  %vm3302_vm4 = vcmp.eq.f32.partialorder %v3301_v62, 8.507059e+37 }
 0x679   :  { %v3421_v23 = vpop.permute.xlu1 %3420 }
 0x67a   :  { %v3457_v30 = vmul.f32 %v3421_v23, %v12127_v7  ;;  %v12150_v23 = vadd.f32 1.0, %v9590_v5  ;;  %v3340_v5 = vmul.f32 %v12137_v48, %v3339_v11 }
 0x67c   :  { %3500 = vrot.lane.b32.xlu2 %v3457_v30, %s16016_s15  ;;  %v12154_v30 = vpop.eup %9591  ;;  %9601 = vrcp.f32 %v12150_v23  ;;  %v3341_v32 = vadd.f32 %v12137_v48, %v3340_v5 }
 0x67d   :  { %v9594_v36 = vpop.eup %9593  ;;  %v3248_v21 = vmul.f32 %v12154_v30, %v12134_v17  ;;  %9603 = vpow2.f32 %v8883_v53  ;;  %vm3253_vm10 = vweird.f32 %v12154_v30 }
 0x67e   :  { %v9596_v47 = vpop.eup %9595  ;;  %v12172_v40 = vadd.f32 1.0, %v9594_v36  ;;  %9605 = vpow2.f32 %v8884_v38  ;;  %v3348_v36 = vand.u32 2147483648, %v12121_v33  ;;  %v3346_v38 = vand.u32 2147483647, %v12121_v33  ;;  %vm3254_vm13 = vmor %vm3252_vm12, %vm3253_vm10 }
 0x67f   :  { %v9598_v31 = vpop.eup %9597  ;;  %9607 = vpow2.f32 %v8878_v63  ;;  %v3249_v54 = vsub.f32 1.0, %v3248_v21 }
 0x680   :  { %v12179_v45 = vpop.eup %9599  ;;  %v12181_v11 = vadd.f32 1.0, %v9598_v31  ;;  %9609 = vrcp.f32 %v12172_v40  ;;  %v3349_v31 = vor.u32 1.1754944e-38, %v3348_v36  ;;  %vm3347_vm9 = vcmp.eq.f32.partialorder %v3346_v38, 8.507059e+37 }
 0x681   :  { %9611 = vpow2.f32 %v8880_v44  ;;  %v3203_v63 = vmul.f32 %v12179_v45, %v12148_v46  ;;  %v3250_v33 = vmul.f32 %v12154_v30, %v3249_v54  ;;  %vm3162_vm10 = vweird.f32 %v12172_v40 }
 0x682   :  { %v12186_v53 = vpop.eup %9601 }
 0x683   :  { %v9604_v62 = vpop.eup %9603  ;;  %v3368_v5 = vmul.f32 %v12186_v53, %v12150_v23  ;;  %vm3373_vm7 = vweird.f32 %v12186_v53 }
 0x684   :  { %v9606_v21 = vpop.eup %9605  ;;  %v12208_v44 = vadd.f32 1.0, %v9604_v62  ;;  %v3258_v62 = vand.u32 2147483648, %v12134_v17 }
 0x685   :  { %v12212_v20 = vadd.f32 1.0, %v9606_v21 }
 0x686   :  { %v3427_v6 = vpop.permute.xlu2 %3426  ;;  %v3259_v35 = vor.u32 1.1754944e-38, %v3258_v62 }
 0x687   :  { %v3460_v16 = vmul.f32 %v3427_v6, %v12152_v52  ;;  %v12175_v6 = vadd.f32 1.0, %v9596_v47  ;;  %v3345_v47 = vsel %vm12195_vm2, %v12137_v48, %v3341_v32  ;;  %v3251_v32 = vadd.f32 %v12154_v30, %v3250_v33 }
 0x688   :  { %v12214_v18 = vsel %vm3347_vm9, %v3349_v31, %v3345_v47  ;;  %vm3372_vm9 = vweird.f32 %v12150_v23 }
 0x689   :  { %3506 = vrot.lane.b32.xlu2 %v3460_v16, %s16016_s15  ;;  %v12177_v16 = vsel %vm3302_vm4, %v3304_v29, %v3300_v56  ;;  %9613 = vrcp.f32 %v12175_v6  ;;  %v9608_v56 = vpop.eup %9607  ;;  %16364 = vst [vmem:[#allocation31_spill] sm:$0xff] %v12214_v18  ;;  %v3255_v31 = vsel %vm3254_vm13, %v12154_v30, %v3251_v32  ;;  %vm3208_vm4 = vweird.f32 %v12179_v45  ;;  %vm12273_vm12 = vmor %vm3372_vm9, %vm3373_vm7 }
 0x68a   :  { %9615 = vrcp.f32 %v12181_v11  ;;  %v3425_v29 = vpop.permute.xlu1 %3424  ;;  %v12240_v9 = vadd.f32 1.0, %v9608_v56  ;;  %vm12260_vm2 = vmor %vm3207_vm8, %vm3208_vm4  ;;  %vm3267_vm9 = vweird.f32 %v12175_v6 }
 0x68b   :  { %9617 = vpow2.f32 %v8881_v57  ;;  %v3459_v54 = vmul.f32 %v3425_v29, %v12214_v18  ;;  %v3369_v57 = vsub.f32 1.0, %v3368_v5 }
 0x68c   :  { %9619 = vrcp.f32 %v12208_v44 }
 0x68d   :  { %9621 = vrcp.f32 %v12212_v20  ;;  %v3370_v29 = vmul.f32 %v12186_v53, %v3369_v57 }
 0x68e   :  { %v3419_v10 = vpop.permute.xlu2 %3418 }
 0x68f   :  { %v3456_v34 = vmul.f32 %v3419_v10, %v12177_v16  ;;  %v3204_v10 = vsub.f32 1.0, %v3203_v63  ;;  %v3256_v63 = vand.u32 2147483647, %v12134_v17  ;;  %v3371_v62 = vadd.f32 %v12186_v53, %v3370_v29 }
 0x691   :  { %3498 = vrot.lane.b32.xlu0 %v3456_v34, %s16016_s15  ;;  %v12210_v34 = vpop.eup %9609  ;;  %v3205_v5 = vmul.f32 %v12179_v45, %v3204_v10  ;;  %vm3257_vm3 = vcmp.eq.f32.partialorder %v3256_v63, 8.507059e+37  ;;  %v3213_v63 = vand.u32 2147483648, %v12148_v46 }
 0x692   :  { %v9612_v48 = vpop.eup %9611  ;;  %v3158_v21 = vmul.f32 %v12210_v34, %v12172_v40  ;;  %v12245_v10 = vsel %vm3257_vm3, %v3259_v35, %v3255_v31  ;;  %v3378_v35 = vand.u32 2147483648, %v12150_v23  ;;  %v3376_v31 = vand.u32 2147483647, %v12150_v23 }
 0x693   :  { %v12219_v36 = vpop.eup %9613  ;;  %v12230_v33 = vadd.f32 1.0, %v9612_v48  ;;  %16365 = vst [vmem:[#allocation4_spill] sm:$0xff] %v12245_v10  ;;  %v3206_v30 = vadd.f32 %v12179_v45, %v3205_v5  ;;  %v3214_v58 = vor.u32 1.1754944e-38, %v3213_v63  ;;  %vm3163_vm3 = vweird.f32 %v12210_v34 }
 0x694   :  { %v12222_v27 = vpop.eup %9615  ;;  %v3263_v17 = vmul.f32 %v12219_v36, %v12175_v6  ;;  %v3159_v4 = vsub.f32 1.0, %v3158_v21  ;;  %v3379_v2 = vor.u32 1.1754944e-38, %v3378_v35  ;;  %vm3377_vm4 = vcmp.eq.f32.partialorder %v3376_v31, 8.507059e+37 }
 0x695   :  { %v9618_v47 = vpop.eup %9617  ;;  %9623 = vrcp.f32 %v12230_v33  ;;  %v3210_v23 = vsel %vm12260_vm2, %v12179_v45, %v3206_v30  ;;  %v3168_v45 = vand.u32 2147483648, %v12172_v40  ;;  %vm3268_vm7 = vweird.f32 %v12219_v36  ;;  %vm12315_vm2 = vmor %vm3162_vm10, %vm3163_vm3 }
 0x696   :  { %v3413_v38 = vpop.permute.xlu2 %3412  ;;  %v12242_v48 = vadd.f32 1.0, %v9618_v47  ;;  %v12249_v32 = vpop.eup %9619  ;;  %v3264_v56 = vsub.f32 1.0, %v3263_v17  ;;  %v3160_v17 = vmul.f32 %v12210_v34, %v3159_v4  ;;  %v3375_v4 = vsel %vm12273_vm12, %v12186_v53, %v3371_v62  ;;  %vm12334_vm10 = vmor %vm3267_vm9, %vm3268_vm7 }
 0x697   :  { %v3453_v57 = vmul.f32 %v3413_v38, %v12245_v10  ;;  %v12257_v21 = vpop.eup %9621  ;;  %v3211_v38 = vand.u32 2147483647, %v12148_v46  ;;  %v3218_v46 = vmul.f32 %v12249_v32, %v12208_v44  ;;  %vm3283_vm8 = vweird.f32 %v12222_v27 }
 0x698   :  { %9625 = vrcp.f32 %v12242_v48  ;;  %v3265_v41 = vmul.f32 %v12219_v36, %v3264_v56  ;;  %v3233_v10 = vmul.f32 %v12257_v21, %v12212_v20  ;;  %v3161_v53 = vadd.f32 %v12210_v34, %v3160_v17 }
 0x699   :  { %3504 = vrot.lane.b32.xlu0 %v3459_v54, %s16016_s15  ;;  %v3278_v54 = vmul.f32 %v12222_v27, %v12181_v11  ;;  %9627 = vrcp.f32 %v12240_v9  ;;  %vm3212_vm13 = vcmp.eq.f32.partialorder %v3211_v38, 8.507059e+37  ;;  %v12297_v56 = vsel %vm3377_vm4, %v3379_v2, %v3375_v4 }
 0x69a   :  { %v12294_v30 = vsel %vm3212_vm13, %v3214_v58, %v3210_v23  ;;  %v3219_v5 = vsub.f32 1.0, %v3218_v46  ;;  %v3266_v38 = vadd.f32 %v12219_v36, %v3265_v41  ;;  %v3234_v2 = vsub.f32 1.0, %v3233_v10 }
 0x69b   :  { %v3279_v47 = vsub.f32 1.0, %v3278_v54  ;;  %v12287_v26 = vpop.eup %9623  ;;  %16370 = vst [vmem:[#allocation6_spill] sm:$0xff] %v12294_v30  ;;  %v3417_v54 = vpop.permute.xlu0 %3416  ;;  %v3273_v17 = vand.u32 2147483648, %v12175_v6  ;;  %v3288_v46 = vand.u32 2147483648, %v12181_v11  ;;  %vm3282_vm12 = vweird.f32 %v12181_v11 }
 0x69c   :  { %v3173_v41 = vmul.f32 %v12287_v26, %v12230_v33  ;;  %v3286_v10 = vand.u32 2147483647, %v12181_v11  ;;  %v3165_v23 = vsel %vm12315_vm2, %v12210_v34, %v3161_v53  ;;  %vm12340_vm13 = vmor %vm3282_vm12, %vm3283_vm8  ;;  %v3169_v11 = vor.u32 1.1754944e-38, %v3168_v45 }
 0x69d   :  { %v3280_v15 = vmul.f32 %v12222_v27, %v3279_v47  ;;  %v3235_v53 = vmul.f32 %v12257_v21, %v3234_v2  ;;  %vm3223_vm8 = vweird.f32 %v12249_v32  ;;  %vm3238_vm2 = vweird.f32 %v12257_v21 }
 0x69e   :  { %v3407_v29 = vpop.permute.xlu2 %3406  ;;  %v12299_v47 = vpop.eup %9625  ;;  %v3174_v45 = vsub.f32 1.0, %v3173_v41  ;;  %vm3287_vm7 = vcmp.eq.f32.partialorder %v3286_v10, 8.507059e+37  ;;  %vm3222_vm9 = vweird.f32 %v12208_v44  ;;  %vm3237_vm12 = vweird.f32 %v12212_v20 }
 0x69f   :  { %v3450_v63 = vmul.f32 %v3407_v29, %v12294_v30  ;;  %v12305_v31 = vpop.eup %9627  ;;  %v3281_v58 = vadd.f32 %v12222_v27, %v3280_v15  ;;  %v3271_v15 = vand.u32 2147483647, %v12175_v6  ;;  %v3274_v29 = vor.u32 1.1754944e-38, %v3273_v17 }
 0x6a0   :  { %v3289_v30 = vor.u32 1.1754944e-38, %v3288_v46  ;;  %v3236_v2 = vadd.f32 %v12257_v21, %v3235_v53  ;;  %v3228_v17 = vand.u32 2147483648, %v12208_v44  ;;  %v3243_v46 = vand.u32 2147483648, %v12212_v20 }
 0x6a1   :  { %3492 = vrot.lane.b32.xlu0 %v3453_v57, %s16016_s15  ;;  %v3166_v57 = vand.u32 2147483647, %v12172_v40  ;;  %v3188_v40 = vmul.f32 %v12299_v47, %v12242_v48  ;;  %v3285_v34 = vsel %vm12340_vm13, %v12222_v27, %v3281_v58  ;;  %vm3272_vm4 = vcmp.eq.f32.partialorder %v3271_v15, 8.507059e+37  ;;  %vm3239_vm13 = vmor %vm3237_vm12, %vm3238_vm2 }
 0x6a2   :  { %v3143_v41 = vmul.f32 %v12305_v31, %v12240_v9  ;;  %v3229_v6 = vor.u32 1.1754944e-38, %v3228_v17  ;;  %vm3177_vm2 = vweird.f32 %v12230_v33 }
 0x6a3   :  { %vm3167_vm3 = vcmp.eq.f32.partialorder %v3166_v57, 8.507059e+37  ;;  %v3189_v18 = vsub.f32 1.0, %v3188_v40  ;;  %v3411_v15 = vpop.permute.xlu0 %3410  ;;  %v3175_v40 = vmul.f32 %v12287_v26, %v3174_v45  ;;  %v3181_v45 = vand.u32 2147483647, %v12230_v33 }
 0x6a4   :  { %v12352_v22 = vsel %vm3167_vm3, %v3169_v11, %v3165_v23  ;;  %v3240_v23 = vsel %vm3239_vm13, %v12257_v21, %v3236_v2  ;;  %v3244_v11 = vor.u32 1.1754944e-38, %v3243_v46 }
 0x6a5   :  { %vm3182_vm13 = vcmp.eq.f32.partialorder %v3181_v45, 8.507059e+37 }
 0x6a6   :  { %v3429_v62 = vpop.permute.xlu1 %3428 }
 0x6a7   :  { %v3461_v35 = vmul.f32 %v3429_v62, %v12297_v56  ;;  %v3270_v62 = vsel %vm12334_vm10, %v12219_v36, %v3266_v38  ;;  %vm3224_vm10 = vmor %vm3222_vm9, %vm3223_vm8  ;;  %vm3193_vm8 = vweird.f32 %v12299_v47  ;;  %vm3192_vm9 = vweird.f32 %v12242_v48 }
 0x6a8   :  { %v12354_v4 = vsel %vm3272_vm4, %v3274_v29, %v3270_v62  ;;  %v3198_v29 = vand.u32 2147483648, %v12242_v48 }
 0x6a9   :  { %3486 = vrot.lane.b32.xlu0 %v3450_v63, %s16016_s15  ;;  %3508 = vrot.lane.b32.xlu1 %v3461_v35, %s16016_s15  ;;  %v3220_v63 = vmul.f32 %v12249_v32, %v3219_v5  ;;  %v3401_v35 = vpop.permute.xlu2 %3400  ;;  %v12357_v5 = vsel %vm3287_vm7, %v3289_v30, %v3285_v34  ;;  %v3226_v30 = vand.u32 2147483647, %v12208_v44  ;;  %v3190_v44 = vmul.f32 %v12299_v47, %v3189_v18 }
 0x6aa   :  { %v3447_v27 = vmul.f32 %v3401_v35, %v12352_v22  ;;  %v3455_v58 = vmul.f32 %v3417_v54, %v12357_v5  ;;  %v3241_v54 = vand.u32 2147483647, %v12212_v20  ;;  %v3144_v20 = vsub.f32 1.0, %v3143_v41 }
 0x6ab   :  { %v3221_v38 = vadd.f32 %v12249_v32, %v3220_v63  ;;  %vm3227_vm3 = vcmp.eq.f32.partialorder %v3226_v30, 8.507059e+37  ;;  %vm3178_vm7 = vweird.f32 %v12287_v26  ;;  %v3191_v18 = vadd.f32 %v12299_v47, %v3190_v44 }
 0x6ac   :  { %vm3242_vm4 = vcmp.eq.f32.partialorder %v3241_v54, 8.507059e+37  ;;  %v3183_v35 = vand.u32 2147483648, %v12230_v33  ;;  %vm3179_vm12 = vmor %vm3177_vm2, %vm3178_vm7  ;;  %v3199_v17 = vor.u32 1.1754944e-38, %v3198_v29  ;;  %vm3147_vm7 = vweird.f32 %v12240_v9 }
 0x6ad   :  { %v3225_v10 = vsel %vm3224_vm10, %v12249_v32, %v3221_v38  ;;  %v12384_v34 = vsel %vm3242_vm4, %v3244_v11, %v3240_v23  ;;  %v3176_v32 = vadd.f32 %v12287_v26, %v3175_v40  ;;  %vm3194_vm10 = vmor %vm3192_vm9, %vm3193_vm8  ;;  %vm3148_vm4 = vweird.f32 %v12305_v31 }
 0x6ae   :  { %v3415_v36 = vpop.permute.xlu1 %3414  ;;  %v12382_v62 = vsel %vm3227_vm3, %v3229_v6, %v3225_v10  ;;  %v3452_v21 = vmul.f32 %v3411_v15, %v12384_v34  ;;  %v3195_v38 = vsel %vm3194_vm10, %v12299_v47, %v3191_v18  ;;  %v3184_v2 = vor.u32 1.1754944e-38, %v3183_v35  ;;  %vm3149_vm8 = vmor %vm3147_vm7, %vm3148_vm4 }
 0x6af   :  { %v3454_v57 = vmul.f32 %v3415_v36, %v12354_v4  ;;  %v3196_v36 = vand.u32 2147483647, %v12242_v48  ;;  %v3151_v47 = vand.u32 2147483647, %v12240_v9 }
 0x6b1   :  { %3480 = vrot.lane.b32.xlu0 %v3447_v27, %s16016_s15  ;;  %3494 = vrot.lane.b32.xlu2 %v3454_v57, %s16016_s15  ;;  %v3405_v27 = vpop.permute.xlu0 %3404  ;;  %v3180_v57 = vsel %vm3179_vm12, %v12287_v26, %v3176_v32  ;;  %vm3197_vm3 = vcmp.eq.f32.partialorder %v3196_v36, 8.507059e+37  ;;  %v3153_v26 = vand.u32 2147483648, %v12240_v9  ;;  %vm3152_vm2 = vcmp.eq.f32.partialorder %v3151_v47, 8.507059e+37 }
 0x6b2   :  { %3496 = vrot.lane.b32.xlu1 %v3455_v58, %s16016_s15  ;;  %v3145_v58 = vmul.f32 %v12305_v31, %v3144_v20  ;;  %v12403_v33 = vsel %vm3182_vm13, %v3184_v2, %v3180_v57  ;;  %v12405_v15 = vsel %vm3197_vm3, %v3199_v17, %v3195_v38 }
 0x6b3   :  { %v3449_v30 = vmul.f32 %v3405_v27, %v12405_v15  ;;  %v3154_v10 = vor.u32 1.1754944e-38, %v3153_v26 }
 0x6b4   :  { %v3146_v54 = vadd.f32 %v12305_v31, %v3145_v58 }
 0x6b6   :  { %v3409_v63 = vpop.permute.xlu1 %3408  ;;  %v3150_v41 = vsel %vm3149_vm8, %v12305_v31, %v3146_v54 }
 0x6b7   :  { %v3451_v53 = vmul.f32 %v3409_v63, %v12382_v62  ;;  %v12417_v23 = vsel %vm3152_vm2, %v3154_v10, %v3150_v41 }
 0x6b9   :  { %3488 = vrot.lane.b32.xlu2 %v3451_v53, %s16016_s15  ;;  %v3399_v40 = vpop.permute.xlu0 %3398 }
 0x6ba   :  { %3490 = vrot.lane.b32.xlu1 %v3452_v21, %s16016_s15  ;;  %v3446_v44 = vmul.f32 %v3399_v40, %v12417_v23 }
 0x6be   :  { %v3403_v46 = vpop.permute.xlu1 %3402 }
 0x6bf   :  { %v3448_v48 = vmul.f32 %v3403_v46, %v12403_v33 }
 0x6c1   :  { %3482 = vrot.lane.b32.xlu2 %v3448_v48, %s16016_s15 }
 0x6c2   :  { %3484 = vrot.lane.b32.xlu1 %v3449_v30, %s16016_s15 }
 0x6ca   :  { %3478 = vrot.lane.b32.xlu1 %v3446_v44, %s16016_s15  ;;  %s16558_s15 = smov 32  }
 0x6d6   :  { %v3501_v6 = vpop.permute.xlu2 %3500 }
 0x6d7   :  { %v3537_v11 = vadd.f32 %v3501_v6, %v12050_v39 }
 0x6d9   :  { %9629 = vtanh.f32 %v3537_v11 }
 0x6de   :  { %v3503_v20 = vpop.permute.xlu1 %3502 }
 0x6df   :  { %v9630_v9 = vpop.eup %9629  ;;  %v3538_v63 = vadd.f32 %v3503_v20, %v12058_v0 }
 0x6e0   :  { %3612 = vrot.lane.b32.xlu0 %v9630_v9, %s16014_s2 }
 0x6e1   :  { %9631 = vtanh.f32 %v3538_v63 }
 0x6e3   :  { %v3507_v31 = vpop.permute.xlu2 %3506 }
 0x6e4   :  { %v3540_v53 = vadd.f32 %v3507_v31, %v12068_v24  ;;  %v3666_v31 = vmul.f32 %v12111_v25, %v12015_v60 }
 0x6e6   :  { %9633 = vtanh.f32 %v3540_v53 }
 0x6e7   :  { %v9632_v32 = vpop.eup %9631 }
 0x6e8   :  { %3614 = vrot.lane.b32.xlu2 %v9632_v32, %s16014_s2 }
 0x6ec   :  { %v9634_v21 = vpop.eup %9633 }
 0x6ed   :  { %3618 = vrot.lane.b32.xlu0 %v9634_v21, %s16014_s2 }
 0x703   :  { %v3499_v39 = vpop.permute.xlu0 %3498 }
 0x704   :  { %v3536_v18 = vadd.f32 %v3499_v39, %v12072_v59 }
 0x706   :  { %9635 = vtanh.f32 %v3536_v18  ;;  %v3665_v18 = vmul.f32 %v12127_v7, %v12009_v28  ;;  %v3568_v28 = vsub.f32 1.0, %v12177_v16 }
 0x70b   :  { %v3495_v35 = vpop.permute.xlu2 %3494  ;;  %v3505_v0 = vpop.permute.xlu0 %3504 }
 0x70c   :  { %v9636_v29 = vpop.eup %9635  ;;  %v3534_v45 = vadd.f32 %v3495_v35, %v12082_v43  ;;  %v3539_v36 = vadd.f32 %v3505_v0, %v12064_v13 }
 0x70d   :  { %3610 = vrot.lane.b32.xlu1 %v9636_v29, %s16014_s2 }
 0x70e   :  { %9637 = vtanh.f32 %v3534_v45  ;;  %v3668_v45 = vmul.f32 %v12152_v52, %v12027_v8  ;;  %v3669_v8 = vmul.f32 %v12297_v56, %v12032_v61 }
 0x70f   :  { %9639 = vtanh.f32 %v3539_v36 }
 0x713   :  { %v3489_v24 = vpop.permute.xlu2 %3488  ;;  %v3493_v27 = vpop.permute.xlu0 %3492 }
 0x714   :  { %v9638_v57 = vpop.eup %9637  ;;  %v3531_v38 = vadd.f32 %v3489_v24, %v12091_v1  ;;  %v3533_v58 = vadd.f32 %v3493_v27, %v12080_v12 }
 0x715   :  { %v9640_v59 = vpop.eup %9639  ;;  %3606 = vrot.lane.b32.xlu0 %v9638_v57, %s16014_s2 }
 0x716   :  { %9641 = vtanh.f32 %v3531_v38  ;;  %3616 = vrot.lane.b32.xlu1 %v9640_v59, %s16014_s2 }
 0x717   :  { %9643 = vtanh.f32 %v3533_v58  ;;  %v3664_v58 = vmul.f32 %v12177_v16, %v12003_v51  ;;  %v3567_v51 = vsub.f32 1.0, %v12357_v5  ;;  %v16382_v16 = vld [vmem:[#allocation31_spill] sm:$0xff] }
 0x71b   :  { %v3483_v43 = vpop.permute.xlu2 %3482  ;;  %v3509_v13 = vpop.permute.xlu1 %3508 }
 0x71c   :  { %v9642_v2 = vpop.eup %9641  ;;  %v3528_v17 = vadd.f32 %v3483_v43, %v12099_v49  ;;  %v3541_v46 = vadd.f32 %v3509_v13, %v12074_v19  ;;  %v3487_v48 = vpop.permute.xlu0 %3486 }
 0x71d   :  { %v9644_v30 = vpop.eup %9643  ;;  %v3530_v1 = vadd.f32 %v3487_v48, %v12089_v3  ;;  %3600 = vrot.lane.b32.xlu0 %v9642_v2, %s16014_s2  ;;  %v3571_v48 = vsub.f32 1.0, %v16382_v16 }
 0x71e   :  { %9645 = vtanh.f32 %v3528_v17  ;;  %3604 = vrot.lane.b32.xlu1 %v9644_v30, %s16014_s2 }
 0x71f   :  { %9647 = vtanh.f32 %v3541_v46  ;;  %v3566_v46 = vsub.f32 1.0, %v12354_v4 }
 0x720   :  { %9649 = vtanh.f32 %v3530_v1  ;;  %v16383_v1 = vld [vmem:[#allocation27_spill] sm:$0xff] }
 0x724   :  { %v9646_v12 = vpop.eup %9645  ;;  %v3497_v54 = vpop.permute.xlu1 %3496 }
 0x725   :  { %v3481_v26 = vpop.permute.xlu0 %3480  ;;  %v9648_v47 = vpop.eup %9647  ;;  %v3535_v41 = vadd.f32 %v3497_v54, %v12040_v55  ;;  %3594 = vrot.lane.b32.xlu0 %v9646_v12, %s16014_s2  ;;  %v3662_v12 = vmul.f32 %v12354_v4, %v16383_v1 }
 0x726   :  { %v3527_v49 = vadd.f32 %v3481_v26, %v12097_v42  ;;  %v9650_v19 = vpop.eup %9649  ;;  %3620 = vrot.lane.b32.xlu2 %v9648_v47, %s16014_s2  ;;  %v16384_v26 = vld [vmem:[#allocation20_spill] sm:$0xff] }
 0x727   :  { %9651 = vtanh.f32 %v3535_v41  ;;  %3598 = vrot.lane.b32.xlu1 %v9650_v19, %s16014_s2  ;;  %v3663_v47 = vmul.f32 %v12357_v5, %v16384_v26  ;;  %v3563_v5 = vsub.f32 1.0, %v12382_v62 }
 0x728   :  { %9653 = vtanh.f32 %v3527_v49  ;;  %v16385_v49 = vld [vmem:[#allocation22_spill] sm:$0xff] }
 0x729   :  { %v3667_v19 = vmul.f32 %v16382_v16, %v16385_v49  ;;  %v16399_v16 = vld [vmem:[#allocation17_spill] sm:$0xff] }
 0x72c   :  { %v3491_v3 = vpop.permute.xlu1 %3490 }
 0x72d   :  { %v9652_v10 = vpop.eup %9651  ;;  %v3532_v40 = vadd.f32 %v3491_v3, %v12044_v50  ;;  %v3570_v50 = vsub.f32 1.0, %v12111_v25  ;;  %v3572_v25 = vsub.f32 1.0, %v12152_v52 }
 0x72e   :  { %v9654_v44 = vpop.eup %9653  ;;  %3608 = vrot.lane.b32.xlu2 %v9652_v10, %s16014_s2 }
 0x72f   :  { %9655 = vtanh.f32 %v3532_v40  ;;  %3592 = vrot.lane.b32.xlu1 %v9654_v44, %s16014_s2 }
 0x734   :  { %v3485_v55 = vpop.permute.xlu1 %3484 }
 0x735   :  { %v9656_v42 = vpop.eup %9655  ;;  %v3529_v6 = vadd.f32 %v3485_v55, %v12048_v14 }
 0x736   :  { %3602 = vrot.lane.b32.xlu2 %v9656_v42, %s16014_s2 }
 0x737   :  { %9657 = vtanh.f32 %v3529_v6  ;;  %v3564_v6 = vsub.f32 1.0, %v12384_v34 }
 0x73c   :  { %v3479_v11 = vpop.permute.xlu1 %3478 }
 0x73d   :  { %v9658_v20 = vpop.eup %9657  ;;  %v3526_v9 = vadd.f32 %v3479_v11, %v12056_v37  ;;  %v3569_v37 = vsub.f32 1.0, %v12127_v7  ;;  %v3573_v7 = vsub.f32 1.0, %v12297_v56  ;;  %v16389_v11 = vld [vmem:[#allocation4_spill] sm:$0xff] }
 0x73e   :  { %3596 = vrot.lane.b32.xlu2 %v9658_v20, %s16014_s2  ;;  %v3565_v20 = vsub.f32 1.0, %v16389_v11 }
 0x73f   :  { %9659 = vtanh.f32 %v3526_v9 }
 0x742   :  { %v3615_v63 = vpop.permute.xlu2 %3614 }
 0x743   :  { %v3650_v53 = vmul.f32 %v3615_v63, %v3570_v50 }
 0x745   :  { %v9660_v32 = vpop.eup %9659  ;;  %v12455_v21 = vadd.f32 %v3666_v31, %v3650_v53  ;;  %v16390_v31 = vld [vmem:[#allocation16_spill] sm:$0xff] }
 0x746   :  { %3590 = vrot.lane.b32.xlu2 %v9660_v32, %s16014_s2  ;;  %v3659_v53 = vmul.f32 %v12382_v62, %v16390_v31 }
 0x747   :  { %16377 = vst [vmem:[#allocation21_spill] sm:$0xff] %v12455_v21  ;;  %v3698_v14 = vmax.f32 %v12455_v21, 0.0 }
 0x749   :  { %3758 = vrot.lane.b32.xlu0 %v3698_v14, %s16014_s2  ;;  %v16391_v14 = vld [vmem:[#allocation18_spill] sm:$0xff] }
 0x752   :  { %v3613_v39 = vpop.permute.xlu0 %3612 }
 0x753   :  { %v3649_v35 = vmul.f32 %v3613_v39, %v3569_v37  ;;  %v3660_v37 = vmul.f32 %v12384_v34, %v16391_v14  ;;  %v3560_v34 = vsub.f32 1.0, %v12403_v33 }
 0x755   :  { %v12463_v0 = vadd.f32 %v3665_v18, %v3649_v35  ;;  %v16392_v18 = vld [vmem:[#allocation19_spill] sm:$0xff] }
 0x756   :  { %v3661_v35 = vmul.f32 %v16389_v11, %v16392_v18 }
 0x757   :  { %16378 = vst [vmem:[#allocation24_spill] sm:$0xff] %v12463_v0  ;;  %v3697_v60 = vmax.f32 %v12463_v0, 0.0 }
 0x759   :  { %3756 = vrot.lane.b32.xlu1 %v3697_v60, %s16014_s2 }
 0x75f   :  { %v3619_v29 = vpop.permute.xlu0 %3618 }
 0x760   :  { %v3652_v36 = vmul.f32 %v3619_v29, %v3572_v25 }
 0x762   :  { %v12470_v24 = vadd.f32 %v3668_v45, %v3652_v36 }
 0x764   :  { %16379 = vst [vmem:[#allocation26_spill] sm:$0xff] %v12470_v24  ;;  %v3700_v27 = vmax.f32 %v12470_v24, 0.0 }
 0x766   :  { %3762 = vrot.lane.b32.xlu1 %v3700_v27, %s16014_s2 }
 0x77f   :  { %v3611_v57 = vpop.permute.xlu1 %3610 }
 0x780   :  { %v3621_v38 = vpop.permute.xlu2 %3620  ;;  %v3648_v59 = vmul.f32 %v3611_v57, %v3568_v28  ;;  %v3561_v28 = vsub.f32 1.0, %v12405_v15 }
 0x781   :  { %v3653_v52 = vmul.f32 %v3621_v38, %v3573_v7  ;;  %v16396_v38 = vld [vmem:[#allocation6_spill] sm:$0xff] }
 0x782   :  { %v12480_v43 = vadd.f32 %v3664_v58, %v3648_v59  ;;  %v3562_v58 = vsub.f32 1.0, %v16396_v38  ;;  %v16397_v59 = vld [vmem:[#allocation66_spill] sm:$0xff] }
 0x783   :  { %v12482_v13 = vadd.f32 %v3669_v8, %v3653_v52  ;;  %v3656_v8 = vmul.f32 %v12403_v33, %v16397_v59  ;;  %v8911_v59 = vld [vmem:[%s15897_s4 + $0x108] sm:$0xff] }
 0x784   :  { %16380 = vst [vmem:[#allocation5_spill] sm:$0xff] %v12480_v43  ;;  %v3696_v2 = vmax.f32 %v12480_v43, 0.0 }
 0x785   :  { %16381 = vst [vmem:[#allocation35_spill] sm:$0xff] %v12482_v13  ;;  %v3701_v17 = vmax.f32 %v12482_v13, 0.0 }
 0x786   :  { %3754 = vrot.lane.b32.xlu2 %v3696_v2, %s16014_s2  ;;  %v16398_v2 = vld [vmem:[#allocation23_spill] sm:$0xff] }
 0x787   :  { %3764 = vrot.lane.b32.xlu0 %v3701_v17, %s16014_s2  ;;  %v3607_v61 = vpop.permute.xlu0 %3606  ;;  %v3657_v17 = vmul.f32 %v12405_v15, %v16398_v2  ;;  %v3558_v15 = vsub.f32 1.0, %v12417_v23  ;;  %v8896_v2 = vld [vmem:[%s15897_s4 + $0x90] sm:$0xff] }
 0x788   :  { %v3609_v56 = vpop.permute.xlu2 %3608  ;;  %v3617_v30 = vpop.permute.xlu1 %3616  ;;  %v3646_v54 = vmul.f32 %v3607_v61, %v3566_v46 }
 0x789   :  { %v3647_v41 = vmul.f32 %v3609_v56, %v3567_v51  ;;  %v3651_v3 = vmul.f32 %v3617_v30, %v3571_v48  ;;  %v3658_v48 = vmul.f32 %v16396_v38, %v16399_v16  ;;  %v3703_v38 = vld [vmem:[%s15897_s4 + $0x8] sm:$0xff]  ;;  %v8897_v16 = vld [vmem:[%s15897_s4 + $0x98] sm:$0xff] }
 0x78a   :  { %v12497_v10 = vadd.f32 %v3662_v12, %v3646_v54 }
 0x78b   :  { %v12499_v40 = vadd.f32 %v3663_v47, %v3647_v41  ;;  %v12501_v44 = vadd.f32 %v3667_v19, %v3651_v3  ;;  %v3559_v47 = vsub.f32 1.0, %v12352_v22  ;;  %v16403_v41 = vld [vmem:[#allocation65_spill] sm:$0xff] }
 0x78c   :  { %16386 = vst [vmem:[#allocation7_spill] sm:$0xff] %v12497_v10  ;;  %v3694_v55 = vmax.f32 %v12497_v10, 0.0  ;;  %v3654_v49 = vmul.f32 %v12417_v23, %v16403_v41  ;;  %v9458_v23 = vld [vmem:[%s16216_s11 + $0x1] ss:$0 sm:$0xff]  ;;  %v8915_v41 = vld [vmem:[%s15897_s4 + $0x128] sm:$0xff] }
 0x78d   :  { %16387 = vst [vmem:[#allocation28_spill] sm:$0xff] %v12499_v40  ;;  %v3695_v42 = vmax.f32 %v12499_v40, 0.0  ;;  %v3699_v4 = vmax.f32 %v12501_v44, 0.0 }
 0x78e   :  { %16388 = vst [vmem:[#allocation25_spill] sm:$0xff] %v12501_v44  ;;  %3750 = vrot.lane.b32.xlu1 %v3694_v55, %s16014_s2  ;;  %v16404_v55 = vld [vmem:[#allocation67_spill] sm:$0xff] }
 0x78f   :  { %3752 = vrot.lane.b32.xlu0 %v3695_v42, %s16014_s2  ;;  %3760 = vrot.lane.b32.xlu2 %v3699_v4, %s16014_s2  ;;  %v3601_v9 = vpop.permute.xlu0 %3600  ;;  %v3655_v42 = vmul.f32 %v12352_v22, %v16404_v55  ;;  %v8916_v55 = vld [vmem:[%s15897_s4 + $0x130] sm:$0xff] }
 0x790   :  { %v3603_v50 = vpop.permute.xlu2 %3602  ;;  %v3605_v63 = vpop.permute.xlu1 %3604  ;;  %v3643_v32 = vmul.f32 %v3601_v9, %v3563_v5 }
 0x791   :  { %v3644_v39 = vmul.f32 %v3603_v50, %v3564_v6  ;;  %v3645_v60 = vmul.f32 %v3605_v63, %v3565_v20 }
 0x792   :  { %v12518_v25 = vadd.f32 %v3659_v53, %v3643_v32 }
 0x793   :  { %v12520_v29 = vadd.f32 %v3660_v37, %v3644_v39  ;;  %v12522_v45 = vadd.f32 %v3661_v35, %v3645_v60 }
 0x794   :  { %16393 = vst [vmem:[#allocation8_spill] sm:$0xff] %v12518_v25  ;;  %v3691_v36 = vmax.f32 %v12518_v25, 0.0 }
 0x795   :  { %16394 = vst [vmem:[#allocation32_spill] sm:$0xff] %v12520_v29  ;;  %v3692_v27 = vmax.f32 %v12520_v29, 0.0  ;;  %v3693_v62 = vmax.f32 %v12522_v45, 0.0 }
 0x796   :  { %16395 = vst [vmem:[#allocation30_spill] sm:$0xff] %v12522_v45  ;;  %3744 = vrot.lane.b32.xlu1 %v3691_v36, %s16014_s2 }
 0x797   :  { %3746 = vrot.lane.b32.xlu0 %v3692_v27, %s16014_s2  ;;  %3748 = vrot.lane.b32.xlu2 %v3693_v62, %s16014_s2  ;;  %v3595_v7 = vpop.permute.xlu0 %3594 }
 0x798   :  { %v3597_v57 = vpop.permute.xlu2 %3596  ;;  %v3640_v52 = vmul.f32 %v3595_v7, %v3560_v34  ;;  %v3702_v34 = vld [vmem:[%s15897_s4] sm:$0xff] }
 0x799   :  { %v3641_v46 = vmul.f32 %v3597_v57, %v3561_v28  ;;  %v3599_v51 = vpop.permute.xlu1 %3598  ;;  %v8894_v28 = vld [vmem:[%s15897_s4 + $0x80] sm:$0xff] }
 0x79a   :  { %v3642_v61 = vmul.f32 %v3599_v51, %v3562_v58  ;;  %v12539_v56 = vadd.f32 %v3656_v8, %v3640_v52  ;;  %v8910_v7 = vld [vmem:[%s15897_s4 + $0x100] sm:$0xff]  ;;  %v8895_v58 = vld [vmem:[%s15897_s4 + $0x88] sm:$0xff]  ;;  %v3704_v52 = vld [vmem:[%s15897_s4 + $0x10] sm:$0xff] }
 0x79b   :  { %v12541_v30 = vadd.f32 %v3657_v17, %v3641_v46  ;;  %v8926_v57 = vld [vmem:[%s15897_s4 + $0x180] sm:$0xff]  ;;  %v8927_v8 = vld [vmem:[%s15897_s4 + $0x188] sm:$0xff]  ;;  %v8912_v17 = vld [vmem:[%s15897_s4 + $0x110] sm:$0xff] }
 0x79c   :  { %16400 = vst [vmem:[#allocation39_spill] sm:$0xff] %v12539_v56  ;;  %v12543_v1 = vadd.f32 %v3658_v48, %v3642_v61  ;;  %v3688_v12 = vmax.f32 %v12539_v56, 0.0  ;;  %v8928_v46 = vld [vmem:[%s15897_s4 + $0x190] sm:$0xff]  ;;  %v3705_v51 = vld [vmem:[%s15897_s4 + $0x18] sm:$0xff] }
 0x79d   :  { %16401 = vst [vmem:[#allocation29_spill] sm:$0xff] %v12541_v30  ;;  %v3689_v33 = vmax.f32 %v12541_v30, 0.0  ;;  %v8913_v48 = vld [vmem:[%s15897_s4 + $0x118] sm:$0xff] }
 0x79e   :  { %16402 = vst [vmem:[#allocation34_spill] sm:$0xff] %v12543_v1  ;;  %v3690_v54 = vmax.f32 %v12543_v1, 0.0  ;;  %3738 = vrot.lane.b32.xlu1 %v3688_v12, %s16014_s2  ;;  %v8929_v61 = vld [vmem:[%s15897_s4 + $0x198] sm:$0xff]  ;;  %v3706_v12 = vld [vmem:[%s15897_s4 + $0x20] sm:$0xff] }
 0x79f   :  { %3740 = vrot.lane.b32.xlu0 %v3689_v33, %s16014_s2  ;;  %v8898_v33 = vld [vmem:[%s15897_s4 + $0xa0] sm:$0xff] }
 0x7a0   :  { %3742 = vrot.lane.b32.xlu2 %v3690_v54, %s16014_s2  ;;  %v3591_v26 = vpop.permute.xlu2 %3590  ;;  %v8914_v54 = vld [vmem:[%s15897_s4 + $0x120] sm:$0xff] }
 0x7a1   :  { %v3638_v19 = vmul.f32 %v3591_v26, %v3558_v15  ;;  %v3593_v3 = vpop.permute.xlu1 %3592  ;;  %v8930_v15 = vld [vmem:[%s15897_s4 + $0x1a0] sm:$0xff]  ;;  %v3707_v26 = vld [vmem:[%s15897_s4 + $0x28] sm:$0xff] }
 0x7a2   :  { %v3639_v4 = vmul.f32 %v3593_v3, %v3559_v47  ;;  %v8899_v47 = vld [vmem:[%s15897_s4 + $0xa8] sm:$0xff]  ;;  %v8900_v3 = vld [vmem:[%s15897_s4 + $0xb0] sm:$0xff] }
 0x7a3   :  { %v12557_v5 = vadd.f32 %v3654_v49, %v3638_v19  ;;  %v8931_v49 = vld [vmem:[%s15897_s4 + $0x1a8] sm:$0xff]  ;;  %v3708_v19 = vld [vmem:[%s15897_s4 + $0x30] sm:$0xff] }
 0x7a4   :  { %v12559_v6 = vadd.f32 %v3655_v42, %v3639_v4  ;;  %v8932_v42 = vld [vmem:[%s15897_s4 + $0x1b0] sm:$0xff]  ;;  %v3709_v4 = vld [vmem:[%s15897_s4 + $0x38] sm:$0xff] }
 0x7a5   :  { %16405 = vst [vmem:[#allocation9_spill] sm:$0xff] %v12557_v5  ;;  %v3686_v11 = vmax.f32 %v12557_v5, 0.0 }
 0x7a6   :  { %16406 = vst [vmem:[#allocation43_spill] sm:$0xff] %v12559_v6  ;;  %v3687_v20 = vmax.f32 %v12559_v6, 0.0 }
 0x7a7   :  { %3734 = vrot.lane.b32.xlu0 %v3686_v11, %s16014_s2  ;;  %v8901_v11 = vld [vmem:[%s15897_s4 + $0xb8] sm:$0xff] }
 0x7a8   :  { %3736 = vrot.lane.b32.xlu2 %v3687_v20, %s16014_s2  ;;  %v8917_v20 = vld [vmem:[%s15897_s4 + $0x138] sm:$0xff] }
 0x7b0   :  { %5011 = vperm.xlu2 %9274, %v9458_v23   ;;  %v8933_v23 = vld [vmem:[%s15897_s4 + $0x1b8] sm:$0xff] }
 0x7bb   :  { %v12572_v50 = vpop.permute.xlu0 %3758 }
 0x7cb   :  { %v12570_v22 = vpop.permute.xlu1 %3756 }
 0x7d8   :  { %v12576_v31 = vpop.permute.xlu1 %3762 }
 0x7e0   :  { %v12568_v9 = vpop.permute.xlu2 %3754 }
 0x7e9   :  { %v12574_v63 = vpop.permute.xlu2 %3760 }
 0x7f1   :  { %v12596_v14 = vpop.permute.xlu2 %3748 }
 0x7f9   :  { %v12578_v53 = vpop.permute.xlu0 %3764 }
 0x7fa   :  { %3782 = vmatpush.msra.mxu0 %v12578_v53  ;;  %3864 = vmatpush.msra.mxu1 %v12578_v53  ;;  %v12624_v35 = vpop.permute.xlu2 %3742 }
 0x7fb   :  { %3946 = vmatpush.msrb.mxu2 %v12578_v53  ;;  %4028 = vmatpush.msrb.mxu3 %v12578_v53 }
 0x7fc   :  { %3783 = vmatpush.msra.mxu0 %v12576_v31  ;;  %3865 = vmatpush.msra.mxu1 %v12576_v31 }
 0x7fd   :  { %3947 = vmatpush.msrb.mxu2 %v12576_v31  ;;  %4029 = vmatpush.msrb.mxu3 %v12576_v31 }
 0x7fe   :  { %3784 = vmatpush.msra.mxu0 %v12574_v63  ;;  %3866 = vmatpush.msra.mxu1 %v12574_v63 }
 0x7ff   :  { %3948 = vmatpush.msrb.mxu2 %v12574_v63  ;;  %4030 = vmatpush.msrb.mxu3 %v12574_v63 }
 0x800   :  { %3785 = vmatpush.msra.mxu0 %v12572_v50  ;;  %3867 = vmatpush.msra.mxu1 %v12572_v50  ;;  %v12594_v32 = vpop.permute.xlu1 %3750 }
 0x801   :  { %3949 = vmatpush.msrb.mxu2 %v12572_v50  ;;  %4031 = vmatpush.msrb.mxu3 %v12572_v50  ;;  %v12600_v37 = vpop.permute.xlu0 %3752 }
 0x802   :  { %3786 = vmatpush.msra.mxu0 %v12570_v22  ;;  %3868 = vmatpush.msra.mxu1 %v12570_v22  ;;  %v12650_v27 = vpop.permute.xlu2 %3736 }
 0x803   :  { %3950 = vmatpush.msrb.mxu2 %v12570_v22  ;;  %4032 = vmatpush.msrb.mxu3 %v12570_v22 }
 0x804   :  { %3787 = vmatpush.msra.mxu0 %v12568_v9  ;;  %3869 = vmatpush.msra.mxu1 %v12568_v9 }
 0x805   :  { %3951 = vmatpush.msrb.mxu2 %v12568_v9  ;;  %4033 = vmatpush.msrb.mxu3 %v12568_v9 }
 0x806   :  { %3788 = vmatpush.msra.mxu0 %v12600_v37  ;;  %3870 = vmatpush.msra.mxu1 %v12600_v37 }
 0x807   :  { %3952 = vmatpush.msrb.mxu2 %v12600_v37  ;;  %4034 = vmatpush.msrb.mxu3 %v12600_v37 }
 0x808   :  { %3789 = vmatpush.msra.mxu0 %v12594_v32  ;;  %3871 = vmatpush.msra.mxu1 %v12594_v32  ;;  %v12618_v39 = vpop.permute.xlu1 %3744 }
 0x809   :  { %3953 = vmatpush.msrb.mxu2 %v12594_v32  ;;  %4035 = vmatpush.msrb.mxu3 %v12594_v32  ;;  %v12620_v18 = vpop.permute.xlu0 %3746 }
 0x80a   :  { %3790 = vmatpush.msra.mxu0 %v12596_v14  ;;  %3872 = vmatpush.msra.mxu1 %v12596_v14 }
 0x80b   :  { %3954 = vmatpush.msrb.mxu2 %v12596_v14  ;;  %4036 = vmatpush.msrb.mxu3 %v12596_v14 }
 0x80c   :  { %3791 = vmatpush.msra.mxu0 %v12620_v18  ;;  %3873 = vmatpush.msra.mxu1 %v12620_v18 }
 0x80d   :  { %3955 = vmatpush.msrb.mxu2 %v12620_v18  ;;  %4037 = vmatpush.msrb.mxu3 %v12620_v18 }
 0x80e   :  { %3792 = vmatpush.msra.mxu0 %v12618_v39  ;;  %3874 = vmatpush.msra.mxu1 %v12618_v39 }
 0x80f   :  { %3956 = vmatpush.msrb.mxu2 %v12618_v39  ;;  %4038 = vmatpush.msrb.mxu3 %v12618_v39 }
 0x810   :  { %3793 = vmatpush.msra.mxu0 %v12624_v35  ;;  %3875 = vmatpush.msra.mxu1 %v12624_v35  ;;  %v12644_v36 = vpop.permute.xlu1 %3738 }
 0x811   :  { %3957 = vmatpush.msrb.mxu2 %v12624_v35  ;;  %4039 = vmatpush.msrb.mxu3 %v12624_v35  ;;  %v12640_v60 = vpop.permute.xlu0 %3740 }
 0x812   :  { %3794 = vmatpush.msra.mxu0 %v12640_v60  ;;  %3876 = vmatpush.msra.mxu1 %v12640_v60 }
 0x813   :  { %3958 = vmatpush.msrb.mxu2 %v12640_v60  ;;  %4040 = vmatpush.msrb.mxu3 %v12640_v60 }
 0x814   :  { %3795 = vmatpush.msra.mxu0 %v12644_v36  ;;  %3877 = vmatpush.msra.mxu1 %v12644_v36 }
 0x815   :  { %3959 = vmatpush.msrb.mxu2 %v12644_v36  ;;  %4041 = vmatpush.msrb.mxu3 %v12644_v36 }
 0x816   :  { %3796 = vmatpush.msra.mxu0 %v12650_v27  ;;  %3878 = vmatpush.msra.mxu1 %v12650_v27 }
 0x817   :  { %3960 = vmatpush.msrb.mxu2 %v12650_v27  ;;  %4042 = vmatpush.msrb.mxu3 %v12650_v27 }
 0x819   :  { %v12658_v62 = vpop.permute.xlu0 %3734 }
 0x81a   :  { %3797 = vmatpush.msra.mxu0 %v12658_v62  ;;  %3879 = vmatpush.msra.mxu1 %v12658_v62 }
 0x81b   :  { %3961 = vmatpush.msrb.mxu2 %v12658_v62  ;;  %4043 = vmatpush.msrb.mxu3 %v12658_v62 }
 0x81c   :  { %3798 = vmatmul.f32.vlgmr.msra.gmra.mxu0 %v3702_v34  ;;  %3880 = vmatmul.f32.vlgmr.msra.gmra.mxu1 %v8894_v28  ;;  %v3710_v34 = vld [vmem:[%s15897_s4 + $0x40] sm:$0xff] }
 0x81d   :  { %3962 = vmatmul.f32.vlgmr.msrb.gmra.mxu2 %v8910_v7  ;;  %4044 = vmatmul.f32.vlgmr.msrb.gmra.mxu3 %v8926_v57  ;;  %v8902_v28 = vld [vmem:[%s15897_s4 + $0xc0] sm:$0xff] }
 0x81e   :  { %v8918_v7 = vld [vmem:[%s15897_s4 + $0x140] sm:$0xff] }
 0x81f   :  { %v8934_v57 = vld [vmem:[%s15897_s4 + $0x1c0] sm:$0xff] }
 0x824   :  { %3801 = vmatmul.f32.gmra.mxu0 %v3703_v38  ;;  %3883 = vmatmul.f32.gmra.mxu1 %v8895_v58  ;;  %v3711_v38 = vld [vmem:[%s15897_s4 + $0x48] sm:$0xff] }
 0x825   :  { %3965 = vmatmul.f32.gmra.mxu2 %v8911_v59  ;;  %4047 = vmatmul.f32.gmra.mxu3 %v8927_v8  ;;  %v8903_v58 = vld [vmem:[%s15897_s4 + $0xc8] sm:$0xff] }
 0x826   :  { %v8919_v59 = vld [vmem:[%s15897_s4 + $0x148] sm:$0xff] }
 0x827   :  { %v8935_v8 = vld [vmem:[%s15897_s4 + $0x1c8] sm:$0xff] }
 0x82c   :  { %3804 = vmatmul.f32.gmra.mxu0 %v3704_v52  ;;  %3886 = vmatmul.f32.gmra.mxu1 %v8896_v2  ;;  %v3712_v52 = vld [vmem:[%s15897_s4 + $0x50] sm:$0xff] }
 0x82d   :  { %3968 = vmatmul.f32.gmra.mxu2 %v8912_v17  ;;  %4050 = vmatmul.f32.gmra.mxu3 %v8928_v46  ;;  %v8904_v2 = vld [vmem:[%s15897_s4 + $0xd0] sm:$0xff] }
 0x82e   :  { %v8920_v17 = vld [vmem:[%s15897_s4 + $0x150] sm:$0xff] }
 0x82f   :  { %v8936_v46 = vld [vmem:[%s15897_s4 + $0x1d0] sm:$0xff] }
 0x834   :  { %3807 = vmatmul.f32.gmra.mxu0 %v3705_v51  ;;  %3889 = vmatmul.f32.gmra.mxu1 %v8897_v16  ;;  %v3713_v51 = vld [vmem:[%s15897_s4 + $0x58] sm:$0xff] }
 0x835   :  { %3971 = vmatmul.f32.gmra.mxu2 %v8913_v48  ;;  %4053 = vmatmul.f32.gmra.mxu3 %v8929_v61  ;;  %v8905_v16 = vld [vmem:[%s15897_s4 + $0xd8] sm:$0xff] }
 0x836   :  { %v8921_v48 = vld [vmem:[%s15897_s4 + $0x158] sm:$0xff] }
 0x837   :  { %v8937_v61 = vld [vmem:[%s15897_s4 + $0x1d8] sm:$0xff] }
 0x83c   :  { %3810 = vmatmul.f32.gmra.mxu0 %v3706_v12  ;;  %3892 = vmatmul.f32.gmra.mxu1 %v8898_v33  ;;  %v8945_v12 = vld [vmem:[%s16217_s9 + $0x38] sm:$0xff] }
 0x83d   :  { %3974 = vmatmul.f32.gmra.mxu2 %v8914_v54  ;;  %4056 = vmatmul.f32.gmra.mxu3 %v8930_v15  ;;  %v8949_v33 = vld [vmem:[%s16223_s29 + $0x38] sm:$0xff]  ;;  %v8944_v54 = vld [vmem:[%s16217_s9 + $0x30] sm:$0xff] }
 0x83e   :  { %v8948_v15 = vld [vmem:[%s16223_s29 + $0x30] sm:$0xff]  ;;  %4167 = vmatpush.msrb.mxu0 %v8945_v12  ;;  %4280 = vmatpush.msrb.mxu1 %v8949_v33 }
 0x83f   :  { %4393 = vmatpush.msra.mxu2 %v8949_v33  ;;  %4506 = vmatpush.msra.mxu3 %v8949_v33 }
 0x840   :  { %4168 = vmatpush.msrb.mxu0 %v8944_v54  ;;  %4281 = vmatpush.msrb.mxu1 %v8948_v15 }
 0x841   :  { %4394 = vmatpush.msra.mxu2 %v8948_v15  ;;  %4507 = vmatpush.msra.mxu3 %v8948_v15 }
 0x844   :  { %3813 = vmatmul.f32.gmra.mxu0 %v3707_v26  ;;  %3895 = vmatmul.f32.gmra.mxu1 %v8899_v47  ;;  %v3714_v26 = vld [vmem:[%s15897_s4 + $0x60] sm:$0xff] }
 0x845   :  { %3977 = vmatmul.f32.gmra.mxu2 %v8915_v41  ;;  %4059 = vmatmul.f32.gmra.mxu3 %v8931_v49  ;;  %v8906_v47 = vld [vmem:[%s15897_s4 + $0xe0] sm:$0xff]  ;;  %v8943_v41 = vld [vmem:[%s16217_s9 + $0x28] sm:$0xff] }
 0x846   :  { %v8947_v49 = vld [vmem:[%s16223_s29 + $0x28] sm:$0xff]  ;;  %4169 = vmatpush.msrb.mxu0 %v8943_v41 }
 0x847   :  { %4282 = vmatpush.msrb.mxu1 %v8947_v49  ;;  %4395 = vmatpush.msra.mxu2 %v8947_v49 }
 0x848   :  { %4508 = vmatpush.msra.mxu3 %v8947_v49 }
 0x84c   :  { %3816 = vmatmul.f32.gmra.mxu0 %v3708_v19  ;;  %3898 = vmatmul.f32.gmra.mxu1 %v8900_v3  ;;  %v8922_v19 = vld [vmem:[%s15897_s4 + $0x160] sm:$0xff] }
 0x84d   :  { %3980 = vmatmul.f32.gmra.mxu2 %v8916_v55  ;;  %4062 = vmatmul.f32.gmra.mxu3 %v8932_v42  ;;  %v8938_v3 = vld [vmem:[%s15897_s4 + $0x1e0] sm:$0xff] }
 0x84e   :  { %v8942_v55 = vld [vmem:[%s16217_s9 + $0x20] sm:$0xff] }
 0x84f   :  { %v8946_v42 = vld [vmem:[%s16223_s29 + $0x20] sm:$0xff]  ;;  %4170 = vmatpush.msrb.mxu0 %v8942_v55  ;;  %s16562_s29 = smov 96  }
 0x850   :  { %4283 = vmatpush.msrb.mxu1 %v8946_v42  ;;  %4396 = vmatpush.msra.mxu2 %v8946_v42 }
 0x851   :  { %4509 = vmatpush.msra.mxu3 %v8946_v42  ;;  %4619 = vmatpush.msra.mxu0 %v8949_v33 }
 0x853   :  { %4620 = vmatpush.msra.mxu0 %v8948_v15 }
 0x854   :  { %3819 = vmatmul.f32.gmra.mxu0 %v3709_v4  ;;  %3901 = vmatmul.f32.gmra.mxu1 %v8901_v11  ;;  %v3715_v4 = vld [vmem:[%s15897_s4 + $0x68] sm:$0xff] }
 0x855   :  { %3983 = vmatmul.f32.gmra.mxu2 %v8917_v20  ;;  %4065 = vmatmul.f32.gmra.mxu3 %v8933_v23  ;;  %v8907_v11 = vld [vmem:[%s15897_s4 + $0xe8] sm:$0xff] }
 0x856   :  { %v8923_v20 = vld [vmem:[%s15897_s4 + $0x168] sm:$0xff]  ;;  %4621 = vmatpush.msra.mxu0 %v8947_v49 }
 0x857   :  { %v8939_v23 = vld [vmem:[%s15897_s4 + $0x1e8] sm:$0xff] }
 0x858   :  { %4622 = vmatpush.msra.mxu0 %v8946_v42 }
 0x85c   :  { %3822 = vmatmul.f32.gmra.mxu0 %v3710_v34  ;;  %3904 = vmatmul.f32.gmra.mxu1 %v8902_v28  ;;  %v3716_v34 = vld [vmem:[%s15897_s4 + $0x70] sm:$0xff] }
 0x85d   :  { %3986 = vmatmul.f32.gmra.mxu2 %v8918_v7  ;;  %4068 = vmatmul.f32.gmra.mxu3 %v8934_v57  ;;  %v8908_v28 = vld [vmem:[%s15897_s4 + $0xf0] sm:$0xff] }
 0x85e   :  { %v8924_v7 = vld [vmem:[%s15897_s4 + $0x170] sm:$0xff] }
 0x85f   :  { %v8940_v57 = vld [vmem:[%s15897_s4 + $0x1f0] sm:$0xff] }
 0x864   :  { %3825 = vmatmul.f32.gmra.mxu0 %v3711_v38  ;;  %3907 = vmatmul.f32.gmra.mxu1 %v8903_v58  ;;  %v3717_v38 = vld [vmem:[%s15897_s4 + $0x78] sm:$0xff] }
 0x865   :  { %3989 = vmatmul.f32.gmra.mxu2 %v8919_v59  ;;  %4071 = vmatmul.f32.gmra.mxu3 %v8935_v8  ;;  %v8909_v58 = vld [vmem:[%s15897_s4 + $0xf8] sm:$0xff] }
 0x866   :  { %v8925_v59 = vld [vmem:[%s15897_s4 + $0x178] sm:$0xff] }
 0x867   :  { %v8941_v8 = vld [vmem:[%s15897_s4 + $0x1f8] sm:$0xff]  ;;  %s16471_s4 = smov 1  }
 0x86c   :  { %3828 = vmatmul.f32.gmra.mxu0 %v3712_v52  ;;  %3910 = vmatmul.f32.gmra.mxu1 %v8904_v2 }
 0x86d   :  { %3992 = vmatmul.f32.gmra.mxu2 %v8920_v17  ;;  %4074 = vmatmul.f32.gmra.mxu3 %v8936_v46 }
 0x874   :  { %3831 = vmatmul.f32.gmra.mxu0 %v3713_v51  ;;  %3913 = vmatmul.f32.gmra.mxu1 %v8905_v16 }
 0x875   :  { %3995 = vmatmul.f32.gmra.mxu2 %v8921_v48  ;;  %4077 = vmatmul.f32.gmra.mxu3 %v8937_v61 }
 0x87c   :  { %3834 = vmatmul.f32.gmra.mxu0 %v3714_v26  ;;  %3916 = vmatmul.f32.gmra.mxu1 %v8906_v47 }
 0x87d   :  { %3998 = vmatmul.f32.gmra.mxu2 %v8922_v19  ;;  %4080 = vmatmul.f32.gmra.mxu3 %v8938_v3 }
 0x884   :  { %3837 = vmatmul.f32.gmra.mxu0 %v3715_v4  ;;  %3919 = vmatmul.f32.gmra.mxu1 %v8907_v11 }
 0x885   :  { %4001 = vmatmul.f32.gmra.mxu2 %v8923_v20  ;;  %4083 = vmatmul.f32.gmra.mxu3 %v8939_v23 }
 0x88c   :  { %3840 = vmatmul.f32.gmra.mxu0 %v3716_v34  ;;  %3922 = vmatmul.f32.gmra.mxu1 %v8908_v28 }
 0x88d   :  { %4004 = vmatmul.f32.gmra.mxu2 %v8924_v7  ;;  %4086 = vmatmul.f32.gmra.mxu3 %v8940_v57 }
 0x894   :  { %3843 = vmatmul.f32.gmra.mxu0 %v3717_v38  ;;  %3925 = vmatmul.f32.gmra.mxu1 %v8909_v58 }
 0x895   :  { %4007 = vmatmul.f32.gmra.mxu2 %v8925_v59  ;;  %4089 = vmatmul.f32.gmra.mxu3 %v8941_v8 }
 0x899   :  { %v12880_v52 = vpop.f32.mrf.mxu0  ;;  %v12882_v2 = vpop.f32.mrf.mxu1 }
 0x89a   :  { %16407 = vst [vmem:[#allocation33_spill] sm:$0xff] %v12880_v52 }
 0x89b   :  { %16408 = vst [vmem:[#allocation36_spill] sm:$0xff] %v12882_v2 }
 0x89c   :  { %8965 = vmatmul.msk.f32.vlgmr.msrb.gmra.mxu0 %vm1053_vm6, %v12658_v62  ;;  %8981 = vmatmul.msk.f32.vlgmr.msrb.gmra.mxu1 %vm1053_vm6, %v12880_v52 }
 0x89d   :  { %8997 = vmatmul.msk.f32.vlgmr.msra.gmra.mxu2 %vm1053_vm6, %v12882_v2 }
 0x8a0   :  { %v12890_v17 = vpop.f32.mrf.mxu2  ;;  %v12892_v46 = vpop.f32.mrf.mxu3 }
 0x8a1   :  { %16409 = vst [vmem:[#allocation38_spill] sm:$0xff] %v12890_v17  ;;  %9013 = vmatmul.msk.f32.vlgmr.msra.gmra.mxu3 %vm1053_vm6, %v12890_v17  ;;  %v12896_v51 = vpop.f32.mrf.mxu0  ;;  %v12898_v16 = vpop.f32.mrf.mxu1 }
 0x8a2   :  { %16410 = vst [vmem:[#allocation47_spill] sm:$0xff] %v12892_v46 }
 0x8a3   :  { %16411 = vst [vmem:[#allocation37_spill] sm:$0xff] %v12896_v51 }
 0x8a4   :  { %16412 = vst [vmem:[#allocation40_spill] sm:$0xff] %v12898_v16  ;;  %8966 = vmatmul.msk.f32.gmra.mxu0 %vm1053_vm6, %v12650_v27  ;;  %8982 = vmatmul.msk.f32.gmra.mxu1 %vm1053_vm6, %v12896_v51 }
 0x8a5   :  { %8998 = vmatmul.msk.f32.gmra.mxu2 %vm1053_vm6, %v12898_v16 }
 0x8a8   :  { %v12906_v62 = vpop.f32.mrf.mxu2  ;;  %v12908_v48 = vpop.f32.mrf.mxu3 }
 0x8a9   :  { %16413 = vst [vmem:[#allocation42_spill] sm:$0xff] %v12906_v62  ;;  %9014 = vmatmul.msk.f32.gmra.mxu3 %vm1053_vm6, %v12906_v62  ;;  %v12912_v61 = vpop.f32.mrf.mxu0  ;;  %v12914_v12 = vpop.f32.mrf.mxu1 }
 0x8aa   :  { %16414 = vst [vmem:[#allocation41_spill] sm:$0xff] %v12908_v48 }
 0x8ab   :  { %16415 = vst [vmem:[#allocation44_spill] sm:$0xff] %v12912_v61 }
 0x8ac   :  { %16416 = vst [vmem:[#allocation51_spill] sm:$0xff] %v12914_v12  ;;  %8967 = vmatmul.msk.f32.gmra.mxu0 %vm1053_vm6, %v12644_v36  ;;  %8983 = vmatmul.msk.f32.gmra.mxu1 %vm1053_vm6, %v12912_v61 }
 0x8ad   :  { %8999 = vmatmul.msk.f32.gmra.mxu2 %vm1053_vm6, %v12914_v12 }
 0x8b0   :  { %v12922_v27 = vpop.f32.mrf.mxu2  ;;  %v12924_v33 = vpop.f32.mrf.mxu3 }
 0x8b1   :  { %16417 = vst [vmem:[#allocation46_spill] sm:$0xff] %v12922_v27  ;;  %9015 = vmatmul.msk.f32.gmra.mxu3 %vm1053_vm6, %v12922_v27  ;;  %v12928_v54 = vpop.f32.mrf.mxu0  ;;  %v12930_v15 = vpop.f32.mrf.mxu1 }
 0x8b2   :  { %16418 = vst [vmem:[#allocation55_spill] sm:$0xff] %v12924_v33 }
 0x8b3   :  { %16419 = vst [vmem:[#allocation45_spill] sm:$0xff] %v12928_v54 }
 0x8b4   :  { %16420 = vst [vmem:[#allocation48_spill] sm:$0xff] %v12930_v15  ;;  %8968 = vmatmul.msk.f32.gmra.mxu0 %vm1053_vm6, %v12640_v60  ;;  %8984 = vmatmul.msk.f32.gmra.mxu1 %vm1053_vm6, %v12928_v54 }
 0x8b5   :  { %9000 = vmatmul.msk.f32.gmra.mxu2 %vm1053_vm6, %v12930_v15 }
 0x8b8   :  { %v12938_v36 = vpop.f32.mrf.mxu2  ;;  %v12940_v26 = vpop.f32.mrf.mxu3 }
 0x8b9   :  { %16421 = vst [vmem:[#allocation50_spill] sm:$0xff] %v12938_v36  ;;  %9016 = vmatmul.msk.f32.gmra.mxu3 %vm1053_vm6, %v12938_v36  ;;  %v12944_v47 = vpop.f32.mrf.mxu0  ;;  %v12946_v41 = vpop.f32.mrf.mxu1 }
 0x8ba   :  { %16422 = vst [vmem:[#allocation12_spill] sm:$0xff] %v12940_v26 }
 0x8bb   :  { %16423 = vst [vmem:[#allocation10_spill] sm:$0xff] %v12944_v47 }
 0x8bc   :  { %16424 = vst [vmem:[#allocation59_spill] sm:$0xff] %v12946_v41  ;;  %8969 = vmatmul.msk.f32.gmra.mxu0 %vm1053_vm6, %v12624_v35  ;;  %8985 = vmatmul.msk.f32.gmra.mxu1 %vm1053_vm6, %v12944_v47 }
 0x8bd   :  { %9001 = vmatmul.msk.f32.gmra.mxu2 %vm1053_vm6, %v12946_v41 }
 0x8c0   :  { %v12954_v60 = vpop.f32.mrf.mxu2  ;;  %v12956_v49 = vpop.f32.mrf.mxu3 }
 0x8c1   :  { %16425 = vst [vmem:[#allocation52_spill] sm:$0xff] %v12954_v60  ;;  %9017 = vmatmul.msk.f32.gmra.mxu3 %vm1053_vm6, %v12954_v60  ;;  %v12960_v19 = vpop.f32.mrf.mxu0  ;;  %v12962_v3 = vpop.f32.mrf.mxu1 }
 0x8c2   :  { %16426 = vst [vmem:[#allocation49_spill] sm:$0xff] %v12956_v49 }
 0x8c3   :  { %16427 = vst [vmem:[#allocation14_spill] sm:$0xff] %v12960_v19 }
 0x8c4   :  { %16428 = vst [vmem:[#allocation11_spill] sm:$0xff] %v12962_v3  ;;  %8970 = vmatmul.msk.f32.gmra.mxu0 %vm1053_vm6, %v12618_v39  ;;  %8986 = vmatmul.msk.f32.gmra.mxu1 %vm1053_vm6, %v12960_v19 }
 0x8c5   :  { %9002 = vmatmul.msk.f32.gmra.mxu2 %vm1053_vm6, %v12962_v3 }
 0x8c8   :  { %v12970_v35 = vpop.f32.mrf.mxu2  ;;  %v12972_v55 = vpop.f32.mrf.mxu3 }
 0x8c9   :  { %16429 = vst [vmem:[#allocation54_spill] sm:$0xff] %v12970_v35  ;;  %9018 = vmatmul.msk.f32.gmra.mxu3 %vm1053_vm6, %v12970_v35  ;;  %v12976_v42 = vpop.f32.mrf.mxu0  ;;  %v12978_v4 = vpop.f32.mrf.mxu1 }
 0x8ca   :  { %16430 = vst [vmem:[#allocation53_spill] sm:$0xff] %v12972_v55 }
 0x8cb   :  { %16431 = vst [vmem:[#allocation62_spill] sm:$0xff] %v12976_v42 }
 0x8cc   :  { %16432 = vst [vmem:[#allocation56_spill] sm:$0xff] %v12978_v4  ;;  %8971 = vmatmul.msk.f32.gmra.mxu0 %vm1053_vm6, %v12620_v18  ;;  %8987 = vmatmul.msk.f32.gmra.mxu1 %vm1053_vm6, %v12976_v42 }
 0x8cd   :  { %9003 = vmatmul.msk.f32.gmra.mxu2 %vm1053_vm6, %v12978_v4 }
 0x8d0   :  { %v12986_v39 = vpop.f32.mrf.mxu2  ;;  %v12988_v11 = vpop.f32.mrf.mxu3 }
 0x8d1   :  { %16433 = vst [vmem:[#allocation58_spill] sm:$0xff] %v12986_v39  ;;  %9019 = vmatmul.msk.f32.gmra.mxu3 %vm1053_vm6, %v12986_v39  ;;  %v12992_v20 = vpop.f32.mrf.mxu0  ;;  %v12994_v23 = vpop.f32.mrf.mxu1 }
 0x8d2   :  { %16434 = vst [vmem:[#allocation63_spill] sm:$0xff] %v12988_v11 }
 0x8d3   :  { %16435 = vst [vmem:[#allocation57_spill] sm:$0xff] %v12992_v20 }
 0x8d4   :  { %16436 = vst [vmem:[#allocation60_spill] sm:$0xff] %v12994_v23  ;;  %8972 = vmatmul.msk.f32.gmra.mxu0 %vm1053_vm6, %v12596_v14  ;;  %8988 = vmatmul.msk.f32.gmra.mxu1 %vm1053_vm6, %v12992_v20 }
 0x8d5   :  { %9004 = vmatmul.msk.f32.gmra.mxu2 %vm1053_vm6, %v12994_v23 }
 0x8d8   :  { %v13002_v18 = vpop.f32.mrf.mxu2  ;;  %v13004_v34 = vpop.f32.mrf.mxu3 }
 0x8d9   :  { %16437 = vst [vmem:[#allocation61_spill] sm:$0xff] %v13002_v18  ;;  %v13006_v28 = vpop.f32.mrf.mxu0  ;;  %v13008_v7 = vpop.f32.mrf.mxu1  ;;  %9020 = vmatmul.msk.f32.gmra.mxu3 %vm1053_vm6, %v13002_v18 }
 0x8da   :  { %16438 = vst [vmem:[#allocation64_spill] sm:$0xff] %v13004_v34 }
 0x8db   :  { %16439 = vst [vmem:[#allocation13_spill] sm:$0xff] %v13006_v28 }
 0x8dc   :  { %16440 = vst [vmem:[#allocation15_spill] sm:$0xff] %v13008_v7  ;;  %8973 = vmatmul.msk.f32.gmra.mxu0 %vm1053_vm6, %v12594_v32  ;;  %8989 = vmatmul.msk.f32.gmra.mxu1 %vm1053_vm6, %v13006_v28 }
 0x8dd   :  { %9005 = vmatmul.msk.f32.gmra.mxu2 %vm1053_vm6, %v13008_v7 }
 0x8e0   :  { %v13018_v14 = vpop.f32.mrf.mxu2  ;;  %v13020_v57 = vpop.f32.mrf.mxu3 }
 0x8e1   :  { %16441 = vst [vmem:[#allocation31_spill] sm:$0xff] %v13018_v14  ;;  %v13022_v38 = vpop.f32.mrf.mxu0  ;;  %v13024_v58 = vpop.f32.mrf.mxu1  ;;  %9021 = vmatmul.msk.f32.gmra.mxu3 %vm1053_vm6, %v13018_v14 }
 0x8e2   :  { %16442 = vst [vmem:[#allocation27_spill] sm:$0xff] %v13020_v57 }
 0x8e3   :  { %16443 = vst [vmem:[#allocation20_spill] sm:$0xff] %v13022_v38 }
 0x8e4   :  { %16444 = vst [vmem:[#allocation22_spill] sm:$0xff] %v13024_v58  ;;  %8974 = vmatmul.msk.f32.gmra.mxu0 %vm1053_vm6, %v12600_v37  ;;  %8990 = vmatmul.msk.f32.gmra.mxu1 %vm1053_vm6, %v13022_v38 }
 0x8e5   :  { %9006 = vmatmul.msk.f32.gmra.mxu2 %vm1053_vm6, %v13024_v58 }
 0x8e8   :  { %v13034_v32 = vpop.f32.mrf.mxu2  ;;  %v13036_v59 = vpop.f32.mrf.mxu3 }
 0x8e9   :  { %16445 = vst [vmem:[#allocation4_spill] sm:$0xff] %v13034_v32  ;;  %v13038_v8 = vpop.f32.mrf.mxu0  ;;  %v13040_v13 = vpop.f32.mrf.mxu1  ;;  %9022 = vmatmul.msk.f32.gmra.mxu3 %vm1053_vm6, %v13034_v32 }
 0x8ea   :  { %16446 = vst [vmem:[#allocation16_spill] sm:$0xff] %v13036_v59 }
 0x8eb   :  { %16447 = vst [vmem:[#allocation18_spill] sm:$0xff] %v13038_v8 }
 0x8ec   :  { %16448 = vst [vmem:[#allocation19_spill] sm:$0xff] %v13040_v13  ;;  %8975 = vmatmul.msk.f32.gmra.mxu0 %vm1053_vm6, %v12568_v9  ;;  %8991 = vmatmul.msk.f32.gmra.mxu1 %vm1053_vm6, %v13038_v8 }
 0x8ed   :  { %9007 = vmatmul.msk.f32.gmra.mxu2 %vm1053_vm6, %v13040_v13 }
 0x8f0   :  { %v13050_v37 = vpop.f32.mrf.mxu2  ;;  %v13052_v24 = vpop.f32.mrf.mxu3 }
 0x8f1   :  { %16449 = vst [vmem:[#allocation6_spill] sm:$0xff] %v13050_v37  ;;  %v13054_v44 = vpop.f32.mrf.mxu0  ;;  %v13056_v21 = vpop.f32.mrf.mxu1  ;;  %9023 = vmatmul.msk.f32.gmra.mxu3 %vm1053_vm6, %v13050_v37 }
 0x8f2   :  { %16450 = vst [vmem:[#allocation66_spill] sm:$0xff] %v13052_v24 }
 0x8f3   :  { %16451 = vst [vmem:[#allocation23_spill] sm:$0xff] %v13054_v44 }
 0x8f4   :  { %16452 = vst [vmem:[#allocation17_spill] sm:$0xff] %v13056_v21  ;;  %8976 = vmatmul.msk.f32.gmra.mxu0 %vm1053_vm6, %v12570_v22  ;;  %8992 = vmatmul.msk.f32.gmra.mxu1 %vm1053_vm6, %v13054_v44 }
 0x8f5   :  { %9008 = vmatmul.msk.f32.gmra.mxu2 %vm1053_vm6, %v13056_v21 }
 0x8f8   :  { %v13066_v9 = vpop.f32.mrf.mxu2  ;;  %v13068_v0 = vpop.f32.mrf.mxu3 }
 0x8f9   :  { %16453 = vst [vmem:[#allocation65_spill] sm:$0xff] %v13066_v9  ;;  %v13070_v43 = vpop.f32.mrf.mxu0  ;;  %v13072_v40 = vpop.f32.mrf.mxu1  ;;  %9024 = vmatmul.msk.f32.gmra.mxu3 %vm1053_vm6, %v13066_v9 }
 0x8fa   :  { %16454 = vst [vmem:[#allocation67_spill] sm:$0xff] %v13068_v0 }
 0x8fb   :  { %16455 = vst [vmem:[#allocation68_spill] sm:$0xff] %v13070_v43 }
 0x8fc   :  { %16456 = vst [vmem:[#allocation69_spill] sm:$0xff] %v13072_v40  ;;  %8977 = vmatmul.msk.f32.gmra.mxu0 %vm1053_vm6, %v12572_v50  ;;  %8993 = vmatmul.msk.f32.gmra.mxu1 %vm1053_vm6, %v13070_v43 }
 0x8fd   :  { %9009 = vmatmul.msk.f32.gmra.mxu2 %vm1053_vm6, %v13072_v40  ;;  %v13179_v40 = vpop.permute.xlu2 %5011 }
 0x900   :  { %v13082_v22 = vpop.f32.mrf.mxu2  ;;  %v13084_v10 = vpop.f32.mrf.mxu3 }
 0x901   :  { %16457 = vst [vmem:[#allocation70_spill] sm:$0xff] %v13082_v22  ;;  %v13086_v45 = vpop.f32.mrf.mxu0  ;;  %v13088_v29 = vpop.f32.mrf.mxu1  ;;  %9025 = vmatmul.msk.f32.gmra.mxu3 %vm1053_vm6, %v13082_v22 }
 0x902   :  { %16458 = vst [vmem:[#allocation71_spill] sm:$0xff] %v13084_v10 }
 0x903   :  { %16459 = vst [vmem:[#allocation72_spill] sm:$0xff] %v13086_v45 }
 0x904   :  { %16460 = vst [vmem:[#allocation73_spill] sm:$0xff] %v13088_v29  ;;  %8978 = vmatmul.msk.f32.gmra.mxu0 %vm1053_vm6, %v12574_v63  ;;  %8994 = vmatmul.msk.f32.gmra.mxu1 %vm1053_vm6, %v13086_v45 }
 0x905   :  { %9010 = vmatmul.msk.f32.gmra.mxu2 %vm1053_vm6, %v13088_v29 }
 0x908   :  { %v13098_v50 = vpop.f32.mrf.mxu2  ;;  %v13100_v25 = vpop.f32.mrf.mxu3 }
 0x909   :  { %16461 = vst [vmem:[#allocation74_spill] sm:$0xff] %v13098_v50  ;;  %v13102_v1 = vpop.f32.mrf.mxu0  ;;  %9026 = vmatmul.msk.f32.gmra.mxu3 %vm1053_vm6, %v13098_v50  ;;  %v13106_v30 = vpop.f32.mrf.mxu1 }
 0x90a   :  { %16462 = vst [vmem:[#allocation75_spill] sm:$0xff] %v13100_v25 }
 0x90b   :  { %16463 = vst [vmem:[#allocation76_spill] sm:$0xff] %v13102_v1 }
 0x90c   :  { %16464 = vst [vmem:[#allocation77_spill] sm:$0xff] %v13106_v30  ;;  %8979 = vmatmul.msk.f32.gmra.mxu0 %vm1053_vm6, %v12576_v31  ;;  %8995 = vmatmul.msk.f32.gmra.mxu1 %vm1053_vm6, %v13102_v1 }
 0x90d   :  { %9011 = vmatmul.msk.f32.gmra.mxu2 %vm1053_vm6, %v13106_v30 }
 0x910   :  { %v13114_v63 = vpop.f32.mrf.mxu2  ;;  %v13116_v56 = vpop.f32.mrf.mxu3 }
 0x911   :  { %16465 = vst [vmem:[#allocation78_spill] sm:$0xff] %v13114_v63  ;;  %v13118_v6 = vpop.f32.mrf.mxu0  ;;  %9027 = vmatmul.msk.f32.gmra.mxu3 %vm1053_vm6, %v13114_v63  ;;  %v13122_v5 = vpop.f32.mrf.mxu1 }
 0x912   :  { %16466 = vst [vmem:[#allocation79_spill] sm:$0xff] %v13116_v56 }
 0x913   :  { %16467 = vst [vmem:[#allocation80_spill] sm:$0xff] %v13118_v6 }
 0x914   :  { %16468 = vst [vmem:[#allocation81_spill] sm:$0xff] %v13122_v5  ;;  %8980 = vmatmul.msk.f32.gmra.mxu0 %vm1053_vm6, %v12578_v53  ;;  %8996 = vmatmul.msk.f32.gmra.mxu1 %vm1053_vm6, %v13118_v6 }
 0x915   :  { %9012 = vmatmul.msk.f32.gmra.mxu2 %vm1053_vm6, %v13122_v5 }
 0x918   :  { %v13130_v31 = vpop.f32.mrf.mxu2  ;;  %v13134_v30 = vpop.f32.mrf.mxu3 }
 0x919   :  { %16469 = vst [vmem:[#allocation82_spill] sm:$0xff] %v13130_v31  ;;  %v4172_v1 = vpop.f32.mrf.mxu0  ;;  %9028 = vmatmul.msk.f32.gmra.mxu3 %vm1053_vm6, %v13130_v31  ;;  %v4285_v23 = vpop.f32.mrf.mxu1 }
 0x91a   :  { %4914 = vperm.xlu1 %9275, %v4172_v1   ;;  %16470 = vst [vmem:[#allocation83_spill] sm:$0xff] %v13134_v30 }
 0x91c   :  { %9029 = vmatmul.msk.f32.vlgmr.msra.gmra.mxu0 %vm1053_vm6, %v12892_v46 }
 0x920   :  { %v4398_v63 = vpop.f32.mrf.mxu2 }
 0x921   :  { %v4175_v53 = vpop.f32.mrf.mxu0  ;;  %v4288_v39 = vpop.f32.mrf.mxu1 }
 0x922   :  { %4688 = vrot.lane.b32.xlu1 %v4398_v63, %s16471_s4  ;;  %4919 = vperm.xlu0 %9270, %v4175_v53  }
 0x924   :  { %v4511_v6 = vpop.f32.mrf.mxu3  ;;  %9030 = vmatmul.msk.f32.gmra.mxu0 %vm1053_vm6, %v12908_v48 }
 0x925   :  { %4752 = vrot.lane.b32.xlu2 %v4511_v6, %s16472_s1 }
 0x928   :  { %v4401_v5 = vpop.f32.mrf.mxu2 }
 0x929   :  { %v4178_v50 = vpop.f32.mrf.mxu0  ;;  %v4291_v3 = vpop.f32.mrf.mxu1 }
 0x92a   :  { %4690 = vrot.lane.b32.xlu0 %v4401_v5, %s16471_s4  ;;  %4924 = vperm.xlu1 %9275, %v4178_v50  }
 0x92c   :  { %v4514_v1 = vpop.f32.mrf.mxu3  ;;  %9031 = vmatmul.msk.f32.gmra.mxu0 %vm1053_vm6, %v12924_v33 }
 0x930   :  { %v4404_v31 = vpop.f32.mrf.mxu2 }
 0x931   :  { %v4181_v29 = vpop.f32.mrf.mxu0  ;;  %v4294_v47 = vpop.f32.mrf.mxu1 }
 0x932   :  { %4754 = vrot.lane.b32.xlu1 %v4514_v1, %s16472_s1  ;;  %4929 = vperm.xlu2 %9274, %v4181_v29  }
 0x934   :  { %v4517_v63 = vpop.f32.mrf.mxu3  ;;  %9032 = vmatmul.msk.f32.gmra.mxu0 %vm1053_vm6, %v12940_v26 }
 0x938   :  { %v4407_v53 = vpop.f32.mrf.mxu2 }
 0x939   :  { %v4184_v6 = vpop.f32.mrf.mxu0  ;;  %v4297_v54 = vpop.f32.mrf.mxu1 }
 0x93a   :  { %4692 = vrot.lane.b32.xlu1 %v4404_v31, %s16471_s4  ;;  %4756 = vrot.lane.b32.xlu2 %v4517_v63, %s16472_s1 }
 0x93b   :  { %4934 = vperm.xlu0 %9270, %v4184_v6  }
 0x93c   :  { %v4520_v5 = vpop.f32.mrf.mxu3  ;;  %9033 = vmatmul.msk.f32.gmra.mxu0 %vm1053_vm6, %v12956_v49 }
 0x940   :  { %v4410_v50 = vpop.f32.mrf.mxu2 }
 0x941   :  { %v4187_v45 = vpop.f32.mrf.mxu0  ;;  %v4300_v48 = vpop.f32.mrf.mxu1 }
 0x942   :  { %4694 = vrot.lane.b32.xlu2 %v4407_v53, %s16471_s4  ;;  %4939 = vperm.xlu1 %9275, %v4187_v45  }
 0x943   :  { %4758 = vrot.lane.b32.xlu0 %v4520_v5, %s16472_s1 }
 0x944   :  { %v4523_v29 = vpop.f32.mrf.mxu3  ;;  %9034 = vmatmul.msk.f32.gmra.mxu0 %vm1053_vm6, %v12972_v55 }
 0x948   :  { %v4413_v1 = vpop.f32.mrf.mxu2 }
 0x949   :  { %v4190_v31 = vpop.f32.mrf.mxu0  ;;  %v13320_v52 = vpop.f32.mrf.mxu1 }
 0x94a   :  { %4760 = vrot.lane.b32.xlu1 %v4523_v29, %s16472_s1  ;;  %4944 = vperm.xlu2 %9274, %v4190_v31  }
 0x94b   :  { %4696 = vrot.lane.b32.xlu0 %v4410_v50, %s16471_s4 }
 0x94c   :  { %v4526_v63 = vpop.f32.mrf.mxu3  ;;  %9035 = vmatmul.msk.f32.gmra.mxu0 %vm1053_vm6, %v12988_v11 }
 0x950   :  { %v4416_v6 = vpop.f32.mrf.mxu2 }
 0x951   :  { %v4193_v53 = vpop.f32.mrf.mxu0 }
 0x952   :  { %4698 = vrot.lane.b32.xlu1 %v4413_v1, %s16471_s4  ;;  %4762 = vrot.lane.b32.xlu2 %v4526_v63, %s16472_s1 }
 0x954   :  { %v4529_v45 = vpop.f32.mrf.mxu3  ;;  %9036 = vmatmul.msk.f32.gmra.mxu0 %vm1053_vm6, %v13004_v34 }
 0x955   :  { %4764 = vrot.lane.b32.xlu0 %v4529_v45, %s16472_s1 }
 0x958   :  { %v4419_v5 = vpop.f32.mrf.mxu2 }
 0x959   :  { %v4196_v29 = vpop.f32.mrf.mxu0 }
 0x95a   :  { %4702 = vrot.lane.b32.xlu1 %v4419_v5, %s16471_s4  ;;  %4700 = vrot.lane.b32.xlu2 %v4416_v6, %s16471_s4 }
 0x95c   :  { %9037 = vmatmul.msk.f32.gmra.mxu0 %vm1053_vm6, %v13020_v57  ;;  %v4532_v50 = vpop.f32.mrf.mxu3 }
 0x95d   :  { %4954 = vperm.xlu0 %9270, %v4196_v29  }
 0x960   :  { %v4422_v1 = vpop.f32.mrf.mxu2 }
 0x961   :  { %v4199_v31 = vpop.f32.mrf.mxu0 }
 0x962   :  { %4949 = vperm.xlu2 %9274, %v4193_v53  }
 0x964   :  { %9038 = vmatmul.msk.f32.gmra.mxu0 %vm1053_vm6, %v13036_v59  ;;  %v4535_v63 = vpop.f32.mrf.mxu3 }
 0x965   :  { %4959 = vperm.xlu0 %9270, %v4199_v31  }
 0x968   :  { %v4425_v45 = vpop.f32.mrf.mxu2 }
 0x969   :  { %v4202_v22 = vpop.f32.mrf.mxu0 }
 0x96a   :  { %4766 = vrot.lane.b32.xlu2 %v4532_v50, %s16472_s1  ;;  %4964 = vperm.xlu1 %9275, %v4202_v22  }
 0x96c   :  { %9039 = vmatmul.msk.f32.gmra.mxu0 %vm1053_vm6, %v13052_v24  ;;  %v4538_v6 = vpop.f32.mrf.mxu3 }
 0x96d   :  { %4706 = vrot.lane.b32.xlu0 %v4425_v45, %s16471_s4 }
 0x970   :  { %v4428_v5 = vpop.f32.mrf.mxu2 }
 0x971   :  { %v4205_v29 = vpop.f32.mrf.mxu0 }
 0x972   :  { %4704 = vrot.lane.b32.xlu2 %v4422_v1, %s16471_s4  ;;  %4770 = vrot.lane.b32.xlu1 %v4538_v6, %s16472_s1 }
 0x974   :  { %9040 = vmatmul.msk.f32.gmra.mxu0 %vm1053_vm6, %v13068_v0  ;;  %v4541_v53 = vpop.f32.mrf.mxu3 }
 0x978   :  { %v4431_v31 = vpop.f32.mrf.mxu2 }
 0x979   :  { %v4208_v22 = vpop.f32.mrf.mxu0 }
 0x97a   :  { %4768 = vrot.lane.b32.xlu2 %v4535_v63, %s16472_s1  ;;  %4969 = vperm.xlu1 %9275, %v4205_v29  }
 0x97b   :  { %4974 = vperm.xlu0 %9270, %v4208_v22  }
 0x97c   :  { %9041 = vmatmul.msk.f32.gmra.mxu0 %vm1053_vm6, %v13084_v10  ;;  %v4544_v45 = vpop.f32.mrf.mxu3 }
 0x97f   :  { %v13186_v6 = vpop.permute.xlu2 %4752 }
 0x980   :  { %v4434_v50 = vpop.f32.mrf.mxu2 }
 0x981   :  { %v4211_v1 = vpop.f32.mrf.mxu0 }
 0x982   :  { %4708 = vrot.lane.b32.xlu2 %v4428_v5, %s16471_s4  ;;  %4772 = vrot.lane.b32.xlu1 %v4541_v53, %s16472_s1 }
 0x983   :  { %4712 = vrot.lane.b32.xlu0 %v4434_v50, %s16471_s4 }
 0x984   :  { %9042 = vmatmul.msk.f32.gmra.mxu0 %vm1053_vm6, %v13100_v25  ;;  %v4547_v22 = vpop.f32.mrf.mxu3 }
 0x988   :  { %v4437_v63 = vpop.f32.mrf.mxu2 }
 0x989   :  { %v4214_v29 = vpop.f32.mrf.mxu0 }
 0x98a   :  { %4710 = vrot.lane.b32.xlu1 %v4431_v31, %s16471_s4  ;;  %4979 = vperm.xlu2 %9274, %v4211_v1  }
 0x98c   :  { %v13192_v10 = vpop.permute.xlu1 %4914  ;;  %v13194_v43 = vpop.permute.xlu2 %4929  ;;  %9043 = vmatmul.msk.f32.gmra.mxu0 %vm1053_vm6, %v13116_v56 }
 0x98d   :  { %v4550_v31 = vpop.f32.mrf.mxu3 }
 0x990   :  { %v4440_v5 = vpop.f32.mrf.mxu2 }
 0x991   :  { %v4217_v53 = vpop.f32.mrf.mxu0 }
 0x992   :  { %4774 = vrot.lane.b32.xlu1 %v4544_v45, %s16472_s1  ;;  %4776 = vrot.lane.b32.xlu2 %v4547_v22, %s16472_s1  ;;  %v16473_v45 = vmov 1  }
 0x993   :  { %4989 = vperm.xlu0 %9270, %v4217_v53  }
 0x994   :  { %v13200_v50 = vpop.permute.xlu1 %4688  ;;  %9044 = vmatmul.msk.f32.gmra.mxu0 %vm1053_vm6, %v13134_v30  ;;  %v13204_v1 = vpop.permute.xlu2 %4756 }
 0x995   :  { %v4553_v53 = vpop.f32.mrf.mxu3  ;;  %v13213_v9 = vpop.permute.xlu0 %4919  ;;  %v4864_v2 = vsel %vm1811_vm14, %v4285_v23, %v13200_v50 }
 0x998   :  { %v4443_v25 = vpop.f32.mrf.mxu2 }
 0x999   :  { %v4624_v0 = vpop.f32.mrf.mxu0 }
 0x99a   :  { %4714 = vrot.lane.b32.xlu2 %v4437_v63, %s16471_s4  ;;  %4984 = vperm.xlu1 %9275, %v4214_v29   ;;  %v16475_v63 = vmov 2  }
 0x99b   :  { %4718 = vrot.lane.b32.xlu0 %v4443_v25, %s16471_s4 }
 0x99c   :  { %v13208_v56 = vpop.permute.xlu1 %4924  ;;  %9276 = vset.pattern.permute.xlu0 %v16473_v45  ;;  %v13211_v22 = vpop.permute.xlu2 %4694 }
 0x99d   :  { %v4556_v44 = vpop.f32.mrf.mxu3  ;;  %v13223_v21 = vpop.permute.xlu0 %4690  ;;  %v4867_v23 = vsel %vm1811_vm14, %v4294_v47, %v13211_v22  ;;  %v9997_v47 = vld [vmem:[%s16285_s14 + $0x8] sm:$0xff] }
 0x9a1   :  { %v4627_v30 = vpop.f32.mrf.mxu0 }
 0x9a2   :  { %4778 = vrot.lane.b32.xlu2 %v4550_v31, %s16472_s1  ;;  %4716 = vrot.lane.b32.xlu1 %v4440_v5, %s16471_s4 }
 0x9a3   :  { %4816 = vrot.lane.b32.xlu0 %v4624_v0, %s16474_s3  ;;  %9277 = vset.pattern.permute.xlu1 %v16475_v63 }
 0x9a4   :  { %v13219_v29 = vpop.permute.xlu1 %4754  ;;  %v13221_v25 = vpop.permute.xlu2 %4944 }
 0x9a9   :  { %v4630_v24 = vpop.f32.mrf.mxu0 }
 0x9aa   :  { %4780 = vrot.lane.b32.xlu1 %v4553_v53, %s16472_s1  ;;  %4818 = vrot.lane.b32.xlu2 %v4627_v30, %s16474_s3 }
 0x9ab   :  { %4782 = vrot.lane.b32.xlu0 %v4556_v44, %s16472_s1 }
 0x9ac   :  { %v13228_v31 = vpop.permute.xlu1 %4692  ;;  %v13230_v5 = vpop.permute.xlu2 %4762 }
 0x9ad   :  { %v13232_v0 = vpop.permute.xlu0 %4934 }
 0x9b1   :  { %v4633_v37 = vpop.f32.mrf.mxu0 }
 0x9b2   :  { %4822 = vrot.lane.b32.xlu1 %v4633_v37, %s16474_s3 }
 0x9b3   :  { %4820 = vrot.lane.b32.xlu0 %v4630_v24, %s16474_s3 }
 0x9b4   :  { %v13236_v8 = vpop.permute.xlu2 %4700  ;;  %v13238_v13 = vpop.permute.xlu1 %4939 }
 0x9b5   :  { %v13241_v30 = vpop.permute.xlu0 %4758 }
 0x9b9   :  { %v4636_v53 = vpop.f32.mrf.mxu0 }
 0x9ba   :  { %4824 = vrot.lane.b32.xlu2 %v4636_v53, %s16474_s3 }
 0x9bc   :  { %v13243_v44 = vpop.permute.xlu2 %4949  ;;  %v13245_v59 = vpop.permute.xlu1 %4760 }
 0x9bd   :  { %v13248_v38 = vpop.permute.xlu0 %4696 }
 0x9c1   :  { %v4639_v32 = vpop.f32.mrf.mxu0 }
 0x9c2   :  { %4826 = vrot.lane.b32.xlu0 %v4639_v32, %s16474_s3 }
 0x9c4   :  { %v13250_v37 = vpop.permute.xlu2 %4766  ;;  %v13252_v58 = vpop.permute.xlu1 %4698 }
 0x9c7   :  { %v13255_v57 = vpop.permute.xlu0 %4764 }
 0x9c9   :  { %v4642_v24 = vpop.f32.mrf.mxu0 }
 0x9ca   :  { %4828 = vrot.lane.b32.xlu1 %v4642_v24, %s16474_s3 }
 0x9cc   :  { %v13257_v53 = vpop.permute.xlu2 %4704  ;;  %v13260_v28 = vpop.permute.xlu1 %4702 }
 0x9cf   :  { %v13264_v32 = vpop.permute.xlu0 %4954 }
 0x9d1   :  { %v4645_v14 = vpop.f32.mrf.mxu0 }
 0x9d2   :  { %4830 = vrot.lane.b32.xlu1 %v4645_v14, %s16474_s3 }
 0x9d4   :  { %v13262_v7 = vpop.permute.xlu2 %4768 }
 0x9d7   :  { %v13271_v20 = vpop.permute.xlu0 %4959 }
 0x9d9   :  { %v4648_v34 = vpop.f32.mrf.mxu0 }
 0x9da   :  { %4832 = vrot.lane.b32.xlu2 %v4648_v34, %s16474_s3 }
 0x9dc   :  { %v13267_v18 = vpop.permute.xlu1 %4964  ;;  %v13269_v24 = vpop.permute.xlu2 %4708 }
 0x9df   :  { %v13279_v55 = vpop.permute.xlu0 %4706 }
 0x9e1   :  { %v4651_v11 = vpop.f32.mrf.mxu0 }
 0x9e2   :  { %4834 = vrot.lane.b32.xlu0 %v4651_v11, %s16474_s3 }
 0x9e4   :  { %v13274_v14 = vpop.permute.xlu1 %4770  ;;  %v13276_v4 = vpop.permute.xlu2 %4979 }
 0x9e9   :  { %v4654_v42 = vpop.f32.mrf.mxu0 }
 0x9ea   :  { %4836 = vrot.lane.b32.xlu1 %v4654_v42, %s16474_s3 }
 0x9ec   :  { %v13281_v34 = vpop.permute.xlu1 %4969  ;;  %v13286_v60 = vpop.permute.xlu2 %4776 }
 0x9ed   :  { %v13284_v49 = vpop.permute.xlu0 %4974 }
 0x9f1   :  { %v4657_v35 = vpop.f32.mrf.mxu0 }
 0x9f2   :  { %4838 = vrot.lane.b32.xlu0 %v4657_v35, %s16474_s3 }
 0x9f4   :  { %v13288_v11 = vpop.permute.xlu1 %4772  ;;  %v13295_v26 = vpop.permute.xlu2 %4714 }
 0x9f5   :  { %v13293_v42 = vpop.permute.xlu0 %4712 }
 0x9f9   :  { %v4660_v19 = vpop.f32.mrf.mxu0 }
 0x9fa   :  { %4840 = vrot.lane.b32.xlu0 %v4660_v19, %s16474_s3 }
 0x9fc   :  { %v13291_v41 = vpop.permute.xlu1 %4710  ;;  %v13302_v33 = vpop.permute.xlu2 %4778 }
 0xa01   :  { %v4663_v36 = vpop.f32.mrf.mxu0 }
 0xa02   :  { %4842 = vrot.lane.b32.xlu1 %v4663_v36, %s16474_s3  ;;  %v4865_v36 = vsel %vm1811_vm14, %v4288_v39, %v13223_v21  ;;  %v4880_v21 = vsel %vm1828_vm15, %v4864_v2, %v13186_v6 }
 0xa03   :  { %v4881_v51 = vsel %vm1828_vm15, %v4865_v36, %v13219_v29 }
 0xa04   :  { %v13298_v35 = vpop.permute.xlu1 %4774  ;;  %v4819_v62 = vpop.permute.xlu2 %4818 }
 0xa05   :  { %v13300_v15 = vpop.permute.xlu0 %4989  ;;  %v4897_v46 = vsel %vm1845_vm0, %v4881_v51, %v4819_v62 }
 0xa06   :  { %v4993_v17 = vadd.f32 %v13213_v9, %v4897_v46  ;;  %v4866_v46 = vsel %vm1811_vm14, %v4291_v3, %v13228_v31 }
 0xa07   :  { %v4882_v50 = vsel %vm1828_vm15, %v4866_v46, %v13204_v1 }
 0xa09   :  { %v4666_v27 = vpop.f32.mrf.mxu0 }
 0xa0a   :  { %4844 = vrot.lane.b32.xlu0 %v4666_v27, %s16474_s3 }
 0xa0c   :  { %v13305_v19 = vpop.permute.xlu1 %4984 }
 0xa0d   :  { %v13307_v12 = vpop.permute.xlu0 %4718 }
 0xa11   :  { %v4669_v61 = vpop.f32.mrf.mxu0 }
 0xa12   :  { %4846 = vrot.lane.b32.xlu2 %v4669_v61, %s16474_s3  ;;  %v5015_v61 = vadd.f32 %v13179_v40, %v4993_v17  ;;  %v4883_v17 = vsel %vm1828_vm15, %v4867_v23, %v13241_v30  ;;  %v4868_v30 = vsel %vm1811_vm14, %v4297_v54, %v13248_v38  ;;  %s16708_s3 = sld [smem:[#allocation97_spill]] }
 0xa14   :  { %v13314_v16 = vpop.permute.xlu1 %4716  ;;  %v5047_v62 = vmul.f32 0.01, %v5015_v61  ;;  %vm5031_vm9 = vcmp.ge.f32.partialorder %v5015_v61, 0.0 }
 0xa15   :  { %v4817_v27 = vpop.permute.xlu0 %4816 }
 0xa16   :  { %v4896_v29 = vsel %vm1845_vm0, %v4880_v21, %v4817_v27  ;;  %v5063_v6 = vsel %vm5031_vm9, %v5015_v61, %v5047_v62  ;;  %v13341_v21 = vpop.f32.mrf.mxu1 }
 0xa17   :  { %v4992_v51 = vadd.f32 %v13192_v10, %v4896_v29  ;;  %v13348_v22 = vadd.f32 %v9997_v47, %v5063_v6  ;;  %v4825_v29 = vpop.permute.xlu2 %4824 }
 0xa19   :  { %v5014_v2 = vadd.f32 %v13179_v40, %v4992_v51  ;;  %v4884_v51 = vsel %vm1828_vm15, %v4868_v30, %v13245_v59 }
 0xa1a   :  { %v4900_v46 = vsel %vm1845_vm0, %v4884_v51, %v4825_v29  ;;  %v9999_v29 = vld [vmem:[%s16285_s14 + $0x10] sm:$0xff] }
 0xa1b   :  { %v5046_v61 = vmul.f32 0.01, %v5014_v2  ;;  %vm5030_vm12 = vcmp.ge.f32.partialorder %v5014_v2, 0.0  ;;  %v4996_v54 = vadd.f32 %v13232_v0, %v4900_v46 }
 0xa1c   :  { %v13325_v39 = vpop.permute.xlu1 %4780 }
 0xa1d   :  { %v13328_v36 = vpop.permute.xlu0 %4782 }
 0xa24   :  { %v4823_v9 = vpop.permute.xlu1 %4822 }
 0xa25   :  { %v4821_v27 = vpop.permute.xlu0 %4820  ;;  %v4899_v10 = vsel %vm1845_vm0, %v4883_v17, %v4823_v9  ;;  %v5062_v17 = vsel %vm5030_vm12, %v5014_v2, %v5046_v61  ;;  %v4309_v9 = vpop.f32.mrf.mxu1  ;;  %v5018_v2 = vadd.f32 %v13179_v40, %v4996_v54 }
 0xa26   :  { %v4898_v3 = vsel %vm1845_vm0, %v4882_v50, %v4821_v27  ;;  %v4995_v1 = vadd.f32 %v13194_v43, %v4899_v10  ;;  %v9998_v43 = vld [vmem:[%s16285_s14] sm:$0xff]  ;;  %v4869_v50 = vsel %vm1811_vm14, %v4300_v48, %v13252_v58  ;;  %v4872_v27 = vsel %vm1811_vm14, %v4309_v9, %v13257_v53 }
 0xa27   :  { %v4994_v31 = vadd.f32 %v13208_v56, %v4898_v3  ;;  %v5097_v56 = vsel %vm2044_vm5, %v13348_v22, -inf  ;;  %v13364_v38 = vadd.f32 %v9998_v43, %v5062_v17  ;;  %v4888_v3 = vsel %vm1828_vm15, %v4872_v27, %v13262_v7 }
 0xa28   :  { %v5017_v23 = vadd.f32 %v13179_v40, %v4995_v1  ;;  %vm5034_vm3 = vcmp.ge.f32.partialorder %v5018_v2, 0.0  ;;  %v4870_v17 = vsel %vm1811_vm14, %v13320_v52, %v13236_v8  ;;  %v10002_v8 = vld [vmem:[%s16285_s14 + $0x20] sm:$0xff] }
 0xa29   :  { %v5016_v62 = vadd.f32 %v13179_v40, %v4994_v31  ;;  %v5094_v0 = vsel %vm2044_vm5, %v13364_v38, -inf  ;;  %v4885_v31 = vsel %vm1828_vm15, %v4869_v50, %v13230_v5  ;;  %v10000_v5 = vld [vmem:[%s16285_s14 + $0x18] sm:$0xff] }
 0xa2a   :  { %v5049_v6 = vmul.f32 0.01, %v5017_v23  ;;  %vm5033_vm13 = vcmp.ge.f32.partialorder %v5017_v23, 0.0 }
 0xa2b   :  { %v5048_v59 = vmul.f32 0.01, %v5016_v62  ;;  %vm5032_vm10 = vcmp.ge.f32.partialorder %v5016_v62, 0.0 }
 0xa2c   :  { %5098 = vmax.xlane.f32.xlu1 %v5097_v56  ;;  %v5065_v48 = vsel %vm5033_vm13, %v5017_v23, %v5049_v6 }
 0xa2d   :  { %v5064_v10 = vsel %vm5032_vm10, %v5016_v62, %v5048_v59  ;;  %v13389_v51 = vadd.f32 %v10000_v5, %v5065_v48  ;;  %v5050_v62 = vmul.f32 0.01, %v5018_v2  ;;  %v4886_v59 = vsel %vm1828_vm15, %v4870_v17, %v13255_v57  ;;  %v10003_v48 = vld [vmem:[%s16285_s14 + $0x40] sm:$0xff]  ;;  %v10005_v17 = vld [vmem:[%s16285_s14 + $0x38] sm:$0xff] }
 0xa2e   :  { %v13384_v7 = vadd.f32 %v9999_v29, %v5064_v10 }
 0xa2f   :  { %v5103_v54 = vsel %vm2044_vm5, %v13389_v51, -inf  ;;  %v5066_v43 = vsel %vm5034_vm3, %v5018_v2, %v5050_v62 }
 0xa30   :  { %v13412_v57 = vadd.f32 %v10002_v8, %v5066_v43 }
 0xa34   :  { %v4827_v47 = vpop.permute.xlu0 %4826  ;;  %v4833_v30 = vpop.permute.xlu2 %4832  ;;  %5095 = vmax.xlane.f32.xlu0 %v5094_v0  ;;  %v10001_v0 = vld [vmem:[%s16285_s14 + $0x28] sm:$0xff] }
 0xa35   :  { %v4901_v58 = vsel %vm1845_vm0, %v4885_v31, %v4827_v47  ;;  %v4904_v53 = vsel %vm1845_vm0, %v4888_v3, %v4833_v30  ;;  %v4871_v47 = vsel %vm1811_vm14, %v13341_v21, %v13260_v28  ;;  %v10004_v21 = vld [vmem:[%s16285_s14 + $0x30] sm:$0xff] }
 0xa36   :  { %v4997_v1 = vadd.f32 %v13238_v13, %v4901_v58  ;;  %v5000_v61 = vadd.f32 %v13264_v32, %v4904_v53  ;;  %v4312_v13 = vpop.f32.mrf.mxu1  ;;  %v5100_v32 = vsel %vm2044_vm5, %v13384_v7, -inf }
 0xa38   :  { %v5019_v56 = vadd.f32 %v13179_v40, %v4997_v1  ;;  %v5022_v46 = vadd.f32 %v13179_v40, %v5000_v61  ;;  %v4887_v1 = vsel %vm1828_vm15, %v4871_v47, %v13250_v37 }
 0xa3a   :  { %vm5035_vm4 = vcmp.ge.f32.partialorder %v5019_v56, 0.0  ;;  %v5051_v23 = vmul.f32 0.01, %v5019_v56  ;;  %v5054_v50 = vmul.f32 0.01, %v5022_v46  ;;  %vm5038_vm7 = vcmp.ge.f32.partialorder %v5022_v46, 0.0 }
 0xa3b   :  { %5101 = vmax.xlane.f32.xlu2 %v5100_v32 }
 0xa3c   :  { %v4829_v9 = vpop.permute.xlu1 %4828  ;;  %5104 = vmax.xlane.f32.xlu0 %v5103_v54  ;;  %v5067_v6 = vsel %vm5035_vm4, %v5019_v56, %v5051_v23  ;;  %v5070_v31 = vsel %vm5038_vm7, %v5022_v46, %v5054_v50 }
 0xa3d   :  { %v4902_v27 = vsel %vm1845_vm0, %v4886_v59, %v4829_v9  ;;  %v13406_v10 = vadd.f32 %v10001_v0, %v5067_v6  ;;  %v13425_v58 = vadd.f32 %v10003_v48, %v5070_v31  ;;  %v4873_v59 = vsel %vm1811_vm14, %v4312_v13, %v13279_v55  ;;  %v10006_v31 = vld [vmem:[%s16285_s14 + $0x48] sm:$0xff] }
 0xa3e   :  { %v4998_v52 = vadd.f32 %v13221_v25, %v4902_v27  ;;  %v5106_v25 = vsel %vm2044_vm5, %v13412_v57, -inf  ;;  %v4315_v53 = vpop.f32.mrf.mxu1  ;;  %v4889_v9 = vsel %vm1828_vm15, %v4873_v59, %v13274_v14 }
 0xa3f   :  { %v5109_v2 = vsel %vm2044_vm5, %v13406_v10, -inf  ;;  %v5118_v56 = vsel %vm2044_vm5, %v13425_v58, -inf }
 0xa40   :  { %v5020_v3 = vadd.f32 %v13179_v40, %v4998_v52  ;;  %5110 = vmax.xlane.f32.xlu1 %v5109_v2  ;;  %v4874_v2 = vsel %vm1811_vm14, %v4315_v53, %v13269_v24 }
 0xa42   :  { %vm5036_vm8 = vcmp.ge.f32.partialorder %v5020_v3, 0.0  ;;  %v5052_v30 = vmul.f32 0.01, %v5020_v3 }
 0xa43   :  { %5107 = vmax.xlane.f32.xlu2 %v5106_v25 }
 0xa44   :  { %v4831_v61 = vpop.permute.xlu1 %4830  ;;  %v5068_v29 = vsel %vm5036_vm8, %v5020_v3, %v5052_v30  ;;  %v4890_v3 = vsel %vm1828_vm15, %v4874_v2, %v13288_v11 }
 0xa45   :  { %v4903_v28 = vsel %vm1845_vm0, %v4887_v1, %v4831_v61  ;;  %v13433_v5 = vadd.f32 %v10004_v21, %v5068_v29 }
 0xa46   :  { %v4999_v62 = vadd.f32 %v13243_v44, %v4903_v28  ;;  %v4318_v44 = vpop.f32.mrf.mxu1 }
 0xa47   :  { %v5112_v46 = vsel %vm2044_vm5, %v13433_v5, -inf  ;;  %v4875_v48 = vsel %vm1811_vm14, %v4318_v44, %v13291_v41 }
 0xa48   :  { %v5021_v37 = vadd.f32 %v13179_v40, %v4999_v62  ;;  %5119 = vmax.xlane.f32.xlu1 %v5118_v56  ;;  %5113 = vmax.xlane.f32.xlu0 %v5112_v46  ;;  %v4891_v53 = vsel %vm1828_vm15, %v4875_v48, %v13298_v35 }
 0xa4a   :  { %vm5037_vm2 = vcmp.ge.f32.partialorder %v5021_v37, 0.0  ;;  %v5053_v32 = vmul.f32 0.01, %v5021_v37 }
 0xa4c   :  { %v5069_v23 = vsel %vm5037_vm2, %v5021_v37, %v5053_v32 }
 0xa4d   :  { %v13444_v54 = vadd.f32 %v10005_v17, %v5069_v23 }
 0xa4e   :  { %v4321_v0 = vpop.f32.mrf.mxu1 }
 0xa4f   :  { %v5115_v43 = vsel %vm2044_vm5, %v13444_v54, -inf  ;;  %v4876_v35 = vsel %vm1811_vm14, %v4321_v0, %v13293_v42 }
 0xa50   :  { %5116 = vmax.xlane.f32.xlu2 %v5115_v43  ;;  %v4892_v37 = vsel %vm1828_vm15, %v4876_v35, %v13286_v60 }
 0xa54   :  { %v4835_v6 = vpop.permute.xlu0 %4834 }
 0xa55   :  { %v4905_v50 = vsel %vm1845_vm0, %v4889_v9, %v4835_v6 }
 0xa56   :  { %v5001_v27 = vadd.f32 %v13271_v20, %v4905_v50  ;;  %v4324_v30 = vpop.f32.mrf.mxu1 }
 0xa57   :  { %v4877_v9 = vsel %vm1811_vm14, %v4324_v30, %v13295_v26 }
 0xa58   :  { %v5023_v52 = vadd.f32 %v13179_v40, %v5001_v27  ;;  %v4893_v6 = vsel %vm1828_vm15, %v4877_v9, %v13302_v33 }
 0xa5a   :  { %vm5039_vm9 = vcmp.ge.f32.partialorder %v5023_v52, 0.0  ;;  %v5055_v8 = vmul.f32 0.01, %v5023_v52 }
 0xa5c   :  { %v4837_v55 = vpop.permute.xlu1 %4836  ;;  %v5071_v13 = vsel %vm5039_vm9, %v5023_v52, %v5055_v8 }
 0xa5d   :  { %v4906_v14 = vsel %vm1845_vm0, %v4890_v3, %v4837_v55  ;;  %v13463_v20 = vadd.f32 %v10006_v31, %v5071_v13 }
 0xa5e   :  { %v5002_v47 = vadd.f32 %v13267_v18, %v4906_v14  ;;  %v10007_v18 = vld [vmem:[%s16285_s14 + $0x50] sm:$0xff]  ;;  %v4327_v46 = vpop.f32.mrf.mxu1 }
 0xa5f   :  { %v5121_v25 = vsel %vm2044_vm5, %v13463_v20, -inf }
 0xa60   :  { %v5024_v24 = vadd.f32 %v13179_v40, %v5002_v47  ;;  %5122 = vmax.xlane.f32.xlu0 %v5121_v25  ;;  %v4878_v47 = vsel %vm1811_vm14, %v4327_v46, %v13314_v16 }
 0xa62   :  { %vm5040_vm12 = vcmp.ge.f32.partialorder %v5024_v24, 0.0  ;;  %v5056_v11 = vmul.f32 0.01, %v5024_v24 }
 0xa64   :  { %v4839_v1 = vpop.permute.xlu0 %4838  ;;  %v5072_v61 = vsel %vm5040_vm12, %v5024_v24, %v5056_v11 }
 0xa65   :  { %v4907_v29 = vsel %vm1845_vm0, %v4891_v53, %v4839_v1  ;;  %v13477_v28 = vadd.f32 %v10007_v18, %v5072_v61 }
 0xa66   :  { %v5003_v21 = vadd.f32 %v13281_v34, %v4907_v29  ;;  %v10008_v34 = vld [vmem:[%s16285_s14 + $0x58] sm:$0xff]  ;;  %v4330_v8 = vpop.f32.mrf.mxu1  ;;  %v10011_v29 = vld [vmem:[%s16285_s14 + $0x70] sm:$0xff] }
 0xa67   :  { %v5124_v62 = vsel %vm2044_vm5, %v13477_v28, -inf  ;;  %v4879_v26 = vsel %vm1811_vm14, %v4330_v8, %v13307_v12 }
 0xa68   :  { %v5025_v41 = vadd.f32 %v13179_v40, %v5003_v21  ;;  %5125 = vmax.xlane.f32.xlu1 %v5124_v62  ;;  %v4895_v55 = vsel %vm1828_vm15, %v4879_v26, %v13328_v36  ;;  %v10010_v36 = vld [vmem:[%s16285_s14 + $0x68] sm:$0xff] }
 0xa6a   :  { %vm5041_vm10 = vcmp.ge.f32.partialorder %v5025_v41, 0.0  ;;  %v5057_v56 = vmul.f32 0.01, %v5025_v41 }
 0xa6c   :  { %v4841_v32 = vpop.permute.xlu0 %4840  ;;  %v5073_v23 = vsel %vm5041_vm10, %v5025_v41, %v5057_v56  ;;  %v4847_v2 = vpop.permute.xlu2 %4846 }
 0xa6d   :  { %v4908_v17 = vsel %vm1845_vm0, %v4892_v37, %v4841_v32  ;;  %v13491_v44 = vadd.f32 %v10008_v34, %v5073_v23  ;;  %v4911_v14 = vsel %vm1845_vm0, %v4895_v55, %v4847_v2 }
 0xa6e   :  { %v5004_v43 = vadd.f32 %v13284_v49, %v4908_v17  ;;  %v10009_v49 = vld [vmem:[%s16285_s14 + $0x60] sm:$0xff]  ;;  %v5007_v12 = vadd.f32 %v13300_v15, %v4911_v14 }
 0xa6f   :  { %v5127_v42 = vsel %vm2044_vm5, %v13491_v44, -inf }
 0xa70   :  { %v5026_v59 = vadd.f32 %v13179_v40, %v5004_v43  ;;  %5128 = vmax.xlane.f32.xlu1 %v5127_v42  ;;  %v5029_v53 = vadd.f32 %v13179_v40, %v5007_v12 }
 0xa72   :  { %vm5042_vm13 = vcmp.ge.f32.partialorder %v5026_v59, 0.0  ;;  %v5058_v60 = vmul.f32 0.01, %v5026_v59  ;;  %v5061_v61 = vmul.f32 0.01, %v5029_v53 }
 0xa74   :  { %v4843_v50 = vpop.permute.xlu1 %4842  ;;  %v5074_v27 = vsel %vm5042_vm13, %v5026_v59, %v5058_v60 }
 0xa75   :  { %v4909_v0 = vsel %vm1845_vm0, %v4893_v6, %v4843_v50  ;;  %v13505_v52 = vadd.f32 %v10009_v49, %v5074_v27 }
 0xa76   :  { %v5005_v3 = vadd.f32 %v13276_v4, %v4909_v0  ;;  %v4894_v4 = vsel %vm1828_vm15, %v4878_v47, %v13325_v39 }
 0xa77   :  { %v5130_v33 = vsel %vm2044_vm5, %v13505_v52, -inf }
 0xa78   :  { %v5027_v13 = vadd.f32 %v13179_v40, %v5005_v3  ;;  %5131 = vmax.xlane.f32.xlu0 %v5130_v33 }
 0xa7a   :  { %vm5043_vm3 = vcmp.ge.f32.partialorder %v5027_v13, 0.0  ;;  %v5059_v31 = vmul.f32 0.01, %v5027_v13 }
 0xa7c   :  { %v4845_v25 = vpop.permute.xlu0 %4844  ;;  %v5075_v24 = vsel %vm5043_vm3, %v5027_v13, %v5059_v31 }
 0xa7d   :  { %v4910_v30 = vsel %vm1845_vm0, %v4894_v4, %v4845_v25  ;;  %v13525_v11 = vadd.f32 %v10010_v36, %v5075_v24  ;;  %vm5045_vm0 = vcmp.ge.f32.partialorder %v5029_v53, 0.0 }
 0xa7e   :  { %v5006_v48 = vadd.f32 %v13305_v19, %v4910_v30  ;;  %v5077_v21 = vsel %vm5045_vm0, %v5029_v53, %v5061_v61 }
 0xa7f   :  { %v5133_v16 = vsel %vm2044_vm5, %v13525_v11, -inf }
 0xa80   :  { %v5028_v39 = vadd.f32 %v13179_v40, %v5006_v48  ;;  %5134 = vmax.xlane.f32.xlu1 %v5133_v16  ;;  %v10012_v40 = vld [vmem:[%s16285_s14 + $0x78] sm:$0xff] }
 0xa81   :  { %v13542_v62 = vadd.f32 %v10012_v40, %v5077_v21 }
 0xa82   :  { %vm5044_vm15 = vcmp.ge.f32.partialorder %v5028_v39, 0.0  ;;  %v5060_v15 = vmul.f32 0.01, %v5028_v39 }
 0xa83   :  { %v5139_v41 = vsel %vm2044_vm5, %v13542_v62, -inf }
 0xa84   :  { %v5076_v1 = vsel %vm5044_vm15, %v5028_v39, %v5060_v15 }
 0xa85   :  { %v13535_v18 = vadd.f32 %v10011_v29, %v5076_v1 }
 0xa87   :  { %v5136_v19 = vsel %vm2044_vm5, %v13535_v18, -inf }
 0xa88   :  { %5137 = vmax.xlane.f32.xlu1 %v5136_v19 }
 0xa90   :  { %5140 = vmax.xlane.f32.xlu1 %v5139_v41 }
 0xa9f   :  { %v5099_v35 = vpop.xlane.xlu1 %5098 }
 0xaa0   :  { %v5143_v56 = vsub.f32 %v13348_v22, %v5099_v35 }
 0xaa2   :  { %v5160_v46 = vmul.f32 1.442695, %v5143_v56 }
 0xaa4   :  { %9661 = vpow2.f32 %v5160_v46 }
 0xaa7   :  { %v5096_v37 = vpop.xlane.xlu0 %5095 }
 0xaa8   :  { %v5142_v32 = vsub.f32 %v13364_v38, %v5096_v37 }
 0xaaa   :  { %v13548_v23 = vpop.eup %9661  ;;  %v5158_v17 = vmul.f32 1.442695, %v5142_v32 }
 0xaab   :  { %v5193_v34 = vsel %vm2044_vm5, %v13548_v23, 0.0 }
 0xaac   :  { %9663 = vpow2.f32 %v5158_v17  ;;  %5194 = vadd.xlane.f32.xlu0 %v5193_v34 }
 0xaae   :  { %v5102_v43 = vpop.xlane.xlu2 %5101 }
 0xaaf   :  { %v5144_v42 = vsub.f32 %v13384_v7, %v5102_v43  ;;  %v5105_v59 = vpop.xlane.xlu0 %5104 }
 0xab0   :  { %v5145_v22 = vsub.f32 %v13389_v51, %v5105_v59 }
 0xab1   :  { %v5162_v60 = vmul.f32 1.442695, %v5144_v42 }
 0xab2   :  { %v13554_v9 = vpop.eup %9663  ;;  %v5164_v6 = vmul.f32 1.442695, %v5145_v22 }
 0xab3   :  { %9665 = vpow2.f32 %v5162_v60  ;;  %v5190_v38 = vsel %vm2044_vm5, %v13554_v9, 0.0  ;;  %v5111_v50 = vpop.xlane.xlu1 %5110 }
 0xab4   :  { %5191 = vadd.xlane.f32.xlu1 %v5190_v38  ;;  %9667 = vpow2.f32 %v5164_v6  ;;  %v5147_v7 = vsub.f32 %v13406_v10, %v5111_v50 }
 0xab6   :  { %v5108_v27 = vpop.xlane.xlu2 %5107  ;;  %v5168_v2 = vmul.f32 1.442695, %v5147_v7 }
 0xab7   :  { %v5146_v0 = vsub.f32 %v13412_v57, %v5108_v27 }
 0xab9   :  { %v13559_v49 = vpop.eup %9665  ;;  %v5166_v8 = vmul.f32 1.442695, %v5146_v0 }
 0xaba   :  { %v5196_v51 = vsel %vm2044_vm5, %v13559_v49, 0.0  ;;  %v13564_v26 = vpop.eup %9667 }
 0xabb   :  { %9669 = vpow2.f32 %v5166_v8  ;;  %5197 = vadd.xlane.f32.xlu2 %v5196_v51  ;;  %v5114_v3 = vpop.xlane.xlu0 %5113  ;;  %v5199_v55 = vsel %vm2044_vm5, %v13564_v26, 0.0  ;;  %v5120_v13 = vpop.xlane.xlu1 %5119 }
 0xabc   :  { %9671 = vpow2.f32 %v5168_v2  ;;  %v5148_v57 = vsub.f32 %v13433_v5, %v5114_v3  ;;  %v5150_v4 = vsub.f32 %v13425_v58, %v5120_v13 }
 0xabe   :  { %v5170_v47 = vmul.f32 1.442695, %v5148_v57  ;;  %v5174_v5 = vmul.f32 1.442695, %v5150_v4  ;;  %v10013_v57 = vld [vmem:[%s16286_s8] sm:$0xff]  ;;  %v16476_v4 = vmov 0  }
 0xac1   :  { %v13566_v33 = vpop.eup %9669 }
 0xac2   :  { %v5202_v10 = vsel %vm2044_vm5, %v13566_v33, 0.0  ;;  %v13575_v25 = vpop.eup %9671 }
 0xac3   :  { %5200 = vadd.xlane.f32.xlu2 %v5199_v55  ;;  %5203 = vadd.xlane.f32.xlu1 %v5202_v10  ;;  %v5117_v14 = vpop.xlane.xlu2 %5116  ;;  %v5205_v24 = vsel %vm2044_vm5, %v13575_v25, 0.0 }
 0xac4   :  { %v5149_v31 = vsub.f32 %v13444_v54, %v5117_v14 }
 0xac6   :  { %v5172_v12 = vmul.f32 1.442695, %v5149_v31 }
 0xac8   :  { %9673 = vpow2.f32 %v5172_v12 }
 0xac9   :  { %9675 = vpow2.f32 %v5170_v47 }
 0xaca   :  { %9677 = vpow2.f32 %v5174_v5 }
 0xacb   :  { %5206 = vadd.xlane.f32.xlu1 %v5205_v24  ;;  %v16477_v24 = vmov 3  }
 0xace   :  { %v13579_v30 = vpop.eup %9673 }
 0xacf   :  { %v13581_v36 = vpop.eup %9675  ;;  %v5211_v54 = vsel %vm2044_vm5, %v13579_v30, 0.0 }
 0xad0   :  { %5212 = vadd.xlane.f32.xlu2 %v5211_v54  ;;  %v5208_v58 = vsel %vm2044_vm5, %v13581_v36, 0.0  ;;  %v13587_v16 = vpop.eup %9677  ;;  %v10015_v54 = vld [vmem:[%s16286_s8 + $0x10] sm:$0xff] }
 0xad1   :  { %v5214_v15 = vsel %vm2044_vm5, %v13587_v16, 0.0 }
 0xad3   :  { %v5123_v48 = vpop.xlane.xlu0 %5122  ;;  %5209 = vadd.xlane.f32.xlu1 %v5208_v58 }
 0xad4   :  { %v5151_v53 = vsub.f32 %v13463_v20, %v5123_v48 }
 0xad6   :  { %v5176_v39 = vmul.f32 1.442695, %v5151_v53 }
 0xad8   :  { %9679 = vpow2.f32 %v5176_v39  ;;  %5215 = vadd.xlane.f32.xlu2 %v5214_v15  ;;  %v10016_v15 = vld [vmem:[%s16286_s8 + $0x20] sm:$0xff] }
 0xadb   :  { %v5126_v1 = vpop.xlane.xlu1 %5125 }
 0xadc   :  { %v5152_v61 = vsub.f32 %v13477_v28, %v5126_v1 }
 0xade   :  { %v13593_v29 = vpop.eup %9679  ;;  %v5178_v19 = vmul.f32 1.442695, %v5152_v61  ;;  %v10017_v61 = vld [vmem:[%s16286_s8 + $0x18] sm:$0xff] }
 0xadf   :  { %v5217_v21 = vsel %vm2044_vm5, %v13593_v29, 0.0 }
 0xae0   :  { %9681 = vpow2.f32 %v5178_v19  ;;  %5218 = vadd.xlane.f32.xlu2 %v5217_v21 }
 0xae3   :  { %v5129_v40 = vpop.xlane.xlu1 %5128 }
 0xae4   :  { %v5153_v20 = vsub.f32 %v13491_v44, %v5129_v40 }
 0xae6   :  { %v13598_v41 = vpop.eup %9681  ;;  %v5180_v35 = vmul.f32 1.442695, %v5153_v20  ;;  %v10018_v20 = vld [vmem:[%s16286_s8 + $0x28] sm:$0xff] }
 0xae7   :  { %v5220_v56 = vsel %vm2044_vm5, %v13598_v41, 0.0 }
 0xae8   :  { %9683 = vpow2.f32 %v5180_v35  ;;  %5221 = vadd.xlane.f32.xlu1 %v5220_v56 }
 0xaeb   :  { %v5132_v28 = vpop.xlane.xlu0 %5131 }
 0xaec   :  { %v5154_v46 = vsub.f32 %v13505_v52, %v5132_v28  ;;  %v10019_v28 = vld [vmem:[%s16286_s8 + $0x30] sm:$0xff] }
 0xaee   :  { %v13603_v37 = vpop.eup %9683  ;;  %v5182_v32 = vmul.f32 1.442695, %v5154_v46 }
 0xaef   :  { %v5223_v17 = vsel %vm2044_vm5, %v13603_v37, 0.0 }
 0xaf0   :  { %9685 = vpow2.f32 %v5182_v32  ;;  %5224 = vadd.xlane.f32.xlu0 %v5223_v17 }
 0xaf3   :  { %v5135_v44 = vpop.xlane.xlu1 %5134 }
 0xaf4   :  { %v5155_v34 = vsub.f32 %v13525_v11, %v5135_v44 }
 0xaf6   :  { %v13608_v43 = vpop.eup %9685  ;;  %v5184_v42 = vmul.f32 1.442695, %v5155_v34  ;;  %v10020_v34 = vld [vmem:[%s16286_s8 + $0x38] sm:$0xff] }
 0xaf7   :  { %v5226_v59 = vsel %vm2044_vm5, %v13608_v43, 0.0 }
 0xaf8   :  { %9687 = vpow2.f32 %v5184_v42  ;;  %5227 = vadd.xlane.f32.xlu2 %v5226_v59 }
 0xafb   :  { %v5138_v52 = vpop.xlane.xlu1 %5137 }
 0xafc   :  { %v5156_v60 = vsub.f32 %v13535_v18, %v5138_v52 }
 0xafe   :  { %v13613_v22 = vpop.eup %9687  ;;  %v5186_v38 = vmul.f32 1.442695, %v5156_v60  ;;  %v10021_v60 = vld [vmem:[%s16286_s8 + $0x40] sm:$0xff] }
 0xaff   :  { %v5229_v6 = vsel %vm2044_vm5, %v13613_v22, 0.0 }
 0xb00   :  { %9689 = vpow2.f32 %v5186_v38  ;;  %5230 = vadd.xlane.f32.xlu1 %v5229_v6 }
 0xb03   :  { %v5141_v11 = vpop.xlane.xlu1 %5140 }
 0xb04   :  { %v5157_v50 = vsub.f32 %v13542_v62, %v5141_v11 }
 0xb06   :  { %v13618_v27 = vpop.eup %9689  ;;  %v5188_v0 = vmul.f32 1.442695, %v5157_v50 }
 0xb07   :  { %v5232_v7 = vsel %vm2044_vm5, %v13618_v27, 0.0 }
 0xb08   :  { %9691 = vpow2.f32 %v5188_v0  ;;  %5233 = vadd.xlane.f32.xlu1 %v5232_v7  ;;  %v8954_v0 = vld [vmem:[%s16288_s30 + $0x38] sm:$0xff]  ;;  %v8953_v7 = vld [vmem:[%s16288_s30 + $0x30] sm:$0xff] }
 0xb09   :  { %5797 = vmatpush.msra.mxu1 %v8954_v0 }
 0xb0b   :  { %5798 = vmatpush.msra.mxu1 %v8953_v7  ;;  %v16482_v7 = vld [vmem:[#allocation40_spill] sm:$0xff] }
 0xb0e   :  { %v13622_v18 = vpop.eup %9691 }
 0xb0f   :  { %v5235_v8 = vsel %vm2044_vm5, %v13622_v18, 0.0 }
 0xb10   :  { %5236 = vadd.xlane.f32.xlu0 %v5235_v8  ;;  %v10022_v8 = vld [vmem:[%s16286_s8 + $0x48] sm:$0xff] }
 0xb1f   :  { %v5195_v2 = vpop.xlane.xlu0 %5194 }
 0xb27   :  { %v5192_v51 = vpop.xlane.xlu1 %5191 }
 0xb28   :  { %9693 = vrcp.f32 %v5192_v51 }
 0xb29   :  { %9695 = vrcp.f32 %v5195_v2 }
 0xb2e   :  { %v9694_v3 = vpop.eup %9693  ;;  %v5198_v13 = vpop.xlane.xlu2 %5197 }
 0xb2f   :  { %v5254_v62 = vmul.f32 %v9694_v3, %v13554_v9  ;;  %v9696_v10 = vpop.eup %9695  ;;  %9697 = vrcp.f32 %v5198_v13  ;;  %v10014_v9 = vld [vmem:[%s16286_s8 + $0x8] sm:$0xff]  ;;  %v10023_v13 = vld [vmem:[%s16286_s8 + $0x50] sm:$0xff] }
 0xb30   :  { %v5255_v14 = vmul.f32 %v9696_v10, %v13548_v23 }
 0xb31   :  { %v13630_v55 = vmul.f32 %v10013_v57, %v5254_v62  ;;  %v8951_v62 = vld [vmem:[%s16288_s30 + $0x20] sm:$0xff] }
 0xb32   :  { %v13639_v31 = vmul.f32 %v10014_v9, %v5255_v14 }
 0xb33   :  { %5383 = vperm.xlu0 %9276, %v13630_v55   ;;  %5479 = vperm.xlu1 %9277, %v13630_v55  }
 0xb34   :  { %5288 = vperm.xlu2 %9274, %v13630_v55  }
 0xb35   :  { %v9698_v12 = vpop.eup %9697 }
 0xb36   :  { %v5204_v47 = vpop.xlane.xlu1 %5203  ;;  %v5201_v5 = vpop.xlane.xlu2 %5200  ;;  %v5256_v23 = vmul.f32 %v9698_v12, %v13559_v49 }
 0xb37   :  { %9699 = vrcp.f32 %v5204_v47 }
 0xb38   :  { %9701 = vrcp.f32 %v5201_v5  ;;  %v13650_v58 = vmul.f32 %v10015_v54, %v5256_v23 }
 0xb3b   :  { %5387 = vperm.xlu0 %9276, %v13639_v31   ;;  %9279 = vset.pattern.permute.xlu1 %v16476_v4 }
 0xb3c   :  { %9278 = vset.pattern.permute.xlu2 %v16477_v24  ;;  %5293 = vperm.xlu1 %9279, %v13639_v31  }
 0xb3d   :  { %5575 = vperm.xlu2 %9278, %v13630_v55   ;;  %v9700_v48 = vpop.eup %9699 }
 0xb3e   :  { %v9702_v53 = vpop.eup %9701  ;;  %v5258_v49 = vmul.f32 %v9700_v48, %v13566_v33  ;;  %v5207_v21 = vpop.xlane.xlu1 %5206 }
 0xb3f   :  { %v5257_v39 = vmul.f32 %v9702_v53, %v13564_v26  ;;  %9703 = vrcp.f32 %v5207_v21  ;;  %v10024_v21 = vld [vmem:[%s16286_s8 + $0x58] sm:$0xff] }
 0xb40   :  { %v13663_v1 = vmul.f32 %v10016_v15, %v5258_v49  ;;  %v16478_v49 = vld [vmem:[#allocation33_spill] sm:$0xff]  ;;  %v16479_v15 = vld [vmem:[#allocation36_spill] sm:$0xff] }
 0xb41   :  { %v13668_v19 = vmul.f32 %v10017_v61, %v5257_v39 }
 0xb43   :  { %9280 = vset.pattern.permute.xlu0 %v16475_v63  ;;  %v5213_v32 = vpop.xlane.xlu2 %5212 }
 0xb44   :  { %5483 = vperm.xlu0 %9280, %v13639_v31   ;;  %9284 = vset.pattern.permute.xlu1 %v16475_v63 }
 0xb45   :  { %9283 = vset.pattern.permute.xlu2 %v16473_v45  ;;  %5487 = vperm.xlu1 %9284, %v13650_v58   ;;  %v9704_v26 = vpop.eup %9703 }
 0xb46   :  { %5391 = vperm.xlu2 %9283, %v13650_v58   ;;  %v5210_v33 = vpop.xlane.xlu1 %5209  ;;  %v5259_v40 = vmul.f32 %v9704_v26, %v13575_v25 }
 0xb47   :  { %9705 = vrcp.f32 %v5210_v33 }
 0xb48   :  { %v13685_v35 = vmul.f32 %v10018_v20, %v5259_v40  ;;  %9707 = vrcp.f32 %v5213_v32  ;;  %v16480_v40 = vld [vmem:[#allocation38_spill] sm:$0xff] }
 0xb4c   :  { %9281 = vset.pattern.permute.xlu0 %v16477_v24 }
 0xb4d   :  { %5579 = vperm.xlu0 %9281, %v13639_v31   ;;  %9287 = vset.pattern.permute.xlu1 %v16473_v45  ;;  %v9706_v56 = vpop.eup %9705 }
 0xb4e   :  { %5399 = vperm.xlu2 %9283, %v13663_v1   ;;  %5395 = vperm.xlu1 %9287, %v13668_v19   ;;  %v5260_v25 = vmul.f32 %v9706_v56, %v13581_v36  ;;  %v5216_v36 = vpop.xlane.xlu2 %5215  ;;  %v9708_v17 = vpop.eup %9707  ;;  %v16481_v56 = vld [vmem:[#allocation47_spill] sm:$0xff] }
 0xb4f   :  { %v5261_v44 = vmul.f32 %v9708_v17, %v13579_v30  ;;  %9709 = vrcp.f32 %v5216_v36 }
 0xb50   :  { %v13697_v46 = vmul.f32 %v10019_v28, %v5260_v25 }
 0xb51   :  { %v13714_v42 = vmul.f32 %v10020_v34, %v5261_v44 }
 0xb55   :  { %9282 = vset.pattern.permute.xlu0 %v16476_v4  ;;  %v9710_v30 = vpop.eup %9709 }
 0xb56   :  { %9292 = vset.pattern.permute.xlu2 %v16477_v24  ;;  %5298 = vperm.xlu0 %9282, %v13650_v58   ;;  %v5219_v59 = vpop.xlane.xlu2 %5218  ;;  %v5262_v52 = vmul.f32 %v9710_v30, %v13587_v16 }
 0xb57   :  { %5591 = vperm.xlu2 %9292, %v13663_v1   ;;  %9288 = vset.pattern.permute.xlu1 %v16475_v63  ;;  %9711 = vrcp.f32 %v5219_v59 }
 0xb58   :  { %5491 = vperm.xlu1 %9288, %v13668_v19   ;;  %v13727_v38 = vmul.f32 %v10021_v60, %v5262_v52 }
 0xb5b   :  { %v5222_v11 = vpop.xlane.xlu1 %5221 }
 0xb5c   :  { %9713 = vrcp.f32 %v5222_v11  ;;  %v10025_v11 = vld [vmem:[%s16286_s8 + $0x70] sm:$0xff] }
 0xb5d   :  { %v9712_v6 = vpop.eup %9711 }
 0xb5e   :  { %9285 = vset.pattern.permute.xlu0 %v16477_v24  ;;  %v5263_v16 = vmul.f32 %v9712_v6, %v13593_v29  ;;  %v8952_v29 = vld [vmem:[%s16288_s30 + $0x28] sm:$0xff] }
 0xb5f   :  { %9294 = vset.pattern.permute.xlu2 %v16473_v45  ;;  %5583 = vperm.xlu0 %9285, %v13650_v58  }
 0xb60   :  { %5403 = vperm.xlu2 %9294, %v13685_v35   ;;  %9293 = vset.pattern.permute.xlu1 %v16476_v4  ;;  %v13744_v51 = vmul.f32 %v10022_v8, %v5263_v16  ;;  %v10026_v16 = vld [vmem:[%s16286_s8 + $0x60] sm:$0xff] }
 0xb61   :  { %5313 = vperm.xlu1 %9293, %v13685_v35   ;;  %5799 = vmatpush.msra.mxu1 %v8952_v29 }
 0xb62   :  { %v9714_v2 = vpop.eup %9713 }
 0xb63   :  { %v5264_v57 = vmul.f32 %v9714_v2, %v13598_v41  ;;  %5800 = vmatpush.msra.mxu1 %v8951_v62  ;;  %v5225_v9 = vpop.xlane.xlu0 %5224 }
 0xb64   :  { %9715 = vrcp.f32 %v5225_v9 }
 0xb65   :  { %v13762_v14 = vmul.f32 %v10023_v13, %v5264_v57 }
 0xb67   :  { %9286 = vset.pattern.permute.xlu0 %v16476_v4 }
 0xb68   :  { %9295 = vset.pattern.permute.xlu2 %v16475_v63  ;;  %5303 = vperm.xlu0 %9286, %v13668_v19  }
 0xb69   :  { %5499 = vperm.xlu2 %9295, %v13685_v35   ;;  %5318 = vperm.xlu1 %9293, %v13697_v46  }
 0xb6a   :  { %v9716_v5 = vpop.eup %9715 }
 0xb6b   :  { %v5228_v50 = vpop.xlane.xlu2 %5227  ;;  %v5265_v54 = vmul.f32 %v9716_v5, %v13603_v37 }
 0xb6d   :  { %v13784_v26 = vmul.f32 %v10024_v21, %v5265_v54  ;;  %v10027_v54 = vld [vmem:[%s16286_s8 + $0x78] sm:$0xff] }
 0xb70   :  { %9289 = vset.pattern.permute.xlu0 %v16477_v24 }
 0xb71   :  { %9296 = vset.pattern.permute.xlu2 %v16477_v24  ;;  %9297 = vset.pattern.permute.xlu1 %v16473_v45 }
 0xb72   :  { %5595 = vperm.xlu2 %9296, %v13685_v35   ;;  %5407 = vperm.xlu1 %9297, %v13697_v46  }
 0xb73   :  { %5587 = vperm.xlu0 %9289, %v13668_v19   ;;  %v13757_v10 = vpop.xlane.xlu1 %5230 }
 0xb7a   :  { %9300 = vset.pattern.permute.xlu2 %v16473_v45  ;;  %9298 = vset.pattern.permute.xlu1 %v16477_v24 }
 0xb7b   :  { %9290 = vset.pattern.permute.xlu0 %v16476_v4  ;;  %5599 = vperm.xlu1 %9298, %v13697_v46   ;;  %v5234_v47 = vpop.xlane.xlu1 %5233 }
 0xb7c   :  { %5308 = vperm.xlu0 %9290, %v13663_v1   ;;  %5411 = vperm.xlu2 %9300, %v13714_v42   ;;  %9717 = vrcp.f32 %v5234_v47  ;;  %v16485_v47 = vld [vmem:[#allocation41_spill] sm:$0xff] }
 0xb7d   :  { %9719 = vrcp.f32 %v5228_v50 }
 0xb82   :  { %v9718_v44 = vpop.eup %9717 }
 0xb83   :  { %9305 = vset.pattern.permute.xlu1 %v16475_v63  ;;  %v5237_v12 = vpop.xlane.xlu0 %5236  ;;  %v9720_v59 = vpop.eup %9719  ;;  %v5268_v30 = vmul.f32 %v9718_v44, %v13618_v27  ;;  %v16489_v44 = vld [vmem:[#allocation55_spill] sm:$0xff] }
 0xb84   :  { %9291 = vset.pattern.permute.xlu0 %v16475_v63  ;;  %9302 = vset.pattern.permute.xlu2 %v16477_v24  ;;  %9721 = vrcp.f32 %v5237_v12  ;;  %v5266_v52 = vmul.f32 %v9720_v59, %v13608_v43  ;;  %v16483_v43 = vld [vmem:[#allocation37_spill] sm:$0xff] }
 0xb85   :  { %5495 = vperm.xlu0 %9291, %v13663_v1   ;;  %5603 = vperm.xlu2 %9302, %v13714_v42   ;;  %v13810_v50 = vmul.f32 %v10025_v11, %v5268_v30  ;;  %9723 = vrcp.f32 %v13757_v10  ;;  %v16490_v11 = vld [vmem:[#allocation45_spill] sm:$0xff] }
 0xb86   :  { %5511 = vperm.xlu1 %9305, %v13727_v38   ;;  %v13815_v0 = vmul.f32 %v10026_v16, %v5266_v52 }
 0xb8a   :  { %v9722_v27 = vpop.eup %9721 }
 0xb8b   :  { %v5269_v57 = vmul.f32 %v9722_v27, %v13622_v18  ;;  %v9724_v10 = vpop.eup %9723 }
 0xb8d   :  { %5503 = vperm.xlu0 %9291, %v13697_v46   ;;  %9304 = vset.pattern.permute.xlu2 %v16473_v45 }
 0xb8e   :  { %5515 = vperm.xlu1 %9305, %v13744_v51   ;;  %5415 = vperm.xlu2 %9304, %v13727_v38   ;;  %v5289_v3 = vpop.permute.xlu2 %5288 }
 0xb8f   :  { %v5366_v39 = vmul.f32 %v5289_v3, %v16478_v49  ;;  %v16484_v3 = vld [vmem:[#allocation42_spill] sm:$0xff]  ;;  %v5267_v49 = vmul.f32 %v9724_v10, %v13613_v22 }
 0xb95   :  { %9299 = vset.pattern.permute.xlu0 %v16476_v4 }
 0xb96   :  { %9310 = vset.pattern.permute.xlu1 %v16476_v4  ;;  %5323 = vperm.xlu0 %9299, %v13714_v42  }
 0xb97   :  { %9306 = vset.pattern.permute.xlu2 %v16477_v24  ;;  %5338 = vperm.xlu1 %9310, %v13762_v14   ;;  %v5576_v41 = vpop.permute.xlu2 %5575 }
 0xb98   :  { %5607 = vperm.xlu2 %9306, %v13727_v38   ;;  %v5638_v25 = vmul.f32 %v5576_v41, %v16481_v56 }
 0xb9e   :  { %9301 = vset.pattern.permute.xlu0 %v16475_v63 }
 0xb9f   :  { %9312 = vset.pattern.permute.xlu1 %v16475_v63  ;;  %5507 = vperm.xlu0 %9301, %v13714_v42  }
 0xba0   :  { %9307 = vset.pattern.permute.xlu2 %v16476_v4  ;;  %5519 = vperm.xlu1 %9312, %v13762_v14   ;;  %v13775_v23 = vpop.permute.xlu2 %5391 }
 0xba1   :  { %5333 = vperm.xlu2 %9307, %v13744_v51  }
 0xba5   :  { %v5384_v48 = vpop.permute.xlu0 %5383  ;;  %v5480_v53 = vpop.permute.xlu1 %5479 }
 0xba6   :  { %v5446_v61 = vmul.f32 %v5384_v48, %v16479_v15  ;;  %v5542_v20 = vmul.f32 %v5480_v53, %v16480_v40  ;;  %v13834_v48 = vmul.f32 %v10027_v54, %v5269_v57  ;;  %v16486_v15 = vld [vmem:[#allocation44_spill] sm:$0xff] }
 0xba7   :  { %9303 = vset.pattern.permute.xlu0 %v16476_v4 }
 0xba8   :  { %v5462_v33 = vadd.f32 %v5446_v61, %v5366_v39  ;;  %9314 = vset.pattern.permute.xlu1 %v16476_v4  ;;  %5328 = vperm.xlu0 %9303, %v13727_v38   ;;  %v13790_v37 = vpop.permute.xlu2 %5399 }
 0xba9   :  { %5343 = vperm.xlu1 %9314, %v13784_v26   ;;  %9308 = vset.pattern.permute.xlu2 %v16473_v45 }
 0xbaa   :  { %v5558_v28 = vadd.f32 %v5542_v20, %v5462_v33  ;;  %5419 = vperm.xlu2 %9308, %v13744_v51   ;;  %v10028_v33 = vld [vmem:[%s16286_s8 + $0x68] sm:$0xff]  ;;  %v16487_v20 = vld [vmem:[#allocation51_spill] sm:$0xff] }
 0xbab   :  { %v13850_v40 = vmul.f32 %v10028_v33, %v5267_v49  ;;  %v5448_v56 = vmul.f32 %v13775_v23, %v16487_v20  ;;  %v16494_v49 = vld [vmem:[#allocation10_spill] sm:$0xff] }
 0xbac   :  { %v5654_v32 = vadd.f32 %v5638_v25, %v5558_v28  ;;  %v16488_v28 = vld [vmem:[#allocation46_spill] sm:$0xff] }
 0xbad   :  { %v5388_v36 = vpop.permute.xlu0 %5387  ;;  %v16496_v33 = vld [vmem:[#allocation14_spill] sm:$0xff] }
 0xbae   :  { %v5294_v17 = vpop.permute.xlu1 %5293  ;;  %9045 = vmatmul.msk.f32.vlgmr.msra.gmra.mxu1 %vm1053_vm6, %v5654_v32  ;;  %v5447_v8 = vmul.f32 %v5388_v36, %v16482_v7  ;;  %v16491_v7 = vld [vmem:[#allocation48_spill] sm:$0xff] }
 0xbaf   :  { %v5367_v29 = vmul.f32 %v5294_v17, %v16483_v43 }
 0xbb0   :  { %9315 = vset.pattern.permute.xlu0 %v16473_v45 }
 0xbb1   :  { %9317 = vset.pattern.permute.xlu1 %v16477_v24  ;;  %5427 = vperm.xlu0 %9315, %v13784_v26   ;;  %v13800_v34 = vpop.permute.xlu2 %5591  ;;  %v5463_v13 = vadd.f32 %v5447_v8, %v5367_v29  ;;  %v16492_v29 = vld [vmem:[#allocation50_spill] sm:$0xff] }
 0xbb2   :  { %5619 = vperm.xlu1 %9317, %v13784_v26   ;;  %9309 = vset.pattern.permute.xlu2 %v16477_v24 }
 0xbb3   :  { %5611 = vperm.xlu2 %9309, %v13744_v51  }
 0xbb6   :  { %v5484_v60 = vpop.permute.xlu0 %5483 }
 0xbb7   :  { %v5488_v6 = vpop.permute.xlu1 %5487  ;;  %v5543_v62 = vmul.f32 %v5484_v60, %v16484_v3 }
 0xbb8   :  { %v5544_v32 = vmul.f32 %v5488_v6, %v16488_v28 }
 0xbb9   :  { %9326 = vset.pattern.permute.xlu0 %v16476_v4  ;;  %v5559_v41 = vadd.f32 %v5543_v62, %v5463_v13 }
 0xbba   :  { %9319 = vset.pattern.permute.xlu1 %v16473_v45  ;;  %5358 = vperm.xlu0 %9326, %v13810_v50   ;;  %v13822_v2 = vpop.permute.xlu2 %5403 }
 0xbbb   :  { %9311 = vset.pattern.permute.xlu2 %v16473_v45  ;;  %5431 = vperm.xlu1 %9319, %v13815_v0  }
 0xbbc   :  { %5423 = vperm.xlu2 %9311, %v13762_v14  }
 0xbbf   :  { %v5580_v9 = vpop.permute.xlu0 %5579 }
 0xbc0   :  { %v5639_v12 = vmul.f32 %v5580_v9, %v16485_v47  ;;  %v5396_v5 = vpop.permute.xlu1 %5395  ;;  %v16493_v9 = vld [vmem:[#allocation12_spill] sm:$0xff] }
 0xbc1   :  { %v5449_v8 = vmul.f32 %v5396_v5, %v16491_v7  ;;  %v5676_v5 = vsel %vm2044_vm5, %v13650_v58, 0.0  ;;  %v16495_v58 = vld [vmem:[#allocation59_spill] sm:$0xff] }
 0xbc2   :  { %v5655_v53 = vadd.f32 %v5639_v12, %v5559_v41  ;;  %9331 = vset.pattern.permute.xlu0 %v16473_v45 }
 0xbc3   :  { %9321 = vset.pattern.permute.xlu1 %v16477_v24  ;;  %5443 = vperm.xlu0 %9331, %v13834_v48   ;;  %v13839_v18 = vpop.permute.xlu2 %5499 }
 0xbc4   :  { %9313 = vset.pattern.permute.xlu2 %v16477_v24  ;;  %5623 = vperm.xlu1 %9321, %v13815_v0  }
 0xbc5   :  { %5615 = vperm.xlu2 %9313, %v13762_v14   ;;  %9046 = vmatmul.msk.f32.gmra.mxu1 %vm1053_vm6, %v5655_v53 }
 0xbc8   :  { %v5299_v39 = vpop.permute.xlu0 %5298 }
 0xbc9   :  { %v5368_v61 = vmul.f32 %v5299_v39, %v16486_v15  ;;  %v5685_v15 = vsel %vm2044_vm5, %v13685_v35, 0.0 }
 0xbca   :  { %v5492_v21 = vpop.permute.xlu1 %5491 }
 0xbcb   :  { %9334 = vset.pattern.permute.xlu0 %v16476_v4  ;;  %v5464_v22 = vadd.f32 %v5448_v56, %v5368_v61  ;;  %v5545_v3 = vmul.f32 %v5492_v21, %v16492_v29  ;;  %v5450_v61 = vmul.f32 %v13790_v37, %v16495_v58  ;;  %v16507_v58 = vld [vmem:[#allocation60_spill] sm:$0xff] }
 0xbcc   :  { %9323 = vset.pattern.permute.xlu1 %v16473_v45  ;;  %v13856_v25 = vpop.permute.xlu2 %5595 }
 0xbcd   :  { %9316 = vset.pattern.permute.xlu2 %v16475_v63  ;;  %5435 = vperm.xlu1 %9323, %v13850_v40   ;;  %v5560_v17 = vadd.f32 %v5544_v32, %v5464_v22  ;;  %v16497_v22 = vld [vmem:[#allocation52_spill] sm:$0xff] }
 0xbce   :  { %5523 = vperm.xlu2 %9316, %v13784_v26  }
 0xbd1   :  { %v5584_v36 = vpop.permute.xlu0 %5583 }
 0xbd2   :  { %v5640_v59 = vmul.f32 %v5584_v36, %v16489_v44  ;;  %v16498_v36 = vld [vmem:[#allocation49_spill] sm:$0xff]  ;;  %v16499_v44 = vld [vmem:[#allocation11_spill] sm:$0xff] }
 0xbd3   :  { %v5314_v30 = vpop.permute.xlu1 %5313 }
 0xbd4   :  { %v5656_v52 = vadd.f32 %v5640_v59, %v5560_v17  ;;  %v5371_v20 = vmul.f32 %v5314_v30, %v16496_v33  ;;  %v5642_v17 = vmul.f32 %v13800_v34, %v16498_v36  ;;  %v5451_v59 = vmul.f32 %v13822_v2, %v16499_v44 }
 0xbd5   :  { %9325 = vset.pattern.permute.xlu1 %v16477_v24  ;;  %v5673_v44 = vsel %vm2044_vm5, %v13639_v31, 0.0 }
 0xbd6   :  { %9318 = vset.pattern.permute.xlu2 %v16476_v4  ;;  %5627 = vperm.xlu1 %9325, %v13850_v40   ;;  %v13866_v23 = vpop.permute.xlu2 %5411 }
 0xbd7   :  { %5348 = vperm.xlu2 %9318, %v13815_v0   ;;  %9047 = vmatmul.msk.f32.gmra.mxu1 %vm1053_vm6, %v5656_v52  ;;  %v5467_v52 = vadd.f32 %v5451_v59, %v5371_v20 }
 0xbda   :  { %v5304_v6 = vpop.permute.xlu0 %5303 }
 0xbdb   :  { %v5319_v60 = vpop.permute.xlu1 %5318  ;;  %v5369_v16 = vmul.f32 %v5304_v6, %v16490_v11  ;;  %v5694_v6 = vsel %vm2044_vm5, %v13727_v38, 0.0  ;;  %v16500_v11 = vld [vmem:[#allocation54_spill] sm:$0xff] }
 0xbdd   :  { %v5465_v43 = vadd.f32 %v5449_v8, %v5369_v16  ;;  %v5547_v16 = vmul.f32 %v13839_v18, %v16500_v11  ;;  %v16501_v8 = vld [vmem:[#allocation53_spill] sm:$0xff]  ;;  %v5703_v18 = vsel %vm2044_vm5, %v13784_v26, 0.0 }
 0xbde   :  { %9328 = vset.pattern.permute.xlu1 %v16475_v63  ;;  %v16506_v26 = vld [vmem:[#allocation57_spill] sm:$0xff] }
 0xbdf   :  { %5535 = vperm.xlu1 %9328, %v13810_v50   ;;  %9320 = vset.pattern.permute.xlu2 %v16475_v63  ;;  %v13874_v27 = vpop.permute.xlu2 %5603  ;;  %v5561_v13 = vadd.f32 %v5545_v3, %v5465_v43  ;;  %v5563_v7 = vadd.f32 %v5547_v16, %v5467_v52  ;;  %v16502_v43 = vld [vmem:[#allocation56_spill] sm:$0xff]  ;;  %v16503_v3 = vld [vmem:[#allocation62_spill] sm:$0xff]  ;;  %v16513_v16 = vld [vmem:[#allocation27_spill] sm:$0xff] }
 0xbe0   :  { %5527 = vperm.xlu2 %9320, %v13815_v0  }
 0xbe4   :  { %v5408_v62 = vpop.permute.xlu1 %5407 }
 0xbe5   :  { %v5588_v57 = vpop.permute.xlu0 %5587  ;;  %v5452_v29 = vmul.f32 %v5408_v62, %v16502_v43  ;;  %v16515_v43 = vld [vmem:[#allocation20_spill] sm:$0xff] }
 0xbe6   :  { %v5641_v41 = vmul.f32 %v5588_v57, %v16493_v9  ;;  %v5372_v57 = vmul.f32 %v5319_v60, %v16503_v3  ;;  %v5712_v60 = vsel %vm2044_vm5, %v13810_v50, 0.0 }
 0xbe7   :  { %9330 = vset.pattern.permute.xlu1 %v16476_v4 }
 0xbe8   :  { %v5657_v47 = vadd.f32 %v5641_v41, %v5561_v13  ;;  %5363 = vperm.xlu1 %9330, %v13834_v48   ;;  %9322 = vset.pattern.permute.xlu2 %v16476_v4  ;;  %v13883_v12 = vpop.permute.xlu2 %5415  ;;  %v16504_v13 = vld [vmem:[#allocation58_spill] sm:$0xff] }
 0xbe9   :  { %5353 = vperm.xlu2 %9322, %v13850_v40  }
 0xbea   :  { %9048 = vmatmul.msk.f32.gmra.mxu1 %vm1053_vm6, %v5657_v47  ;;  %v5468_v47 = vadd.f32 %v5452_v29, %v5372_v57 }
 0xbed   :  { %5677 = vadd.xlane.f32.xlu0 %v5676_v5  ;;  %v5600_v54 = vpop.permute.xlu1 %5599 }
 0xbee   :  { %v5309_v53 = vpop.permute.xlu0 %5308 }
 0xbef   :  { %v5370_v39 = vmul.f32 %v5309_v53, %v16494_v49  ;;  %v16505_v53 = vld [vmem:[#allocation63_spill] sm:$0xff] }
 0xbf0   :  { %9333 = vset.pattern.permute.xlu1 %v16477_v24 }
 0xbf1   :  { %5635 = vperm.xlu1 %9333, %v13834_v48   ;;  %9324 = vset.pattern.permute.xlu2 %v16475_v63  ;;  %v5466_v56 = vadd.f32 %v5450_v61, %v5370_v39  ;;  %v5453_v61 = vmul.f32 %v13866_v23, %v16507_v58  ;;  %v16510_v23 = vld [vmem:[#allocation15_spill] sm:$0xff]  ;;  %v16522_v58 = vld [vmem:[#allocation17_spill] sm:$0xff] }
 0xbf2   :  { %5531 = vperm.xlu2 %9324, %v13850_v40   ;;  %v13893_v10 = vpop.permute.xlu2 %5607  ;;  %v5454_v59 = vmul.f32 %v13883_v12, %v16510_v23  ;;  %v5682_v12 = vsel %vm2044_vm5, %v13663_v1, 0.0 }
 0xbf5   :  { %5686 = vadd.xlane.f32.xlu0 %v5685_v15 }
 0xbf7   :  { %v5496_v21 = vpop.permute.xlu0 %5495 }
 0xbf8   :  { %v5546_v28 = vmul.f32 %v5496_v21, %v16497_v22  ;;  %v5512_v32 = vpop.permute.xlu1 %5511 }
 0xbf9   :  { %9336 = vset.pattern.permute.xlu1 %v16476_v4 }
 0xbfa   :  { %v5562_v35 = vadd.f32 %v5546_v28, %v5466_v56  ;;  %9327 = vset.pattern.permute.xlu2 %v16473_v45  ;;  %v5643_v45 = vmul.f32 %v13856_v25, %v16501_v8 }
 0xbfb   :  { %5439 = vperm.xlu2 %9327, %v13810_v50   ;;  %v5334_v37 = vpop.permute.xlu2 %5333 }
 0xbfc   :  { %v5658_v30 = vadd.f32 %v5642_v17, %v5562_v35  ;;  %v5659_v41 = vadd.f32 %v5643_v45, %v5563_v7  ;;  %v16511_v35 = vld [vmem:[#allocation13_spill] sm:$0xff]  ;;  %v5375_v29 = vmul.f32 %v5334_v37, %v16515_v43  ;;  %v16530_v43 = vld [vmem:[#allocation72_spill] sm:$0xff] }
 0xbfd   :  { %5695 = vadd.xlane.f32.xlu0 %v5694_v6  ;;  %v16512_v6 = vld [vmem:[#allocation31_spill] sm:$0xff] }
 0xbfe   :  { %9049 = vmatmul.msk.f32.gmra.mxu1 %vm1053_vm6, %v5658_v30 }
 0xbff   :  { %v5504_v34 = vpop.permute.xlu0 %5503 }
 0xc00   :  { %v5516_v2 = vpop.permute.xlu1 %5515  ;;  %v5548_v38 = vmul.f32 %v5504_v34, %v16504_v13  ;;  %v16514_v34 = vld [vmem:[#allocation22_spill] sm:$0xff] }
 0xc02   :  { %v5564_v25 = vadd.f32 %v5548_v38, %v5468_v47  ;;  %v16517_v38 = vld [vmem:[#allocation16_spill] sm:$0xff] }
 0xc03   :  { %9329 = vset.pattern.permute.xlu2 %v16477_v24  ;;  %v5644_v24 = vmul.f32 %v5600_v54, %v16505_v53  ;;  %v16508_v54 = vld [vmem:[#allocation61_spill] sm:$0xff]  ;;  %v5691_v53 = vsel %vm2044_vm5, %v13714_v42, 0.0  ;;  %v5700_v42 = vsel %vm2044_vm5, %v13762_v14, 0.0  ;;  %v5709_v14 = vsel %vm2044_vm5, %v13850_v40, 0.0 }
 0xc04   :  { %5631 = vperm.xlu2 %9329, %v13810_v50   ;;  %v5420_v9 = vpop.permute.xlu2 %5419  ;;  %v5688_v40 = vsel %vm2044_vm5, %v13697_v46, 0.0 }
 0xc05   :  { %5704 = vadd.xlane.f32.xlu0 %v5703_v18  ;;  %v5660_v49 = vadd.f32 %v5644_v24, %v5564_v25  ;;  %v5455_v7 = vmul.f32 %v5420_v9, %v16514_v34  ;;  %v16519_v25 = vld [vmem:[#allocation18_spill] sm:$0xff] }
 0xc06   :  { %9050 = vmatmul.msk.f32.gmra.mxu1 %vm1053_vm6, %v5659_v41  ;;  %v16518_v41 = vld [vmem:[#allocation19_spill] sm:$0xff] }
 0xc07   :  { %v5471_v3 = vadd.f32 %v5455_v7, %v5375_v29 }
 0xc08   :  { %v5324_v5 = vpop.permute.xlu0 %5323 }
 0xc09   :  { %v5339_v62 = vpop.permute.xlu1 %5338  ;;  %v5373_v15 = vmul.f32 %v5324_v5, %v16506_v26 }
 0xc0a   :  { %v5376_v5 = vmul.f32 %v5339_v62, %v16519_v25  ;;  %v5706_v25 = vsel %vm2044_vm5, %v13815_v0, 0.0 }
 0xc0b   :  { %v5469_v33 = vadd.f32 %v5453_v61, %v5373_v15 }
 0xc0c   :  { %9332 = vset.pattern.permute.xlu2 %v16475_v63  ;;  %v16509_v63 = vld [vmem:[#allocation64_spill] sm:$0xff] }
 0xc0d   :  { %5539 = vperm.xlu2 %9332, %v13834_v48   ;;  %v5612_v39 = vpop.permute.xlu2 %5611  ;;  %5713 = vadd.xlane.f32.xlu0 %v5712_v60  ;;  %v5645_v22 = vmul.f32 %v13874_v27, %v16509_v63  ;;  %v5550_v27 = vmul.f32 %v5512_v32, %v16512_v6  ;;  %v16516_v32 = vld [vmem:[#allocation4_spill] sm:$0xff] }
 0xc0e   :  { %9051 = vmatmul.msk.f32.gmra.mxu1 %vm1053_vm6, %v5660_v49  ;;  %v5551_v13 = vmul.f32 %v5516_v2, %v16516_v32  ;;  %v5647_v18 = vmul.f32 %v5612_v39, %v16517_v38  ;;  %v16520_v49 = vld [vmem:[#allocation6_spill] sm:$0xff]  ;;  %v5697_v38 = vsel %vm2044_vm5, %v13744_v51, 0.0 }
 0xc0f   :  { %v16521_v2 = vld [vmem:[#allocation66_spill] sm:$0xff] }
 0xc10   :  { %v16536_v51 = vld [vmem:[#allocation78_spill] sm:$0xff] }
 0xc11   :  { %v5508_v21 = vpop.permute.xlu0 %5507 }
 0xc12   :  { %v5549_v20 = vmul.f32 %v5508_v21, %v16508_v54  ;;  %v5520_v56 = vpop.permute.xlu1 %5519  ;;  %v16523_v21 = vld [vmem:[#allocation23_spill] sm:$0xff]  ;;  %v16524_v54 = vld [vmem:[#allocation65_spill] sm:$0xff] }
 0xc13   :  { %v5552_v60 = vmul.f32 %v5520_v56, %v16520_v49 }
 0xc14   :  { %v5565_v50 = vadd.f32 %v5549_v20, %v5469_v33 }
 0xc15   :  { %9335 = vset.pattern.permute.xlu2 %v16476_v4  ;;  %v5646_v4 = vmul.f32 %v13893_v10, %v16513_v16  ;;  %v5567_v10 = vadd.f32 %v5551_v13, %v5471_v3  ;;  %v5679_v16 = vsel %vm2044_vm5, %v13668_v19, 0.0  ;;  %v16532_v19 = vld [vmem:[#allocation74_spill] sm:$0xff] }
 0xc16   :  { %v5661_v28 = vadd.f32 %v5645_v22, %v5565_v50  ;;  %v5424_v36 = vpop.permute.xlu2 %5423  ;;  %v5670_v50 = vsel %vm2044_vm5, %v13630_v55, 0.0 }
 0xc17   :  { %v5456_v9 = vmul.f32 %v5424_v36, %v16518_v41  ;;  %v5663_v37 = vadd.f32 %v5647_v18, %v5567_v10  ;;  %v16525_v36 = vld [vmem:[#allocation67_spill] sm:$0xff] }
 0xc18   :  { %9052 = vmatmul.msk.f32.gmra.mxu1 %vm1053_vm6, %v5661_v28  ;;  %v16533_v18 = vld [vmem:[#allocation75_spill] sm:$0xff] }
 0xc19   :  { %v5472_v1 = vadd.f32 %v5456_v9, %v5376_v5 }
 0xc1a   :  { %v5329_v17 = vpop.permute.xlu0 %5328 }
 0xc1b   :  { %v5374_v52 = vmul.f32 %v5329_v17, %v16511_v35  ;;  %v5344_v30 = vpop.permute.xlu1 %5343  ;;  %5674 = vadd.xlane.f32.xlu1 %v5673_v44  ;;  %v5568_v15 = vadd.f32 %v5552_v60, %v5472_v1  ;;  %v16526_v44 = vld [vmem:[#allocation68_spill] sm:$0xff]  ;;  %v16527_v35 = vld [vmem:[#allocation69_spill] sm:$0xff] }
 0xc1c   :  { %v5377_v33 = vmul.f32 %v5344_v30, %v16523_v21  ;;  %v16535_v1 = vld [vmem:[#allocation76_spill] sm:$0xff] }
 0xc1d   :  { %v5470_v11 = vadd.f32 %v5454_v59, %v5374_v52 }
 0xc1f   :  { %v5566_v8 = vadd.f32 %v5550_v27, %v5470_v11  ;;  %v5616_v45 = vpop.permute.xlu2 %5615  ;;  %v16528_v27 = vld [vmem:[#allocation70_spill] sm:$0xff] }
 0xc20   :  { %v5648_v26 = vmul.f32 %v5616_v45, %v16521_v2 }
 0xc21   :  { %v5662_v31 = vadd.f32 %v5646_v4, %v5566_v8  ;;  %v16529_v4 = vld [vmem:[#allocation71_spill] sm:$0xff] }
 0xc22   :  { %v5664_v62 = vadd.f32 %v5648_v26, %v5568_v15  ;;  %v5715_v26 = vsel %vm2044_vm5, %v13834_v48, 0.0 }
 0xc23   :  { %5683 = vadd.xlane.f32.xlu1 %v5682_v12  ;;  %9053 = vmatmul.msk.f32.gmra.mxu1 %vm1053_vm6, %v5662_v31  ;;  %v5428_v24 = vpop.permute.xlu0 %5427  ;;  %v16531_v12 = vld [vmem:[#allocation73_spill] sm:$0xff] }
 0xc24   :  { %v5620_v57 = vpop.permute.xlu1 %5619  ;;  %v5457_v61 = vmul.f32 %v5428_v24, %v16522_v58  ;;  %v16537_v58 = vld [vmem:[#allocation79_spill] sm:$0xff] }
 0xc25   :  { %v5649_v17 = vmul.f32 %v5620_v57, %v16525_v36 }
 0xc26   :  { %v5473_v22 = vadd.f32 %v5457_v61, %v5377_v33  ;;  %v16538_v33 = vld [vmem:[#allocation80_spill] sm:$0xff] }
 0xc28   :  { %v5524_v47 = vpop.permute.xlu2 %5523 }
 0xc29   :  { %v5553_v20 = vmul.f32 %v5524_v47, %v16524_v54  ;;  %v16539_v54 = vld [vmem:[#allocation81_spill] sm:$0xff] }
 0xc2b   :  { %5692 = vadd.xlane.f32.xlu1 %v5691_v53  ;;  %9054 = vmatmul.msk.f32.gmra.mxu1 %vm1053_vm6, %v5663_v37  ;;  %v5569_v56 = vadd.f32 %v5553_v20, %v5473_v22  ;;  %v16534_v37 = vld [vmem:[#allocation77_spill] sm:$0xff] }
 0xc2c   :  { %v5359_v5 = vpop.permute.xlu0 %5358 }
 0xc2d   :  { %v5432_v39 = vpop.permute.xlu1 %5431  ;;  %v5665_v59 = vadd.f32 %v5649_v17, %v5569_v56  ;;  %v5380_v24 = vmul.f32 %v5359_v5, %v16535_v1  ;;  %v16540_v56 = vld [vmem:[#allocation82_spill] sm:$0xff] }
 0xc2e   :  { %v5458_v52 = vmul.f32 %v5432_v39, %v16527_v35  ;;  %v8961_v35 = vld [vmem:[%s15895_s17 + $0x68] sm:$0xff] }
 0xc31   :  { %v5349_v63 = vpop.permute.xlu2 %5348 }
 0xc32   :  { %v5378_v23 = vmul.f32 %v5349_v63, %v16526_v44  ;;  %v8963_v44 = vld [vmem:[%s15895_s17 + $0x78] sm:$0xff] }
 0xc33   :  { %5701 = vadd.xlane.f32.xlu1 %v5700_v42  ;;  %9055 = vmatmul.msk.f32.gmra.mxu1 %vm1053_vm6, %v5664_v62 }
 0xc34   :  { %v5474_v6 = vadd.f32 %v5458_v52, %v5378_v23  ;;  %6021 = vmatpush.msrb.mxu2 %v8963_v44  ;;  %v8962_v23 = vld [vmem:[%s15895_s17 + $0x70] sm:$0xff]  ;;  %v8960_v52 = vld [vmem:[%s15895_s17 + $0x60] sm:$0xff] }
 0xc35   :  { %v5444_v0 = vpop.permute.xlu0 %5443 }
 0xc36   :  { %v5624_v28 = vpop.permute.xlu1 %5623  ;;  %5671 = vadd.xlane.f32.xlu2 %v5670_v50  ;;  %v5461_v20 = vmul.f32 %v5444_v0, %v16539_v54  ;;  %6022 = vmatpush.msrb.mxu2 %v8962_v23 }
 0xc37   :  { %v5650_v34 = vmul.f32 %v5624_v28, %v16529_v4  ;;  %v16541_v28 = vld [vmem:[#allocation83_spill] sm:$0xff] }
 0xc38   :  { %6023 = vmatpush.msrb.mxu2 %v8961_v35  ;;  %v14029_v4 = vld [vmem:[%s16290_s0 + $0x1] ss:$0 sm:$0xff] }
 0xc3a   :  { %v5528_v30 = vpop.permute.xlu2 %5527  ;;  %6024 = vmatpush.msrb.mxu2 %v8960_v52 }
 0xc3b   :  { %v5554_v11 = vmul.f32 %v5528_v30, %v16528_v27  ;;  %5710 = vadd.xlane.f32.xlu1 %v5709_v14  ;;  %9056 = vmatmul.msk.f32.gmra.mxu1 %vm1053_vm6, %v5665_v59  ;;  %v5802_v59 = vpop.f32.mrf.mxu1  ;;  %v8959_v30 = vld [vmem:[%s15895_s17 + $0x58] sm:$0xff]  ;;  %v8958_v14 = vld [vmem:[%s15895_s17 + $0x50] sm:$0xff]  ;;  %v8957_v27 = vld [vmem:[%s15895_s17 + $0x48] sm:$0xff] }
 0xc3c   :  { %6025 = vmatpush.msrb.mxu2 %v8959_v30 }
 0xc3d   :  { %v5570_v55 = vadd.f32 %v5554_v11, %v5474_v6  ;;  %v8956_v11 = vld [vmem:[%s15895_s17 + $0x40] sm:$0xff] }
 0xc3e   :  { %5680 = vadd.xlane.f32.xlu2 %v5679_v16  ;;  %6026 = vmatpush.msrb.mxu2 %v8958_v14 }
 0xc3f   :  { %v5436_v7 = vpop.permute.xlu1 %5435  ;;  %v5666_v8 = vadd.f32 %v5650_v34, %v5570_v55 }
 0xc40   :  { %v5459_v3 = vmul.f32 %v5436_v7, %v16531_v12  ;;  %6027 = vmatpush.msrb.mxu2 %v8957_v27  ;;  %v16545_v27 = vld [vmem:[#allocation29_spill] sm:$0xff] }
 0xc42   :  { %6028 = vmatpush.msrb.mxu2 %v8956_v11 }
 0xc43   :  { %v5354_v45 = vpop.permute.xlu2 %5353  ;;  %9057 = vmatmul.msk.f32.gmra.mxu1 %vm1053_vm6, %v5666_v8  ;;  %v5805_v6 = vpop.f32.mrf.mxu1 }
 0xc44   :  { %v5379_v29 = vmul.f32 %v5354_v45, %v16530_v43 }
 0xc46   :  { %5689 = vadd.xlane.f32.xlu2 %v5688_v40  ;;  %v5475_v32 = vadd.f32 %v5459_v3, %v5379_v29 }
 0xc48   :  { %v5628_v31 = vpop.permute.xlu1 %5627 }
 0xc49   :  { %v5651_v10 = vmul.f32 %v5628_v31, %v16533_v18 }
 0xc4c   :  { %v5532_v57 = vpop.permute.xlu2 %5531 }
 0xc4d   :  { %v5555_v13 = vmul.f32 %v5532_v57, %v16532_v19 }
 0xc4e   :  { %5698 = vadd.xlane.f32.xlu2 %v5697_v38 }
 0xc4f   :  { %v5571_v41 = vadd.f32 %v5555_v13, %v5475_v32 }
 0xc51   :  { %v5667_v9 = vadd.f32 %v5651_v10, %v5571_v41  ;;  %v5536_v47 = vpop.permute.xlu1 %5535 }
 0xc52   :  { %v5556_v60 = vmul.f32 %v5536_v47, %v16536_v51 }
 0xc53   :  { %9058 = vmatmul.msk.f32.gmra.mxu1 %vm1053_vm6, %v5667_v9 }
 0xc54   :  { %v5808_v55 = vpop.f32.mrf.mxu1 }
 0xc55   :  { %v5440_v46 = vpop.permute.xlu2 %5439 }
 0xc56   :  { %5707 = vadd.xlane.f32.xlu2 %v5706_v25  ;;  %v5460_v53 = vmul.f32 %v5440_v46, %v16534_v37 }
 0xc58   :  { %v5476_v49 = vadd.f32 %v5460_v53, %v5380_v24 }
 0xc5a   :  { %v5364_v2 = vpop.permute.xlu1 %5363  ;;  %v5572_v15 = vadd.f32 %v5556_v60, %v5476_v49  ;;  %v16542_v49 = vld [vmem:[#allocation9_spill] sm:$0xff] }
 0xc5b   :  { %v5381_v62 = vmul.f32 %v5364_v2, %v16538_v33 }
 0xc5d   :  { %v5477_v22 = vadd.f32 %v5461_v20, %v5381_v62 }
 0xc5e   :  { %5716 = vadd.xlane.f32.xlu2 %v5715_v26  ;;  %v5632_v39 = vpop.permute.xlu2 %5631 }
 0xc5f   :  { %v5652_v61 = vmul.f32 %v5632_v39, %v16537_v58 }
 0xc60   :  { %v5678_v7 = vpop.xlane.xlu0 %5677 }
 0xc61   :  { %v5668_v21 = vadd.f32 %v5652_v61, %v5572_v15  ;;  %v5723_v29 = vmul.f32 %v14029_v4, %v5678_v7 }
 0xc63   :  { %9059 = vmatmul.msk.f32.gmra.mxu1 %vm1053_vm6, %v5668_v21  ;;  %v5636_v63 = vpop.permute.xlu1 %5635  ;;  %v5809_v57 = vadd.f32 %v5808_v55, %v5723_v29  ;;  %v16543_v21 = vld [vmem:[#allocation43_spill] sm:$0xff]  ;;  %v16546_v29 = vld [vmem:[#allocation34_spill] sm:$0xff] }
 0xc64   :  { %v5653_v48 = vmul.f32 %v5636_v63, %v16541_v28 }
 0xc65   :  { %v5868_v18 = vmin.f32 %v5809_v57, 0.0  ;;  %vm5852_vm7 = vcmp.gt.f32.partialorder %v5809_v57, 0.0 }
 0xc67   :  { %v5540_v42 = vpop.permute.xlu2 %5539  ;;  %v5811_v45 = vpop.f32.mrf.mxu1  ;;  %v5886_v9 = vmul.f32 1.442695, %v5868_v18 }
 0xc68   :  { %v5557_v50 = vmul.f32 %v5540_v42, %v16540_v56  ;;  %v5687_v58 = vpop.xlane.xlu0 %5686 }
 0xc69   :  { %v5726_v54 = vmul.f32 %v14029_v4, %v5687_v58 }
 0xc6a   :  { %v5573_v36 = vadd.f32 %v5557_v50, %v5477_v22 }
 0xc6c   :  { %v5669_v17 = vadd.f32 %v5653_v48, %v5573_v36  ;;  %v16544_v48 = vld [vmem:[#allocation39_spill] sm:$0xff] }
 0xc6e   :  { %9060 = vmatmul.msk.f32.gmra.mxu1 %vm1053_vm6, %v5669_v17 }
 0xc7b   :  { %v5814_v13 = vpop.f32.mrf.mxu1 }
 0xc83   :  { %v5817_v37 = vpop.f32.mrf.mxu1 }
 0xc84   :  { %v5818_v20 = vadd.f32 %v5817_v37, %v5726_v54 }
 0xc86   :  { %v5871_v50 = vmin.f32 %v5818_v20, 0.0  ;;  %vm5855_vm9 = vcmp.gt.f32.partialorder %v5818_v20, 0.0 }
 0xc88   :  { %v5892_v23 = vmul.f32 1.442695, %v5871_v50 }
 0xc8b   :  { %v5820_v33 = vpop.f32.mrf.mxu1 }
 0xc8e   :  { %v5675_v16 = vpop.xlane.xlu1 %5674 }
 0xc8f   :  { %v5722_v34 = vmul.f32 %v14029_v4, %v5675_v16 }
 0xc91   :  { %v5806_v8 = vadd.f32 %v5805_v6, %v5722_v34 }
 0xc93   :  { %v5867_v31 = vmin.f32 %v5806_v8, 0.0  ;;  %vm5851_vm4 = vcmp.gt.f32.partialorder %v5806_v8, 0.0 }
 0xc95   :  { %v5884_v32 = vmul.f32 1.442695, %v5867_v31  ;;  %v5823_v17 = vpop.f32.mrf.mxu1 }
 0xc96   :  { %v5684_v46 = vpop.xlane.xlu1 %5683 }
 0xc97   :  { %v5725_v1 = vmul.f32 %v14029_v4, %v5684_v46 }
 0xc99   :  { %v5815_v2 = vadd.f32 %v5814_v13, %v5725_v1 }
 0xc9b   :  { %v5870_v61 = vmin.f32 %v5815_v2, 0.0  ;;  %vm5854_vm2 = vcmp.gt.f32.partialorder %v5815_v2, 0.0 }
 0xc9d   :  { %v5890_v63 = vmul.f32 1.442695, %v5870_v61 }
 0xc9e   :  { %v5693_v35 = vpop.xlane.xlu1 %5692 }
 0xc9f   :  { %v5728_v14 = vmul.f32 %v14029_v4, %v5693_v35 }
 0xca0   :  { %v5826_v55 = vpop.f32.mrf.mxu1 }
 0xca1   :  { %v5824_v34 = vadd.f32 %v5823_v17, %v5728_v14 }
 0xca3   :  { %vm5857_vm10 = vcmp.gt.f32.partialorder %v5824_v34, 0.0 }
 0xca9   :  { %v5672_v40 = vpop.xlane.xlu2 %5671 }
 0xcaa   :  { %v5721_v43 = vmul.f32 %v14029_v4, %v5672_v40  ;;  %v5696_v40 = vpop.xlane.xlu0 %5695 }
 0xcac   :  { %v5803_v12 = vadd.f32 %v5802_v59, %v5721_v43  ;;  %v5873_v43 = vmin.f32 %v5824_v34, 0.0 }
 0xcae   :  { %v5866_v3 = vmin.f32 %v5803_v12, 0.0  ;;  %vm5850_vm5 = vcmp.gt.f32.partialorder %v5803_v12, 0.0 }
 0xcb0   :  { %v5882_v19 = vmul.f32 1.442695, %v5866_v3  ;;  %v5729_v3 = vmul.f32 %v14029_v4, %v5696_v40 }
 0xcb1   :  { %v5681_v38 = vpop.xlane.xlu2 %5680 }
 0xcb2   :  { %9725 = vpow2.f32 %v5882_v19  ;;  %v5724_v10 = vmul.f32 %v14029_v4, %v5681_v38  ;;  %v5827_v19 = vadd.f32 %v5826_v55, %v5729_v3 }
 0xcb3   :  { %9727 = vpow2.f32 %v5884_v32  ;;  %v5896_v32 = vmul.f32 1.442695, %v5873_v43 }
 0xcb4   :  { %v5812_v47 = vadd.f32 %v5811_v45, %v5724_v10  ;;  %9729 = vpow2.f32 %v5886_v9  ;;  %v5874_v10 = vmin.f32 %v5827_v19, 0.0  ;;  %v16547_v9 = vld [vmem:[#allocation8_spill] sm:$0xff]  ;;  %vm5858_vm13 = vcmp.gt.f32.partialorder %v5827_v19, 0.0 }
 0xcb6   :  { %v5869_v24 = vmin.f32 %v5812_v47, 0.0  ;;  %vm5853_vm8 = vcmp.gt.f32.partialorder %v5812_v47, 0.0 }
 0xcb8   :  { %v9726_v41 = vpop.eup %9725  ;;  %v5888_v26 = vmul.f32 1.442695, %v5869_v24  ;;  %v5702_v24 = vpop.xlane.xlu1 %5701 }
 0xcb9   :  { %v9061_v25 = vadd.f32 -1.0, %v9726_v41  ;;  %v9728_v5 = vpop.eup %9727  ;;  %v5690_v42 = vpop.xlane.xlu2 %5689 }
 0xcba   :  { %v9062_v60 = vadd.f32 -1.0, %v9728_v5  ;;  %v9730_v15 = vpop.eup %9729  ;;  %9731 = vpow2.f32 %v5888_v26  ;;  %v5727_v28 = vmul.f32 %v14029_v4, %v5690_v42 }
 0xcbb   :  { %v5930_v53 = vsel %vm5850_vm5, %v5803_v12, %v9061_v25  ;;  %v9063_v62 = vadd.f32 -1.0, %v9730_v15  ;;  %9733 = vpow2.f32 %v5890_v63  ;;  %v5898_v25 = vmul.f32 1.442695, %v5874_v10 }
 0xcbc   :  { %v5946_v51 = vsel %vm1053_vm6, %v5930_v53, %v16542_v49  ;;  %v5931_v39 = vsel %vm5851_vm4, %v5806_v8, %v9062_v60  ;;  %v5821_v59 = vadd.f32 %v5820_v33, %v5727_v28  ;;  %9735 = vpow2.f32 %v5892_v23  ;;  %v16548_v60 = vld [vmem:[#allocation32_spill] sm:$0xff]  ;;  %v5705_v33 = vpop.xlane.xlu0 %5704 }
 0xcbd   :  { %9077 = vmatmul.msk.f32.vlgmr.msrb.gmra.mxu2 %vm2964_vm11, %v5946_v51  ;;  %v5947_v0 = vsel %vm1053_vm6, %v5931_v39, %v16543_v21  ;;  %v5932_v22 = vsel %vm5852_vm7, %v5809_v57, %v9063_v62  ;;  %v5829_v57 = vpop.f32.mrf.mxu1  ;;  %v5731_v39 = vmul.f32 %v14029_v4, %v5702_v24 }
 0xcbe   :  { %v5948_v36 = vsel %vm1053_vm6, %v5932_v22, %v16544_v48  ;;  %v5872_v6 = vmin.f32 %v5821_v59, 0.0  ;;  %vm5856_vm12 = vcmp.gt.f32.partialorder %v5821_v59, 0.0  ;;  %v5732_v22 = vmul.f32 %v14029_v4, %v5705_v33  ;;  %v16554_v33 = vld [vmem:[#allocation21_spill] sm:$0xff] }
 0xcc0   :  { %v9732_v56 = vpop.eup %9731  ;;  %v5894_v7 = vmul.f32 1.442695, %v5872_v6 }
 0xcc1   :  { %v9064_v44 = vadd.f32 -1.0, %v9732_v56  ;;  %v9734_v30 = vpop.eup %9733  ;;  %v5699_v13 = vpop.xlane.xlu2 %5698 }
 0xcc2   :  { %v9065_v16 = vadd.f32 -1.0, %v9734_v30  ;;  %v9736_v45 = vpop.eup %9735  ;;  %9737 = vpow2.f32 %v5894_v7  ;;  %v5730_v41 = vmul.f32 %v14029_v4, %v5699_v13  ;;  %v16551_v7 = vld [vmem:[#allocation28_spill] sm:$0xff]  ;;  %v16552_v13 = vld [vmem:[#allocation5_spill] sm:$0xff] }
 0xcc3   :  { %v5933_v52 = vsel %vm5853_vm8, %v5812_v47, %v9064_v44  ;;  %v9066_v12 = vadd.f32 -1.0, %v9736_v45  ;;  %9739 = vpow2.f32 %v5896_v32 }
 0xcc4   :  { %v5949_v11 = vsel %vm1053_vm6, %v5933_v52, %v16545_v27  ;;  %v5934_v8 = vsel %vm5854_vm2, %v5815_v2, %v9065_v16  ;;  %v5830_v5 = vadd.f32 %v5829_v57, %v5730_v41  ;;  %9741 = vpow2.f32 %v5898_v25  ;;  %v5711_v16 = vpop.xlane.xlu1 %5710  ;;  %v5714_v32 = vpop.xlane.xlu0 %5713 }
 0xcc5   :  { %9078 = vmatmul.msk.f32.gmra.mxu2 %vm2964_vm11, %v5947_v0  ;;  %v5950_v31 = vsel %vm1053_vm6, %v5934_v8, %v16546_v29  ;;  %v5935_v38 = vsel %vm5855_vm9, %v5818_v20, %v9066_v12  ;;  %v5832_v37 = vpop.f32.mrf.mxu1  ;;  %v16549_v20 = vld [vmem:[#allocation30_spill] sm:$0xff]  ;;  %v5734_v43 = vmul.f32 %v14029_v4, %v5711_v16  ;;  %v5735_v41 = vmul.f32 %v14029_v4, %v5714_v32 }
 0xcc6   :  { %v5951_v47 = vsel %vm1053_vm6, %v5935_v38, %v16547_v9  ;;  %v5875_v51 = vmin.f32 %v5830_v5, 0.0  ;;  %v5833_v15 = vadd.f32 %v5832_v37, %v5731_v39  ;;  %vm5859_vm3 = vcmp.gt.f32.partialorder %v5830_v5, 0.0 }
 0xcc8   :  { %v9738_v18 = vpop.eup %9737  ;;  %v5900_v58 = vmul.f32 1.442695, %v5875_v51  ;;  %v5876_v54 = vmin.f32 %v5833_v15, 0.0  ;;  %vm5860_vm15 = vcmp.gt.f32.partialorder %v5833_v15, 0.0 }
 0xcc9   :  { %v9067_v46 = vadd.f32 -1.0, %v9738_v18  ;;  %v9740_v1 = vpop.eup %9739  ;;  %v5708_v28 = vpop.xlane.xlu2 %5707 }
 0xcca   :  { %v9068_v26 = vadd.f32 -1.0, %v9740_v1  ;;  %v9742_v0 = vpop.eup %9741  ;;  %9743 = vpow2.f32 %v5900_v58  ;;  %v5902_v56 = vmul.f32 1.442695, %v5876_v54  ;;  %v5733_v23 = vmul.f32 %v14029_v4, %v5708_v28  ;;  %v16553_v1 = vld [vmem:[#allocation24_spill] sm:$0xff] }
 0xccb   :  { %v5936_v53 = vsel %vm5856_vm12, %v5821_v59, %v9067_v46  ;;  %v9069_v42 = vadd.f32 -1.0, %v9742_v0  ;;  %v16550_v59 = vld [vmem:[#allocation7_spill] sm:$0xff] }
 0xccc   :  { %v5952_v2 = vsel %vm1053_vm6, %v5936_v53, %v16548_v60  ;;  %v5937_v61 = vsel %vm5857_vm10, %v5824_v34, %v9068_v26  ;;  %9745 = vpow2.f32 %v5902_v56  ;;  %v16555_v56 = vld [vmem:[#allocation25_spill] sm:$0xff] }
 0xccd   :  { %9079 = vmatmul.msk.f32.gmra.mxu2 %vm2964_vm11, %v5948_v36  ;;  %v5835_v62 = vpop.f32.mrf.mxu1  ;;  %v5953_v63 = vsel %vm1053_vm6, %v5937_v61, %v16549_v20  ;;  %v5938_v36 = vsel %vm5858_vm13, %v5827_v19, %v9069_v42 }
 0xcce   :  { %v5836_v50 = vadd.f32 %v5835_v62, %v5732_v22  ;;  %v5954_v35 = vsel %vm1053_vm6, %v5938_v36, %v16550_v59 }
 0xcd0   :  { %v9744_v17 = vpop.eup %9743  ;;  %v5877_v44 = vmin.f32 %v5836_v50, 0.0  ;;  %vm5861_vm0 = vcmp.gt.f32.partialorder %v5836_v50, 0.0 }
 0xcd1   :  { %v9070_v30 = vadd.f32 -1.0, %v9744_v17  ;;  %v5717_v37 = vpop.xlane.xlu2 %5716  ;;  %v16556_v17 = vld [vmem:[#allocation26_spill] sm:$0xff] }
 0xcd2   :  { %v5904_v14 = vmul.f32 1.442695, %v5877_v44  ;;  %v9746_v55 = vpop.eup %9745  ;;  %v5736_v26 = vmul.f32 %v14029_v4, %v5717_v37 }
 0xcd3   :  { %v9071_v45 = vadd.f32 -1.0, %v9746_v55 }
 0xcd4   :  { %9747 = vpow2.f32 %v5904_v14 }
 0xcd5   :  { %9080 = vmatmul.msk.f32.gmra.mxu2 %vm2964_vm11, %v5949_v11  ;;  %v5838_v52 = vpop.f32.mrf.mxu1  ;;  %v5939_v11 = vsel %vm5859_vm3, %v5830_v5, %v9070_v30  ;;  %v5940_v3 = vsel %vm5860_vm15, %v5833_v15, %v9071_v45 }
 0xcd6   :  { %v5839_v6 = vadd.f32 %v5838_v52, %v5733_v23  ;;  %v5955_v8 = vsel %vm1053_vm6, %v5939_v11, %v16551_v7  ;;  %v5956_v38 = vsel %vm1053_vm6, %v5940_v3, %v16552_v13  ;;  %v16557_v52 = vld [vmem:[#allocation35_spill] sm:$0xff] }
 0xcd8   :  { %v5878_v34 = vmin.f32 %v5839_v6, 0.0  ;;  %vm5862_vm5 = vcmp.gt.f32.partialorder %v5839_v6, 0.0 }
 0xcda   :  { %v9748_v57 = vpop.eup %9747 }
 0xcdb   :  { %v9072_v18 = vadd.f32 -1.0, %v9748_v57 }
 0xcdd   :  { %9081 = vmatmul.msk.f32.gmra.mxu2 %vm2964_vm11, %v5950_v31  ;;  %v5841_v40 = vpop.f32.mrf.mxu1  ;;  %v5906_v31 = vmul.f32 1.442695, %v5878_v34  ;;  %v5941_v25 = vsel %vm5861_vm0, %v5836_v50, %v9072_v18 }
 0xcde   :  { %v5842_v12 = vadd.f32 %v5841_v40, %v5734_v43  ;;  %v5957_v24 = vsel %vm1053_vm6, %v5941_v25, %v16553_v1 }
 0xcdf   :  { %9749 = vpow2.f32 %v5906_v31 }
 0xce0   :  { %v5879_v19 = vmin.f32 %v5842_v12, 0.0  ;;  %vm5863_vm4 = vcmp.gt.f32.partialorder %v5842_v12, 0.0 }
 0xce5   :  { %9082 = vmatmul.msk.f32.gmra.mxu2 %vm2964_vm11, %v5951_v47  ;;  %v5844_v10 = vpop.f32.mrf.mxu1  ;;  %v5908_v47 = vmul.f32 1.442695, %v5879_v19  ;;  %v9750_v5 = vpop.eup %9749 }
 0xce6   :  { %v5845_v46 = vadd.f32 %v5844_v10, %v5735_v41 }
 0xce7   :  { %9751 = vpow2.f32 %v5908_v47 }
 0xce8   :  { %v5880_v53 = vmin.f32 %v5845_v46, 0.0  ;;  %vm5864_vm7 = vcmp.gt.f32.partialorder %v5845_v46, 0.0 }
 0xcea   :  { %v5910_v39 = vmul.f32 1.442695, %v5880_v53 }
 0xcec   :  { %9753 = vpow2.f32 %v5910_v39 }
 0xced   :  { %9083 = vmatmul.msk.f32.gmra.mxu2 %vm2964_vm11, %v5952_v2  ;;  %v5847_v51 = vpop.f32.mrf.mxu1  ;;  %v9073_v2 = vadd.f32 -1.0, %v9750_v5  ;;  %v9752_v61 = vpop.eup %9751 }
 0xcee   :  { %v5848_v15 = vadd.f32 %v5847_v51, %v5736_v26  ;;  %v9074_v54 = vadd.f32 -1.0, %v9752_v61 }
 0xcef   :  { %v5942_v58 = vsel %vm5862_vm5, %v5839_v6, %v9073_v2  ;;  %v14100_v6 = vld [vmem:[%s15896_s18 + $0x1] ss:$0 sm:$0xff]  ;;  %s16559_s18 = smov 64  }
 0xcf0   :  { %v5881_v0 = vmin.f32 %v5848_v15, 0.0  ;;  %v5958_v62 = vsel %vm1053_vm6, %v5942_v58, %v16554_v33  ;;  %v5943_v42 = vsel %vm5863_vm4, %v5842_v12, %v9074_v54  ;;  %vm5865_vm8 = vcmp.gt.f32.partialorder %v5848_v15, 0.0 }
 0xcf1   :  { %v5959_v4 = vsel %vm1053_vm6, %v5943_v42, %v16555_v56 }
 0xcf2   :  { %v9754_v22 = vpop.eup %9753 }
 0xcf3   :  { %v9075_v50 = vadd.f32 -1.0, %v9754_v22 }
 0xcf5   :  { %9084 = vmatmul.msk.f32.gmra.mxu2 %vm2964_vm11, %v5953_v63  ;;  %v5912_v63 = vmul.f32 1.442695, %v5881_v0  ;;  %v5944_v28 = vsel %vm5864_vm7, %v5845_v46, %v9075_v50 }
 0xcf6   :  { %v5960_v44 = vsel %vm1053_vm6, %v5944_v28, %v16556_v17 }
 0xcf7   :  { %9755 = vpow2.f32 %v5912_v63 }
 0xcfd   :  { %9085 = vmatmul.msk.f32.gmra.mxu2 %vm2964_vm11, %v5954_v35  ;;  %v9756_v36 = vpop.eup %9755 }
 0xcfe   :  { %v9076_v23 = vadd.f32 -1.0, %v9756_v36 }
 0xd00   :  { %v5945_v35 = vsel %vm5865_vm8, %v5848_v15, %v9076_v23 }
 0xd01   :  { %v5961_v30 = vsel %vm1053_vm6, %v5945_v35, %v16557_v52 }
 0xd05   :  { %9086 = vmatmul.msk.f32.gmra.mxu2 %vm2964_vm11, %v5955_v8 }
 0xd0d   :  { %9087 = vmatmul.msk.f32.gmra.mxu2 %vm2964_vm11, %v5956_v38 }
 0xd15   :  { %9088 = vmatmul.msk.f32.gmra.mxu2 %vm2964_vm11, %v5957_v24 }
 0xd1d   :  { %9089 = vmatmul.msk.f32.gmra.mxu2 %vm2964_vm11, %v5958_v62 }
 0xd25   :  { %9090 = vmatmul.msk.f32.gmra.mxu2 %vm2964_vm11, %v5959_v4 }
 0xd2d   :  { %9091 = vmatmul.msk.f32.gmra.mxu2 %vm2964_vm11, %v5960_v44 }
 0xd35   :  { %9092 = vmatmul.msk.f32.gmra.mxu2 %vm2964_vm11, %v5961_v30 }
 0xd40   :  { %v14095_v14 = vpop.f32.mrf.mxu2 }
 0xd48   :  { %v6033_v11 = vpop.f32.mrf.mxu2 }
 0xd49   :  { %v14103_v55 = vadd.f32 %v14100_v6, %v6033_v11 }
 0xd4b   :  { %6400 = vrot.lane.b32.xlu2 %v14103_v55, %s16558_s15  ;;  %v9094_v25 = vmul.f32 -1.442695, %v14103_v55 }
 0xd4d   :  { %9757 = vpow2.f32 %v9094_v25 }
 0xd50   :  { %v6036_v16 = vpop.f32.mrf.mxu2 }
 0xd51   :  { %v14108_v34 = vadd.f32 %v14100_v6, %v6036_v16 }
 0xd53   :  { %6402 = vrot.lane.b32.xlu1 %v14108_v34, %s16558_s15  ;;  %v9095_v5 = vmul.f32 -1.442695, %v14108_v34  ;;  %v9758_v51 = vpop.eup %9757 }
 0xd54   :  { %v6127_v2 = vadd.f32 1.0, %v9758_v51 }
 0xd55   :  { %9759 = vpow2.f32 %v9095_v5 }
 0xd56   :  { %vm6162_vm9 = vweird.f32 %v6127_v2  ;;  %v6166_v25 = vand.u32 2147483647, %v6127_v2 }
 0xd58   :  { %v6039_v8 = vpop.f32.mrf.mxu2  ;;  %vm6167_vm13 = vcmp.eq.f32.partialorder %v6166_v25, 8.507059e+37 }
 0xd59   :  { %v14113_v45 = vadd.f32 %v14100_v6, %v6039_v8 }
 0xd5b   :  { %6404 = vrot.lane.b32.xlu0 %v14113_v45, %s16558_s15  ;;  %v9760_v15 = vpop.eup %9759 }
 0xd5c   :  { %v14165_v61 = vadd.f32 1.0, %v9760_v15 }
 0xd5e   :  { %vm6177_vm3 = vweird.f32 %v14165_v61 }
 0xd60   :  { %v6042_v40 = vpop.f32.mrf.mxu2 }
 0xd61   :  { %v14118_v43 = vadd.f32 %v14100_v6, %v6042_v40 }
 0xd63   :  { %6406 = vrot.lane.b32.xlu2 %v14118_v43, %s16558_s15  ;;  %v9097_v24 = vmul.f32 -1.442695, %v14118_v43 }
 0xd65   :  { %9761 = vpow2.f32 %v9097_v24 }
 0xd66   :  { %9763 = vrcp.f32 %v6127_v2 }
 0xd67   :  { %9765 = vrcp.f32 %v14165_v61 }
 0xd68   :  { %v6045_v31 = vpop.f32.mrf.mxu2 }
 0xd69   :  { %v14123_v12 = vadd.f32 %v14100_v6, %v6045_v31  ;;  %v14192_v31 = vadd.f32 %v14100_v6, %v14095_v14 }
 0xd6b   :  { %6408 = vrot.lane.b32.xlu1 %v14123_v12, %s16558_s15  ;;  %v9762_v58 = vpop.eup %9761  ;;  %v9098_v50 = vmul.f32 -1.442695, %v14123_v12 }
 0xd6c   :  { %v14167_v0 = vadd.f32 1.0, %v9762_v58  ;;  %v9764_v42 = vpop.eup %9763  ;;  %v6183_v58 = vand.u32 2147483648, %v14165_v61 }
 0xd6d   :  { %v6158_v22 = vmul.f32 %v9764_v42, %v6127_v2  ;;  %v9766_v4 = vpop.eup %9765  ;;  %vm6163_vm2 = vweird.f32 %v9764_v42 }
 0xd6e   :  { %9767 = vrcp.f32 %v14167_v0  ;;  %v6173_v30 = vmul.f32 %v9766_v4, %v14165_v61  ;;  %vm6164_vm12 = vmor %vm6162_vm9, %vm6163_vm2  ;;  %vm6178_vm10 = vweird.f32 %v9766_v4  ;;  %vm6207_vm5 = vweird.f32 %v14167_v0 }
 0xd6f   :  { %v6159_v44 = vsub.f32 1.0, %v6158_v22  ;;  %vm6179_vm0 = vmor %vm6177_vm3, %vm6178_vm10 }
 0xd70   :  { %v6048_v3 = vpop.f32.mrf.mxu2  ;;  %v6174_v40 = vsub.f32 1.0, %v6173_v30 }
 0xd71   :  { %v14128_v57 = vadd.f32 %v14100_v6, %v6048_v3  ;;  %v6160_v16 = vmul.f32 %v9764_v42, %v6159_v44 }
 0xd73   :  { %6410 = vrot.lane.b32.xlu0 %v14128_v57, %s16558_s15  ;;  %v6161_v3 = vadd.f32 %v9764_v42, %v6160_v16 }
 0xd74   :  { %v14178_v36 = vpop.eup %9767 }
 0xd75   :  { %v6203_v8 = vmul.f32 %v14178_v36, %v14167_v0  ;;  %vm6208_vm15 = vweird.f32 %v14178_v36 }
 0xd76   :  { %vm6209_vm4 = vmor %vm6207_vm5, %vm6208_vm15 }
 0xd78   :  { %v6051_v32 = vpop.f32.mrf.mxu2 }
 0xd79   :  { %v14133_v19 = vadd.f32 %v14100_v6, %v6051_v32  ;;  %v6204_v32 = vsub.f32 1.0, %v6203_v8 }
 0xd7b   :  { %6412 = vrot.lane.b32.xlu2 %v14133_v19, %s16558_s15  ;;  %v9100_v62 = vmul.f32 -1.442695, %v14133_v19  ;;  %v6205_v14 = vmul.f32 %v14178_v36, %v6204_v32 }
 0xd7d   :  { %9769 = vpow2.f32 %v9100_v62  ;;  %v6206_v22 = vadd.f32 %v14178_v36, %v6205_v14 }
 0xd7e   :  { %9771 = vpow2.f32 %v9098_v50  ;;  %v6213_v50 = vand.u32 2147483648, %v14167_v0 }
 0xd7f   :  { %v6210_v30 = vsel %vm6209_vm4, %v14178_v36, %v6206_v22 }
 0xd80   :  { %v6054_v38 = vpop.f32.mrf.mxu2 }
 0xd81   :  { %v14138_v18 = vadd.f32 %v14100_v6, %v6054_v38 }
 0xd83   :  { %6414 = vrot.lane.b32.xlu1 %v14138_v18, %s16558_s15  ;;  %v9770_v35 = vpop.eup %9769 }
 0xd84   :  { %v14186_v11 = vadd.f32 1.0, %v9770_v35  ;;  %v9772_v38 = vpop.eup %9771  ;;  %v6211_v35 = vand.u32 2147483647, %v14167_v0  ;;  %v9101_v0 = vmul.f32 -1.442695, %v14138_v18 }
 0xd85   :  { %v14197_v5 = vadd.f32 1.0, %v9772_v38 }
 0xd86   :  { %9773 = vrcp.f32 %v14186_v11  ;;  %vm6212_vm8 = vcmp.eq.f32.partialorder %v6211_v35, 8.507059e+37  ;;  %vm6252_vm9 = vweird.f32 %v14186_v11 }
 0xd87   :  { %9775 = vrcp.f32 %v14197_v5  ;;  %vm6222_vm3 = vweird.f32 %v14197_v5 }
 0xd88   :  { %v6057_v10 = vpop.f32.mrf.mxu2 }
 0xd89   :  { %v14143_v41 = vadd.f32 %v14100_v6, %v6057_v10  ;;  %v6168_v10 = vand.u32 2147483648, %v6127_v2 }
 0xd8b   :  { %6416 = vrot.lane.b32.xlu0 %v14143_v41, %s16558_s15  ;;  %v6169_v24 = vor.u32 1.1754944e-38, %v6168_v10 }
 0xd8c   :  { %v9774_v15 = vpop.eup %9773 }
 0xd8d   :  { %v6248_v44 = vmul.f32 %v9774_v15, %v14186_v11  ;;  %v9776_v38 = vpop.eup %9775  ;;  %vm6253_vm2 = vweird.f32 %v9774_v15 }
 0xd8f   :  { %v6249_v32 = vsub.f32 1.0, %v6248_v44 }
 0xd90   :  { %v6060_v47 = vpop.f32.mrf.mxu2 }
 0xd91   :  { %v14148_v46 = vadd.f32 %v14100_v6, %v6060_v47  ;;  %v6175_v47 = vmul.f32 %v9766_v4, %v6174_v40  ;;  %v6214_v40 = vor.u32 1.1754944e-38, %v6213_v50  ;;  %v6250_v36 = vmul.f32 %v9774_v15, %v6249_v32 }
 0xd93   :  { %6418 = vrot.lane.b32.xlu2 %v14148_v46, %s16558_s15  ;;  %v9103_v62 = vmul.f32 -1.442695, %v14148_v46  ;;  %v14220_v10 = vsel %vm6212_vm8, %v6214_v40, %v6210_v30 }
 0xd95   :  { %9777 = vpow2.f32 %v9103_v62 }
 0xd96   :  { %9779 = vpow2.f32 %v9101_v0 }
 0xd98   :  { %v6063_v37 = vpop.f32.mrf.mxu2 }
 0xd99   :  { %v14155_v53 = vadd.f32 %v14100_v6, %v6063_v37  ;;  %v6165_v37 = vsel %vm6164_vm12, %v9764_v42, %v6161_v3  ;;  %vm6254_vm12 = vmor %vm6252_vm9, %vm6253_vm2 }
 0xd9a   :  { %v14202_v2 = vsel %vm6167_vm13, %v6169_v24, %v6165_v37  ;;  %v6218_v37 = vmul.f32 %v9776_v38, %v14197_v5  ;;  %v6251_v24 = vadd.f32 %v9774_v15, %v6250_v36  ;;  %vm6223_vm13 = vweird.f32 %v9776_v38 }
 0xd9b   :  { %6420 = vrot.lane.b32.xlu1 %v14155_v53, %s16558_s15  ;;  %v9778_v25 = vpop.eup %9777  ;;  %vm6224_vm15 = vmor %vm6222_vm3, %vm6223_vm13 }
 0xd9c   :  { %v6136_v14 = vadd.f32 1.0, %v9778_v25  ;;  %v9780_v62 = vpop.eup %9779 }
 0xd9d   :  { %v6134_v50 = vadd.f32 1.0, %v9780_v62 }
 0xd9e   :  { %9781 = vrcp.f32 %v6136_v14  ;;  %v6303_v62 = vand.u32 2147483648, %v6136_v14  ;;  %vm6297_vm4 = vweird.f32 %v6136_v14 }
 0xd9f   :  { %9783 = vrcp.f32 %v6134_v50  ;;  %vm6267_vm9 = vweird.f32 %v6134_v50 }
 0xda0   :  { %v6066_v26 = vpop.f32.mrf.mxu2 }
 0xda1   :  { %v14161_v39 = vadd.f32 %v14100_v6, %v6066_v26  ;;  %v6176_v26 = vadd.f32 %v9766_v4, %v6175_v47 }
 0xda3   :  { %6422 = vrot.lane.b32.xlu0 %v14161_v39, %s16558_s15 }
 0xda4   :  { %v9782_v30 = vpop.eup %9781 }
 0xda5   :  { %v6401_v51 = vpop.permute.xlu2 %6400  ;;  %v9784_v36 = vpop.eup %9783  ;;  %vm6298_vm5 = vweird.f32 %v9782_v30 }
 0xda6   :  { %v6447_v42 = vmul.f32 %v6401_v51, %v14202_v2  ;;  %v6219_v51 = vsub.f32 1.0, %v6218_v37  ;;  %v9104_v37 = vmul.f32 -1.442695, %v14155_v53  ;;  %vm6268_vm2 = vweird.f32 %v9784_v36 }
 0xda8   :  { %v6069_v54 = vpop.f32.mrf.mxu2 }
 0xda9   :  { %v14172_v63 = vadd.f32 %v14100_v6, %v6069_v54  ;;  %v6181_v54 = vand.u32 2147483647, %v14165_v61  ;;  %v6184_v61 = vor.u32 1.1754944e-38, %v6183_v58  ;;  %v6256_v58 = vand.u32 2147483647, %v14186_v11 }
 0xdab   :  { %6424 = vrot.lane.b32.xlu2 %v14172_v63, %s16558_s15  ;;  %vm6182_vm7 = vcmp.eq.f32.partialorder %v6181_v54, 8.507059e+37  ;;  %v6255_v54 = vsel %vm6254_vm12, %v9774_v15, %v6251_v24  ;;  %vm6257_vm10 = vcmp.eq.f32.partialorder %v6256_v58, 8.507059e+37  ;;  %v6226_v15 = vand.u32 2147483647, %v14197_v5  ;;  %vm6269_vm12 = vmor %vm6267_vm9, %vm6268_vm2 }
 0xdb0   :  { %v6072_v28 = vpop.f32.mrf.mxu2 }
 0xdb1   :  { %v14181_v23 = vadd.f32 %v14100_v6, %v6072_v28  ;;  %v6180_v28 = vsel %vm6179_vm0, %v9766_v4, %v6176_v26  ;;  %v6258_v26 = vand.u32 2147483648, %v14186_v11  ;;  %v9106_v11 = vmul.f32 -1.442695, %v14172_v63 }
 0xdb2   :  { %v14216_v8 = vsel %vm6182_vm7, %v6184_v61, %v6180_v28  ;;  %vm6227_vm0 = vcmp.eq.f32.partialorder %v6226_v15, 8.507059e+37  ;;  %vm6299_vm7 = vmor %vm6297_vm4, %vm6298_vm5 }
 0xdb3   :  { %6426 = vrot.lane.b32.xlu0 %v14181_v23, %s16558_s15  ;;  %16560 = vst [vmem:[#allocation33_spill] sm:$0xff] %v14216_v8  ;;  %v6259_v22 = vor.u32 1.1754944e-38, %v6258_v26  ;;  %9785 = vpow2.f32 %v9106_v11 }
 0xdb4   :  { %9787 = vpow2.f32 %v9104_v37 }
 0xdb5   :  { %v14229_v28 = vsel %vm6257_vm10, %v6259_v22, %v6255_v54  ;;  %v6301_v54 = vand.u32 2147483647, %v6136_v14 }
 0xdb7   :  { %vm6302_vm8 = vcmp.eq.f32.partialorder %v6301_v54, 8.507059e+37 }
 0xdb9   :  { %v9786_v24 = vpop.eup %9785 }
 0xdbb   :  { %6398 = vrot.lane.b32.xlu0 %v14192_v31, %s16558_s15 }
 0xdbd   :  { %v6407_v3 = vpop.permute.xlu2 %6406 }
 0xdbe   :  { %v6450_v47 = vmul.f32 %v6407_v3, %v14220_v10  ;;  %v6293_v3 = vmul.f32 %v9782_v30, %v6136_v14  ;;  %v6271_v14 = vand.u32 2147483647, %v6134_v50 }
 0xdc0   :  { %v6294_v25 = vsub.f32 1.0, %v6293_v3  ;;  %vm6272_vm10 = vcmp.eq.f32.partialorder %v6271_v14, 8.507059e+37 }
 0xdc3   :  { %6480 = vrot.lane.b32.xlu0 %v6447_v42, %s16559_s18  ;;  %v6220_v42 = vmul.f32 %v9776_v38, %v6219_v51  ;;  %v6263_v51 = vmul.f32 %v9784_v36, %v6134_v50 }
 0xdc5   :  { %v6403_v16 = vpop.permute.xlu1 %6402  ;;  %v6221_v61 = vadd.f32 %v9776_v38, %v6220_v42  ;;  %v6264_v58 = vsub.f32 1.0, %v6263_v51  ;;  %v9788_v42 = vpop.eup %9787 }
 0xdc6   :  { %v6448_v4 = vmul.f32 %v6403_v16, %v14216_v8  ;;  %v6228_v16 = vand.u32 2147483648, %v14197_v5  ;;  %v6295_v5 = vmul.f32 %v9782_v30, %v6294_v25 }
 0xdc7   :  { %v6225_v40 = vsel %vm6224_vm15, %v9776_v38, %v6221_v61  ;;  %v6139_v38 = vadd.f32 1.0, %v9786_v24  ;;  %v6137_v61 = vadd.f32 1.0, %v9788_v42  ;;  %v9093_v42 = vmul.f32 -1.442695, %v14192_v31 }
 0xdc8   :  { %6482 = vrot.lane.b32.xlu2 %v6448_v4, %s16559_s18  ;;  %v6229_v4 = vor.u32 1.1754944e-38, %v6228_v16  ;;  %v6296_v26 = vadd.f32 %v9782_v30, %v6295_v5 }
 0xdc9   :  { %9789 = vrcp.f32 %v6139_v38  ;;  %v6348_v54 = vand.u32 2147483648, %v6139_v38  ;;  %vm6342_vm3 = vweird.f32 %v6139_v38  ;;  %vm6312_vm4 = vweird.f32 %v6137_v61 }
 0xdca   :  { %v14237_v0 = vsel %vm6227_vm0, %v6229_v4, %v6225_v40  ;;  %v6300_v22 = vsel %vm6299_vm7, %v9782_v30, %v6296_v26  ;;  %v6273_v4 = vand.u32 2147483648, %v6134_v50  ;;  %9791 = vrcp.f32 %v6137_v61 }
 0xdcb   :  { %6486 = vrot.lane.b32.xlu0 %v6450_v47, %s16559_s18  ;;  %16561 = vst [vmem:[#allocation36_spill] sm:$0xff] %v14237_v0  ;;  %v9107_v26 = vmul.f32 -1.442695, %v14181_v23 }
 0xdcd   :  { %9793 = vpow2.f32 %v9107_v26 }
 0xdce   :  { %9795 = vpow2.f32 %v9093_v42  ;;  %v9096_v42 = vmul.f32 -1.442695, %v14113_v45 }
 0xdcf   :  { %v9790_v3 = vpop.eup %9789 }
 0xdd0   :  { %v9792_v51 = vpop.eup %9791  ;;  %vm6343_vm13 = vweird.f32 %v9790_v3 }
 0xdd1   :  { %vm6344_vm15 = vmor %vm6342_vm3, %vm6343_vm13  ;;  %vm6313_vm5 = vweird.f32 %v9792_v51 }
 0xdd2   :  { %vm6314_vm7 = vmor %vm6312_vm4, %vm6313_vm5 }
 0xdd5   :  { %v6413_v44 = vpop.permute.xlu2 %6412 }
 0xdd6   :  { %v6453_v35 = vmul.f32 %v6413_v44, %v14229_v28  ;;  %v6265_v44 = vmul.f32 %v9784_v36, %v6264_v58 }
 0xdd8   :  { %6492 = vrot.lane.b32.xlu0 %v6453_v35, %s16559_s18  ;;  %v6304_v35 = vor.u32 1.1754944e-38, %v6303_v62  ;;  %v6266_v40 = vadd.f32 %v9784_v36, %v6265_v44  ;;  %v6308_v62 = vmul.f32 %v9792_v51, %v6137_v61  ;;  %v9794_v44 = vpop.eup %9793 }
 0xdda   :  { %v14242_v16 = vsel %vm6302_vm8, %v6304_v35, %v6300_v22  ;;  %v6270_v30 = vsel %vm6269_vm12, %v9784_v36, %v6266_v40  ;;  %v6309_v36 = vsub.f32 1.0, %v6308_v62  ;;  %v6346_v22 = vand.u32 2147483647, %v6139_v38 }
 0xddb   :  { %v6140_v40 = vadd.f32 1.0, %v9794_v44 }
 0xddc   :  { %vm6347_vm0 = vcmp.eq.f32.partialorder %v6346_v22, 8.507059e+37  ;;  %v6716_v22 = vld [vmem:[%s15898_s5 + $0x70] sm:$0xff] }
 0xddd   :  { %v6409_v32 = vpop.permute.xlu1 %6408  ;;  %9797 = vrcp.f32 %v6140_v40  ;;  %vm6357_vm9 = vweird.f32 %v6140_v40 }
 0xdde   :  { %v6451_v47 = vmul.f32 %v6409_v32, %v14237_v0  ;;  %v6338_v32 = vmul.f32 %v9790_v3, %v6139_v38  ;;  %v6316_v38 = vand.u32 2147483647, %v6137_v61 }
 0xde0   :  { %6488 = vrot.lane.b32.xlu2 %v6451_v47, %s16559_s18  ;;  %v6274_v47 = vor.u32 1.1754944e-38, %v6273_v4  ;;  %v6339_v5 = vsub.f32 1.0, %v6338_v32  ;;  %v14252_v4 = vpop.permute.xlu0 %6404  ;;  %vm6317_vm8 = vcmp.eq.f32.partialorder %v6316_v38, 8.507059e+37 }
 0xde2   :  { %v14246_v37 = vsel %vm6272_vm10, %v6274_v47, %v6270_v30  ;;  %v6340_v58 = vmul.f32 %v9790_v3, %v6339_v5 }
 0xde4   :  { %v6341_v50 = vadd.f32 %v9790_v3, %v6340_v58 }
 0xde6   :  { %v6345_v35 = vsel %vm6344_vm15, %v9790_v3, %v6341_v50  ;;  %v9796_v3 = vpop.eup %9795 }
 0xde7   :  { %v14258_v26 = vadd.f32 1.0, %v9796_v3 }
 0xde8   :  { %v14260_v58 = vpop.permute.xlu0 %6410 }
 0xde9   :  { %9799 = vrcp.f32 %v14258_v26  ;;  %v6153_v48 = vand.u32 2147483648, %v14258_v26  ;;  %vm6147_vm3 = vweird.f32 %v14258_v26 }
 0xdea   :  { %9801 = vpow2.f32 %v9096_v42  ;;  %v6713_v42 = vld [vmem:[%s15898_s5 + $0x58] sm:$0xff] }
 0xded   :  { %v6419_v11 = vpop.permute.xlu2 %6418 }
 0xdee   :  { %v6456_v15 = vmul.f32 %v6419_v11, %v14242_v16  ;;  %v6310_v11 = vmul.f32 %v9792_v51, %v6309_v36 }
 0xdf0   :  { %6498 = vrot.lane.b32.xlu0 %v6456_v15, %s16559_s18  ;;  %v6349_v15 = vor.u32 1.1754944e-38, %v6348_v54  ;;  %v6311_v47 = vadd.f32 %v9792_v51, %v6310_v11  ;;  %v9798_v54 = vpop.eup %9797  ;;  %v9099_v11 = vmul.f32 -1.442695, %v14128_v57 }
 0xdf1   :  { %vm6358_vm2 = vweird.f32 %v9798_v54 }
 0xdf2   :  { %v14254_v14 = vsel %vm6347_vm0, %v6349_v15, %v6345_v35  ;;  %v9800_v35 = vpop.eup %9799  ;;  %v6717_v15 = vld [vmem:[%s15898_s5 + $0x78] sm:$0xff]  ;;  %9803 = vpow2.f32 %v9099_v11  ;;  %vm6359_vm12 = vmor %vm6357_vm9, %vm6358_vm2 }
 0xdf3   :  { %vm6148_vm13 = vweird.f32 %v9800_v35 }
 0xdf4   :  { %vm6149_vm15 = vmor %vm6147_vm3, %vm6148_vm13 }
 0xdf5   :  { %v6415_v25 = vpop.permute.xlu1 %6414 }
 0xdf6   :  { %v6454_v24 = vmul.f32 %v6415_v25, %v14246_v37  ;;  %v6318_v25 = vand.u32 2147483648, %v6137_v61  ;;  %v6353_v61 = vmul.f32 %v9798_v54, %v6140_v40 }
 0xdf8   :  { %6494 = vrot.lane.b32.xlu2 %v6454_v24, %s16559_s18  ;;  %v6315_v24 = vsel %vm6314_vm7, %v9792_v51, %v6311_v47  ;;  %v6319_v5 = vor.u32 1.1754944e-38, %v6318_v25  ;;  %v6354_v44 = vsub.f32 1.0, %v6353_v61  ;;  %v6143_v47 = vmul.f32 %v9800_v35, %v14258_v26 }
 0xdfa   :  { %v14262_v50 = vsel %vm6317_vm8, %v6319_v5, %v6315_v24  ;;  %v6144_v24 = vsub.f32 1.0, %v6143_v47  ;;  %v6363_v5 = vand.u32 2147483648, %v6140_v40 }
 0xdfc   :  { %v6364_v11 = vor.u32 1.1754944e-38, %v6363_v5 }
 0xdfd   :  { %v14268_v51 = vpop.permute.xlu0 %6416 }
 0xe05   :  { %v6425_v30 = vpop.permute.xlu2 %6424 }
 0xe06   :  { %v6459_v32 = vmul.f32 %v6425_v30, %v14254_v14  ;;  %v9802_v30 = vpop.eup %9801 }
 0xe07   :  { %v14278_v25 = vadd.f32 1.0, %v9802_v30  ;;  %v9804_v61 = vpop.eup %9803 }
 0xe08   :  { %6504 = vrot.lane.b32.xlu0 %v6459_v32, %s16559_s18  ;;  %v6355_v32 = vmul.f32 %v9798_v54, %v6354_v44  ;;  %v6145_v44 = vmul.f32 %v9800_v35, %v6144_v24 }
 0xe09   :  { %9805 = vrcp.f32 %v14278_v25  ;;  %vm6192_vm4 = vweird.f32 %v14278_v25 }
 0xe0a   :  { %v6356_v3 = vadd.f32 %v9798_v54, %v6355_v32  ;;  %v6146_v47 = vadd.f32 %v9800_v35, %v6145_v44  ;;  %v6715_v44 = vld [vmem:[%s15898_s5 + $0x68] sm:$0xff] }
 0xe0c   :  { %v6150_v5 = vsel %vm6149_vm15, %v9800_v35, %v6146_v47 }
 0xe0d   :  { %v6421_v62 = vpop.permute.xlu1 %6420 }
 0xe0e   :  { %v6457_v36 = vmul.f32 %v6421_v62, %v14262_v50  ;;  %v9102_v62 = vmul.f32 -1.442695, %v14143_v41 }
 0xe0f   :  { %v9806_v27 = vpop.eup %9805 }
 0xe10   :  { %6500 = vrot.lane.b32.xlu2 %v6457_v36, %s16559_s18  ;;  %6844 = vperm.xlu0 %9334, %v6717_v15   ;;  %v6361_v36 = vand.u32 2147483647, %v6140_v40  ;;  %9807 = vpow2.f32 %v9102_v62  ;;  %v14287_v15 = vadd.f32 1.0, %v9804_v61  ;;  %v6188_v24 = vmul.f32 %v9806_v27, %v14278_v25  ;;  %v6710_v62 = vld [vmem:[%s15898_s5 + $0x40] sm:$0xff] }
 0xe11   :  { %vm6193_vm5 = vweird.f32 %v9806_v27 }
 0xe12   :  { %vm6362_vm10 = vcmp.eq.f32.partialorder %v6361_v36, 8.507059e+37  ;;  %9809 = vrcp.f32 %v14287_v15  ;;  %v6154_v36 = vor.u32 1.1754944e-38, %v6153_v48  ;;  %vm6194_vm7 = vmor %vm6192_vm4, %vm6193_vm5  ;;  %vm6237_vm9 = vweird.f32 %v14287_v15 }
 0xe15   :  { %v14280_v38 = vpop.permute.xlu0 %6422 }
 0xe18   :  { %6839 = vperm.xlu2 %9335, %v6716_v22   ;;  %6824 = vperm.xlu0 %9334, %v6713_v42   ;;  %v6360_v22 = vsel %vm6359_vm12, %v9798_v54, %v6356_v3  ;;  %v9105_v42 = vmul.f32 -1.442695, %v14161_v39  ;;  %v6151_v54 = vand.u32 2147483647, %v14258_v26  ;;  %v9808_v3 = vpop.eup %9807 }
 0xe19   :  { %v14289_v30 = vsel %vm6362_vm10, %v6364_v11, %v6360_v22  ;;  %v14302_v61 = vadd.f32 1.0, %v9808_v3  ;;  %v6189_v11 = vsub.f32 1.0, %v6188_v24  ;;  %v6712_v24 = vld [vmem:[%s15898_s5 + $0x50] sm:$0xff] }
 0xe1a   :  { %9811 = vpow2.f32 %v9105_v42  ;;  %vm6152_vm0 = vcmp.eq.f32.partialorder %v6151_v54, 8.507059e+37  ;;  %v6075_v54 = vpop.f32.mrf.mxu2 }
 0xe1b   :  { %v14304_v22 = vsel %vm6152_vm0, %v6154_v36, %v6150_v5  ;;  %9813 = vrcp.f32 %v14302_v61  ;;  %v14321_v5 = vadd.f32 %v14100_v6, %v6075_v54  ;;  %vm6282_vm3 = vweird.f32 %v14302_v61 }
 0xe20   :  { %6809 = vperm.xlu0 %9334, %v6710_v62  }
 0xe22   :  { %v14313_v42 = vpop.permute.xlu2 %6482 }
 0xe25   :  { %v6427_v32 = vpop.permute.xlu0 %6426 }
 0xe26   :  { %v6460_v40 = vmul.f32 %v6427_v32, %v14289_v30  ;;  %v9810_v32 = vpop.eup %9809 }
 0xe27   :  { %v9812_v48 = vpop.eup %9811  ;;  %v6233_v47 = vmul.f32 %v9810_v32, %v14287_v15  ;;  %vm6238_vm2 = vweird.f32 %v9810_v32 }
 0xe28   :  { %6506 = vrot.lane.b32.xlu2 %v6460_v40, %s16559_s18  ;;  %v6190_v40 = vmul.f32 %v9806_v27, %v6189_v11  ;;  %v14315_v3 = vadd.f32 1.0, %v9812_v48  ;;  %v6196_v11 = vand.u32 2147483647, %v14278_v25  ;;  %vm6239_vm12 = vmor %vm6237_vm9, %vm6238_vm2 }
 0xe29   :  { %v6234_v36 = vsub.f32 1.0, %v6233_v47 }
 0xe2a   :  { %v6191_v62 = vadd.f32 %v9806_v27, %v6190_v40  ;;  %9815 = vrcp.f32 %v14315_v3  ;;  %vm6197_vm8 = vcmp.eq.f32.partialorder %v6196_v11, 8.507059e+37  ;;  %vm6327_vm4 = vweird.f32 %v14315_v3 }
 0xe2b   :  { %v6235_v6 = vmul.f32 %v9810_v32, %v6234_v36 }
 0xe2d   :  { %v6399_v26 = vpop.permute.xlu0 %6398  ;;  %v6236_v9 = vadd.f32 %v9810_v32, %v6235_v6 }
 0xe2e   :  { %v6446_v35 = vmul.f32 %v6399_v26, %v14304_v22  ;;  %v9814_v26 = vpop.eup %9813 }
 0xe2f   :  { %v6278_v48 = vmul.f32 %v9814_v26, %v14302_v61  ;;  %vm6283_vm13 = vweird.f32 %v9814_v26 }
 0xe30   :  { %6478 = vrot.lane.b32.xlu1 %v6446_v35, %s16559_s18  ;;  %6834 = vperm.xlu2 %9335, %v6715_v44   ;;  %v6198_v44 = vand.u32 2147483648, %v14278_v25  ;;  %v6195_v35 = vsel %vm6194_vm7, %v9806_v27, %v6191_v62  ;;  %v9816_v0 = vpop.eup %9815  ;;  %v6243_v27 = vand.u32 2147483648, %v14287_v15  ;;  %v6241_v62 = vand.u32 2147483647, %v14287_v15  ;;  %vm6284_vm15 = vmor %vm6282_vm3, %vm6283_vm13 }
 0xe31   :  { %vm6328_vm5 = vweird.f32 %v9816_v0 }
 0xe32   :  { %v6199_v47 = vor.u32 1.1754944e-38, %v6198_v44  ;;  %v6323_v44 = vmul.f32 %v9816_v0, %v14315_v3  ;;  %vm6242_vm10 = vcmp.eq.f32.partialorder %v6241_v62, 8.507059e+37  ;;  %vm6329_vm7 = vmor %vm6327_vm4, %vm6328_vm5 }
 0xe34   :  { %v14331_v8 = vsel %vm6197_vm8, %v6199_v47, %v6195_v35  ;;  %v6244_v35 = vor.u32 1.1754944e-38, %v6243_v27  ;;  %v6324_v15 = vsub.f32 1.0, %v6323_v44  ;;  %v6333_v27 = vand.u32 2147483648, %v14315_v3 }
 0xe35   :  { %v6449_v25 = vmul.f32 %v14252_v4, %v14331_v8 }
 0xe36   :  { %v6325_v47 = vmul.f32 %v9816_v0, %v6324_v15 }
 0xe38   :  { %6428 = vrot.lane.b32.xlu1 %v14321_v5, %s16558_s15  ;;  %6819 = vperm.xlu2 %9335, %v6712_v24   ;;  %v6279_v24 = vsub.f32 1.0, %v6278_v48 }
 0xe3a   :  { %v6489_v40 = vpop.permute.xlu2 %6488  ;;  %v6280_v36 = vmul.f32 %v9814_v26, %v6279_v24  ;;  %v6326_v24 = vadd.f32 %v9816_v0, %v6325_v47 }
 0xe3b   :  { %v6531_v54 = vadd.f32 %v6489_v40, %v14123_v12  ;;  %v6240_v12 = vsel %vm6239_vm12, %v9810_v32, %v6236_v9  ;;  %v6288_v40 = vand.u32 2147483648, %v14302_v61  ;;  %v6286_v9 = vand.u32 2147483647, %v14302_v61 }
 0xe3c   :  { %v14341_v4 = vsel %vm6242_vm10, %v6244_v35, %v6240_v12  ;;  %v6281_v48 = vadd.f32 %v9814_v26, %v6280_v36  ;;  %v6331_v61 = vand.u32 2147483647, %v14315_v3  ;;  %v6334_v12 = vor.u32 1.1754944e-38, %v6333_v27 }
 0xe3d   :  { %9817 = vtanh.f32 %v6531_v54  ;;  %v6452_v6 = vmul.f32 %v14260_v58, %v14341_v4  ;;  %v6289_v54 = vor.u32 1.1754944e-38, %v6288_v40  ;;  %vm6287_vm0 = vcmp.eq.f32.partialorder %v6286_v9, 8.507059e+37 }
 0xe3e   :  { %v6285_v32 = vsel %vm6284_vm15, %v9814_v26, %v6281_v48  ;;  %v6330_v26 = vsel %vm6329_vm7, %v9816_v0, %v6326_v24  ;;  %vm6332_vm8 = vcmp.eq.f32.partialorder %v6331_v61, 8.507059e+37  ;;  %v9108_v3 = vmul.f32 -1.442695, %v14321_v5  ;;  %v6481_v61 = vpop.permute.xlu0 %6480 }
 0xe3f   :  { %v14358_v44 = vsel %vm6332_vm8, %v6334_v12, %v6330_v26 }
 0xe40   :  { %6484 = vrot.lane.b32.xlu1 %v6449_v25, %s16559_s18  ;;  %v14349_v25 = vsel %vm6287_vm0, %v6289_v54, %v6285_v32 }
 0xe41   :  { %v6455_v58 = vmul.f32 %v14268_v51, %v14349_v25  ;;  %v6458_v51 = vmul.f32 %v14280_v38, %v14358_v44 }
 0xe43   :  { %v9818_v11 = vpop.eup %9817 }
 0xe44   :  { %6600 = vrot.lane.b32.xlu2 %v9818_v11, %s16562_s29 }
 0xe48   :  { %6490 = vrot.lane.b32.xlu1 %v6452_v6, %s16559_s18 }
 0xe50   :  { %6496 = vrot.lane.b32.xlu1 %v6455_v58, %s16559_s18 }
 0xe52   :  { %v6495_v62 = vpop.permute.xlu2 %6494 }
 0xe53   :  { %v6534_v36 = vadd.f32 %v6495_v62, %v14138_v18  ;;  %v14374_v62 = vld [vmem:[%s15898_s5 + $0x60] sm:$0xff] }
 0xe55   :  { %9819 = vtanh.f32 %v6534_v36  ;;  %v6487_v36 = vpop.permute.xlu0 %6486 }
 0xe56   :  { %9821 = vpow2.f32 %v9108_v3  ;;  %v14381_v3 = vld [vmem:[%s15898_s5 + $0x48] sm:$0xff] }
 0xe58   :  { %6502 = vrot.lane.b32.xlu1 %v6458_v51, %s16559_s18  ;;  %v6530_v51 = vadd.f32 %v6487_v36, %v14118_v43 }
 0xe5b   :  { %v9820_v11 = vpop.eup %9819 }
 0xe5c   :  { %6606 = vrot.lane.b32.xlu2 %v9820_v11, %s16562_s29  ;;  %v9822_v0 = vpop.eup %9821 }
 0xe5d   :  { %v6141_v35 = vadd.f32 1.0, %v9822_v0 }
 0xe5f   :  { %9823 = vrcp.f32 %v6141_v35  ;;  %v6378_v38 = vand.u32 2147483648, %v6141_v35  ;;  %vm6372_vm9 = vweird.f32 %v6141_v35  ;;  %v6376_v32 = vand.u32 2147483647, %v6141_v35 }
 0xe61   :  { %v6379_v54 = vor.u32 1.1754944e-38, %v6378_v38  ;;  %vm6377_vm10 = vcmp.eq.f32.partialorder %v6376_v32, 8.507059e+37 }
 0xe65   :  { %v9824_v6 = vpop.eup %9823 }
 0xe66   :  { %v6368_v18 = vmul.f32 %v9824_v6, %v6141_v35  ;;  %vm6373_vm2 = vweird.f32 %v9824_v6 }
 0xe67   :  { %vm6374_vm12 = vmor %vm6372_vm9, %vm6373_vm2 }
 0xe68   :  { %v6369_v48 = vsub.f32 1.0, %v6368_v18 }
 0xe6a   :  { %v6370_v15 = vmul.f32 %v9824_v6, %v6369_v48  ;;  %v6501_v12 = vpop.permute.xlu2 %6500 }
 0xe6c   :  { %v6371_v9 = vadd.f32 %v9824_v6, %v6370_v15 }
 0xe6e   :  { %v6375_v47 = vsel %vm6374_vm12, %v9824_v6, %v6371_v9  ;;  %v6493_v6 = vpop.permute.xlu0 %6492 }
 0xe6f   :  { %v14367_v24 = vsel %vm6377_vm10, %v6379_v54, %v6375_v47  ;;  %v6533_v18 = vadd.f32 %v6493_v6, %v14133_v19 }
 0xe72   :  { %v14383_v0 = vpop.permute.xlu2 %6839 }
 0xe82   :  { %v6507_v38 = vpop.permute.xlu2 %6506 }
 0xe83   :  { %v6540_v32 = vadd.f32 %v6507_v38, %v14181_v23 }
 0xe8a   :  { %v6835_v38 = vpop.permute.xlu2 %6834 }
 0xea2   :  { %v14365_v40 = vpop.permute.xlu1 %6478 }
 0xeaa   :  { %v6429_v58 = vpop.permute.xlu1 %6428 }
 0xeab   :  { %v6461_v27 = vmul.f32 %v6429_v58, %v14367_v24 }
 0xead   :  { %6508 = vrot.lane.b32.xlu1 %v6461_v27, %s16559_s18 }
 0xeb2   :  { %v6485_v26 = vpop.permute.xlu1 %6484 }
 0xeb5   :  { %6829 = vperm.xlu1 %9336, %v14374_v62  }
 0xeba   :  { %v6491_v11 = vpop.permute.xlu1 %6490 }
 0xebb   :  { %v6532_v35 = vadd.f32 %v6491_v11, %v14128_v57  ;;  %v6499_v57 = vpop.permute.xlu0 %6498 }
 0xebc   :  { %v6536_v47 = vadd.f32 %v6499_v57, %v14148_v46  ;;  %v6528_v57 = vadd.f32 %v14313_v42, %v14108_v34  ;;  %v6658_v34 = vmul.f32 %v14220_v10, %v16546_v29 }
 0xebd   :  { %9825 = vtanh.f32 %v6532_v35  ;;  %6814 = vperm.xlu1 %9336, %v14381_v3  }
 0xebe   :  { %9827 = vtanh.f32 %v6530_v51  ;;  %v6537_v51 = vadd.f32 %v6501_v12, %v14155_v53  ;;  %v14409_v53 = vld [vmem:[%s15898_s5 + $0x28] sm:$0xff]  ;;  %v14417_v12 = vld [vmem:[%s15898_s5 + $0x30] sm:$0xff] }
 0xebf   :  { %vm6723_vm7 = vcmp.eq.f32.partialorder %v14409_v53, 0.0  ;;  %vm6724_vm12 = vcmp.eq.f32.partialorder %v14417_v12, 0.0 }
 0xec2   :  { %v6497_v48 = vpop.permute.xlu1 %6496 }
 0xec3   :  { %v9826_v15 = vpop.eup %9825  ;;  %v6535_v43 = vadd.f32 %v6497_v48, %v14143_v41  ;;  %v6529_v41 = vadd.f32 %v6485_v26, %v14113_v45  ;;  %v6505_v46 = vpop.permute.xlu0 %6504  ;;  %v6526_v45 = vadd.f32 %v14365_v40, %v14192_v31  ;;  %v14424_v31 = vld [vmem:[%s15898_s5 + $0x8] sm:$0xff] }
 0xec4   :  { %v9828_v9 = vpop.eup %9827  ;;  %6602 = vrot.lane.b32.xlu0 %v9826_v15, %s16562_s29  ;;  %vm6719_vm5 = vcmp.eq.f32.partialorder %v14424_v31, 0.0 }
 0xec5   :  { %9829 = vtanh.f32 %v6535_v43  ;;  %6598 = vrot.lane.b32.xlu1 %v9828_v9, %s16562_s29 }
 0xec6   :  { %9831 = vtanh.f32 %v6533_v18 }
 0xec7   :  { %9833 = vtanh.f32 %v6540_v32  ;;  %v14447_v32 = vld [vmem:[%s15898_s5 + $0x38] sm:$0xff] }
 0xeca   :  { %v6503_v54 = vpop.permute.xlu1 %6502 }
 0xecb   :  { %v9830_v58 = vpop.eup %9829  ;;  %v6538_v19 = vadd.f32 %v6503_v54, %v14161_v39  ;;  %v6539_v39 = vadd.f32 %v6505_v46, %v14172_v63  ;;  %v6527_v63 = vadd.f32 %v6481_v61, %v14103_v55  ;;  %v14431_v55 = vld [vmem:[%s15898_s5 + $0x18] sm:$0xff]  ;;  %v14437_v61 = vld [vmem:[%s15898_s5] sm:$0xff]  ;;  %v6562_v54 = vsub.f32 1.0, %v14220_v10 }
 0xecc   :  { %v9832_v27 = vpop.eup %9831  ;;  %6608 = vrot.lane.b32.xlu0 %v9830_v58, %s16562_s29  ;;  %v14453_v58 = vpop.permute.xlu0 %6844  ;;  %v6661_v46 = vmul.f32 %v14229_v28, %v16549_v20  ;;  %v6664_v20 = vmul.f32 %v14242_v16, %v16552_v13  ;;  %vm6718_vm13 = vcmp.eq.f32.partialorder %v14437_v61, 0.0 }
 0xecd   :  { %9835 = vtanh.f32 %v6538_v19  ;;  %6604 = vrot.lane.b32.xlu1 %v9832_v27, %s16562_s29  ;;  %v9834_v36 = vpop.eup %9833 }
 0xece   :  { %9837 = vtanh.f32 %v6536_v47 }
 0xecf   :  { %9839 = vtanh.f32 %v6529_v41 }
 0xed0   :  { %9841 = vtanh.f32 %v6537_v51  ;;  %v14464_v51 = vld [vmem:[%s15898_s5 + $0x20] sm:$0xff] }
 0xed1   :  { %9843 = vtanh.f32 %v6539_v39  ;;  %vm6722_vm15 = vcmp.eq.f32.partialorder %v14464_v51, 0.0 }
 0xed2   :  { %9845 = vtanh.f32 %v6526_v45 }
 0xed3   :  { %v9836_v23 = vpop.eup %9835  ;;  %9847 = vtanh.f32 %v6527_v63 }
 0xed4   :  { %v9838_v11 = vpop.eup %9837  ;;  %6614 = vrot.lane.b32.xlu2 %v9836_v23, %s16562_s29  ;;  %6618 = vrot.lane.b32.xlu0 %v9834_v36, %s16562_s29  ;;  %v6565_v36 = vsub.f32 1.0, %v14229_v28  ;;  %v6825_v29 = vpop.permute.xlu0 %6824 }
 0xed5   :  { %6610 = vrot.lane.b32.xlu1 %v9838_v11, %s16562_s29  ;;  %v9840_v35 = vpop.eup %9839 }
 0xed6   :  { %v9842_v6 = vpop.eup %9841 }
 0xed7   :  { %v9844_v26 = vpop.eup %9843 }
 0xed8   :  { %v9846_v18 = vpop.eup %9845 }
 0xed9   :  { %v9848_v40 = vpop.eup %9847 }
 0xedc   :  { %6596 = vrot.lane.b32.xlu0 %v9840_v35, %s16562_s29  ;;  %v14476_v35 = vld [vmem:[%s15898_s5 + $0x10] sm:$0xff] }
 0xedd   :  { %6612 = vrot.lane.b32.xlu1 %v9842_v6, %s16562_s29  ;;  %vm6720_vm2 = vcmp.eq.f32.partialorder %v14476_v35, 0.0 }
 0xee4   :  { %6794 = vperm.xlu0 %9334, %v14409_v53  }
 0xee5   :  { %6616 = vrot.lane.b32.xlu1 %v9844_v26, %s16562_s29  ;;  %v6568_v26 = vsub.f32 1.0, %v14242_v16 }
 0xeec   :  { %6590 = vrot.lane.b32.xlu0 %v9846_v18, %s16562_s29  ;;  %v14480_v18 = vpop.permute.xlu0 %6809 }
 0xeed   :  { %6799 = vperm.xlu1 %9336, %v14417_v12  }
 0xef4   :  { %6774 = vperm.xlu0 %9334, %v14424_v31  }
 0xef5   :  { %6592 = vrot.lane.b32.xlu1 %v9848_v40, %s16562_s29  ;;  %v6569_v40 = vsub.f32 1.0, %v14262_v50 }
 0xefd   :  { %6784 = vperm.xlu1 %9336, %v14431_v55  }
 0xf05   :  { %6769 = vperm.xlu1 %9336, %v14437_v61  }
 0xf1f   :  { %v6509_v48 = vpop.permute.xlu1 %6508 }
 0xf20   :  { %v6541_v15 = vadd.f32 %v6509_v48, %v14321_v5  ;;  %v6820_v5 = vpop.permute.xlu2 %6819 }
 0xf22   :  { %9849 = vtanh.f32 %v6541_v15 }
 0xf23   :  { %9851 = vtanh.f32 %v6528_v57  ;;  %v6665_v57 = vmul.f32 %v14262_v50, %v16553_v1  ;;  %v6667_v1 = vmul.f32 %v14254_v14, %v16555_v56 }
 0xf27   :  { %v6830_v43 = vpop.permute.xlu1 %6829 }
 0xf28   :  { %v9850_v9 = vpop.eup %9849  ;;  %v14466_v23 = vpop.permute.xlu2 %6600 }
 0xf29   :  { %6620 = vrot.lane.b32.xlu2 %v9850_v9, %s16562_s29  ;;  %v9852_v27 = vpop.eup %9851  ;;  %v6570_v9 = vsub.f32 1.0, %v14358_v44 }
 0xf2f   :  { %v14449_v47 = vpop.permute.xlu1 %6814 }
 0xf30   :  { %v6607_v6 = vpop.permute.xlu2 %6606 }
 0xf31   :  { %6804 = vperm.xlu2 %9335, %v14447_v32  }
 0xf37   :  { %v6599_v19 = vpop.permute.xlu1 %6598 }
 0xf38   :  { %v6642_v42 = vmul.f32 %v6599_v19, %v6562_v54  ;;  %v6615_v48 = vpop.permute.xlu2 %6614 }
 0xf39   :  { %6594 = vrot.lane.b32.xlu2 %v9852_v27, %s16562_s29  ;;  %v6650_v19 = vmul.f32 %v6615_v48, %v6570_v9  ;;  %v6572_v9 = vsub.f32 1.0, %v14289_v30 }
 0xf3a   :  { %v14458_v41 = vadd.f32 %v6658_v34, %v6642_v42  ;;  %v6603_v42 = vpop.permute.xlu0 %6602 }
 0xf3f   :  { %v6605_v11 = vpop.permute.xlu1 %6604 }
 0xf40   :  { %v6645_v39 = vmul.f32 %v6605_v11, %v6565_v36  ;;  %v6666_v36 = vmul.f32 %v14358_v44, %v16554_v33  ;;  %v6571_v11 = vsub.f32 1.0, %v14254_v14 }
 0xf41   :  { %6789 = vperm.xlu2 %9335, %v14464_v51  }
 0xf42   :  { %v14471_v10 = vadd.f32 %v6661_v46, %v6645_v39  ;;  %v6682_v16 = vadd.f32 %v6666_v36, %v6650_v19  ;;  %v6609_v44 = vpop.permute.xlu0 %6608  ;;  %v6573_v36 = vsub.f32 1.0, %v14367_v24 }
 0xf47   :  { %v6611_v45 = vpop.permute.xlu1 %6610 }
 0xf48   :  { %v6648_v63 = vmul.f32 %v6611_v45, %v6568_v26 }
 0xf49   :  { %6779 = vperm.xlu2 %9335, %v14476_v35  }
 0xf4a   :  { %v6680_v28 = vadd.f32 %v6664_v20, %v6648_v63  ;;  %v14499_v63 = vmax.f32 %v6682_v16, 0.0  ;;  %v6660_v16 = vmul.f32 %v14341_v4, %v16548_v60  ;;  %v6559_v60 = vsub.f32 1.0, %v14202_v2 }
 0xf4c   :  { %v14488_v27 = vmax.f32 %v6680_v28, 0.0  ;;  %16565 = vst [vmem:[#allocation40_spill] sm:$0xff] %v14499_v63  ;;  %v6859_v28 = vmul.f32 %v6830_v43, %v14499_v63  ;;  %v6668_v43 = vmul.f32 %v14289_v30, %v16556_v17  ;;  %v6663_v17 = vmul.f32 %v14349_v25, %v16551_v7 }
 0xf4d   :  { %v6558_v30 = vsub.f32 1.0, %v14304_v22 }
 0xf4e   :  { %16563 = vst [vmem:[#allocation38_spill] sm:$0xff] %v14488_v27  ;;  %v6857_v46 = vmul.f32 %v6820_v5, %v14488_v27 }
 0xf4f   :  { %v6613_v15 = vpop.permute.xlu1 %6612 }
 0xf50   :  { %v6649_v54 = vmul.f32 %v6613_v15, %v6569_v40 }
 0xf52   :  { %v6681_v34 = vadd.f32 %v6665_v57, %v6649_v54  ;;  %v6564_v54 = vsub.f32 1.0, %v14341_v4 }
 0xf54   :  { %v14492_v13 = vmax.f32 %v6681_v34, 0.0  ;;  %v6644_v19 = vmul.f32 %v6603_v42, %v6564_v54 }
 0xf56   :  { %16564 = vst [vmem:[#allocation47_spill] sm:$0xff] %v14492_v13  ;;  %v6858_v39 = vmul.f32 %v6825_v29, %v14492_v13  ;;  %v6619_v29 = vpop.permute.xlu0 %6618 }
 0xf57   :  { %v6617_v45 = vpop.permute.xlu1 %6616  ;;  %v6652_v57 = vmul.f32 %v6619_v29, %v6572_v9  ;;  %v14541_v9 = vmax.f32 %v14471_v10, 0.0 }
 0xf58   :  { %v6651_v50 = vmul.f32 %v6617_v45, %v6571_v11  ;;  %v9347_v26 = vpack.i.bf16 %v6857_v46, %v6858_v39  ;;  %v6566_v39 = vsub.f32 1.0, %v14246_v37  ;;  %v6669_v45 = vmul.f32 %v14367_v24, %v16557_v52 }
 0xf59   :  { %v6684_v34 = vadd.f32 %v6668_v43, %v6652_v57  ;;  %v6662_v52 = vmul.f32 %v14246_v37, %v16550_v59  ;;  %16570 = vst [vmem:[#allocation51_spill] sm:$0xff] %v14541_v9 }
 0xf5a   :  { %v6683_v20 = vadd.f32 %v6667_v1, %v6651_v50  ;;  %9348 = vrot.lane.b32.xlu1 %v9347_v26, %s16562_s29  ;;  %v6676_v50 = vadd.f32 %v6660_v16, %v6644_v19 }
 0xf5c   :  { %v14502_v33 = vmax.f32 %v6683_v20, 0.0  ;;  %v6646_v20 = vmul.f32 %v6607_v6, %v6566_v39  ;;  %v14534_v7 = vmax.f32 %v6676_v50, 0.0  ;;  %v6655_v6 = vmul.f32 %v14202_v2, %v16543_v21 }
 0xf5e   :  { %16566 = vst [vmem:[#allocation37_spill] sm:$0xff] %v14502_v33  ;;  %v6860_v5 = vmul.f32 %v6835_v38, %v14502_v33  ;;  %v14507_v48 = vpop.permute.xlu0 %6596  ;;  %v6567_v38 = vsub.f32 1.0, %v14349_v25  ;;  %v6654_v25 = vmul.f32 %v14304_v22, %v16542_v49  ;;  %v6678_v29 = vadd.f32 %v6662_v52, %v6646_v20 }
 0xf5f   :  { %v6800_v56 = vpop.permute.xlu1 %6799  ;;  %16569 = vst [vmem:[#allocation44_spill] sm:$0xff] %v14534_v7  ;;  %v14578_v52 = vmax.f32 %v14458_v41, 0.0 }
 0xf60   :  { %v9342_v40 = vpack.i.bf16 %v6859_v28, %v6860_v5  ;;  %v6647_v11 = vmul.f32 %v6609_v44, %v6567_v38  ;;  %v14527_v28 = vmax.f32 %v6684_v34, 0.0  ;;  %v14551_v2 = vmax.f32 %v6678_v29, 0.0 }
 0xf61   :  { %16580 = vst [vmem:[#allocation12_spill] sm:$0xff] %v14578_v52 }
 0xf62   :  { %9343 = vrot.lane.b32.xlu0 %v9342_v40, %s16562_s29  ;;  %16567 = vst [vmem:[#allocation42_spill] sm:$0xff] %v14527_v28  ;;  %v6679_v44 = vadd.f32 %v6663_v17, %v6647_v11  ;;  %v6861_v57 = vmul.f32 %v14383_v0, %v14527_v28  ;;  %v16573_v0 = vld [vmem:[#allocation36_spill] sm:$0xff]  ;;  %v6855_v16 = vmul.f32 %v14480_v18, %v14551_v2  ;;  %v16577_v17 = vld [vmem:[#allocation33_spill] sm:$0xff]  ;;  %v16578_v18 = vld [vmem:[#allocation39_spill] sm:$0xff] }
 0xf63   :  { %16572 = vst [vmem:[#allocation55_spill] sm:$0xff] %v14551_v2  ;;  %v6563_v38 = vsub.f32 1.0, %v16573_v0 }
 0xf64   :  { %v14547_v37 = vmax.f32 %v6679_v44, 0.0 }
 0xf66   :  { %v14509_v14 = vpop.permute.xlu0 %6794  ;;  %16571 = vst [vmem:[#allocation46_spill] sm:$0xff] %v14547_v37 }
 0xf67   :  { %v6593_v15 = vpop.permute.xlu1 %6592 }
 0xf68   :  { %v6639_v5 = vmul.f32 %v6593_v15, %v6559_v60  ;;  %v6853_v15 = vmul.f32 %v6800_v56, %v14534_v7  ;;  %v6856_v56 = vmul.f32 %v14449_v47, %v14547_v37 }
 0xf6a   :  { %v6671_v49 = vadd.f32 %v6655_v6, %v6639_v5  ;;  %v16581_v6 = vld [vmem:[#allocation29_spill] sm:$0xff] }
 0xf6b   :  { %v6657_v29 = vmul.f32 %v14331_v8, %v16581_v6  ;;  %v6952_v6 = vld [vmem:[%s15900_s20] sm:$0xff] }
 0xf6e   :  { %v6591_v42 = vpop.permute.xlu0 %6590 }
 0xf6f   :  { %v14525_v26 = vpop.permute.xlu1 %6784  ;;  %v6638_v24 = vmul.f32 %v6591_v42, %v6558_v30  ;;  %v6560_v30 = vsub.f32 1.0, %v16577_v17  ;;  %v9352_v42 = vpack.i.bf16 %v6855_v16, %v6856_v56 }
 0xf71   :  { %v6670_v43 = vadd.f32 %v6654_v25, %v6638_v24 }
 0xf73   :  { %v14555_v34 = vmax.f32 %v6670_v43, 0.0 }
 0xf75   :  { %16574 = vst [vmem:[#allocation45_spill] sm:$0xff] %v14555_v34 }
 0xf77   :  { %v6770_v19 = vpop.permute.xlu1 %6769 }
 0xf78   :  { %v6847_v11 = vmul.f32 %v6770_v19, %v14555_v34 }
 0xf83   :  { %v6621_v46 = vpop.permute.xlu2 %6620 }
 0xf84   :  { %v6653_v1 = vmul.f32 %v6621_v46, %v6573_v36  ;;  %v6643_v36 = vmul.f32 %v14466_v23, %v6563_v38  ;;  %v6775_v46 = vpop.permute.xlu0 %6774  ;;  %v6561_v23 = vsub.f32 1.0, %v14331_v8 }
 0xf86   :  { %v6685_v4 = vadd.f32 %v6669_v45, %v6653_v1  ;;  %v16576_v45 = vld [vmem:[#allocation8_spill] sm:$0xff]  ;;  %v6641_v24 = vmul.f32 %v14507_v48, %v6561_v23 }
 0xf87   :  { %v6659_v1 = vmul.f32 %v16573_v0, %v16576_v45 }
 0xf88   :  { %v14532_v40 = vmax.f32 %v6685_v4, 0.0  ;;  %v6656_v4 = vmul.f32 %v16577_v17, %v16578_v18 }
 0xf89   :  { %v6675_v20 = vadd.f32 %v6659_v1, %v6643_v36 }
 0xf8a   :  { %16568 = vst [vmem:[#allocation41_spill] sm:$0xff] %v14532_v40  ;;  %v6862_v59 = vmul.f32 %v14453_v58, %v14532_v40  ;;  %v14557_v58 = vmax.f32 %v6671_v49, 0.0 }
 0xf8b   :  { %v6805_v54 = vpop.permute.xlu2 %6804  ;;  %v14575_v44 = vmax.f32 %v6675_v20, 0.0 }
 0xf8c   :  { %v6854_v22 = vmul.f32 %v6805_v54, %v14541_v9  ;;  %v9337_v21 = vpack.i.bf16 %v6861_v57, %v6862_v59  ;;  %16575 = vst [vmem:[#allocation48_spill] sm:$0xff] %v14557_v58  ;;  %v6848_v50 = vmul.f32 %v6775_v46, %v14557_v58 }
 0xf8d   :  { %16579 = vst [vmem:[#allocation50_spill] sm:$0xff] %v14575_v44  ;;  %v6852_v57 = vmul.f32 %v14509_v14, %v14575_v44 }
 0xf8e   :  { %v9357_v10 = vpack.i.bf16 %v6853_v15, %v6854_v22  ;;  %9338 = vrot.lane.b32.xlu2 %v9337_v21, %s16562_s29  ;;  %v9372_v60 = vpack.i.bf16 %v6847_v11, %v6848_v50  ;;  %v6673_v15 = vadd.f32 %v6657_v29, %v6641_v24  ;;  %v6955_v24 = vld [vmem:[%s15900_s20 + $0x18] sm:$0xff] }
 0xf90   :  { %9358 = vrot.lane.b32.xlu0 %v9357_v10, %s16562_s29  ;;  %v14591_v41 = vmax.f32 %v6673_v15, 0.0 }
 0xf92   :  { %16583 = vst [vmem:[#allocation59_spill] sm:$0xff] %v14591_v41  ;;  %v6850_v8 = vmul.f32 %v14525_v26, %v14591_v41 }
 0xf93   :  { %v6595_v39 = vpop.permute.xlu2 %6594 }
 0xf94   :  { %v6640_v47 = vmul.f32 %v6595_v39, %v6560_v30 }
 0xf96   :  { %9353 = vrot.lane.b32.xlu2 %v9352_v42, %s16562_s29  ;;  %v6672_v5 = vadd.f32 %v6656_v4, %v6640_v47  ;;  %v14630_v4 = vld [vmem:[%s15899_s7] sm:$0xff] }
 0xf98   :  { %9373 = vrot.lane.b32.xlu0 %v9372_v60, %s16562_s29  ;;  %v14586_v54 = vmax.f32 %v6672_v5, 0.0  ;;  %v6954_v5 = vld [vmem:[%s15900_s20 + $0x10] sm:$0xff] }
 0xf9a   :  { %16582 = vst [vmem:[#allocation10_spill] sm:$0xff] %v14586_v54 }
 0xf9b   :  { %v6790_v25 = vpop.permute.xlu2 %6789 }
 0xf9c   :  { %v6851_v59 = vmul.f32 %v6790_v25, %v14578_v52  ;;  %v6953_v25 = vld [vmem:[%s15900_s20 + $0x8] sm:$0xff] }
 0xf9e   :  { %v9362_v43 = vpack.i.bf16 %v6851_v59, %v6852_v57 }
 0xfa0   :  { %6991 = vrot.lane.b32.xlu0 %v14586_v54, %s16562_s29  ;;  %9363 = vrot.lane.b32.xlu1 %v9362_v43, %s16562_s29 }
 0xfa3   :  { %v6780_v48 = vpop.permute.xlu2 %6779 }
 0xfa4   :  { %v6849_v49 = vmul.f32 %v6780_v48, %v14586_v54 }
 0xfa6   :  { %v9367_v14 = vpack.i.bf16 %v6849_v49, %v6850_v8 }
 0xfa8   :  { %6997 = vrot.lane.b32.xlu0 %v14575_v44, %s16562_s29  ;;  %6987 = vrot.lane.b32.xlu1 %v14555_v34, %s16562_s29 }
 0xfa9   :  { %9368 = vrot.lane.b32.xlu2 %v9367_v14, %s16562_s29 }
 0xfb0   :  { %7003 = vrot.lane.b32.xlu0 %v14551_v2, %s16562_s29  ;;  %6993 = vrot.lane.b32.xlu1 %v14591_v41, %s16562_s29 }
 0xfb1   :  { %6989 = vrot.lane.b32.xlu2 %v14557_v58, %s16562_s29 }
 0xfb8   :  { %7009 = vrot.lane.b32.xlu0 %v14492_v13, %s16562_s29  ;;  %6999 = vrot.lane.b32.xlu1 %v14534_v7, %s16562_s29 }
 0xfb9   :  { %6995 = vrot.lane.b32.xlu2 %v14578_v52, %s16562_s29 }
 0xfc0   :  { %7015 = vrot.lane.b32.xlu0 %v14527_v28, %s16562_s29  ;;  %7005 = vrot.lane.b32.xlu1 %v14547_v37, %s16562_s29 }
 0xfc1   :  { %7001 = vrot.lane.b32.xlu2 %v14541_v9, %s16562_s29 }
 0xfc8   :  { %7011 = vrot.lane.b32.xlu1 %v14499_v63, %s16562_s29 }
 0xfc9   :  { %7007 = vrot.lane.b32.xlu2 %v14488_v27, %s16562_s29 }
 0xfcc   :  { %v9349_v0 = vpop.permute.xlu1 %9348 }
 0xfcd   :  { %v9350_v56 = vunpack.i.l.bf16 %v9349_v0  ;;  %v9351_v16 = vunpack.i.h.bf16 %v9349_v0  ;;  %v14672_v0 = vld [vmem:[%s15901_s19 + $0x8] sm:$0xff] }
 0xfce   :  { %16585 = vst [vmem:[#allocation52_spill] sm:$0xff] %v14672_v0 }
 0xfd0   :  { %7017 = vrot.lane.b32.xlu1 %v14532_v40, %s16562_s29 }
 0xfd1   :  { %7013 = vrot.lane.b32.xlu2 %v14502_v33, %s16562_s29  ;;  %v14927_v33 = vld [vmem:[%s15898_s5 + $0x40] sm:$0xff] }
 0xfd4   :  { %v9344_v21 = vpop.permute.xlu0 %9343 }
 0xfd5   :  { %v9345_v19 = vunpack.i.l.bf16 %v9344_v21  ;;  %v9346_v38 = vunpack.i.h.bf16 %v9344_v21  ;;  %v14659_v21 = vld [vmem:[%s15901_s19 + $0x18] sm:$0xff] }
 0xfd6   :  { %7131 = vmatpush.msrb.mxu0 %v14659_v21 }
 0xfe8   :  { %v9339_v26 = vpop.permute.xlu2 %9338 }
 0xfe9   :  { %v9340_v22 = vunpack.i.l.bf16 %v9339_v26  ;;  %v9341_v10 = vunpack.i.h.bf16 %v9339_v26 }
 0xfeb   :  { %6927 = vmatpush.msrb.mxu3 %v9340_v22 }
 0xfed   :  { %6928 = vmatpush.msrb.mxu3 %v9341_v10 }
 0xfef   :  { %6929 = vmatpush.msrb.mxu3 %v9345_v19  ;;  %v14666_v19 = vld [vmem:[%s15901_s19 + $0x10] sm:$0xff] }
 0xff0   :  { %v9354_v36 = vpop.permute.xlu2 %9353  ;;  %16584 = vst [vmem:[#allocation14_spill] sm:$0xff] %v14666_v19  ;;  %7132 = vmatpush.msrb.mxu0 %v14666_v19 }
 0xff1   :  { %6930 = vmatpush.msrb.mxu3 %v9346_v38  ;;  %v9355_v11 = vunpack.i.l.bf16 %v9354_v36  ;;  %v9356_v46 = vunpack.i.h.bf16 %v9354_v36  ;;  %v14678_v38 = vld [vmem:[%s15901_s19] sm:$0xff] }
 0xff2   :  { %7133 = vmatpush.msrb.mxu0 %v14672_v0  ;;  %16586 = vst [vmem:[#allocation49_spill] sm:$0xff] %v14678_v38 }
 0xff3   :  { %6931 = vmatpush.msrb.mxu3 %v9350_v56 }
 0xff4   :  { %7134 = vmatpush.msrb.mxu0 %v14678_v38 }
 0xff5   :  { %6932 = vmatpush.msrb.mxu3 %v9351_v16 }
 0xff7   :  { %6933 = vmatpush.msrb.mxu3 %v9355_v11 }
 0xff9   :  { %6934 = vmatpush.msrb.mxu3 %v9356_v46 }
0x1002   :  { %v9359_v39 = vpop.permute.xlu0 %9358 }
0x1003   :  { %v9360_v45 = vunpack.i.l.bf16 %v9359_v39  ;;  %v9361_v1 = vunpack.i.h.bf16 %v9359_v39  ;;  %v9369_v30 = vpop.permute.xlu2 %9368 }
0x1004   :  { %v9370_v20 = vunpack.i.l.bf16 %v9369_v30  ;;  %v9371_v47 = vunpack.i.h.bf16 %v9369_v30  ;;  %v14713_v30 = vld [vmem:[%s15902_s6 + $0x18] sm:$0xff] }
0x1005   :  { %6935 = vmatpush.msrb.mxu3 %v9360_v45  ;;  %v14692_v45 = vld [vmem:[%s15902_s6] sm:$0xff] }
0x1007   :  { %6936 = vmatpush.msrb.mxu3 %v9361_v1 }
0x100a   :  { %v9374_v60 = vpop.permute.xlu0 %9373 }
0x100b   :  { %v9375_v23 = vunpack.i.l.bf16 %v9374_v60  ;;  %v9376_v18 = vunpack.i.h.bf16 %v9374_v60  ;;  %v6990_v57 = vpop.permute.xlu2 %6989  ;;  %v14734_v60 = vld [vmem:[%s15902_s6 + $0x30] sm:$0xff] }
0x1012   :  { %v9364_v50 = vpop.permute.xlu1 %9363  ;;  %v6992_v59 = vpop.permute.xlu0 %6991 }
0x1013   :  { %v9365_v17 = vunpack.i.l.bf16 %v9364_v50  ;;  %v9366_v42 = vunpack.i.h.bf16 %v9364_v50  ;;  %v6996_v43 = vpop.permute.xlu2 %6995  ;;  %v14699_v50 = vld [vmem:[%s15902_s6 + $0x8] sm:$0xff] }
0x1015   :  { %6937 = vmatpush.msrb.mxu3 %v9365_v17  ;;  %v14706_v17 = vld [vmem:[%s15902_s6 + $0x10] sm:$0xff] }
0x1017   :  { %6938 = vmatpush.msrb.mxu3 %v9366_v42  ;;  %v14720_v42 = vld [vmem:[%s15902_s6 + $0x20] sm:$0xff] }
0x1019   :  { %6939 = vmatpush.msrb.mxu3 %v9370_v20  ;;  %v14727_v20 = vld [vmem:[%s15902_s6 + $0x28] sm:$0xff] }
0x101a   :  { %v6988_v29 = vpop.permute.xlu1 %6987  ;;  %v6998_v48 = vpop.permute.xlu0 %6997 }
0x101b   :  { %6940 = vmatpush.msrb.mxu3 %v9371_v47  ;;  %v7002_v49 = vpop.permute.xlu2 %7001  ;;  %v14741_v47 = vld [vmem:[%s15902_s6 + $0x38] sm:$0xff] }
0x101d   :  { %6941 = vmatpush.msrb.mxu3 %v9375_v23  ;;  %v14748_v23 = vld [vmem:[%s15902_s6 + $0x40] sm:$0xff] }
0x101f   :  { %6942 = vmatpush.msrb.mxu3 %v9376_v18  ;;  %v14755_v18 = vld [vmem:[%s15902_s6 + $0x48] sm:$0xff] }
0x1020   :  { %6943 = vmatmul.f32.vlgmr.msrb.gmra.mxu3 %v14630_v4 }
0x1021   :  { %7063 = vmatpush.msra.mxu3 %v6955_v24  ;;  %v14762_v24 = vld [vmem:[%s15902_s6 + $0x50] sm:$0xff] }
0x1022   :  { %v6994_v15 = vpop.permute.xlu1 %6993  ;;  %v7004_v14 = vpop.permute.xlu0 %7003 }
0x1023   :  { %7064 = vmatpush.msra.mxu3 %v6954_v5  ;;  %v7008_v22 = vpop.permute.xlu2 %7007  ;;  %v14769_v5 = vld [vmem:[%s15902_s6 + $0x58] sm:$0xff] }
0x1025   :  { %7065 = vmatpush.msra.mxu3 %v6953_v25  ;;  %v33_v25 = vstv %s15903_s21 }
0x1026   :  { %34 = vst [vmem:[#allocation2] sm:$0x1] %v33_v25 }
0x1027   :  { %7066 = vmatpush.msra.mxu3 %v6952_v6  ;;  %v14779_v6 = vld [vmem:[%s15902_s6 + $0x60] sm:$0xff] }
0x1028   :  { %9109 = vmatmul.msk.f32.vlgmr.msra.gmra.mxu3 %vm1053_vm6, %v6988_v29 }
0x102a   :  { %v7000_v8 = vpop.permute.xlu1 %6999  ;;  %v7010_v10 = vpop.permute.xlu0 %7009 }
0x102b   :  { %v7014_v36 = vpop.permute.xlu2 %7013 }
0x1030   :  { %9110 = vmatmul.msk.f32.gmra.mxu3 %vm1053_vm6, %v6990_v57  ;;  %v14788_v57 = vld [vmem:[%s15902_s6 + $0x68] sm:$0xff] }
0x1032   :  { %v7006_v26 = vpop.permute.xlu1 %7005  ;;  %v7016_v16 = vpop.permute.xlu0 %7015 }
0x1038   :  { %9111 = vmatmul.msk.f32.gmra.mxu3 %vm1053_vm6, %v6992_v59 }
0x103a   :  { %v7012_v56 = vpop.permute.xlu1 %7011 }
0x1040   :  { %9112 = vmatmul.msk.f32.gmra.mxu3 %vm1053_vm6, %v6994_v15  ;;  %v14797_v15 = vld [vmem:[%s15902_s6 + $0x70] sm:$0xff] }
0x1042   :  { %v7018_v11 = vpop.permute.xlu1 %7017 }
0x1048   :  { %9113 = vmatmul.msk.f32.gmra.mxu3 %vm1053_vm6, %v6996_v43 }
0x1050   :  { %9114 = vmatmul.msk.f32.gmra.mxu3 %vm1053_vm6, %v6998_v48  ;;  %v14806_v48 = vld [vmem:[%s15902_s6 + $0x78] sm:$0xff] }
0x1058   :  { %9115 = vmatmul.msk.f32.gmra.mxu3 %vm1053_vm6, %v7000_v8 }
0x1060   :  { %9116 = vmatmul.msk.f32.gmra.mxu3 %vm1053_vm6, %v7002_v49 }
0x1068   :  { %9117 = vmatmul.msk.f32.gmra.mxu3 %vm1053_vm6, %v7004_v14 }
0x1070   :  { %9118 = vmatmul.msk.f32.gmra.mxu3 %vm1053_vm6, %v7006_v26 }
0x1078   :  { %9119 = vmatmul.msk.f32.gmra.mxu3 %vm1053_vm6, %v7008_v22 }
0x1080   :  { %9120 = vmatmul.msk.f32.gmra.mxu3 %vm1053_vm6, %v7010_v10 }
0x1088   :  { %9121 = vmatmul.msk.f32.gmra.mxu3 %vm1053_vm6, %v7012_v56 }
0x1090   :  { %9122 = vmatmul.msk.f32.gmra.mxu3 %vm1053_vm6, %v7014_v36  ;;  %v14817_v36 = vld [vmem:[#allocation2] ss:$0 sm:$0xff] }
0x1098   :  { %9123 = vmatmul.msk.f32.gmra.mxu3 %vm1053_vm6, %v7016_v16 }
0x10a0   :  { %9124 = vmatmul.msk.f32.gmra.mxu3 %vm1053_vm6, %v7018_v11 }
0x10a3   :  { %v14685_v46 = vpop.f32.mrf.mxu3 }
0x10a4   :  { %16587 = vst [vmem:[#allocation11_spill] sm:$0xff] %v14685_v46  ;;  %v6947_v39 = vmax.f32 %v14685_v46, 0.0 }
0x10a6   :  { %9125 = vmatmul.msk.f32.vlgmr.msrb.gmra.mxu0 %vm1053_vm6, %v6947_v39 }
0x10ab   :  { %v14781_v29 = vpop.f32.mrf.mxu3 }
0x10ac   :  { %16588 = vst [vmem:[#allocation54_spill] sm:$0xff] %v14781_v29 }
0x10b3   :  { %v14792_v59 = vpop.f32.mrf.mxu3 }
0x10b4   :  { %16589 = vst [vmem:[#allocation53_spill] sm:$0xff] %v14792_v59 }
0x10bb   :  { %v14801_v43 = vpop.f32.mrf.mxu3 }
0x10bc   :  { %16590 = vst [vmem:[#allocation56_spill] sm:$0xff] %v14801_v43 }
0x10c3   :  { %v14810_v8 = vpop.f32.mrf.mxu3 }
0x10c4   :  { %16591 = vst [vmem:[#allocation62_spill] sm:$0xff] %v14810_v8 }
0x10cb   :  { %v14812_v26 = vpop.f32.mrf.mxu3 }
0x10cc   :  { %16592 = vst [vmem:[#allocation58_spill] sm:$0xff] %v14812_v26 }
0x10d3   :  { %v14814_v10 = vpop.f32.mrf.mxu3 }
0x10d4   :  { %16593 = vst [vmem:[#allocation63_spill] sm:$0xff] %v14814_v10 }
0x10db   :  { %v14822_v39 = vpop.f32.mrf.mxu3 }
0x10dc   :  { %16594 = vst [vmem:[#allocation57_spill] sm:$0xff] %v14822_v39 }
0x1123   :  { %v7136_v1 = vpop.f32.mrf.mxu0 }
0x1124   :  { %7202 = vmatpush.msrb.mxu1 %v7136_v1 }
0x1125   :  { %9126 = vmatmul.msk.f32.vlgmr.msrb.gmra.mxu1 %vm114_vm1, %v14692_v45 }
0x112d   :  { %9127 = vmatmul.msk.f32.gmra.mxu1 %vm114_vm1, %v14699_v50 }
0x1135   :  { %9128 = vmatmul.msk.f32.gmra.mxu1 %vm114_vm1, %v14706_v17 }
0x113d   :  { %9129 = vmatmul.msk.f32.gmra.mxu1 %vm114_vm1, %v14713_v30 }
0x1145   :  { %9130 = vmatmul.msk.f32.gmra.mxu1 %vm114_vm1, %v14720_v42 }
0x114d   :  { %9131 = vmatmul.msk.f32.gmra.mxu1 %vm114_vm1, %v14727_v20 }
0x1155   :  { %9132 = vmatmul.msk.f32.gmra.mxu1 %vm114_vm1, %v14734_v60 }
0x115d   :  { %9133 = vmatmul.msk.f32.gmra.mxu1 %vm114_vm1, %v14741_v47 }
0x1165   :  { %9134 = vmatmul.msk.f32.gmra.mxu1 %vm114_vm1, %v14748_v23 }
0x116d   :  { %9135 = vmatmul.msk.f32.gmra.mxu1 %vm114_vm1, %v14755_v18 }
0x1175   :  { %9136 = vmatmul.msk.f32.gmra.mxu1 %vm114_vm1, %v14762_v24 }
0x117d   :  { %9137 = vmatmul.msk.f32.gmra.mxu1 %vm114_vm1, %v14769_v5 }
0x1185   :  { %9138 = vmatmul.msk.f32.gmra.mxu1 %vm114_vm1, %v14779_v6 }
0x118d   :  { %9139 = vmatmul.msk.f32.gmra.mxu1 %vm114_vm1, %v14788_v57 }
0x1195   :  { %9140 = vmatmul.msk.f32.gmra.mxu1 %vm114_vm1, %v14797_v15 }
0x119d   :  { %9141 = vmatmul.msk.f32.gmra.mxu1 %vm114_vm1, %v14806_v48 }
0x11a2   :  { %v7204_v49 = vpop.f32.mrf.mxu1 }
0x11a3   :  { %v7252_v56 = vadd.f32 %v7204_v49, %v14781_v29  ;;  %v16139_v49 = vmov 0.0  }
0x11a4   :  { %v14829_v29 = vsel %vm6718_vm13, -9e+08, %v16139_v49  ;;  %v14834_v44 = vsel %vm6722_vm15, -9e+08, %v16139_v49  ;;  %v14864_v53 = vsel %vm6723_vm7, -9e+08, %v16139_v49 }
0x11a5   :  { %v7271_v11 = vadd.f32 %v14817_v36, %v7252_v56  ;;  %16595 = vst [vmem:[#allocation60_spill] sm:$0xff] %v14829_v29  ;;  %v14886_v35 = vsel %vm6720_vm2, -9e+08, %v16139_v49  ;;  %v14892_v12 = vsel %vm6724_vm12, -9e+08, %v16139_v49  ;;  %vm6726_vm13 = vcmp.eq.f32.partialorder %v14927_v33, 0.0 }
0x11a6   :  { %16596 = vst [vmem:[#allocation61_spill] sm:$0xff] %v14834_v44  ;;  %vm6725_vm12 = vcmp.eq.f32.partialorder %v14447_v32, 0.0 }
0x11a7   :  { %v7303_v1 = vmul.f32 0.01, %v7271_v11  ;;  %vm7287_vm3 = vcmp.ge.f32.partialorder %v7271_v11, 0.0  ;;  %16599 = vst [vmem:[#allocation13_spill] sm:$0xff] %v14864_v53 }
0x11a8   :  { %16601 = vst [vmem:[#allocation27_spill] sm:$0xff] %v14886_v35 }
0x11a9   :  { %v7319_v41 = vsel %vm7287_vm3, %v7271_v11, %v7303_v1  ;;  %16602 = vst [vmem:[#allocation22_spill] sm:$0xff] %v14892_v12  ;;  %vm6727_vm3 = vcmp.eq.f32.partialorder %v14381_v3, 0.0  ;;  %v14943_v3 = vld [vmem:[%s15898_s5 + $0x68] sm:$0xff] }
0x11aa   :  { %v7207_v14 = vpop.f32.mrf.mxu1  ;;  %vm6731_vm7 = vcmp.eq.f32.partialorder %v14943_v3, 0.0 }
0x11ab   :  { %v7253_v25 = vadd.f32 %v7207_v14, %v14792_v59  ;;  %v14837_v14 = vadd.f32 %v7319_v41, %v14829_v29  ;;  %v14841_v59 = vpop.f32.mrf.mxu3  ;;  %v14849_v41 = vsel %vm6719_vm5, -9e+08, %v16139_v49  ;;  %vm6730_vm5 = vcmp.eq.f32.partialorder %v14374_v62, 0.0 }
0x11ac   :  { %16597 = vst [vmem:[#allocation64_spill] sm:$0xff] %v14841_v59 }
0x11ad   :  { %v7272_v56 = vadd.f32 %v14817_v36, %v7253_v25  ;;  %16598 = vst [vmem:[#allocation15_spill] sm:$0xff] %v14849_v41  ;;  %v14853_v31 = vsel %vm1811_vm14, %v14837_v14, -inf }
0x11af   :  { %v7304_v51 = vmul.f32 0.01, %v7272_v56  ;;  %vm7288_vm4 = vcmp.ge.f32.partialorder %v7272_v56, 0.0 }
0x11b2   :  { %v7210_v22 = vpop.f32.mrf.mxu1 }
0x11ba   :  { %v14819_v16 = vpop.f32.mrf.mxu1 }
0x11c2   :  { %v7216_v46 = vpop.f32.mrf.mxu1 }
0x11c3   :  { %v7256_v54 = vadd.f32 %v7216_v46, %v14812_v26  ;;  %v7254_v46 = vadd.f32 %v7210_v22, %v14801_v43  ;;  %v7320_v22 = vsel %vm7288_vm4, %v7272_v56, %v7304_v51 }
0x11c5   :  { %v7275_v34 = vadd.f32 %v14817_v36, %v7256_v54 }
0x11c7   :  { %vm7291_vm0 = vcmp.ge.f32.partialorder %v7275_v34, 0.0  ;;  %v7307_v61 = vmul.f32 0.01, %v7275_v34 }
0x11c9   :  { %v7323_v26 = vsel %vm7291_vm0, %v7275_v34, %v7307_v61 }
0x11ca   :  { %v14844_v11 = vadd.f32 %v7323_v26, %v14834_v44  ;;  %v7219_v54 = vpop.f32.mrf.mxu1  ;;  %v7273_v26 = vadd.f32 %v14817_v36, %v7254_v46 }
0x11cb   :  { %v7257_v1 = vadd.f32 %v7219_v54, %v14814_v10  ;;  %v14867_v10 = vadd.f32 %v7320_v22, %v14849_v41 }
0x11cc   :  { %v14857_v34 = vsel %vm1811_vm14, %v14844_v11, -inf  ;;  %v7305_v44 = vmul.f32 0.01, %v7273_v26  ;;  %vm7289_vm9 = vcmp.ge.f32.partialorder %v7273_v26, 0.0 }
0x11cd   :  { %v7276_v61 = vadd.f32 %v14817_v36, %v7257_v1  ;;  %v14875_v1 = vpop.f32.mrf.mxu3  ;;  %v14879_v25 = vsel %vm1811_vm14, %v14867_v10, -inf }
0x11ce   :  { %16600 = vst [vmem:[#allocation31_spill] sm:$0xff] %v14875_v1 }
0x11cf   :  { %vm7292_vm8 = vcmp.ge.f32.partialorder %v7276_v61, 0.0  ;;  %v7308_v54 = vmul.f32 0.01, %v7276_v61 }
0x11d1   :  { %v7324_v43 = vsel %vm7292_vm8, %v7276_v61, %v7308_v54 }
0x11d2   :  { %v14871_v56 = vadd.f32 %v7324_v43, %v14864_v53  ;;  %v7222_v51 = vpop.f32.mrf.mxu1  ;;  %v7321_v43 = vsel %vm7289_vm9, %v7273_v26, %v7305_v44 }
0x11d3   :  { %v7258_v46 = vadd.f32 %v7222_v51, %v14822_v39  ;;  %v14895_v39 = vadd.f32 %v7321_v43, %v14886_v35 }
0x11d4   :  { %v14883_v22 = vsel %vm1811_vm14, %v14871_v56, -inf }
0x11d5   :  { %v7277_v54 = vadd.f32 %v14817_v36, %v7258_v46  ;;  %v14902_v44 = vsel %vm1811_vm14, %v14895_v39, -inf  ;;  %v14910_v61 = vpop.f32.mrf.mxu3 }
0x11d6   :  { %16603 = vst [vmem:[#allocation20_spill] sm:$0xff] %v14910_v61 }
0x11d7   :  { %vm7293_vm10 = vcmp.ge.f32.partialorder %v7277_v54, 0.0  ;;  %v7309_v51 = vmul.f32 0.01, %v7277_v54 }
0x11d9   :  { %v7325_v53 = vsel %vm7293_vm10, %v7277_v54, %v7309_v51 }
0x11da   :  { %v14898_v41 = vadd.f32 %v7325_v53, %v14892_v12  ;;  %v7225_v29 = vpop.f32.mrf.mxu1 }
0x11db   :  { %v7259_v62 = vadd.f32 %v7225_v29, %v14841_v59 }
0x11dc   :  { %v14906_v26 = vsel %vm1811_vm14, %v14898_v41, -inf }
0x11dd   :  { %v14912_v49 = vpop.f32.mrf.mxu3 }
0x11de   :  { %16604 = vst [vmem:[#allocation4_spill] sm:$0xff] %v14912_v49 }
0x11e2   :  { %v7228_v43 = vpop.f32.mrf.mxu1 }
0x11e3   :  { %v7260_v58 = vadd.f32 %v7228_v43, %v14875_v1 }
0x11e5   :  { %v14914_v53 = vpop.f32.mrf.mxu3  ;;  %v7279_v2 = vadd.f32 %v14817_v36, %v7260_v58 }
0x11e6   :  { %16605 = vst [vmem:[#allocation16_spill] sm:$0xff] %v14914_v53 }
0x11e7   :  { %v7311_v28 = vmul.f32 0.01, %v7279_v2  ;;  %vm7295_vm15 = vcmp.ge.f32.partialorder %v7279_v2, 0.0 }
0x11ea   :  { %v7231_v54 = vpop.f32.mrf.mxu1 }
0x11eb   :  { %v7261_v52 = vadd.f32 %v7231_v54, %v14910_v61  ;;  %v7327_v54 = vsel %vm7295_vm15, %v7279_v2, %v7311_v28  ;;  %v7255_v28 = vadd.f32 %v14819_v16, %v14810_v8  ;;  %v7278_v16 = vadd.f32 %v14817_v36, %v7259_v62 }
0x11ed   :  { %v14916_v35 = vpop.f32.mrf.mxu3  ;;  %v7280_v46 = vadd.f32 %v14817_v36, %v7261_v52  ;;  %vm7294_vm10 = vcmp.ge.f32.partialorder %v7278_v16, 0.0 }
0x11ee   :  { %16606 = vst [vmem:[#allocation19_spill] sm:$0xff] %v14916_v35 }
0x11ef   :  { %v7312_v9 = vmul.f32 0.01, %v7280_v46  ;;  %vm7296_vm0 = vcmp.ge.f32.partialorder %v7280_v46, 0.0 }
0x11f2   :  { %v7234_v51 = vpop.f32.mrf.mxu1 }
0x11f5   :  { %v14931_v43 = vpop.f32.mrf.mxu3 }
0x11f6   :  { %16607 = vst [vmem:[#allocation18_spill] sm:$0xff] %v14931_v43 }
0x11fa   :  { %v7237_v12 = vpop.f32.mrf.mxu1 }
0x11fb   :  { %v7263_v27 = vadd.f32 %v7237_v12, %v14914_v53  ;;  %v14980_v12 = vld [vmem:[%s15898_s5 + $0x50] sm:$0xff] }
0x11fc   :  { %vm6728_vm2 = vcmp.eq.f32.partialorder %v14980_v12, 0.0 }
0x1202   :  { %v7240_v37 = vpop.f32.mrf.mxu1 }
0x1203   :  { %v7264_v7 = vadd.f32 %v7240_v37, %v14916_v35  ;;  %v16608_v37 = vmov 0.0   ;;  %v7328_v35 = vsel %vm7296_vm0, %v7280_v46, %v7312_v9  ;;  %v7262_v46 = vadd.f32 %v7234_v51, %v14912_v49 }
0x1204   :  { %v14935_v52 = vsel %vm6726_vm13, -9e+08, %v16608_v37  ;;  %v14947_v1 = vsel %vm6730_vm5, -9e+08, %v16608_v37  ;;  %v7310_v49 = vmul.f32 0.01, %v7278_v16 }
0x1205   :  { %v7283_v40 = vadd.f32 %v14817_v36, %v7264_v7  ;;  %16609 = vst [vmem:[#allocation6_spill] sm:$0xff] %v14935_v52  ;;  %v14938_v7 = vsel %vm6727_vm3, -9e+08, %v16608_v37  ;;  %v14954_v9 = vadd.f32 %v7327_v54, %v14935_v52  ;;  %v7282_v54 = vadd.f32 %v14817_v36, %v7263_v27 }
0x1206   :  { %16610 = vst [vmem:[#allocation66_spill] sm:$0xff] %v14938_v7  ;;  %v14957_v2 = vadd.f32 %v7328_v35, %v14938_v7  ;;  %v7274_v35 = vadd.f32 %v14817_v36, %v7255_v28  ;;  %v14987_v28 = vld [vmem:[%s15898_s5 + $0x58] sm:$0xff]  ;;  %v16614_v27 = vmax.f32 %v14853_v31, %v14857_v34  ;;  %vm6721_vm13 = vcmp.eq.f32.partialorder %v14431_v55, 0.0 }
0x1207   :  { %v7315_v58 = vmul.f32 0.01, %v7283_v40  ;;  %vm7299_vm4 = vcmp.ge.f32.partialorder %v7283_v40, 0.0  ;;  %16611 = vst [vmem:[#allocation17_spill] sm:$0xff] %v14947_v1  ;;  %v7363_v51 = vsel %vm1811_vm14, %v14954_v9, -inf  ;;  %vm6729_vm9 = vcmp.eq.f32.partialorder %v14987_v28, 0.0 }
0x1208   :  { %v7306_v8 = vmul.f32 0.01, %v7274_v35  ;;  %vm7290_vm3 = vcmp.ge.f32.partialorder %v7274_v35, 0.0  ;;  %vm7298_vm0 = vcmp.ge.f32.partialorder %v7282_v54, 0.0  ;;  %v15010_v31 = vsel %vm6725_vm12, -9e+08, %v16608_v37 }
0x1209   :  { %v7331_v63 = vsel %vm7299_vm4, %v7283_v40, %v7315_v58  ;;  %v14966_v40 = vsel %vm6731_vm7, -9e+08, %v16608_v37  ;;  %v14969_v58 = vpop.f32.mrf.mxu3  ;;  %16616 = vst [vmem:[#allocation67_spill] sm:$0xff] %v15010_v31  ;;  %v7326_v34 = vsel %vm7294_vm10, %v7278_v16, %v7310_v49  ;;  %v15021_v55 = vsel %vm6728_vm2, -9e+08, %v16608_v37 }
0x120a   :  { %v7243_v61 = vpop.f32.mrf.mxu1  ;;  %v14963_v29 = vadd.f32 %v7331_v63, %v14947_v1  ;;  %16612 = vst [vmem:[#allocation23_spill] sm:$0xff] %v14966_v40  ;;  %v7281_v63 = vadd.f32 %v14817_v36, %v7262_v46  ;;  %v15026_v32 = vsel %vm6729_vm9, -9e+08, %v16608_v37 }
0x120b   :  { %v7265_v13 = vadd.f32 %v7243_v61, %v14931_v43  ;;  %16613 = vst [vmem:[#allocation65_spill] sm:$0xff] %v14969_v58 }
0x120c   :  { %v7371_v46 = vsel %vm1811_vm14, %v14963_v29, -inf  ;;  %v7313_v43 = vmul.f32 0.01, %v7281_v63  ;;  %vm7297_vm15 = vcmp.ge.f32.partialorder %v7281_v63, 0.0  ;;  %16617 = vst [vmem:[#allocation68_spill] sm:$0xff] %v15021_v55 }
0x120d   :  { %v7284_v38 = vadd.f32 %v14817_v36, %v7265_v13  ;;  %v7365_v13 = vsel %vm1811_vm14, %v14957_v2, -inf  ;;  %16618 = vst [vmem:[#allocation69_spill] sm:$0xff] %v15026_v32 }
0x120e   :  { %v7329_v49 = vsel %vm7297_vm15, %v7281_v63, %v7313_v43 }
0x120f   :  { %vm7300_vm8 = vcmp.ge.f32.partialorder %v7284_v38, 0.0  ;;  %v7316_v61 = vmul.f32 0.01, %v7284_v38  ;;  %v7345_v43 = vadd.f32 %v7329_v49, %v15021_v55 }
0x1211   :  { %v7332_v62 = vsel %vm7300_vm8, %v7284_v38, %v7316_v61  ;;  %v7364_v38 = vmax.f32 %v16614_v27, %v7363_v51  ;;  %v16615_v61 = vmax.f32 %v14879_v25, %v14883_v22  ;;  %v15043_v27 = vld [vmem:[%s15898_s5 + $0x78] sm:$0xff] }
0x1212   :  { %v14994_v1 = vadd.f32 %v7332_v62, %v14966_v40  ;;  %v7246_v53 = vpop.f32.mrf.mxu1  ;;  %v7314_v62 = vmul.f32 0.01, %v7282_v54  ;;  %vm6733_vm7 = vcmp.eq.f32.partialorder %v15043_v27, 0.0 }
0x1213   :  { %v7366_v7 = vmax.f32 %v16615_v61, %v7365_v13  ;;  %v7266_v52 = vadd.f32 %v7246_v53, %v14969_v58  ;;  %v7372_v40 = vmax.f32 %v7364_v38, %v7371_v46  ;;  %v15015_v53 = vld [vmem:[%s15898_s5 + $0x70] sm:$0xff]  ;;  %v15056_v38 = vsel %vm6733_vm7, -9e+08, %v16608_v37 }
0x1214   :  { %v7373_v59 = vsel %vm1811_vm14, %v14994_v1, -inf  ;;  %vm6732_vm5 = vcmp.eq.f32.partialorder %v15015_v53, 0.0 }
0x1215   :  { %v7374_v0 = vmax.f32 %v7366_v7, %v7373_v59  ;;  %v7285_v19 = vadd.f32 %v14817_v36, %v7266_v52  ;;  %v7322_v59 = vsel %vm7290_vm3, %v7274_v35, %v7306_v8  ;;  %v7330_v52 = vsel %vm7298_vm0, %v7282_v54, %v7314_v62  ;;  %v15031_v7 = vpop.f32.mrf.mxu3 }
0x1216   :  { %16620 = vst [vmem:[#allocation71_spill] sm:$0xff] %v15031_v7  ;;  %v15037_v51 = vsel %vm6732_vm5, -9e+08, %v16608_v37  ;;  %v7346_v35 = vadd.f32 %v7330_v52, %v15026_v32 }
0x1217   :  { %v7379_v25 = vmax.f32 %v7372_v40, %v7374_v0  ;;  %v7317_v22 = vmul.f32 0.01, %v7285_v19  ;;  %vm7301_vm4 = vcmp.ge.f32.partialorder %v7285_v19, 0.0  ;;  %v15029_v0 = vsel %vm6721_vm13, -9e+08, %v16608_v37  ;;  %16621 = vst [vmem:[#allocation72_spill] sm:$0xff] %v15037_v51 }
0x1218   :  { %16619 = vst [vmem:[#allocation70_spill] sm:$0xff] %v15029_v0  ;;  %v15034_v40 = vadd.f32 %v7326_v34, %v15010_v31  ;;  %v15047_v8 = vadd.f32 %v7322_v59, %v15029_v0  ;;  %v7367_v34 = vsel %vm1811_vm14, %v7345_v43, -inf }
0x1219   :  { %v7333_v13 = vsel %vm7301_vm4, %v7285_v19, %v7317_v22  ;;  %v7369_v22 = vsel %vm1811_vm14, %v7346_v35, -inf }
0x121a   :  { %v7249_v16 = vpop.f32.mrf.mxu1  ;;  %v7361_v19 = vsel %vm1811_vm14, %v15034_v40, -inf  ;;  %v7349_v54 = vadd.f32 %v7333_v13, %v15037_v51  ;;  %v7354_v62 = vsel %vm1811_vm14, %v15047_v8, -inf }
0x121b   :  { %v7267_v46 = vadd.f32 %v7249_v16, %v15031_v7  ;;  %v7362_v59 = vmax.f32 %v7354_v62, %v7361_v19  ;;  %v16622_v16 = vmax.f32 %v14902_v44, %v14906_v26 }
0x121d   :  { %v7286_v63 = vadd.f32 %v14817_v36, %v7267_v46  ;;  %v7375_v36 = vsel %vm1811_vm14, %v7349_v54, -inf  ;;  %v7368_v37 = vmax.f32 %v16622_v16, %v7367_v34  ;;  %v7370_v13 = vmax.f32 %v7362_v59, %v7369_v22 }
0x121f   :  { %vm7302_vm8 = vcmp.ge.f32.partialorder %v7286_v63, 0.0  ;;  %v7318_v61 = vmul.f32 0.01, %v7286_v63  ;;  %v7376_v51 = vmax.f32 %v7368_v37, %v7375_v36 }
0x1221   :  { %v7334_v49 = vsel %vm7302_vm8, %v7286_v63, %v7318_v61 }
0x1222   :  { %v7350_v52 = vadd.f32 %v7334_v49, %v15056_v38 }
0x1224   :  { %v7377_v46 = vsel %vm1811_vm14, %v7350_v52, -inf }
0x1225   :  { %v7378_v32 = vmax.f32 %v7370_v13, %v7377_v46 }
0x1227   :  { %v7380_v55 = vmax.f32 %v7376_v51, %v7378_v32 }
0x1229   :  { %v7381_v0 = vmax.f32 %v7379_v25, %v7380_v55 }
0x122b   :  { %v7382_v7 = vrot.slane %v7381_v0, 4 }
0x122d   :  { %v7383_v31 = vmax.f32 %v7381_v0, %v7382_v7 }
0x122f   :  { %v7384_v58 = vrot.slane %v7383_v31, 2 }
0x1231   :  { %v7385_v19 = vmax.f32 %v7383_v31, %v7384_v58 }
0x1233   :  { %v7386_v63 = vrot.slane %v7385_v19, 1 }
0x1235   :  { %v15068_v61 = vmax.f32 %v7385_v19, %v7386_v63 }
0x1237   :  { %v7403_v62 = vsub.f32 %v7350_v52, %v15068_v61  ;;  %v7402_v49 = vsub.f32 %v7349_v54, %v15068_v61  ;;  %v7401_v44 = vsub.f32 %v14994_v1, %v15068_v61  ;;  %v7400_v26 = vsub.f32 %v14963_v29, %v15068_v61 }
0x1238   :  { %v7394_v25 = vsub.f32 %v14898_v41, %v15068_v61  ;;  %v7399_v31 = vsub.f32 %v7346_v35, %v15068_v61  ;;  %v7398_v0 = vsub.f32 %v7345_v43, %v15068_v61  ;;  %v7393_v7 = vsub.f32 %v14871_v56, %v15068_v61 }
0x1239   :  { %v7434_v34 = vmul.f32 1.442695, %v7403_v62  ;;  %v7432_v32 = vmul.f32 1.442695, %v7402_v49  ;;  %v7430_v58 = vmul.f32 1.442695, %v7401_v44  ;;  %v7392_v1 = vsub.f32 %v14844_v11, %v15068_v61 }
0x123a   :  { %v7428_v55 = vmul.f32 1.442695, %v7400_v26  ;;  %v7391_v29 = vsub.f32 %v15047_v8, %v15068_v61  ;;  %v7390_v41 = vsub.f32 %v14895_v39, %v15068_v61  ;;  %v7389_v51 = vsub.f32 %v14867_v10, %v15068_v61 }
0x123b   :  { %9853 = vpow2.f32 %v7434_v34  ;;  %v7388_v35 = vsub.f32 %v14837_v14, %v15068_v61  ;;  %v7426_v43 = vmul.f32 1.442695, %v7399_v31  ;;  %v7397_v56 = vsub.f32 %v14957_v2, %v15068_v61 }
0x123c   :  { %9855 = vpow2.f32 %v7432_v32  ;;  %v7424_v11 = vmul.f32 1.442695, %v7398_v0  ;;  %v7396_v8 = vsub.f32 %v14954_v9, %v15068_v61  ;;  %v7395_v14 = vsub.f32 %v15034_v40, %v15068_v61 }
0x123d   :  { %9857 = vpow2.f32 %v7430_v58  ;;  %v7422_v10 = vmul.f32 1.442695, %v7397_v56  ;;  %v7416_v52 = vmul.f32 1.442695, %v7394_v25  ;;  %v7414_v16 = vmul.f32 1.442695, %v7393_v7 }
0x123e   :  { %9859 = vpow2.f32 %v7428_v55  ;;  %v7420_v2 = vmul.f32 1.442695, %v7396_v8  ;;  %v7418_v9 = vmul.f32 1.442695, %v7395_v14  ;;  %v7412_v13 = vmul.f32 1.442695, %v7392_v1 }
0x123f   :  { %9861 = vpow2.f32 %v7426_v43  ;;  %v7410_v19 = vmul.f32 1.442695, %v7391_v29  ;;  %v7408_v61 = vmul.f32 1.442695, %v7390_v41  ;;  %v7406_v49 = vmul.f32 1.442695, %v7389_v51 }
0x1240   :  { %9863 = vpow2.f32 %v7424_v11  ;;  %v7404_v26 = vmul.f32 1.442695, %v7388_v35 }
0x1241   :  { %v15094_v54 = vpop.eup %9853  ;;  %9865 = vpow2.f32 %v7422_v10 }
0x1242   :  { %7436 = vmatpush.msra.mxu2 %v15094_v54  ;;  %v15099_v39 = vpop.eup %9855  ;;  %9867 = vpow2.f32 %v7420_v2 }
0x1243   :  { %v15104_v22 = vpop.eup %9857  ;;  %9869 = vpow2.f32 %v7418_v9 }
0x1244   :  { %7437 = vmatpush.msra.mxu2 %v15099_v39  ;;  %v15107_v59 = vpop.eup %9859  ;;  %9871 = vpow2.f32 %v7416_v52 }
0x1245   :  { %v15110_v36 = vpop.eup %9861  ;;  %9873 = vpow2.f32 %v7414_v16 }
0x1246   :  { %7438 = vmatpush.msra.mxu2 %v15104_v22  ;;  %v15113_v40 = vpop.eup %9863  ;;  %9875 = vpow2.f32 %v7412_v13 }
0x1247   :  { %v15116_v37 = vpop.eup %9865  ;;  %9877 = vpow2.f32 %v7410_v19 }
0x1248   :  { %7439 = vmatpush.msra.mxu2 %v15107_v59  ;;  %v15119_v46 = vpop.eup %9867  ;;  %9879 = vpow2.f32 %v7408_v61  ;;  %v10037_v61 = vld [vmem:[%s15898_s5 + $0x20] sm:$0xff] }
0x1249   :  { %v15122_v63 = vpop.eup %9869  ;;  %9881 = vpow2.f32 %v7406_v49 }
0x124a   :  { %7440 = vmatpush.msra.mxu2 %v15110_v36  ;;  %v15125_v62 = vpop.eup %9871  ;;  %9883 = vpow2.f32 %v7404_v26 }
0x124b   :  { %v15128_v44 = vpop.eup %9873 }
0x124c   :  { %7441 = vmatpush.msra.mxu2 %v15113_v40  ;;  %v15131_v34 = vpop.eup %9875 }
0x124d   :  { %v15134_v32 = vpop.eup %9877 }
0x124e   :  { %7442 = vmatpush.msra.mxu2 %v15116_v37  ;;  %v15137_v25 = vpop.eup %9879 }
0x124f   :  { %v15140_v58 = vpop.eup %9881 }
0x1250   :  { %7443 = vmatpush.msra.mxu2 %v15119_v46  ;;  %v15143_v31 = vpop.eup %9883 }
0x1252   :  { %7444 = vmatpush.msra.mxu2 %v15122_v63 }
0x1254   :  { %7445 = vmatpush.msra.mxu2 %v15125_v62 }
0x1256   :  { %7446 = vmatpush.msra.mxu2 %v15128_v44 }
0x1258   :  { %7447 = vmatpush.msra.mxu2 %v15131_v34 }
0x125a   :  { %7448 = vmatpush.msra.mxu2 %v15134_v32 }
0x125c   :  { %7449 = vmatpush.msra.mxu2 %v15137_v25 }
0x125e   :  { %7450 = vmatpush.msra.mxu2 %v15140_v58 }
0x1260   :  { %7451 = vmatpush.msra.mxu2 %v15143_v31 }
0x1261   :  { %7452 = vmatmul.f32.vlgmr.msra.gmra.mxu2 %v14630_v4 }
0x12e4   :  { %v7453_v55 = vpop.f32.mrf.mxu2 }
0x12e5   :  { %v7456_v0 = vmax.f32 %v7453_v55, 1e-20 }
0x12e7   :  { %7472 = vmatpush.msra.mxu0 %v7456_v0 }
0x12e8   :  { %9142 = vmatmul.msk.f32.vlgmr.msra.gmra.mxu0 %vm114_vm1, %v14692_v45 }
0x12f0   :  { %9143 = vmatmul.msk.f32.gmra.mxu0 %vm114_vm1, %v14699_v50 }
0x12f8   :  { %9144 = vmatmul.msk.f32.gmra.mxu0 %vm114_vm1, %v14706_v17 }
0x1300   :  { %9145 = vmatmul.msk.f32.gmra.mxu0 %vm114_vm1, %v14713_v30 }
0x1308   :  { %9146 = vmatmul.msk.f32.gmra.mxu0 %vm114_vm1, %v14720_v42 }
0x1310   :  { %9147 = vmatmul.msk.f32.gmra.mxu0 %vm114_vm1, %v14727_v20 }
0x1318   :  { %9148 = vmatmul.msk.f32.gmra.mxu0 %vm114_vm1, %v14734_v60 }
0x1320   :  { %9149 = vmatmul.msk.f32.gmra.mxu0 %vm114_vm1, %v14741_v47 }
0x1328   :  { %9150 = vmatmul.msk.f32.gmra.mxu0 %vm114_vm1, %v14748_v23 }
0x1330   :  { %9151 = vmatmul.msk.f32.gmra.mxu0 %vm114_vm1, %v14755_v18 }
0x1338   :  { %9152 = vmatmul.msk.f32.gmra.mxu0 %vm114_vm1, %v14762_v24 }
0x1340   :  { %9153 = vmatmul.msk.f32.gmra.mxu0 %vm114_vm1, %v14769_v5 }
0x1348   :  { %9154 = vmatmul.msk.f32.gmra.mxu0 %vm114_vm1, %v14779_v6 }
0x1350   :  { %9155 = vmatmul.msk.f32.gmra.mxu0 %vm114_vm1, %v14788_v57 }
0x1358   :  { %9156 = vmatmul.msk.f32.gmra.mxu0 %vm114_vm1, %v14797_v15 }
0x1360   :  { %9157 = vmatmul.msk.f32.gmra.mxu0 %vm114_vm1, %v14806_v48 }
0x1365   :  { %v15179_v45 = vpop.f32.mrf.mxu0 }
0x136d   :  { %v7477_v50 = vpop.f32.mrf.mxu0 }
0x1375   :  { %v15181_v17 = vpop.f32.mrf.mxu0 }
0x137d   :  { %v15183_v30 = vpop.f32.mrf.mxu0 }
0x1385   :  { %v7486_v42 = vpop.f32.mrf.mxu0 }
0x138d   :  { %v7489_v20 = vpop.f32.mrf.mxu0 }
0x1395   :  { %v15185_v60 = vpop.f32.mrf.mxu0 }
0x139d   :  { %v7495_v47 = vpop.f32.mrf.mxu0 }
0x13a5   :  { %v7498_v23 = vpop.f32.mrf.mxu0 }
0x13ad   :  { %v7501_v18 = vpop.f32.mrf.mxu0 }
0x13b5   :  { %v7504_v24 = vpop.f32.mrf.mxu0 }
0x13b6   :  { %9885 = vrcp.f32 %v7504_v24 }
0x13bc   :  { %v9886_v5 = vpop.eup %9885 }
0x13bd   :  { %v7548_v6 = vmul.f32 %v9886_v5, %v15113_v40  ;;  %v7507_v57 = vpop.f32.mrf.mxu0 }
0x13be   :  { %9887 = vrcp.f32 %v7507_v57 }
0x13bf   :  { %v15189_v15 = vmul.f32 %v14980_v12, %v7548_v6  ;;  %v10035_v12 = vld [vmem:[%s15898_s5 + $0x60] sm:$0xff] }
0x13c1   :  { %7622 = vperm.xlu1 %9336, %v15189_v15  }
0x13c4   :  { %v9888_v48 = vpop.eup %9887 }
0x13c5   :  { %v7549_v7 = vmul.f32 %v9888_v48, %v15110_v36  ;;  %v7510_v1 = vpop.f32.mrf.mxu0  ;;  %v16624_v48 = vld [vmem:[#allocation52_spill] sm:$0xff] }
0x13c6   :  { %9889 = vrcp.f32 %v7510_v1 }
0x13c7   :  { %v15194_v29 = vmul.f32 %v14987_v28, %v7549_v7  ;;  %v16625_v7 = vld [vmem:[#allocation49_spill] sm:$0xff] }
0x13c9   :  { %7627 = vperm.xlu0 %9334, %v15194_v29  }
0x13cc   :  { %v9890_v41 = vpop.eup %9889 }
0x13cd   :  { %v7550_v51 = vmul.f32 %v9890_v41, %v15107_v59  ;;  %v7513_v35 = vpop.f32.mrf.mxu0  ;;  %v16626_v41 = vld [vmem:[#allocation38_spill] sm:$0xff] }
0x13ce   :  { %9891 = vrcp.f32 %v7513_v35  ;;  %v16627_v35 = vld [vmem:[#allocation47_spill] sm:$0xff] }
0x13cf   :  { %v7566_v43 = vmul.f32 %v10035_v12, %v7550_v51  ;;  %9893 = vrcp.f32 %v7495_v47  ;;  %v10041_v47 = vld [vmem:[%s15898_s5 + $0x10] sm:$0xff] }
0x13d1   :  { %7632 = vperm.xlu2 %9335, %v7566_v43  }
0x13d4   :  { %v9892_v56 = vpop.eup %9891 }
0x13d5   :  { %v7551_v11 = vmul.f32 %v9892_v56, %v15104_v22  ;;  %v7516_v8 = vpop.f32.mrf.mxu0  ;;  %v9894_v10 = vpop.eup %9893  ;;  %v10036_v22 = vld [vmem:[%s15898_s5 + $0x38] sm:$0xff] }
0x13d6   :  { %9895 = vrcp.f32 %v7516_v8  ;;  %v7545_v14 = vmul.f32 %v9894_v10, %v15122_v63  ;;  %v16629_v8 = vld [vmem:[#allocation37_spill] sm:$0xff] }
0x13d7   :  { %v7567_v28 = vmul.f32 %v14943_v3, %v7551_v11  ;;  %9897 = vrcp.f32 %v7486_v42  ;;  %v16628_v11 = vld [vmem:[#allocation40_spill] sm:$0xff] }
0x13d8   :  { %9899 = vrcp.f32 %v7498_v23  ;;  %v7561_v52 = vmul.f32 %v10036_v22, %v7545_v14  ;;  %v16631_v22 = vld [vmem:[#allocation51_spill] sm:$0xff] }
0x13d9   :  { %7637 = vperm.xlu1 %9336, %v7567_v28  }
0x13dc   :  { %v9896_v2 = vpop.eup %9895 }
0x13dd   :  { %v7552_v59 = vmul.f32 %v9896_v2, %v15099_v39  ;;  %v7519_v9 = vpop.f32.mrf.mxu0  ;;  %v9898_v36 = vpop.eup %9897 }
0x13de   :  { %9901 = vrcp.f32 %v7519_v9  ;;  %v9900_v3 = vpop.eup %9899  ;;  %v7542_v16 = vmul.f32 %v9898_v36, %v15131_v34  ;;  %v16630_v9 = vld [vmem:[#allocation41_spill] sm:$0xff] }
0x13df   :  { %v7568_v40 = vmul.f32 %v15015_v53, %v7552_v59  ;;  %9903 = vrcp.f32 %v7477_v50  ;;  %v7546_v13 = vmul.f32 %v9900_v3, %v15119_v46  ;;  %v10039_v50 = vld [vmem:[%s15898_s5 + $0x28] sm:$0xff] }
0x13e0   :  { %9905 = vrcp.f32 %v7489_v20  ;;  %v7558_v49 = vmul.f32 %v10037_v61, %v7542_v16 }
0x13e1   :  { %7607 = vperm.xlu1 %9336, %v7561_v52   ;;  %7642 = vperm.xlu0 %9334, %v7568_v40   ;;  %9907 = vrcp.f32 %v7501_v18  ;;  %v7562_v53 = vmul.f32 %v14927_v33, %v7546_v13  ;;  %v10038_v33 = vld [vmem:[%s15898_s5 + $0x8] sm:$0xff]  ;;  %v10042_v18 = vld [vmem:[%s15898_s5 + $0x30] sm:$0xff] }
0x13e2   :  { %9909 = vrcp.f32 %v15181_v17  ;;  %v16633_v13 = vld [vmem:[#allocation44_spill] sm:$0xff] }
0x13e3   :  { %9911 = vrcp.f32 %v15185_v60 }
0x13e4   :  { %v9902_v39 = vpop.eup %9901  ;;  %9913 = vrcp.f32 %v15183_v30  ;;  %v10043_v30 = vld [vmem:[%s15898_s5 + $0x18] sm:$0xff] }
0x13e5   :  { %v7553_v19 = vmul.f32 %v9902_v39, %v15094_v54  ;;  %v9904_v63 = vpop.eup %9903  ;;  %9915 = vrcp.f32 %v15179_v45  ;;  %v10044_v45 = vld [vmem:[%s15898_s5] sm:$0xff] }
0x13e6   :  { %v9906_v55 = vpop.eup %9905  ;;  %v7539_v54 = vmul.f32 %v9904_v63, %v15140_v58 }
0x13e7   :  { %v7569_v26 = vmul.f32 %v15043_v27, %v7553_v19  ;;  %v9908_v0 = vpop.eup %9907  ;;  %v7543_v46 = vmul.f32 %v9906_v55, %v15128_v44  ;;  %v10040_v44 = vld [vmem:[%s15898_s5 + $0x48] sm:$0xff]  ;;  %v16635_v55 = vld [vmem:[#allocation55_spill] sm:$0xff] }
0x13e8   :  { %v7547_v34 = vmul.f32 %v9908_v0, %v15116_v37  ;;  %v7555_v27 = vmul.f32 %v10038_v33, %v7539_v54  ;;  %v9910_v42 = vpop.eup %9909 }
0x13e9   :  { %7592 = vperm.xlu1 %9336, %v7558_v49   ;;  %7612 = vperm.xlu0 %9334, %v7562_v53   ;;  %v7559_v17 = vmul.f32 %v10039_v50, %v7543_v46  ;;  %v9912_v37 = vpop.eup %9911  ;;  %v7540_v20 = vmul.f32 %v9910_v42, %v15137_v25 }
0x13ea   :  { %7647 = vperm.xlu2 %9335, %v7569_v26   ;;  %7750 = vmatpush.msrb.mxu2 %v7569_v26  ;;  %v7563_v58 = vmul.f32 %v10040_v44, %v7547_v34  ;;  %v7544_v60 = vmul.f32 %v9912_v37, %v15125_v62  ;;  %v9914_v5 = vpop.eup %9913  ;;  %v16638_v44 = vld [vmem:[#allocation50_spill] sm:$0xff] }
0x13eb   :  { %v7556_v23 = vmul.f32 %v10041_v47, %v7540_v20  ;;  %v7541_v62 = vmul.f32 %v9914_v5, %v15134_v32  ;;  %v9916_v25 = vpop.eup %9915  ;;  %v16639_v20 = vld [vmem:[#allocation45_spill] sm:$0xff] }
0x13ec   :  { %7751 = vmatpush.msrb.mxu2 %v7568_v40  ;;  %v7560_v24 = vmul.f32 %v10042_v18, %v7544_v60  ;;  %v7538_v57 = vmul.f32 %v9916_v25, %v15143_v31  ;;  %v16632_v40 = vld [vmem:[#allocation42_spill] sm:$0xff] }
0x13ed   :  { %v7557_v6 = vmul.f32 %v10043_v30, %v7541_v62  ;;  %v16641_v62 = vld [vmem:[#allocation10_spill] sm:$0xff] }
0x13ee   :  { %7752 = vmatpush.msrb.mxu2 %v7567_v28  ;;  %v7554_v32 = vmul.f32 %v10044_v45, %v7538_v57 }
0x13f0   :  { %7753 = vmatpush.msrb.mxu2 %v7566_v43 }
0x13f1   :  { %7577 = vperm.xlu1 %9336, %v7555_v27   ;;  %7597 = vperm.xlu0 %9334, %v7559_v17  }
0x13f2   :  { %7617 = vperm.xlu2 %9335, %v7563_v58   ;;  %7754 = vmatpush.msrb.mxu2 %v15194_v29 }
0x13f4   :  { %7755 = vmatpush.msrb.mxu2 %v15189_v15  ;;  %v16623_v15 = vld [vmem:[#allocation14_spill] sm:$0xff] }
0x13f6   :  { %7756 = vmatpush.msrb.mxu2 %v7563_v58 }
0x13f8   :  { %7757 = vmatpush.msrb.mxu2 %v7562_v53  ;;  %v16634_v53 = vld [vmem:[#allocation46_spill] sm:$0xff] }
0x13f9   :  { %7582 = vperm.xlu0 %9334, %v7556_v23  }
0x13fa   :  { %7602 = vperm.xlu2 %9335, %v7560_v24   ;;  %7758 = vmatpush.msrb.mxu2 %v7561_v52 }
0x13fc   :  { %7759 = vmatpush.msrb.mxu2 %v7560_v24  ;;  %v16640_v24 = vld [vmem:[#allocation59_spill] sm:$0xff] }
0x13fe   :  { %7760 = vmatpush.msrb.mxu2 %v7559_v17  ;;  %v16637_v17 = vld [vmem:[#allocation48_spill] sm:$0xff] }
0x1400   :  { %7761 = vmatpush.msrb.mxu2 %v7558_v49 }
0x1402   :  { %7587 = vperm.xlu2 %9335, %v7557_v6   ;;  %7762 = vmatpush.msrb.mxu2 %v7557_v6  ;;  %v16642_v6 = vld [vmem:[#allocation11_spill] sm:$0xff] }
0x1404   :  { %7763 = vmatpush.msrb.mxu2 %v7556_v23 }
0x1406   :  { %7764 = vmatpush.msrb.mxu2 %v7555_v27  ;;  %v16636_v27 = vld [vmem:[#allocation12_spill] sm:$0xff] }
0x1408   :  { %7765 = vmatpush.msrb.mxu2 %v7554_v32 }
0x1409   :  { %7766 = vmatmul.f32.vlgmr.msrb.gmra.mxu2 %v14630_v4 }
0x140a   :  { %7572 = vperm.xlu2 %9335, %v7554_v32   ;;  %7895 = vmatpush.msra.mxu2 %v14659_v21 }
0x140c   :  { %7896 = vmatpush.msra.mxu2 %v16623_v15 }
0x140e   :  { %7897 = vmatpush.msra.mxu2 %v16624_v48 }
0x1410   :  { %7898 = vmatpush.msra.mxu2 %v16625_v7 }
0x142b   :  { %v7633_v29 = vpop.permute.xlu2 %7632 }
0x142c   :  { %v7662_v21 = vmul.f32 %v7633_v29, %v16628_v11 }
0x1433   :  { %v7623_v31 = vpop.permute.xlu1 %7622 }
0x1434   :  { %v7660_v51 = vmul.f32 %v7623_v31, %v16626_v41 }
0x143b   :  { %v7628_v1 = vpop.permute.xlu0 %7627 }
0x143c   :  { %v7661_v12 = vmul.f32 %v7628_v1, %v16627_v35 }
0x143e   :  { %v9387_v43 = vpack.i.bf16 %v7660_v51, %v7661_v12 }
0x1440   :  { %9388 = vrot.lane.b32.xlu2 %v9387_v43, %s16562_s29 }
0x1444   :  { %v7648_v4 = vpop.permute.xlu2 %7647 }
0x1445   :  { %v7665_v36 = vmul.f32 %v7648_v4, %v16630_v9 }
0x144b   :  { %v7638_v56 = vpop.permute.xlu1 %7637 }
0x144c   :  { %v7663_v28 = vmul.f32 %v7638_v56, %v16629_v8  ;;  %v7618_v10 = vpop.permute.xlu2 %7617 }
0x144d   :  { %v7659_v26 = vmul.f32 %v7618_v10, %v16634_v53 }
0x144e   :  { %v9382_v14 = vpack.i.bf16 %v7662_v21, %v7663_v28 }
0x1450   :  { %9383 = vrot.lane.b32.xlu1 %v9382_v14, %s16562_s29 }
0x1453   :  { %v7608_v2 = vpop.permute.xlu1 %7607  ;;  %v7643_v59 = vpop.permute.xlu0 %7642 }
0x1454   :  { %v7657_v52 = vmul.f32 %v7608_v2, %v16631_v22  ;;  %v7664_v3 = vmul.f32 %v7643_v59, %v16632_v40  ;;  %v7603_v16 = vpop.permute.xlu2 %7602 }
0x1455   :  { %v7656_v39 = vmul.f32 %v7603_v16, %v16633_v13  ;;  %v16665_v13 = vld [vmem:[#allocation19_spill] sm:$0xff] }
0x1456   :  { %v9377_v19 = vpack.i.bf16 %v7664_v3, %v7665_v36 }
0x1457   :  { %v9397_v63 = vpack.i.bf16 %v7656_v39, %v7657_v52 }
0x1458   :  { %9378 = vrot.lane.b32.xlu0 %v9377_v19, %s16562_s29  ;;  %v15285_v19 = vld [vmem:[%s15905_s22 + $0x18] sm:$0xff] }
0x1459   :  { %9398 = vrot.lane.b32.xlu1 %v9397_v63, %s16562_s29  ;;  %v15290_v63 = vld [vmem:[%s15899_s7] sm:$0xff] }
0x145b   :  { %v7593_v61 = vpop.permute.xlu1 %7592  ;;  %v7613_v49 = vpop.permute.xlu0 %7612 }
0x145c   :  { %v7658_v0 = vmul.f32 %v7613_v49, %v16635_v55  ;;  %v7588_v54 = vpop.permute.xlu2 %7587  ;;  %v7654_v50 = vmul.f32 %v7593_v61, %v16636_v27  ;;  %v15296_v61 = vld [vmem:[%s15905_s22 + $0x10] sm:$0xff]  ;;  %v15302_v49 = vld [vmem:[%s15905_s22 + $0x8] sm:$0xff] }
0x145d   :  { %v7653_v5 = vmul.f32 %v7588_v54, %v16640_v24  ;;  %v15316_v54 = vld [vmem:[%s15907_s24 + $0x38] sm:$0xff]  ;;  %v16655_v24 = vld [vmem:[#allocation56_spill] sm:$0xff] }
0x145e   :  { %v9392_v46 = vpack.i.bf16 %v7658_v0, %v7659_v26  ;;  %v15309_v26 = vld [vmem:[%s15905_s22] sm:$0xff] }
0x1460   :  { %9393 = vrot.lane.b32.xlu0 %v9392_v46, %s16562_s29  ;;  %v15321_v46 = vld [vmem:[%s15907_s24 + $0x30] sm:$0xff] }
0x1461   :  { %16643 = vst [vmem:[#allocation73_spill] sm:$0xff] %v15321_v46 }
0x1463   :  { %v7578_v34 = vpop.permute.xlu1 %7577  ;;  %v7598_v33 = vpop.permute.xlu0 %7597 }
0x1464   :  { %v7651_v42 = vmul.f32 %v7578_v34, %v16637_v17  ;;  %v7655_v58 = vmul.f32 %v7598_v33, %v16638_v44  ;;  %v7573_v37 = vpop.permute.xlu2 %7572  ;;  %v15327_v34 = vld [vmem:[%s15907_s24 + $0x28] sm:$0xff]  ;;  %v15333_v33 = vld [vmem:[%s15907_s24 + $0x20] sm:$0xff] }
0x1465   :  { %v7650_v60 = vmul.f32 %v7573_v37, %v16639_v20  ;;  %16644 = vst [vmem:[#allocation74_spill] sm:$0xff] %v15327_v34  ;;  %v15354_v37 = vld [vmem:[%s15907_s24 + $0x8] sm:$0xff] }
0x1466   :  { %v9402_v47 = vpack.i.bf16 %v7654_v50, %v7655_v58  ;;  %16645 = vst [vmem:[#allocation75_spill] sm:$0xff] %v15333_v33  ;;  %v15339_v50 = vld [vmem:[%s15907_s24 + $0x18] sm:$0xff]  ;;  %v9466_v58 = vld [vmem:[%s15904_s23] ss:$0 sm:$0xff] }
0x1467   :  { %v9412_v23 = vpack.i.bf16 %v7650_v60, %v7651_v42  ;;  %16646 = vst [vmem:[#allocation77_spill] sm:$0xff] %v15339_v50  ;;  %v15345_v42 = vld [vmem:[%s15907_s24 + $0x10] sm:$0xff] }
0x1468   :  { %9403 = vrot.lane.b32.xlu2 %v9402_v47, %s16562_s29  ;;  %16647 = vst [vmem:[#allocation76_spill] sm:$0xff] %v15345_v42  ;;  %v15360_v47 = vld [vmem:[%s15907_s24] sm:$0xff] }
0x1469   :  { %9413 = vrot.lane.b32.xlu1 %v9412_v23, %s16562_s29  ;;  %16648 = vst [vmem:[#allocation78_spill] sm:$0xff] %v15354_v37 }
0x146a   :  { %16649 = vst [vmem:[#allocation79_spill] sm:$0xff] %v15360_v47 }
0x146b   :  { %v7583_v18 = vpop.permute.xlu0 %7582 }
0x146c   :  { %v7652_v25 = vmul.f32 %v7583_v18, %v16641_v62 }
0x146e   :  { %v9407_v30 = vpack.i.bf16 %v7652_v25, %v7653_v5 }
0x1470   :  { %9408 = vrot.lane.b32.xlu0 %v9407_v30, %s16562_s29 }
0x1478   :  { %7809 = vrot.lane.b32.xlu0 %v16642_v6, %s16558_s15 }
0x148c   :  { %v7767_v57 = vpop.f32.mrf.mxu2 }
0x148d   :  { %7772 = vperm.xlu2 %9335, %v7767_v57  }
0x149a   :  { %v9389_v31 = vpop.permute.xlu2 %9388 }
0x149b   :  { %v9390_v29 = vunpack.i.l.bf16 %v9389_v31  ;;  %v9391_v12 = vunpack.i.h.bf16 %v9389_v31 }
0x14c2   :  { %v9384_v15 = vpop.permute.xlu1 %9383  ;;  %v9404_v28 = vpop.permute.xlu2 %9403 }
0x14c3   :  { %v9385_v7 = vunpack.i.l.bf16 %v9384_v15  ;;  %v9386_v1 = vunpack.i.h.bf16 %v9384_v15  ;;  %v9405_v14 = vunpack.i.l.bf16 %v9404_v28  ;;  %v9406_v2 = vunpack.i.h.bf16 %v9404_v28 }
0x14ca   :  { %v9379_v45 = vpop.permute.xlu0 %9378 }
0x14cb   :  { %v9380_v32 = vunpack.i.l.bf16 %v9379_v45  ;;  %v9381_v48 = vunpack.i.h.bf16 %v9379_v45  ;;  %v9399_v4 = vpop.permute.xlu1 %9398 }
0x14cc   :  { %v9400_v21 = vunpack.i.l.bf16 %v9399_v4  ;;  %v9401_v10 = vunpack.i.h.bf16 %v9399_v4 }
0x14cd   :  { %7730 = vmatpush.msrb.mxu3 %v9380_v32 }
0x14cf   :  { %7731 = vmatpush.msrb.mxu3 %v9381_v48  ;;  %v9467_v48 = vld [vmem:[%s15906_s25] ss:$0 sm:$0xff] }
0x14d1   :  { %7732 = vmatpush.msrb.mxu3 %v9385_v7 }
0x14d2   :  { %v9394_v51 = vpop.permute.xlu0 %9393 }
0x14d3   :  { %7733 = vmatpush.msrb.mxu3 %v9386_v1  ;;  %v9395_v43 = vunpack.i.l.bf16 %v9394_v51  ;;  %v9396_v56 = vunpack.i.h.bf16 %v9394_v51 }
0x14d5   :  { %7734 = vmatpush.msrb.mxu3 %v9390_v29 }
0x14d7   :  { %7735 = vmatpush.msrb.mxu3 %v9391_v12 }
0x14d9   :  { %7736 = vmatpush.msrb.mxu3 %v9395_v43 }
0x14db   :  { %7737 = vmatpush.msrb.mxu3 %v9396_v56  ;;  %v9414_v52 = vpop.permute.xlu1 %9413 }
0x14dc   :  { %v9415_v16 = vunpack.i.l.bf16 %v9414_v52  ;;  %v9416_v39 = vunpack.i.h.bf16 %v9414_v52 }
0x14dd   :  { %7738 = vmatpush.msrb.mxu3 %v9400_v21 }
0x14df   :  { %7739 = vmatpush.msrb.mxu3 %v9401_v10 }
0x14e1   :  { %7740 = vmatpush.msrb.mxu3 %v9405_v14 }
0x14e2   :  { %v9409_v59 = vpop.permute.xlu0 %9408 }
0x14e3   :  { %v9410_v36 = vunpack.i.l.bf16 %v9409_v59  ;;  %7741 = vmatpush.msrb.mxu3 %v9406_v2  ;;  %v9411_v3 = vunpack.i.h.bf16 %v9409_v59 }
0x14e5   :  { %7742 = vmatpush.msrb.mxu3 %v9410_v36 }
0x14e7   :  { %7743 = vmatpush.msrb.mxu3 %v9411_v3  ;;  %v7773_v60 = vpop.permute.xlu2 %7772 }
0x14e8   :  { %v7778_v23 = vmul.f32 %v9466_v58, %v7773_v60 }
0x14e9   :  { %7744 = vmatpush.msrb.mxu3 %v9415_v16 }
0x14ea   :  { %v7810_v45 = vpop.permute.xlu0 %7809 }
0x14eb   :  { %7745 = vmatpush.msrb.mxu3 %v9416_v39 }
0x14ec   :  { %7746 = vmatmul.f32.vlgmr.msrb.gmra.mxu3 %v15290_v63 }
0x14ed   :  { %7794 = vmatpush.msra.mxu3 %v15285_v19 }
0x14ef   :  { %7795 = vmatpush.msra.mxu3 %v15296_v61 }
0x14f1   :  { %7796 = vmatpush.msra.mxu3 %v15302_v49 }
0x14f3   :  { %7797 = vmatpush.msra.mxu3 %v15309_v26 }
0x14f5   :  { %7827 = vmatpush.msrb.mxu3 %v15316_v54 }
0x14f7   :  { %7828 = vmatpush.msrb.mxu3 %v15321_v46  ;;  %v16681_v46 = vld [vmem:[#allocation69_spill] sm:$0xff] }
0x14f9   :  { %7829 = vmatpush.msrb.mxu3 %v15327_v34  ;;  %v16678_v34 = vld [vmem:[#allocation71_spill] sm:$0xff] }
0x14fb   :  { %7830 = vmatpush.msrb.mxu3 %v15333_v33  ;;  %v16672_v33 = vld [vmem:[#allocation16_spill] sm:$0xff] }
0x14fd   :  { %7831 = vmatpush.msrb.mxu3 %v15339_v50 }
0x14ff   :  { %7832 = vmatpush.msrb.mxu3 %v15345_v42  ;;  %v16671_v42 = vld [vmem:[#allocation4_spill] sm:$0xff] }
0x1501   :  { %7833 = vmatpush.msrb.mxu3 %v15354_v37  ;;  %v16670_v37 = vld [vmem:[#allocation66_spill] sm:$0xff] }
0x1503   :  { %7834 = vmatpush.msrb.mxu3 %v15360_v47 }
0x156f   :  { %v7747_v0 = vpop.f32.mrf.mxu3 }
0x1570   :  { %9158 = vmatmul.msk.f32.vlgmr.msra.gmra.mxu3 %vm1053_vm6, %v7747_v0 }
0x15f3   :  { %v7799_v18 = vpop.f32.mrf.mxu3 }
0x15f4   :  { %v7800_v5 = vadd.f32 %v7799_v18, %v7778_v23 }
0x15f6   :  { %v7803_v25 = vmin.f32 %v7800_v5, 0.0  ;;  %vm7802_vm2 = vcmp.gt.f32.partialorder %v7800_v5, 0.0 }
0x15f8   :  { %v7804_v30 = vmul.f32 1.442695, %v7803_v25 }
0x15fa   :  { %9917 = vpow2.f32 %v7804_v30 }
0x1600   :  { %v9918_v6 = vpop.eup %9917 }
0x1601   :  { %v9159_v57 = vadd.f32 -1.0, %v9918_v6  ;;  %v15380_v6 = vld [vmem:[%s15902_s6] sm:$0xff] }
0x1603   :  { %v7807_v32 = vsel %vm7802_vm2, %v7800_v5, %v9159_v57  ;;  %v15387_v57 = vld [vmem:[%s15902_s6 + $0x8] sm:$0xff] }
0x1604   :  { %v7812_v15 = vsel %vm1053_vm6, %v7807_v32, %v7810_v45  ;;  %v15401_v32 = vld [vmem:[%s15902_s6 + $0x18] sm:$0xff] }
0x1605   :  { %9160 = vmatmul.msk.f32.vlgmr.msrb.gmra.mxu3 %vm2964_vm11, %v7812_v15  ;;  %v15408_v15 = vld [vmem:[%s15902_s6 + $0x20] sm:$0xff] }
0x1688   :  { %v7836_v7 = vpop.f32.mrf.mxu3 }
0x1689   :  { %v7837_v31 = vadd.f32 %v9467_v48, %v7836_v7  ;;  %v15415_v48 = vld [vmem:[%s15902_s6 + $0x28] sm:$0xff]  ;;  %v15422_v7 = vld [vmem:[%s15902_s6 + $0x30] sm:$0xff] }
0x168b   :  { %7859 = vrot.lane.b32.xlu1 %v7837_v31, %s16558_s15  ;;  %v9161_v1 = vmul.f32 -1.442695, %v7837_v31 }
0x168d   :  { %9919 = vpow2.f32 %v9161_v1  ;;  %v15436_v1 = vld [vmem:[%s15902_s6 + $0x40] sm:$0xff] }
0x1693   :  { %v9920_v29 = vpop.eup %9919 }
0x1694   :  { %v7842_v51 = vadd.f32 1.0, %v9920_v29  ;;  %v15443_v29 = vld [vmem:[%s15902_s6 + $0x48] sm:$0xff] }
0x1696   :  { %9921 = vrcp.f32 %v7842_v51  ;;  %v7854_v28 = vand.u32 2147483648, %v7842_v51  ;;  %vm7848_vm12 = vweird.f32 %v7842_v51  ;;  %v7852_v10 = vand.u32 2147483647, %v7842_v51 }
0x1698   :  { %v7855_v2 = vor.u32 1.1754944e-38, %v7854_v28  ;;  %vm7853_vm13 = vcmp.eq.f32.partialorder %v7852_v10, 8.507059e+37 }
0x169c   :  { %v9922_v12 = vpop.eup %9921 }
0x169d   :  { %v7844_v43 = vmul.f32 %v9922_v12, %v7842_v51  ;;  %vm7849_vm9 = vweird.f32 %v9922_v12  ;;  %v15450_v51 = vld [vmem:[%s15902_s6 + $0x50] sm:$0xff] }
0x169e   :  { %vm7850_vm10 = vmor %vm7848_vm12, %vm7849_vm9 }
0x169f   :  { %v7845_v4 = vsub.f32 1.0, %v7844_v43  ;;  %v15464_v43 = vld [vmem:[%s15902_s6 + $0x60] sm:$0xff] }
0x16a1   :  { %v7846_v56 = vmul.f32 %v9922_v12, %v7845_v4  ;;  %v15471_v4 = vld [vmem:[%s15902_s6 + $0x68] sm:$0xff] }
0x16a3   :  { %v7847_v21 = vadd.f32 %v9922_v12, %v7846_v56  ;;  %v15478_v56 = vld [vmem:[%s15902_s6 + $0x70] sm:$0xff] }
0x16a5   :  { %v7851_v14 = vsel %vm7850_vm10, %v9922_v12, %v7847_v21  ;;  %v15457_v12 = vld [vmem:[%s15902_s6 + $0x58] sm:$0xff] }
0x16a6   :  { %v7856_v36 = vsel %vm7853_vm13, %v7855_v2, %v7851_v14  ;;  %v15485_v21 = vld [vmem:[%s15902_s6 + $0x78] sm:$0xff] }
0x16a7   :  { %v7869_v0 = vsub.f32 1.0, %v7856_v36  ;;  %v7875_v60 = vmul.f32 %v7856_v36, %v7810_v45  ;;  %v15394_v45 = vld [vmem:[%s15902_s6 + $0x10] sm:$0xff] }
0x16a8   :  { %v16651_v2 = vld [vmem:[#allocation54_spill] sm:$0xff] }
0x16fd   :  { %v7860_v59 = vpop.permute.xlu1 %7859 }
0x16fe   :  { %v7862_v52 = vmul.f32 %v7860_v59, %v7856_v36 }
0x1700   :  { %7864 = vrot.lane.b32.xlu2 %v7862_v52, %s16559_s18  ;;  %v15492_v52 = vld [vmem:[#allocation2] ss:$0 sm:$0xff] }
0x175a   :  { %v7865_v3 = vpop.permute.xlu2 %7864 }
0x175b   :  { %v7867_v16 = vadd.f32 %v7865_v3, %v7837_v31  ;;  %v15429_v31 = vld [vmem:[%s15902_s6 + $0x38] sm:$0xff] }
0x175d   :  { %9923 = vtanh.f32 %v7867_v16 }
0x1763   :  { %v9924_v39 = vpop.eup %9923 }
0x1764   :  { %7871 = vrot.lane.b32.xlu0 %v9924_v39, %s16562_s29  ;;  %v16652_v39 = vld [vmem:[#allocation53_spill] sm:$0xff] }
0x17d6   :  { %v7872_v58 = vpop.permute.xlu0 %7871 }
0x17d7   :  { %v7874_v23 = vmul.f32 %v7872_v58, %v7869_v0 }
0x17d9   :  { %v15372_v18 = vadd.f32 %v7875_v60, %v7874_v23  ;;  %v16653_v60 = vld [vmem:[#allocation58_spill] sm:$0xff] }
0x17db   :  { %16650 = vst [vmem:[#allocation80_spill] sm:$0xff] %v15372_v18  ;;  %v7877_v5 = vmax.f32 %v15372_v18, 0.0 }
0x17dd   :  { %7879 = vrot.lane.b32.xlu1 %v7877_v5, %s16562_s29 }
0x184f   :  { %v7880_v25 = vpop.permute.xlu1 %7879 }
0x1850   :  { %9162 = vmatmul.msk.f32.vlgmr.msra.gmra.mxu2 %vm1053_vm6, %v7880_v25 }
0x18d3   :  { %v7900_v30 = vpop.f32.mrf.mxu2 }
0x18d4   :  { %7918 = vmatpush.msra.mxu3 %v7900_v30 }
0x18d5   :  { %9163 = vmatmul.msk.f32.vlgmr.msra.gmra.mxu3 %vm114_vm1, %v15380_v6 }
0x18dd   :  { %9164 = vmatmul.msk.f32.gmra.mxu3 %vm114_vm1, %v15387_v57 }
0x18e5   :  { %9165 = vmatmul.msk.f32.gmra.mxu3 %vm114_vm1, %v15394_v45 }
0x18ed   :  { %9166 = vmatmul.msk.f32.gmra.mxu3 %vm114_vm1, %v15401_v32 }
0x18f5   :  { %9167 = vmatmul.msk.f32.gmra.mxu3 %vm114_vm1, %v15408_v15 }
0x18fd   :  { %9168 = vmatmul.msk.f32.gmra.mxu3 %vm114_vm1, %v15415_v48 }
0x1905   :  { %9169 = vmatmul.msk.f32.gmra.mxu3 %vm114_vm1, %v15422_v7 }
0x190d   :  { %9170 = vmatmul.msk.f32.gmra.mxu3 %vm114_vm1, %v15429_v31 }
0x1915   :  { %9171 = vmatmul.msk.f32.gmra.mxu3 %vm114_vm1, %v15436_v1 }
0x191d   :  { %9172 = vmatmul.msk.f32.gmra.mxu3 %vm114_vm1, %v15443_v29 }
0x1925   :  { %9173 = vmatmul.msk.f32.gmra.mxu3 %vm114_vm1, %v15450_v51 }
0x192d   :  { %9174 = vmatmul.msk.f32.gmra.mxu3 %vm114_vm1, %v15457_v12 }
0x1935   :  { %9175 = vmatmul.msk.f32.gmra.mxu3 %vm114_vm1, %v15464_v43 }
0x193d   :  { %9176 = vmatmul.msk.f32.gmra.mxu3 %vm114_vm1, %v15471_v4 }
0x1945   :  { %9177 = vmatmul.msk.f32.gmra.mxu3 %vm114_vm1, %v15478_v56 }
0x194d   :  { %9178 = vmatmul.msk.f32.gmra.mxu3 %vm114_vm1, %v15485_v21 }
0x1958   :  { %v7920_v28 = vpop.f32.mrf.mxu3 }
0x1959   :  { %v7968_v59 = vadd.f32 %v7920_v28, %v16651_v2  ;;  %v16654_v2 = vld [vmem:[#allocation60_spill] sm:$0xff] }
0x195b   :  { %v7984_v3 = vadd.f32 %v15492_v52, %v7968_v59 }
0x195d   :  { %v8016_v16 = vmul.f32 0.01, %v7984_v3  ;;  %vm8000_vm3 = vcmp.ge.f32.partialorder %v7984_v3, 0.0 }
0x195f   :  { %v8032_v5 = vsel %vm8000_vm3, %v7984_v3, %v8016_v16 }
0x1960   :  { %v7923_v10 = vpop.f32.mrf.mxu3  ;;  %v15500_v18 = vadd.f32 %v8032_v5, %v16654_v2  ;;  %v16658_v5 = vld [vmem:[#allocation15_spill] sm:$0xff]  ;;  %v16659_v2 = vld [vmem:[#allocation13_spill] sm:$0xff] }
0x1961   :  { %v7969_v0 = vadd.f32 %v7923_v10, %v16652_v39  ;;  %v16656_v10 = vld [vmem:[#allocation61_spill] sm:$0xff] }
0x1962   :  { %v15509_v16 = vsel %vm1811_vm14, %v15500_v18, -inf }
0x1963   :  { %v7985_v25 = vadd.f32 %v15492_v52, %v7969_v0 }
0x1965   :  { %v8017_v62 = vmul.f32 0.01, %v7985_v25  ;;  %vm8001_vm0 = vcmp.ge.f32.partialorder %v7985_v25, 0.0 }
0x1968   :  { %v7926_v14 = vpop.f32.mrf.mxu3 }
0x1969   :  { %v7970_v59 = vadd.f32 %v7926_v14, %v16655_v24 }
0x1970   :  { %v15490_v36 = vpop.f32.mrf.mxu3 }
0x1978   :  { %v7932_v58 = vpop.f32.mrf.mxu3 }
0x1979   :  { %v7972_v23 = vadd.f32 %v7932_v58, %v16653_v60  ;;  %v16657_v58 = vld [vmem:[#allocation63_spill] sm:$0xff]  ;;  %v8033_v60 = vsel %vm8001_vm0, %v7985_v25, %v8017_v62  ;;  %v16660_v62 = vld [vmem:[#allocation57_spill] sm:$0xff] }
0x197b   :  { %v7988_v30 = vadd.f32 %v15492_v52, %v7972_v23  ;;  %v7986_v23 = vadd.f32 %v15492_v52, %v7970_v59 }
0x197d   :  { %vm8004_vm15 = vcmp.ge.f32.partialorder %v7988_v30, 0.0  ;;  %v8020_v28 = vmul.f32 0.01, %v7988_v30  ;;  %vm8002_vm4 = vcmp.ge.f32.partialorder %v7986_v23, 0.0 }
0x197f   :  { %v8036_v20 = vsel %vm8004_vm15, %v7988_v30, %v8020_v28  ;;  %v8018_v30 = vmul.f32 0.01, %v7986_v23 }
0x1980   :  { %v15504_v39 = vadd.f32 %v8036_v20, %v16656_v10  ;;  %v7935_v44 = vpop.f32.mrf.mxu3 }
0x1981   :  { %v7973_v3 = vadd.f32 %v7935_v44, %v16657_v58  ;;  %v15520_v44 = vadd.f32 %v8033_v60, %v16658_v5  ;;  %v8034_v24 = vsel %vm8002_vm4, %v7986_v23, %v8018_v30 }
0x1982   :  { %v15513_v0 = vsel %vm1811_vm14, %v15504_v39, -inf }
0x1983   :  { %v7989_v20 = vadd.f32 %v15492_v52, %v7973_v3  ;;  %v8065_v59 = vsel %vm1811_vm14, %v15520_v44, -inf }
0x1985   :  { %vm8005_vm5 = vcmp.ge.f32.partialorder %v7989_v20, 0.0  ;;  %v8021_v14 = vmul.f32 0.01, %v7989_v20 }
0x1987   :  { %v8037_v28 = vsel %vm8005_vm5, %v7989_v20, %v8021_v14  ;;  %v16661_v20 = vld [vmem:[#allocation27_spill] sm:$0xff] }
0x1988   :  { %v15523_v10 = vadd.f32 %v8037_v28, %v16659_v2  ;;  %v7938_v58 = vpop.f32.mrf.mxu3  ;;  %v15532_v14 = vadd.f32 %v8034_v24, %v16661_v20  ;;  %v16662_v2 = vld [vmem:[#allocation22_spill] sm:$0xff]  ;;  %v16664_v20 = vld [vmem:[#allocation20_spill] sm:$0xff] }
0x1989   :  { %v7974_v25 = vadd.f32 %v7938_v58, %v16660_v62 }
0x198a   :  { %v8070_v3 = vsel %vm1811_vm14, %v15523_v10, -inf  ;;  %v15539_v62 = vsel %vm1811_vm14, %v15532_v14, -inf }
0x198b   :  { %v8071_v17 = vmax.f32 %v8065_v59, %v8070_v3  ;;  %v7990_v60 = vadd.f32 %v15492_v52, %v7974_v25 }
0x198d   :  { %vm8006_vm7 = vcmp.ge.f32.partialorder %v7990_v60, 0.0  ;;  %v8022_v5 = vmul.f32 0.01, %v7990_v60 }
0x198f   :  { %v8038_v28 = vsel %vm8006_vm7, %v7990_v60, %v8022_v5  ;;  %v16663_v60 = vld [vmem:[#allocation31_spill] sm:$0xff] }
0x1990   :  { %v15535_v27 = vadd.f32 %v8038_v28, %v16662_v2  ;;  %v7941_v58 = vpop.f32.mrf.mxu3 }
0x1992   :  { %v15543_v23 = vsel %vm1811_vm14, %v15535_v27, -inf }
0x1998   :  { %v7944_v25 = vpop.f32.mrf.mxu3 }
0x1999   :  { %v7976_v5 = vadd.f32 %v7944_v25, %v16663_v60  ;;  %v16666_v60 = vld [vmem:[#allocation64_spill] sm:$0xff] }
0x199b   :  { %v7992_v2 = vadd.f32 %v15492_v52, %v7976_v5  ;;  %v16667_v5 = vld [vmem:[#allocation18_spill] sm:$0xff] }
0x199d   :  { %v8024_v22 = vmul.f32 0.01, %v7992_v2  ;;  %vm8008_vm8 = vcmp.ge.f32.partialorder %v7992_v2, 0.0 }
0x199f   :  { %v8040_v11 = vsel %vm8008_vm8, %v7992_v2, %v8024_v22 }
0x19a0   :  { %v7947_v59 = vpop.f32.mrf.mxu3 }
0x19a1   :  { %v7977_v28 = vadd.f32 %v7947_v59, %v16664_v20  ;;  %v7975_v59 = vadd.f32 %v7941_v58, %v16666_v60 }
0x19a3   :  { %v7993_v55 = vadd.f32 %v15492_v52, %v7977_v28  ;;  %v16668_v28 = vld [vmem:[#allocation62_spill] sm:$0xff] }
0x19a4   :  { %v7971_v47 = vadd.f32 %v15490_v36, %v16668_v28 }
0x19a5   :  { %v8025_v9 = vmul.f32 0.01, %v7993_v55  ;;  %vm8009_vm2 = vcmp.ge.f32.partialorder %v7993_v55, 0.0 }
0x19a6   :  { %v7987_v36 = vadd.f32 %v15492_v52, %v7971_v47  ;;  %v16675_v47 = vmax.f32 %v15509_v16, %v15513_v0 }
0x19a7   :  { %v8041_v35 = vsel %vm8009_vm2, %v7993_v55, %v8025_v9  ;;  %v16673_v55 = vld [vmem:[#allocation17_spill] sm:$0xff] }
0x19a8   :  { %v7950_v24 = vpop.f32.mrf.mxu3  ;;  %v8019_v28 = vmul.f32 0.01, %v7987_v36  ;;  %vm8003_vm13 = vcmp.ge.f32.partialorder %v7987_v36, 0.0 }
0x19a9   :  { %v7978_v50 = vadd.f32 %v7950_v24, %v16671_v42  ;;  %v16674_v24 = vld [vmem:[#allocation23_spill] sm:$0xff] }
0x19ab   :  { %v7994_v42 = vadd.f32 %v15492_v52, %v7978_v50 }
0x19ad   :  { %v8026_v50 = vmul.f32 0.01, %v7994_v42  ;;  %vm8010_vm3 = vcmp.ge.f32.partialorder %v7994_v42, 0.0 }
0x19b0   :  { %v7953_v3 = vpop.f32.mrf.mxu3 }
0x19b1   :  { %v7979_v22 = vadd.f32 %v7953_v3, %v16672_v33 }
0x19b3   :  { %v7995_v33 = vadd.f32 %v15492_v52, %v7979_v22 }
0x19b5   :  { %v8027_v22 = vmul.f32 0.01, %v7995_v33  ;;  %vm8011_vm15 = vcmp.ge.f32.partialorder %v7995_v33, 0.0 }
0x19b8   :  { %v7956_v53 = vpop.f32.mrf.mxu3 }
0x19b9   :  { %v7980_v40 = vadd.f32 %v7956_v53, %v16665_v13  ;;  %v16669_v13 = vld [vmem:[#allocation6_spill] sm:$0xff] }
0x19ba   :  { %v15558_v53 = vadd.f32 %v8040_v11, %v16669_v13 }
0x19bb   :  { %v7996_v8 = vadd.f32 %v15492_v52, %v7980_v40  ;;  %v15561_v40 = vadd.f32 %v8041_v35, %v16670_v37 }
0x19bc   :  { %v8076_v11 = vsel %vm1811_vm14, %v15558_v53, -inf }
0x19bd   :  { %v8028_v30 = vmul.f32 0.01, %v7996_v8  ;;  %vm8012_vm9 = vcmp.ge.f32.partialorder %v7996_v8, 0.0  ;;  %v8078_v35 = vsel %vm1811_vm14, %v15561_v40, -inf  ;;  %v8077_v60 = vmax.f32 %v16675_v47, %v8076_v11 }
0x19be   :  { %v8042_v11 = vsel %vm8010_vm3, %v7994_v42, %v8026_v50  ;;  %v16682_v42 = vld [vmem:[#allocation72_spill] sm:$0xff] }
0x19bf   :  { %v8044_v20 = vsel %vm8012_vm9, %v7996_v8, %v8028_v30  ;;  %v7991_v8 = vadd.f32 %v15492_v52, %v7975_v59  ;;  %v8079_v59 = vmax.f32 %v8071_v17, %v8078_v35  ;;  %v8035_v17 = vsel %vm8003_vm13, %v7987_v36, %v8019_v28 }
0x19c0   :  { %v7959_v25 = vpop.f32.mrf.mxu3  ;;  %v15567_v58 = vadd.f32 %v8044_v20, %v16673_v55  ;;  %v16676_v20 = vld [vmem:[#allocation65_spill] sm:$0xff]  ;;  %v8043_v35 = vsel %vm8011_vm15, %v7995_v33, %v8027_v22 }
0x19c1   :  { %v7981_v41 = vadd.f32 %v7959_v25, %v16667_v5  ;;  %v8023_v25 = vmul.f32 0.01, %v7991_v8  ;;  %vm8007_vm10 = vcmp.ge.f32.partialorder %v7991_v8, 0.0 }
0x19c2   :  { %v8084_v37 = vsel %vm1811_vm14, %v15567_v58, -inf }
0x19c3   :  { %v7997_v9 = vadd.f32 %v15492_v52, %v7981_v41 }
0x19c5   :  { %vm8013_vm12 = vcmp.ge.f32.partialorder %v7997_v9, 0.0  ;;  %v8029_v30 = vmul.f32 0.01, %v7997_v9 }
0x19c7   :  { %v8045_v41 = vsel %vm8013_vm12, %v7997_v9, %v8029_v30  ;;  %v8085_v9 = vmax.f32 %v8077_v60, %v8084_v37  ;;  %v16679_v60 = vld [vmem:[#allocation70_spill] sm:$0xff] }
0x19c8   :  { %v15580_v3 = vadd.f32 %v8045_v41, %v16674_v24  ;;  %v7962_v2 = vpop.f32.mrf.mxu3  ;;  %v8039_v41 = vsel %vm8007_vm10, %v7991_v8, %v8023_v25  ;;  %v16677_v24 = vld [vmem:[#allocation67_spill] sm:$0xff]  ;;  %v8059_v8 = vadd.f32 %v8043_v35, %v16681_v46 }
0x19c9   :  { %v7982_v5 = vadd.f32 %v7962_v2, %v16676_v20  ;;  %v15590_v2 = vadd.f32 %v8039_v41, %v16677_v24 }
0x19ca   :  { %v8086_v13 = vsel %vm1811_vm14, %v15580_v3, -inf  ;;  %v8082_v22 = vsel %vm1811_vm14, %v8059_v8, -inf }
0x19cb   :  { %v8087_v55 = vmax.f32 %v8079_v59, %v8086_v13  ;;  %v7998_v30 = vadd.f32 %v15492_v52, %v7982_v5  ;;  %v15594_v59 = vadd.f32 %v8035_v17, %v16679_v60  ;;  %v16680_v5 = vld [vmem:[#allocation68_spill] sm:$0xff]  ;;  %v8074_v36 = vsel %vm1811_vm14, %v15590_v2, -inf }
0x19cc   :  { %v8058_v13 = vadd.f32 %v8042_v11, %v16680_v5 }
0x19cd   :  { %v8092_v16 = vmax.f32 %v8085_v9, %v8087_v55  ;;  %v8030_v0 = vmul.f32 0.01, %v7998_v30  ;;  %vm8014_vm0 = vcmp.ge.f32.partialorder %v7998_v30, 0.0  ;;  %v8067_v50 = vsel %vm1811_vm14, %v15594_v59, -inf }
0x19ce   :  { %v8075_v9 = vmax.f32 %v8067_v50, %v8074_v36 }
0x19cf   :  { %v8046_v20 = vsel %vm8014_vm0, %v7998_v30, %v8030_v0  ;;  %v16683_v30 = vmax.f32 %v15539_v62, %v15543_v23 }
0x19d0   :  { %v7965_v47 = vpop.f32.mrf.mxu3  ;;  %v8062_v33 = vadd.f32 %v8046_v20, %v16682_v42  ;;  %v8083_v0 = vmax.f32 %v8075_v9, %v8082_v22 }
0x19d1   :  { %v7983_v37 = vadd.f32 %v7965_v47, %v16678_v34  ;;  %v8080_v34 = vsel %vm1811_vm14, %v8058_v13, -inf }
0x19d2   :  { %v8088_v46 = vsel %vm1811_vm14, %v8062_v33, -inf  ;;  %v8081_v41 = vmax.f32 %v16683_v30, %v8080_v34 }
0x19d3   :  { %v7999_v25 = vadd.f32 %v15492_v52, %v7983_v37 }
0x19d4   :  { %v8089_v11 = vmax.f32 %v8081_v41, %v8088_v46 }
0x19d5   :  { %vm8015_vm5 = vcmp.ge.f32.partialorder %v7999_v25, 0.0  ;;  %v8031_v28 = vmul.f32 0.01, %v7999_v25 }
0x19d7   :  { %v8047_v55 = vsel %vm8015_vm5, %v7999_v25, %v8031_v28 }
0x19d8   :  { %v8063_v52 = vadd.f32 %v8047_v55, %v15056_v38 }
0x19da   :  { %v8090_v17 = vsel %vm1811_vm14, %v8063_v52, -inf }
0x19db   :  { %v8091_v35 = vmax.f32 %v8083_v0, %v8090_v17 }
0x19dd   :  { %v8093_v24 = vmax.f32 %v8089_v11, %v8091_v35 }
0x19df   :  { %v8094_v47 = vmax.f32 %v8092_v16, %v8093_v24 }
0x19e1   :  { %v8095_v20 = vrot.slane %v8094_v47, 4 }
0x19e3   :  { %v8096_v37 = vmax.f32 %v8094_v47, %v8095_v20 }
0x19e5   :  { %v8097_v60 = vrot.slane %v8096_v37, 2 }
0x19e7   :  { %v8098_v5 = vmax.f32 %v8096_v37, %v8097_v60 }
0x19e9   :  { %v8099_v25 = vrot.slane %v8098_v5, 1 }
0x19eb   :  { %v15612_v36 = vmax.f32 %v8098_v5, %v8099_v25 }
0x19ed   :  { %v8116_v38 = vsub.f32 %v8063_v52, %v15612_v36  ;;  %v8115_v42 = vsub.f32 %v8062_v33, %v15612_v36  ;;  %v8114_v62 = vsub.f32 %v15580_v3, %v15612_v36  ;;  %v8113_v23 = vsub.f32 %v15567_v58, %v15612_v36 }
0x19ee   :  { %v8107_v16 = vsub.f32 %v15535_v27, %v15612_v36  ;;  %v8112_v22 = vsub.f32 %v8059_v8, %v15612_v36  ;;  %v8111_v55 = vsub.f32 %v8058_v13, %v15612_v36  ;;  %v8106_v33 = vsub.f32 %v15523_v10, %v15612_v36 }
0x19ef   :  { %v8147_v28 = vmul.f32 1.442695, %v8116_v38  ;;  %v8145_v50 = vmul.f32 1.442695, %v8115_v42  ;;  %v8143_v34 = vmul.f32 1.442695, %v8114_v62  ;;  %v8105_v3 = vsub.f32 %v15504_v39, %v15612_v36 }
0x19f0   :  { %v8141_v9 = vmul.f32 1.442695, %v8113_v23  ;;  %v8104_v58 = vsub.f32 %v15594_v59, %v15612_v36  ;;  %v8103_v27 = vsub.f32 %v15532_v14, %v15612_v36  ;;  %v8102_v46 = vsub.f32 %v15520_v44, %v15612_v36 }
0x19f1   :  { %9925 = vpow2.f32 %v8147_v28  ;;  %v8101_v8 = vsub.f32 %v15500_v18, %v15612_v36  ;;  %v8139_v13 = vmul.f32 1.442695, %v8112_v22  ;;  %v8110_v10 = vsub.f32 %v15561_v40, %v15612_v36 }
0x19f2   :  { %9927 = vpow2.f32 %v8145_v50  ;;  %v8137_v39 = vmul.f32 1.442695, %v8111_v55  ;;  %v8109_v59 = vsub.f32 %v15558_v53, %v15612_v36  ;;  %v8108_v18 = vsub.f32 %v15590_v2, %v15612_v36 }
0x19f3   :  { %9929 = vpow2.f32 %v8143_v34  ;;  %v8135_v44 = vmul.f32 1.442695, %v8110_v10  ;;  %v8129_v17 = vmul.f32 1.442695, %v8107_v16  ;;  %v8127_v11 = vmul.f32 1.442695, %v8106_v33 }
0x19f4   :  { %9931 = vpow2.f32 %v8141_v9  ;;  %v8133_v40 = vmul.f32 1.442695, %v8109_v59  ;;  %v8131_v53 = vmul.f32 1.442695, %v8108_v18  ;;  %v8125_v24 = vmul.f32 1.442695, %v8105_v3 }
0x19f5   :  { %9933 = vpow2.f32 %v8139_v13  ;;  %v8123_v20 = vmul.f32 1.442695, %v8104_v58  ;;  %v8121_v60 = vmul.f32 1.442695, %v8103_v27  ;;  %v8119_v25 = vmul.f32 1.442695, %v8102_v46 }
0x19f6   :  { %9935 = vpow2.f32 %v8137_v39  ;;  %v8117_v38 = vmul.f32 1.442695, %v8101_v8  ;;  %v10064_v33 = vld [vmem:[%s15898_s5 + $0x58] sm:$0xff]  ;;  %v10065_v8 = vld [vmem:[%s15898_s5 + $0x60] sm:$0xff] }
0x19f7   :  { %v15638_v52 = vpop.eup %9925  ;;  %9937 = vpow2.f32 %v8135_v44  ;;  %v10066_v44 = vld [vmem:[%s15898_s5 + $0x68] sm:$0xff] }
0x19f8   :  { %8149 = vmatpush.msrb.mxu2 %v15638_v52  ;;  %v15643_v14 = vpop.eup %9927  ;;  %9939 = vpow2.f32 %v8133_v40 }
0x19f9   :  { %v15648_v30 = vpop.eup %9929  ;;  %9941 = vpow2.f32 %v8131_v53 }
0x19fa   :  { %8150 = vmatpush.msrb.mxu2 %v15643_v14  ;;  %v15651_v41 = vpop.eup %9931  ;;  %9943 = vpow2.f32 %v8129_v17 }
0x19fb   :  { %v15654_v0 = vpop.eup %9933  ;;  %9945 = vpow2.f32 %v8127_v11 }
0x19fc   :  { %8151 = vmatpush.msrb.mxu2 %v15648_v30  ;;  %v15657_v2 = vpop.eup %9935  ;;  %9947 = vpow2.f32 %v8125_v24  ;;  %v10068_v24 = vld [vmem:[%s15898_s5 + $0x70] sm:$0xff] }
0x19fd   :  { %v15660_v35 = vpop.eup %9937  ;;  %9949 = vpow2.f32 %v8123_v20 }
0x19fe   :  { %8152 = vmatpush.msrb.mxu2 %v15651_v41  ;;  %v15663_v47 = vpop.eup %9939  ;;  %9951 = vpow2.f32 %v8121_v60 }
0x19ff   :  { %v15666_v37 = vpop.eup %9941  ;;  %9953 = vpow2.f32 %v8119_v25 }
0x1a00   :  { %8153 = vmatpush.msrb.mxu2 %v15654_v0  ;;  %v15669_v5 = vpop.eup %9943  ;;  %9955 = vpow2.f32 %v8117_v38 }
0x1a01   :  { %v15672_v36 = vpop.eup %9945 }
0x1a02   :  { %8154 = vmatpush.msrb.mxu2 %v15657_v2  ;;  %v15675_v42 = vpop.eup %9947 }
0x1a03   :  { %v15678_v62 = vpop.eup %9949 }
0x1a04   :  { %8155 = vmatpush.msrb.mxu2 %v15660_v35  ;;  %v15681_v23 = vpop.eup %9951 }
0x1a05   :  { %v15684_v28 = vpop.eup %9953 }
0x1a06   :  { %8156 = vmatpush.msrb.mxu2 %v15663_v47  ;;  %v15687_v50 = vpop.eup %9955 }
0x1a08   :  { %8157 = vmatpush.msrb.mxu2 %v15666_v37 }
0x1a0a   :  { %8158 = vmatpush.msrb.mxu2 %v15669_v5 }
0x1a0c   :  { %8159 = vmatpush.msrb.mxu2 %v15672_v36 }
0x1a0e   :  { %8160 = vmatpush.msrb.mxu2 %v15675_v42 }
0x1a10   :  { %8161 = vmatpush.msrb.mxu2 %v15678_v62 }
0x1a12   :  { %8162 = vmatpush.msrb.mxu2 %v15681_v23 }
0x1a14   :  { %8163 = vmatpush.msrb.mxu2 %v15684_v28 }
0x1a16   :  { %8164 = vmatpush.msrb.mxu2 %v15687_v50 }
0x1a17   :  { %8165 = vmatmul.f32.vlgmr.msrb.gmra.mxu2 %v15290_v63 }
0x1a9a   :  { %v8166_v16 = vpop.f32.mrf.mxu2 }
0x1a9b   :  { %v8169_v34 = vmax.f32 %v8166_v16, 1e-20 }
0x1a9d   :  { %8185 = vmatpush.msra.mxu2 %v8169_v34  ;;  %v10069_v34 = vld [vmem:[%s15898_s5 + $0x20] sm:$0xff] }
0x1a9e   :  { %9179 = vmatmul.msk.f32.vlgmr.msra.gmra.mxu2 %vm114_vm1, %v15380_v6 }
0x1aa6   :  { %9180 = vmatmul.msk.f32.gmra.mxu2 %vm114_vm1, %v15387_v57 }
0x1aae   :  { %9181 = vmatmul.msk.f32.gmra.mxu2 %vm114_vm1, %v15394_v45 }
0x1ab6   :  { %9182 = vmatmul.msk.f32.gmra.mxu2 %vm114_vm1, %v15401_v32 }
0x1abe   :  { %9183 = vmatmul.msk.f32.gmra.mxu2 %vm114_vm1, %v15408_v15 }
0x1ac6   :  { %9184 = vmatmul.msk.f32.gmra.mxu2 %vm114_vm1, %v15415_v48 }
0x1ace   :  { %9185 = vmatmul.msk.f32.gmra.mxu2 %vm114_vm1, %v15422_v7 }
0x1ad6   :  { %9186 = vmatmul.msk.f32.gmra.mxu2 %vm114_vm1, %v15429_v31 }
0x1ade   :  { %9187 = vmatmul.msk.f32.gmra.mxu2 %vm114_vm1, %v15436_v1 }
0x1ae6   :  { %9188 = vmatmul.msk.f32.gmra.mxu2 %vm114_vm1, %v15443_v29 }
0x1aee   :  { %9189 = vmatmul.msk.f32.gmra.mxu2 %vm114_vm1, %v15450_v51 }
0x1af6   :  { %9190 = vmatmul.msk.f32.gmra.mxu2 %vm114_vm1, %v15457_v12 }
0x1afe   :  { %9191 = vmatmul.msk.f32.gmra.mxu2 %vm114_vm1, %v15464_v43 }
0x1b06   :  { %9192 = vmatmul.msk.f32.gmra.mxu2 %vm114_vm1, %v15471_v4 }
0x1b0e   :  { %9193 = vmatmul.msk.f32.gmra.mxu2 %vm114_vm1, %v15478_v56  ;;  %v10063_v56 = vld [vmem:[%s15898_s5 + $0x50] sm:$0xff] }
0x1b16   :  { %9194 = vmatmul.msk.f32.gmra.mxu2 %vm114_vm1, %v15485_v21 }
0x1b21   :  { %v15723_v6 = vpop.f32.mrf.mxu2 }
0x1b29   :  { %v8190_v57 = vpop.f32.mrf.mxu2 }
0x1b31   :  { %v15725_v45 = vpop.f32.mrf.mxu2 }
0x1b39   :  { %v15727_v32 = vpop.f32.mrf.mxu2 }
0x1b41   :  { %v8199_v15 = vpop.f32.mrf.mxu2 }
0x1b49   :  { %v8202_v48 = vpop.f32.mrf.mxu2 }
0x1b51   :  { %v15729_v7 = vpop.f32.mrf.mxu2 }
0x1b59   :  { %v8208_v31 = vpop.f32.mrf.mxu2 }
0x1b61   :  { %v8211_v1 = vpop.f32.mrf.mxu2 }
0x1b69   :  { %v8214_v29 = vpop.f32.mrf.mxu2 }
0x1b71   :  { %v8217_v51 = vpop.f32.mrf.mxu2 }
0x1b72   :  { %9957 = vrcp.f32 %v8217_v51 }
0x1b78   :  { %v9958_v12 = vpop.eup %9957 }
0x1b79   :  { %v8261_v43 = vmul.f32 %v9958_v12, %v15657_v2  ;;  %v8220_v4 = vpop.f32.mrf.mxu2  ;;  %v10072_v12 = vld [vmem:[%s15898_s5 + $0x8] sm:$0xff] }
0x1b7a   :  { %9959 = vrcp.f32 %v8220_v4 }
0x1b7b   :  { %v15735_v21 = vmul.f32 %v10063_v56, %v8261_v43 }
0x1b7d   :  { %8335 = vperm.xlu1 %9336, %v15735_v21  }
0x1b80   :  { %v9960_v22 = vpop.eup %9959 }
0x1b81   :  { %v8262_v9 = vmul.f32 %v9960_v22, %v15654_v0  ;;  %v8223_v55 = vpop.f32.mrf.mxu2 }
0x1b82   :  { %9961 = vrcp.f32 %v8223_v55 }
0x1b83   :  { %v15742_v3 = vmul.f32 %v10064_v33, %v8262_v9  ;;  %v10075_v9 = vld [vmem:[%s15898_s5 + $0x10] sm:$0xff] }
0x1b84   :  { %v10076_v33 = vld [vmem:[%s15898_s5 + $0x30] sm:$0xff] }
0x1b85   :  { %8340 = vperm.xlu0 %9334, %v15742_v3  }
0x1b88   :  { %v9962_v58 = vpop.eup %9961 }
0x1b89   :  { %v8263_v27 = vmul.f32 %v9962_v58, %v15651_v41  ;;  %v8226_v46 = vpop.f32.mrf.mxu2 }
0x1b8a   :  { %9963 = vrcp.f32 %v8226_v46  ;;  %v16685_v46 = vld [vmem:[#allocation74_spill] sm:$0xff] }
0x1b8b   :  { %v8279_v13 = vmul.f32 %v10065_v8, %v8263_v27  ;;  %9965 = vrcp.f32 %v8208_v31  ;;  %v16686_v8 = vld [vmem:[#allocation75_spill] sm:$0xff] }
0x1b8d   :  { %8345 = vperm.xlu2 %9335, %v8279_v13  }
0x1b90   :  { %v9964_v10 = vpop.eup %9963 }
0x1b91   :  { %v8264_v39 = vmul.f32 %v9964_v10, %v15648_v30  ;;  %v8229_v59 = vpop.f32.mrf.mxu2  ;;  %v9966_v40 = vpop.eup %9965  ;;  %v10067_v30 = vld [vmem:[%s15898_s5 + $0x38] sm:$0xff] }
0x1b92   :  { %9967 = vrcp.f32 %v8229_v59  ;;  %v8258_v41 = vmul.f32 %v9966_v40, %v15666_v37  ;;  %v16689_v10 = vld [vmem:[#allocation78_spill] sm:$0xff] }
0x1b93   :  { %v8280_v18 = vmul.f32 %v10066_v44, %v8264_v39  ;;  %9969 = vrcp.f32 %v8199_v15 }
0x1b94   :  { %9971 = vrcp.f32 %v8211_v1  ;;  %v8274_v11 = vmul.f32 %v10067_v30, %v8258_v41 }
0x1b95   :  { %8350 = vperm.xlu1 %9336, %v8280_v18  }
0x1b98   :  { %v9968_v53 = vpop.eup %9967 }
0x1b99   :  { %v8265_v0 = vmul.f32 %v9968_v53, %v15643_v14  ;;  %v8232_v17 = vpop.f32.mrf.mxu2  ;;  %v9970_v2 = vpop.eup %9969  ;;  %v16693_v53 = vld [vmem:[#allocation40_spill] sm:$0xff] }
0x1b9a   :  { %9973 = vrcp.f32 %v8232_v17  ;;  %v9972_v60 = vpop.eup %9971  ;;  %v8255_v14 = vmul.f32 %v9970_v2, %v15675_v42  ;;  %v10071_v42 = vld [vmem:[%s15898_s5 + $0x78] sm:$0xff]  ;;  %v16694_v17 = vld [vmem:[#allocation37_spill] sm:$0xff] }
0x1b9b   :  { %v8281_v20 = vmul.f32 %v10068_v24, %v8265_v0  ;;  %9975 = vrcp.f32 %v8190_v57  ;;  %v8259_v37 = vmul.f32 %v9972_v60, %v15663_v47  ;;  %v10070_v57 = vld [vmem:[%s15898_s5 + $0x40] sm:$0xff]  ;;  %v16695_v60 = vld [vmem:[#allocation41_spill] sm:$0xff] }
0x1b9c   :  { %9977 = vrcp.f32 %v8202_v48  ;;  %v8271_v15 = vmul.f32 %v10069_v34, %v8255_v14 }
0x1b9d   :  { %8320 = vperm.xlu1 %9336, %v8274_v11   ;;  %8355 = vperm.xlu0 %9334, %v8281_v20   ;;  %9979 = vrcp.f32 %v8214_v29  ;;  %v8275_v31 = vmul.f32 %v10070_v57, %v8259_v37  ;;  %v16696_v37 = vld [vmem:[#allocation51_spill] sm:$0xff] }
0x1b9e   :  { %9981 = vrcp.f32 %v15725_v45  ;;  %v10073_v45 = vld [vmem:[%s15898_s5 + $0x28] sm:$0xff] }
0x1b9f   :  { %9983 = vrcp.f32 %v15729_v7 }
0x1ba0   :  { %v9974_v25 = vpop.eup %9973  ;;  %9985 = vrcp.f32 %v15727_v32  ;;  %v10077_v32 = vld [vmem:[%s15898_s5 + $0x18] sm:$0xff] }
0x1ba1   :  { %v8266_v38 = vmul.f32 %v9974_v25, %v15638_v52  ;;  %v9976_v16 = vpop.eup %9975  ;;  %9987 = vrcp.f32 %v15723_v6  ;;  %v10078_v6 = vld [vmem:[%s15898_s5] sm:$0xff] }
0x1ba2   :  { %v9978_v48 = vpop.eup %9977  ;;  %v8252_v52 = vmul.f32 %v9976_v16, %v15684_v28 }
0x1ba3   :  { %v8282_v47 = vmul.f32 %v10071_v42, %v8266_v38  ;;  %v9980_v1 = vpop.eup %9979  ;;  %v8256_v29 = vmul.f32 %v9978_v48, %v15672_v36  ;;  %v10074_v36 = vld [vmem:[%s15898_s5 + $0x48] sm:$0xff]  ;;  %v16697_v38 = vld [vmem:[#allocation42_spill] sm:$0xff] }
0x1ba4   :  { %v8260_v51 = vmul.f32 %v9980_v1, %v15660_v35  ;;  %v8268_v43 = vmul.f32 %v10072_v12, %v8252_v52  ;;  %v9982_v56 = vpop.eup %9981  ;;  %v16699_v1 = vld [vmem:[#allocation46_spill] sm:$0xff] }
0x1ba5   :  { %8305 = vperm.xlu1 %9336, %v8271_v15   ;;  %8325 = vperm.xlu0 %9334, %v8275_v31   ;;  %v8272_v4 = vmul.f32 %v10073_v45, %v8256_v29  ;;  %v9984_v35 = vpop.eup %9983  ;;  %v8253_v7 = vmul.f32 %v9982_v56, %v15681_v23  ;;  %v16700_v29 = vld [vmem:[#allocation55_spill] sm:$0xff]  ;;  %v16701_v56 = vld [vmem:[#allocation12_spill] sm:$0xff] }
0x1ba6   :  { %8360 = vperm.xlu2 %9335, %v8282_v47   ;;  %8463 = vmatpush.msrb.mxu0 %v8282_v47  ;;  %v8276_v28 = vmul.f32 %v10074_v36, %v8260_v51  ;;  %v8257_v22 = vmul.f32 %v9984_v35, %v15669_v5  ;;  %v9986_v58 = vpop.eup %9985 }
0x1ba7   :  { %v8269_v55 = vmul.f32 %v10075_v9, %v8253_v7  ;;  %v8254_v5 = vmul.f32 %v9986_v58, %v15678_v62  ;;  %v9988_v23 = vpop.eup %9987  ;;  %v16703_v7 = vld [vmem:[#allocation50_spill] sm:$0xff] }
0x1ba8   :  { %8464 = vmatpush.msrb.mxu0 %v8281_v20  ;;  %v8251_v27 = vmul.f32 %v9988_v23, %v15687_v50  ;;  %v16684_v50 = vld [vmem:[#allocation73_spill] sm:$0xff]  ;;  %v16705_v23 = vld [vmem:[#allocation59_spill] sm:$0xff] }
0x1baa   :  { %8465 = vmatpush.msrb.mxu0 %v8280_v18  ;;  %v8267_v62 = vmul.f32 %v10078_v6, %v8251_v27 }
0x1bac   :  { %8466 = vmatpush.msrb.mxu0 %v8279_v13  ;;  %v16687_v13 = vld [vmem:[#allocation77_spill] sm:$0xff] }
0x1bad   :  { %8290 = vperm.xlu1 %9336, %v8268_v43   ;;  %8310 = vperm.xlu0 %9334, %v8272_v4  }
0x1bae   :  { %8330 = vperm.xlu2 %9335, %v8276_v28   ;;  %8467 = vmatpush.msrb.mxu0 %v15742_v3  ;;  %v8273_v3 = vmul.f32 %v10076_v33, %v8257_v22 }
0x1bb0   :  { %8468 = vmatpush.msrb.mxu0 %v15735_v21  ;;  %v8270_v21 = vmul.f32 %v10077_v32, %v8254_v5 }
0x1bb2   :  { %8469 = vmatpush.msrb.mxu0 %v8276_v28  ;;  %v16702_v28 = vld [vmem:[#allocation48_spill] sm:$0xff] }
0x1bb4   :  { %8470 = vmatpush.msrb.mxu0 %v8275_v31 }
0x1bb5   :  { %8295 = vperm.xlu0 %9334, %v8269_v55  }
0x1bb6   :  { %8315 = vperm.xlu2 %9335, %v8273_v3   ;;  %8471 = vmatpush.msrb.mxu0 %v8274_v11 }
0x1bb8   :  { %8472 = vmatpush.msrb.mxu0 %v8273_v3 }
0x1bba   :  { %8473 = vmatpush.msrb.mxu0 %v8272_v4 }
0x1bbc   :  { %8474 = vmatpush.msrb.mxu0 %v8271_v15  ;;  %v16698_v15 = vld [vmem:[#allocation44_spill] sm:$0xff] }
0x1bbe   :  { %8300 = vperm.xlu2 %9335, %v8270_v21   ;;  %8475 = vmatpush.msrb.mxu0 %v8270_v21  ;;  %v16706_v21 = vld [vmem:[#allocation10_spill] sm:$0xff] }
0x1bc0   :  { %8476 = vmatpush.msrb.mxu0 %v8269_v55  ;;  %v16704_v55 = vld [vmem:[#allocation45_spill] sm:$0xff] }
0x1bc2   :  { %8477 = vmatpush.msrb.mxu0 %v8268_v43 }
0x1bc4   :  { %8478 = vmatpush.msrb.mxu0 %v8267_v62 }
0x1bc5   :  { %8479 = vmatmul.f32.vlgmr.msrb.gmra.mxu0 %v15290_v63  ;;  %v16688_v63 = vld [vmem:[#allocation76_spill] sm:$0xff] }
0x1bc6   :  { %8285 = vperm.xlu2 %9335, %v8267_v62   ;;  %8504 = vmatpush.msra.mxu0 %v15285_v19  ;;  %v16690_v19 = vld [vmem:[#allocation79_spill] sm:$0xff] }
0x1bc8   :  { %8505 = vmatpush.msra.mxu0 %v15296_v61 }
0x1bca   :  { %8506 = vmatpush.msra.mxu0 %v15302_v49 }
0x1bcc   :  { %8507 = vmatpush.msra.mxu0 %v15309_v26  ;;  %v16691_v26 = vld [vmem:[#allocation38_spill] sm:$0xff] }
0x1bce   :  { %8530 = vmatpush.msrb.mxu0 %v15316_v54  ;;  %v16692_v54 = vld [vmem:[#allocation47_spill] sm:$0xff] }
0x1bd0   :  { %8531 = vmatpush.msrb.mxu0 %v16684_v50 }
0x1bd2   :  { %8532 = vmatpush.msrb.mxu0 %v16685_v46 }
0x1bd4   :  { %8533 = vmatpush.msrb.mxu0 %v16686_v8 }
0x1bd6   :  { %8534 = vmatpush.msrb.mxu0 %v16687_v13 }
0x1bd8   :  { %8535 = vmatpush.msrb.mxu0 %v16688_v63 }
0x1bda   :  { %8536 = vmatpush.msrb.mxu0 %v16689_v10 }
0x1bdc   :  { %8537 = vmatpush.msrb.mxu0 %v16690_v19 }
0x1be7   :  { %v8346_v39 = vpop.permute.xlu2 %8345 }
0x1be8   :  { %v8375_v0 = vmul.f32 %v8346_v39, %v16693_v53 }
0x1bef   :  { %v8336_v61 = vpop.permute.xlu1 %8335 }
0x1bf0   :  { %v8373_v59 = vmul.f32 %v8336_v61, %v16691_v26 }
0x1bf7   :  { %v8341_v49 = vpop.permute.xlu0 %8340 }
0x1bf8   :  { %v8374_v44 = vmul.f32 %v8341_v49, %v16692_v54 }
0x1bfa   :  { %v9427_v18 = vpack.i.bf16 %v8373_v59, %v8374_v44 }
0x1bfc   :  { %9428 = vrot.lane.b32.xlu2 %v9427_v18, %s16562_s29 }
0x1c00   :  { %v8361_v40 = vpop.permute.xlu2 %8360 }
0x1c01   :  { %v8378_v14 = vmul.f32 %v8361_v40, %v16695_v60 }
0x1c07   :  { %v8351_v41 = vpop.permute.xlu1 %8350 }
0x1c08   :  { %v8376_v2 = vmul.f32 %v8351_v41, %v16694_v17  ;;  %v8331_v30 = vpop.permute.xlu2 %8330 }
0x1c09   :  { %v8372_v52 = vmul.f32 %v8331_v30, %v16699_v1 }
0x1c0a   :  { %v9422_v11 = vpack.i.bf16 %v8375_v0, %v8376_v2 }
0x1c0c   :  { %9423 = vrot.lane.b32.xlu1 %v9422_v11, %s16562_s29 }
0x1c0f   :  { %v8321_v24 = vpop.permute.xlu1 %8320  ;;  %v8356_v20 = vpop.permute.xlu0 %8355 }
0x1c10   :  { %v8370_v25 = vmul.f32 %v8321_v24, %v16696_v37  ;;  %v8377_v16 = vmul.f32 %v8356_v20, %v16697_v38  ;;  %v8316_v34 = vpop.permute.xlu2 %8315  ;;  %v10079_v20 = vld [vmem:[%s15899_s7] sm:$0xff] }
0x1c11   :  { %v8369_v57 = vmul.f32 %v8316_v34, %v16698_v15  ;;  %v10080_v37 = vld [vmem:[%s15904_s23] ss:$0 sm:$0xff] }
0x1c12   :  { %v9417_v31 = vpack.i.bf16 %v8377_v16, %v8378_v14 }
0x1c13   :  { %v9437_v42 = vpack.i.bf16 %v8369_v57, %v8370_v25 }
0x1c14   :  { %9418 = vrot.lane.b32.xlu0 %v9417_v31, %s16562_s29 }
0x1c15   :  { %9438 = vrot.lane.b32.xlu1 %v9437_v42, %s16562_s29 }
0x1c17   :  { %v8306_v47 = vpop.permute.xlu1 %8305  ;;  %v8326_v48 = vpop.permute.xlu0 %8325 }
0x1c18   :  { %v8371_v51 = vmul.f32 %v8326_v48, %v16700_v29  ;;  %v8301_v12 = vpop.permute.xlu2 %8300  ;;  %v8367_v36 = vmul.f32 %v8306_v47, %v16701_v56  ;;  %v16707_v47 = vld [vmem:[#allocation80_spill] sm:$0xff] }
0x1c19   :  { %v8366_v32 = vmul.f32 %v8301_v12, %v16705_v23 }
0x1c1a   :  { %v9432_v43 = vpack.i.bf16 %v8371_v51, %v8372_v52  ;;  %v10081_v52 = vld [vmem:[%s15906_s25] ss:$0 sm:$0xff] }
0x1c1c   :  { %9433 = vrot.lane.b32.xlu0 %v9432_v43, %s16562_s29 }
0x1c1f   :  { %v8291_v45 = vpop.permute.xlu1 %8290  ;;  %v8311_v4 = vpop.permute.xlu0 %8310 }
0x1c20   :  { %v8364_v35 = vmul.f32 %v8291_v45, %v16702_v28  ;;  %v8368_v22 = vmul.f32 %v8311_v4, %v16703_v7  ;;  %v8286_v9 = vpop.permute.xlu2 %8285 }
0x1c21   :  { %v8363_v33 = vmul.f32 %v8286_v9, %v16704_v55 }
0x1c22   :  { %v9442_v3 = vpack.i.bf16 %v8367_v36, %v8368_v22 }
0x1c23   :  { %v9452_v58 = vpack.i.bf16 %v8363_v33, %v8364_v35 }
0x1c24   :  { %9443 = vrot.lane.b32.xlu2 %v9442_v3, %s16562_s29 }
0x1c25   :  { %9453 = vrot.lane.b32.xlu1 %v9452_v58, %s16562_s29 }
0x1c27   :  { %v8296_v5 = vpop.permute.xlu0 %8295 }
0x1c28   :  { %v8365_v27 = vmul.f32 %v8296_v5, %v16706_v21  ;;  %v8582_v21 = vld [vmem:[%s15908_s26 + $0x10] sm:$0xff] }
0x1c2a   :  { %v9447_v6 = vpack.i.bf16 %v8365_v27, %v8366_v32  ;;  %v8583_v32 = vld [vmem:[%s15908_s26 + $0x18] sm:$0xff]  ;;  %v8581_v27 = vld [vmem:[%s15908_s26 + $0x8] sm:$0xff] }
0x1c2c   :  { %9448 = vrot.lane.b32.xlu0 %v9447_v6, %s16562_s29  ;;  %v8580_v6 = vld [vmem:[%s15908_s26] sm:$0xff] }
0x1c42   :  { %v8480_v62 = vpop.f32.mrf.mxu0 }
0x1c43   :  { %8485 = vperm.xlu2 %9335, %v8480_v62  }
0x1c56   :  { %v9429_v10 = vpop.permute.xlu2 %9428 }
0x1c57   :  { %v9430_v61 = vunpack.i.l.bf16 %v9429_v10  ;;  %v9431_v39 = vunpack.i.h.bf16 %v9429_v10 }
0x1c7e   :  { %v9424_v8 = vpop.permute.xlu1 %9423  ;;  %v9444_v18 = vpop.permute.xlu2 %9443 }
0x1c7f   :  { %v9425_v63 = vunpack.i.l.bf16 %v9424_v8  ;;  %v9426_v19 = vunpack.i.h.bf16 %v9424_v8  ;;  %v9445_v41 = vunpack.i.l.bf16 %v9444_v18  ;;  %v9446_v53 = vunpack.i.h.bf16 %v9444_v18 }
0x1c86   :  { %v9419_v50 = vpop.permute.xlu0 %9418 }
0x1c87   :  { %v9420_v46 = vunpack.i.l.bf16 %v9419_v50  ;;  %v9421_v13 = vunpack.i.h.bf16 %v9419_v50  ;;  %v9439_v59 = vpop.permute.xlu1 %9438 }
0x1c88   :  { %v9440_v44 = vunpack.i.l.bf16 %v9439_v59  ;;  %v9441_v40 = vunpack.i.h.bf16 %v9439_v59 }
0x1c89   :  { %8443 = vmatpush.msra.mxu1 %v9420_v46 }
0x1c8b   :  { %8444 = vmatpush.msra.mxu1 %v9421_v13 }
0x1c8d   :  { %8445 = vmatpush.msra.mxu1 %v9425_v63  ;;  %v35_v63 = vstv %s15909_s27 }
0x1c8e   :  { %v9434_v49 = vpop.permute.xlu0 %9433  ;;  %36 = vst [vmem:[#allocation3] sm:$0x1] %v35_v63 }
0x1c8f   :  { %8446 = vmatpush.msra.mxu1 %v9426_v19  ;;  %v9435_v26 = vunpack.i.l.bf16 %v9434_v49  ;;  %v9436_v54 = vunpack.i.h.bf16 %v9434_v49 }
0x1c91   :  { %8447 = vmatpush.msra.mxu1 %v9430_v61 }
0x1c93   :  { %8448 = vmatpush.msra.mxu1 %v9431_v39 }
0x1c95   :  { %8449 = vmatpush.msra.mxu1 %v9435_v26  ;;  %v9468_v19 = vld [vmem:[#allocation3] ss:$0 sm:$0xff] }
0x1c97   :  { %8450 = vmatpush.msra.mxu1 %v9436_v54  ;;  %v9454_v2 = vpop.permute.xlu1 %9453 }
0x1c98   :  { %v9455_v11 = vunpack.i.l.bf16 %v9454_v2  ;;  %v9456_v24 = vunpack.i.h.bf16 %v9454_v2 }
0x1c99   :  { %8451 = vmatpush.msra.mxu1 %v9440_v44 }
0x1c9b   :  { %8452 = vmatpush.msra.mxu1 %v9441_v40 }
0x1c9d   :  { %8453 = vmatpush.msra.mxu1 %v9445_v41  ;;  %v8486_v14 = vpop.permute.xlu2 %8485 }
0x1c9e   :  { %v9449_v0 = vpop.permute.xlu0 %9448  ;;  %v8488_v25 = vmul.f32 %v10080_v37, %v8486_v14 }
0x1c9f   :  { %v9450_v17 = vunpack.i.l.bf16 %v9449_v0  ;;  %8454 = vmatpush.msra.mxu1 %v9446_v53  ;;  %v9451_v30 = vunpack.i.h.bf16 %v9449_v0 }
0x1ca1   :  { %8455 = vmatpush.msra.mxu1 %v9450_v17 }
0x1ca3   :  { %8456 = vmatpush.msra.mxu1 %v9451_v30 }
0x1ca5   :  { %8457 = vmatpush.msra.mxu1 %v9455_v11 }
0x1ca7   :  { %8458 = vmatpush.msra.mxu1 %v9456_v24 }
0x1ca8   :  { %8459 = vmatmul.f32.vlgmr.msra.gmra.mxu1 %v10079_v20 }
0x1ca9   :  { %8605 = vmatpush.msrb.mxu1 %v8583_v32 }
0x1cab   :  { %8606 = vmatpush.msrb.mxu1 %v8582_v21 }
0x1cad   :  { %8607 = vmatpush.msrb.mxu1 %v8581_v27 }
0x1caf   :  { %8608 = vmatpush.msrb.mxu1 %v8580_v6 }
0x1d25   :  { %v8460_v60 = vpop.f32.mrf.mxu1 }
0x1d26   :  { %9195 = vmatmul.msk.f32.vlgmr.msra.gmra.mxu0 %vm1053_vm6, %v8460_v60 }
0x1da3   :  { %v8509_v38 = vpop.f32.mrf.mxu0 }
0x1da4   :  { %v8510_v16 = vadd.f32 %v8509_v38, %v8488_v25 }
0x1da6   :  { %v8513_v34 = vmin.f32 %v8510_v16, 0.0  ;;  %vm8512_vm1 = vcmp.gt.f32.partialorder %v8510_v16, 0.0 }
0x1da8   :  { %v8514_v15 = vmul.f32 1.442695, %v8513_v34 }
0x1daa   :  { %9989 = vpow2.f32 %v8514_v15 }
0x1db0   :  { %v9990_v57 = vpop.eup %9989 }
0x1db1   :  { %v9196_v31 = vadd.f32 -1.0, %v9990_v57 }
0x1db3   :  { %v8517_v42 = vsel %vm8512_vm1, %v8510_v16, %v9196_v31 }
0x1db4   :  { %v8518_v48 = vsel %vm1053_vm6, %v8517_v42, %v16707_v47 }
0x1db5   :  { %9197 = vmatmul.msk.f32.vlgmr.msrb.gmra.mxu0 %vm2964_vm11, %v8518_v48 }
0x1e32   :  { %v8539_v1 = vpop.f32.mrf.mxu0 }
0x1e33   :  { %v8540_v29 = vadd.f32 %v10081_v52, %v8539_v1 }
0x1e35   :  { %8562 = vrot.lane.b32.xlu0 %v8540_v29, %s16558_s15  ;;  %v9198_v51 = vmul.f32 -1.442695, %v8540_v29 }
0x1e37   :  { %9991 = vpow2.f32 %v9198_v51 }
0x1e3d   :  { %v9992_v12 = vpop.eup %9991 }
0x1e3e   :  { %v8545_v43 = vadd.f32 1.0, %v9992_v12 }
0x1e40   :  { %9993 = vrcp.f32 %v8545_v43  ;;  %v8557_v35 = vand.u32 2147483648, %v8545_v43  ;;  %vm8551_vm11 = vweird.f32 %v8545_v43  ;;  %v8555_v7 = vand.u32 2147483647, %v8545_v43 }
0x1e42   :  { %v8558_v9 = vor.u32 1.1754944e-38, %v8557_v35  ;;  %vm8556_vm8 = vcmp.eq.f32.partialorder %v8555_v7, 8.507059e+37 }
0x1e46   :  { %v9994_v45 = vpop.eup %9993 }
0x1e47   :  { %v8547_v4 = vmul.f32 %v9994_v45, %v8545_v43  ;;  %vm8552_vm4 = vweird.f32 %v9994_v45 }
0x1e48   :  { %vm8553_vm7 = vmor %vm8551_vm11, %vm8552_vm4 }
0x1e49   :  { %v8548_v56 = vsub.f32 1.0, %v8547_v4 }
0x1e4b   :  { %v8549_v36 = vmul.f32 %v9994_v45, %v8548_v56 }
0x1e4d   :  { %v8550_v28 = vadd.f32 %v9994_v45, %v8549_v36 }
0x1e4f   :  { %v8554_v22 = vsel %vm8553_vm7, %v9994_v45, %v8550_v28 }
0x1e50   :  { %v8559_v33 = vsel %vm8556_vm8, %v8558_v9, %v8554_v22 }
0x1e51   :  { %v8572_v62 = vsub.f32 1.0, %v8559_v33  ;;  %v8578_v46 = vmul.f32 %v8559_v33, %v16707_v47 }
0x1ea7   :  { %v8563_v55 = vpop.permute.xlu0 %8562 }
0x1ea8   :  { %v8565_v3 = vmul.f32 %v8563_v55, %v8559_v33 }
0x1eaa   :  { %8567 = vrot.lane.b32.xlu1 %v8565_v3, %s16559_s18 }
0x1f1c   :  { %v8568_v58 = vpop.permute.xlu1 %8567 }
0x1f1d   :  { %v8570_v5 = vadd.f32 %v8568_v58, %v8540_v29 }
0x1f1f   :  { %9995 = vtanh.f32 %v8570_v5 }
0x1f25   :  { %v9996_v23 = vpop.eup %9995 }
0x1f26   :  { %8574 = vrot.lane.b32.xlu2 %v9996_v23, %s16562_s29 }
0x1f80   :  { %v8575_v50 = vpop.permute.xlu2 %8574 }
0x1f81   :  { %v8577_v8 = vmul.f32 %v8575_v50, %v8572_v62 }
0x1f83   :  { %v8579_v13 = vadd.f32 %v8578_v46, %v8577_v8 }
0x1f85   :  { %8589 = vrot.lane.b32.xlu0 %v8579_v13, %s16562_s29 }
0x1ff7   :  { %v8590_v10 = vpop.permute.xlu0 %8589 }
0x1ff8   :  { %9199 = vmatmul.msk.f32.vlgmr.msrb.gmra.mxu1 %vm1053_vm6, %v8590_v10 }
0x2075   :  { %v8610_v61 = vpop.f32.mrf.mxu1 }
0x2076   :  { %v8611_v49 = vadd.f32 %v9468_v19, %v8610_v61 }
0x2078   :  { %8613 = vst.msk [vmem:[%s16708_s3] sm:$0xff] %vm1811_vm14, %v8611_v49 }

</bundles_post_ra>
